<compile_context>
chip_gen: v7x
topology: tpu7x:2x2x1
jax: 0.10.0
libtpu: 0.0.40
codegen_flags: <defaults>
</compile_context>

<pallas_src>
import numpy as np
import jax
import jax.numpy as jnp
from jax.experimental import pallas as pl
from jax.experimental.pallas import tpu as pltpu

DIM_H = 32        # dim_h
CLASS_NUM = 8     # class_num
EPS = 1e-5        # BatchNorm1d eps
N_LAYERS = 5

# wsq slab (17, 32, 32) row layout
IDX_WL = 0            # Wl@L for layers 1..5
IDX_WR = 5            # Wr@L for layers 1..5
IDX_OUT0 = 10         # lins_out[0] 32x32 blocks for [x, h1..h5]
IDX_OUT1 = 16         # lins_out[1]

# bias slab (11, 160) row layout (cols 0:32 unless noted)
#   rows 0..4 : folded conv/l biases per layer
BROW_BN_G = 5
BROW_BN_B = 6
BROW_OUT0_B = 7
BROW_OUT1_B = 8
BROW_LIN1_B = 9       # full 160 cols
BROW_LIN2_B = 10      # cols 0:CLASS_NUM

VMEM = pl.BlockSpec(memory_space=pltpu.MemorySpace.VMEM)


# --------------------------------------------------------------------------- #
# Single fused forward kernel (pure value dataflow, no VMEM scratch)
# --------------------------------------------------------------------------- #
def _fused_forward_kernel(
    # data
    xfa_ref, gsrc_ref, gdst_ref, sdst_ref, pool_ref,
    # packed / folded weights
    wnode_ref, wsq_ref, bias_ref, wtail_ref,
    # outputs
    h_out_ref, logp_out_ref,
):
    f32 = jnp.float32

    gamma = bias_ref[BROW_BN_G:BROW_BN_G + 1, 0:DIM_H]
    beta = bias_ref[BROW_BN_B:BROW_BN_B + 1, 0:DIM_H]

    # BatchNorm1d(track_running_stats=False): batch stats, biased variance.
    # Single-pass form: the two axis-0 reductions are independent (no mean->var
    # serialization).  TODO(synk): at N>=512 move these to the MXU via a
    # ones-row matmul (the MXU has slack on this kernel's critical path).
    def bn(y):
        mean = jnp.mean(y, axis=0, keepdims=True)
        ex2 = jnp.mean(y * y, axis=0, keepdims=True)
        var = ex2 - mean * mean
        return (y - mean) * jax.lax.rsqrt(var + EPS) * gamma + beta

    def swish(y):
        return y * jax.nn.sigmoid(y)

    # ---- packed node projection: one lane-dense (N,16)@(16,128) dot ----
    proj = jnp.dot(xfa_ref[...], wnode_ref[...], preferred_element_type=f32)
    x = proj[:, 0 * DIM_H:1 * DIM_H]          # self.x1(x_feat)
    xh = proj[:, 1 * DIM_H:2 * DIM_H]         # self.x(self.x1(x_feat)), pre-BN
    u = proj[:, 2 * DIM_H:3 * DIM_H]          # x2 src half (+ x2_b)
    v = proj[:, 3 * DIM_H:4 * DIM_H]          # x2 dst half

    # one-hot graph operators: bf16 in HBM/VMEM (exact), f32 for the math
    gsrc = gsrc_ref[...].astype(f32)          # (E, N) gather source nodes
    gdst = gdst_ref[...].astype(f32)          # (E, N) gather destination nodes
    sdst = sdst_ref[...].astype(f32)          # (N, E) scatter-add to destinations
    pool = pool_ref[...].astype(f32)          # (G, N) global_add_pool

    # tt = relu(x2(cat(x_feat[src], x_feat[dst])))   (projection done per-node)
    tt = jnp.maximum(jnp.dot(gsrc, u, preferred_element_type=f32)
                     + jnp.dot(gdst, v, preferred_element_type=f32), 0.0)

    # fused global_add_pool + lins_out[0] accumulator, seeded with the x-head
    acc = jnp.dot(jnp.dot(pool, bn(xh), preferred_element_type=f32),
                  wsq_ref[IDX_OUT0], preferred_element_type=f32)

    # ---- 5 GNN layers; conv_k & l_k folded into two (32,32) blocks each ----
    h_prev = x
    for i in range(N_LAYERS):
        msg = jnp.dot(gsrc, h_prev, preferred_element_type=f32) * tt   # edge msgs
        agg = jnp.dot(sdst, msg, preferred_element_type=f32)           # scatter-add
        y = (jnp.dot(agg, wsq_ref[IDX_WL + i], preferred_element_type=f32)
             + jnp.dot(h_prev, wsq_ref[IDX_WR + i], preferred_element_type=f32)
             + bias_ref[i:i + 1, 0:DIM_H])
        if i == 1:                    # h2: l_2 -> swish -> (dropout) -> BN
            y = bn(swish(y))
        else:                         # h1,h3,h4,h5: l_k -> BN -> swish
            y = swish(bn(y))
        acc = acc + jnp.dot(jnp.dot(pool, y, preferred_element_type=f32),
                            wsq_ref[IDX_OUT0 + 1 + i], preferred_element_type=f32)
        h_prev = y

    # ---- output MLP (Dropouts are identity in eval mode) ----
    h = jnp.maximum(acc + bias_ref[BROW_OUT0_B:BROW_OUT0_B + 1, 0:DIM_H], 0.0)
    h = jnp.maximum(jnp.dot(h, wsq_ref[IDX_OUT1], preferred_element_type=f32)
                    + bias_ref[BROW_OUT1_B:BROW_OUT1_B + 1, 0:DIM_H], 0.0)
    h = jnp.maximum(jnp.dot(h, wtail_ref[0:DIM_H, :], preferred_element_type=f32)
                    + bias_ref[BROW_LIN1_B:BROW_LIN1_B + 1, :], 0.0)
    h = (jnp.dot(h, wtail_ref[DIM_H:DIM_H + 5 * DIM_H, 0:CLASS_NUM],
                 preferred_element_type=f32)
         + bias_ref[BROW_LIN2_B:BROW_LIN2_B + 1, 0:CLASS_NUM])
    h_out_ref[...] = h

    # log_softmax(dim=1)
    m = jnp.max(h, axis=1, keepdims=True)
    s = h - m
    logp_out_ref[...] = s - jnp.log(jnp.sum(jnp.exp(s), axis=1, keepdims=True))


# --------------------------------------------------------------------------- #
# Wrapper: trace-time weight folding / packing + single pallas_call
# --------------------------------------------------------------------------- #
def gin_attribute_forward(params, x_in, bb_embs, side_chain_embs,
                          gsrc, gdst, sdst, pool_mat):
    f32 = jnp.float32
    N = x_in.shape[0]
    G = pool_mat.shape[0]
    BW = 5 * DIM_H                                       # bias-slab width (=lin1 out)

    # x = cat(x, bb_embs, side_chain_embs) -> (N,15); ones column folds all biases
    x_feat = jnp.concatenate([x_in, bb_embs, side_chain_embs], axis=1)
    dim_x = x_feat.shape[1]
    x_feat_aug = jnp.concatenate([x_feat, jnp.ones((N, 1), f32)], axis=1)   # (N,16)

    # ---- trace-time weight folding (exact linear composition) ----
    x1w, x1b = params["x1_w"], params["x1_b"]
    xw, xb = params["x_w"], params["x_b"]
    w2a, w2b = params["x2_w"][:dim_x], params["x2_w"][dim_x:]
    x2b = params["x2_b"]

    wnode = jnp.concatenate([                            # lane-dense (16, 128)
        jnp.concatenate([x1w, x1b.reshape(1, -1)], axis=0),
        jnp.concatenate([x1w @ xw, (x1b @ xw + xb).reshape(1, -1)], axis=0),
        jnp.concatenate([w2a, x2b.reshape(1, -1)], axis=0),
        jnp.concatenate([w2b, jnp.zeros((1, DIM_H), f32)], axis=0),
    ], axis=1)

    wl_fold, wr_fold, cb_fold = [], [], []
    for i in range(1, N_LAYERS + 1):
        p = params[f"conv{i}"]
        lw, lb = params[f"l{i}_w"], params[f"l{i}_b"]
        wl_fold.append(p["wl"] @ lw)                     # applied to agg
        wr_fold.append(p["wr"] @ lw)                     # applied to h_prev
        cb_fold.append(p["bl"] @ lw + lb)

    out0_blocks = [params["out0_w"][j * DIM_H:(j + 1) * DIM_H] for j in range(6)]
    wsq = jnp.stack(wl_fold + wr_fold + out0_blocks + [params["out1_w"]])   # (17,32,32)

    pad_row = lambda a: jnp.pad(a.reshape(1, -1), ((0, 0), (0, BW - a.shape[-1])))
    bias = jnp.concatenate(
        [pad_row(b) for b in cb_fold]
        + [pad_row(params["bn_g"]), pad_row(params["bn_b"]),
           pad_row(params["out0_b"]), pad_row(params["out1_b"]),
           params["lin1_b"].reshape(1, -1), pad_row(params["lin2_b"])],
        axis=0)                                                             # (11,160)

    wtail = jnp.concatenate(
        [params["lin1_w"],
         jnp.pad(params["lin2_w"], ((0, 0), (0, BW - CLASS_NUM)))], axis=0)  # (192,160)

    # one-hot operators: bf16 is exact for 0/1 -> half the HBM traffic / VMEM
    args = (x_feat_aug,
            gsrc.astype(jnp.bfloat16), gdst.astype(jnp.bfloat16),
            sdst.astype(jnp.bfloat16), pool_mat.astype(jnp.bfloat16),
            wnode, wsq, bias, wtail)

    out_shape = (jax.ShapeDtypeStruct((G, CLASS_NUM), jnp.float32),
                 jax.ShapeDtypeStruct((G, CLASS_NUM), jnp.float32))

    # explicit VMEM budget (v7x: 64 MiB physical / 32 MiB default scoped)
    def padded_bytes(a):
        s = a.shape
        lead = int(np.prod(s[:-2])) if len(s) > 2 else 1
        sub = -(-s[-2] // 8) * 8
        lane = -(-s[-1] // 128) * 128
        return lead * sub * lane * jnp.dtype(a.dtype).itemsize
    in_bytes = sum(padded_bytes(a) for a in args)
    vmem_limit = int(min(48 << 20, max(16 << 20, 2 * in_bytes + (4 << 20))))

    # TODO(synk): a per-graph "parallel" grid axis (to use v7x's 2 TensorCores)
    # is not semantics-preserving here: the shared BatchNorm1d computes batch
    # statistics over ALL nodes across graphs, coupling the graphs.
    return pl.pallas_call(
        _fused_forward_kernel,
        out_shape=out_shape,
        in_specs=[VMEM] * len(args),
        out_specs=(VMEM, VMEM),
        compiler_params=pltpu.CompilerParams(vmem_limit_bytes=vmem_limit),
    )(*args)


# --------------------------------------------------------------------------- #
# Parameters (PyTorch-layout-equivalent, stored as (in, out))
# --------------------------------------------------------------------------- #
def init_params(key):
    ks = iter(jax.random.split(key, 64))

    def lin(fan_in, fan_out, bias=True):
        w = 0.1 * jax.random.normal(next(ks), (fan_in, fan_out), jnp.float32)
        if bias:
            b = 0.1 * jax.random.normal(next(ks), (fan_out,), jnp.float32)
            return w, b
        return w

    p = {}
    p["x1_w"], p["x1_b"] = lin(15, DIM_H)                 # Linear(15, dim_h)
    p["x2_w"], p["x2_b"] = lin(30, DIM_H)                 # Linear(30, dim_h)
    for i in range(1, N_LAYERS + 1):                      # conv1..conv5 + l_1..l_5
        wl, bl = lin(DIM_H, DIM_H)
        wr = lin(DIM_H, DIM_H, bias=False)
        p[f"conv{i}"] = {"wl": wl, "bl": bl, "wr": wr}
        p[f"l{i}_w"], p[f"l{i}_b"] = lin(DIM_H, DIM_H)
    p["x_w"], p["x_b"] = lin(DIM_H, DIM_H)                # self.x
    p["bn_g"] = jnp.ones((DIM_H,), jnp.float32)           # shared BatchNorm1d (self.m)
    p["bn_b"] = jnp.zeros((DIM_H,), jnp.float32)
    p["out0_w"], p["out0_b"] = lin(6 * DIM_H, DIM_H)      # lins_out[0]
    p["out1_w"], p["out1_b"] = lin(DIM_H, DIM_H)          # lins_out[1]
    p["lin1_w"], p["lin1_b"] = lin(DIM_H, DIM_H * 5)      # lin1
    p["lin2_w"], p["lin2_b"] = lin(DIM_H * 5, CLASS_NUM)  # lin2
    return p


# --------------------------------------------------------------------------- #
# Pure-JAX reference (unfolded, mirrors the PyTorch forward in eval mode)
# --------------------------------------------------------------------------- #
def _reference_forward(params, x_in, bb_embs, side_chain_embs,
                       gsrc, gdst, sdst, pool_mat):
    with jax.default_matmul_precision("float32"):
        xf = jnp.concatenate([x_in, bb_embs, side_chain_embs], axis=1)

        def bn(y):
            mean = jnp.mean(y, axis=0, keepdims=True)
            var = jnp.mean((y - mean) ** 2, axis=0, keepdims=True)
            return ((y - mean) / jnp.sqrt(var + EPS)) * params["bn_g"] + params["bn_b"]

        sw = lambda y: y * jax.nn.sigmoid(y)
        x = xf @ params["x1_w"] + params["x1_b"]
        tt = jax.nn.relu(jnp.concatenate([gsrc @ xf, gdst @ xf], axis=1)
                         @ params["x2_w"] + params["x2_b"])
        hs, h_prev = [], x
        for i in range(1, N_LAYERS + 1):
            p = params[f"conv{i}"]
            agg = sdst @ ((gsrc @ h_prev) * tt)
            y = (agg @ p["wl"] + p["bl"] + h_prev @ p["wr"]) @ params[f"l{i}_w"] \
                + params[f"l{i}_b"]
            y = bn(sw(y)) if i == 2 else sw(bn(y))
            hs.append(y)
            h_prev = y
        xh = bn(x @ params["x_w"] + params["x_b"])
        pooled = jnp.concatenate([pool_mat @ xh] + [pool_mat @ h for h in hs], axis=1)
        h = jax.nn.relu(pooled @ params["out0_w"] + params["out0_b"])
        h = jax.nn.relu(h @ params["out1_w"] + params["out1_b"])
        h = jax.nn.relu(h @ params["lin1_w"] + params["lin1_b"])
        h = h @ params["lin2_w"] + params["lin2_b"]
        return h, jax.nn.log_softmax(h, axis=1)


if __name__ == "__main__":
    key = jax.random.PRNGKey(0)
    N, G = 32, 2
    k = jax.random.split(key, 8)

    x_in = jax.random.normal(k[0], (N, 1), jnp.float32)             # node scalar feature
    bb_embs = jax.random.normal(k[1], (N, 6), jnp.float32)          # backbone dihedral emb
    side_chain_embs = jax.random.normal(k[2], (N, 8), jnp.float32)  # side-chain emb
    coords_ca = jax.random.uniform(k[3], (N, 3), jnp.float32, 0.0, 6.0)
    batch_vec = np.repeat(np.arange(G), N // G)

    # radius_graph(CA, r=9, batch, max_num_neighbors=15): host-side preprocessing.
    # TODO(synk): radius_graph (dynamic-size neighbor search) has no clean Pallas
    # equivalent; edge_index is built with numpy here.  At larger N/E the dense
    # one-hot gather/scatter matrices should be replaced by scalar-prefetched
    # int32 indices (PrefetchScalarGridSpec) + in-VMEM segment-sum.
    ca_np = np.asarray(coords_ca)
    src, dst = [], []
    for i in range(N):
        cnt = 0
        for j in range(N):
            if j == i or batch_vec[i] != batch_vec[j]:
                continue
            if np.linalg.norm(ca_np[i] - ca_np[j]) < 9.0:
                src.append(j)
                dst.append(i)
                cnt += 1
                if cnt >= 15:
                    break
    if src:
        E = len(src)
        gsrc = np.zeros((E, N), np.float32); gsrc[np.arange(E), src] = 1.0
        gdst = np.zeros((E, N), np.float32); gdst[np.arange(E), dst] = 1.0
    else:
        # No edges: keep one all-zero dummy edge so no operand is zero-sized.
        # Zero gather rows / scatter columns contribute nothing -> matches the
        # reference's zero aggregation (no fake self-loop message).
        E = 1
        gsrc = np.zeros((1, N), np.float32)
        gdst = np.zeros((1, N), np.float32)
    sdst = np.ascontiguousarray(gdst.T)                    # (N, E) scatter-add matrix
    pool_mat = np.zeros((G, N), np.float32)                # (G, N) global_add_pool
    pool_mat[batch_vec, np.arange(N)] = 1.0

    params = init_params(k[4])

    gsrc_j, gdst_j = jnp.asarray(gsrc), jnp.asarray(gdst)
    sdst_j, pool_j = jnp.asarray(sdst), jnp.asarray(pool_mat)

    fwd = jax.jit(gin_attribute_forward)
    h, logp = fwd(params, x_in, bb_embs, side_chain_embs,
                  gsrc_j, gdst_j, sdst_j, pool_j)
    jax.block_until_ready((h, logp))

    assert h.shape == (G, CLASS_NUM) and logp.shape == (G, CLASS_NUM)
    assert bool(jnp.all(jnp.isfinite(h))) and bool(jnp.all(jnp.isfinite(logp)))

    # tolerance check vs. unfolded pure-JAX reference (loose bound: fp32 rounding
    # order differs due to weight folding and MXU pass selection)
    h_ref, logp_ref = _reference_forward(params, x_in, bb_embs, side_chain_embs,
                                         gsrc_j, gdst_j, sdst_j, pool_j)
    np.testing.assert_allclose(np.asarray(h), np.asarray(h_ref), rtol=2e-2, atol=2e-2)
    np.testing.assert_allclose(np.asarray(logp), np.asarray(logp_ref), rtol=2e-2, atol=2e-2)

    print("KERNEL_OK")
</pallas_src>

<mosaic_0001>
module attributes {stable_mosaic.version = 11 : i64} {
  func.func @_fused_forward_kernel(%arg0: memref<32x16xf32, #tpu.memory_space<vmem>>, %arg1: memref<480x32xbf16, #tpu.memory_space<vmem>>, %arg2: memref<480x32xbf16, #tpu.memory_space<vmem>>, %arg3: memref<32x480xbf16, #tpu.memory_space<vmem>>, %arg4: memref<2x32xbf16, #tpu.memory_space<vmem>>, %arg5: memref<16x128xf32, #tpu.memory_space<vmem>>, %arg6: memref<17x32x32xf32, #tpu.memory_space<vmem>>, %arg7: memref<11x160xf32, #tpu.memory_space<vmem>>, %arg8: memref<192x160xf32, #tpu.memory_space<vmem>>, %arg9: memref<2x8xf32, #tpu.memory_space<vmem>>, %arg10: memref<2x8xf32, #tpu.memory_space<vmem>>) attributes {dimension_semantics = [], scalar_prefetch = 0 : i64, scratch_operands = 0 : i64, tpu.core_type = #tpu.core_type<tc>} {
    %c5 = arith.constant 5 : index
    %c0 = arith.constant 0 : index
    %0 = vector.load %arg7[%c5, %c0] : memref<11x160xf32, #tpu.memory_space<vmem>>, vector<1x32xf32>
    %c6 = arith.constant 6 : index
    %c0_0 = arith.constant 0 : index
    %1 = vector.load %arg7[%c6, %c0_0] : memref<11x160xf32, #tpu.memory_space<vmem>>, vector<1x32xf32>
    %c0_1 = arith.constant 0 : index
    %c0_2 = arith.constant 0 : index
    %2 = vector.load %arg0[%c0_1, %c0_2] : memref<32x16xf32, #tpu.memory_space<vmem>>, vector<32x16xf32>
    %c0_3 = arith.constant 0 : index
    %c0_4 = arith.constant 0 : index
    %3 = vector.load %arg5[%c0_3, %c0_4] : memref<16x128xf32, #tpu.memory_space<vmem>>, vector<16x128xf32>
    %cst = arith.constant dense<0.000000e+00> : vector<32x128xf32>
    %4 = tpu.matmul %2, %3, %cst {dimension_numbers = #tpu.dot_dimension_numbers<[1], [0], [0], [1], [0, 0, 1, 1], [], []>} : vector<32x16xf32>, vector<16x128xf32>, vector<32x128xf32> -> vector<32x128xf32>
    %5 = vector.extract_strided_slice %4 {offsets = [0, 0], sizes = [32, 32], strides = [1, 1]} : vector<32x128xf32> to vector<32x32xf32>
    %6 = vector.extract_strided_slice %4 {offsets = [0, 32], sizes = [32, 32], strides = [1, 1]} : vector<32x128xf32> to vector<32x32xf32>
    %7 = vector.extract_strided_slice %4 {offsets = [0, 64], sizes = [32, 32], strides = [1, 1]} : vector<32x128xf32> to vector<32x32xf32>
    %8 = vector.extract_strided_slice %4 {offsets = [0, 96], sizes = [32, 32], strides = [1, 1]} : vector<32x128xf32> to vector<32x32xf32>
    %c0_5 = arith.constant 0 : index
    %c0_6 = arith.constant 0 : index
    %9 = vector.load %arg1[%c0_5, %c0_6] : memref<480x32xbf16, #tpu.memory_space<vmem>>, vector<480x32xbf16>
    %10 = arith.extf %9 : vector<480x32xbf16> to vector<480x32xf32>
    %c0_7 = arith.constant 0 : index
    %c0_8 = arith.constant 0 : index
    %11 = vector.load %arg2[%c0_7, %c0_8] : memref<480x32xbf16, #tpu.memory_space<vmem>>, vector<480x32xbf16>
    %12 = arith.extf %11 : vector<480x32xbf16> to vector<480x32xf32>
    %c0_9 = arith.constant 0 : index
    %c0_10 = arith.constant 0 : index
    %13 = vector.load %arg3[%c0_9, %c0_10] : memref<32x480xbf16, #tpu.memory_space<vmem>>, vector<32x480xbf16>
    %14 = arith.extf %13 : vector<32x480xbf16> to vector<32x480xf32>
    %c0_11 = arith.constant 0 : index
    %c0_12 = arith.constant 0 : index
    %15 = vector.load %arg4[%c0_11, %c0_12] : memref<2x32xbf16, #tpu.memory_space<vmem>>, vector<2x32xbf16>
    %16 = arith.extf %15 : vector<2x32xbf16> to vector<2x32xf32>
    %cst_13 = arith.constant dense<0.000000e+00> : vector<480x32xf32>
    %17 = tpu.matmul %10, %7, %cst_13 {dimension_numbers = #tpu.dot_dimension_numbers<[1], [0], [0], [1], [0, 0, 1, 1], [], []>} : vector<480x32xf32>, vector<32x32xf32>, vector<480x32xf32> -> vector<480x32xf32>
    %cst_14 = arith.constant dense<0.000000e+00> : vector<480x32xf32>
    %18 = tpu.matmul %12, %8, %cst_14 {dimension_numbers = #tpu.dot_dimension_numbers<[1], [0], [0], [1], [0, 0, 1, 1], [], []>} : vector<480x32xf32>, vector<32x32xf32>, vector<480x32xf32> -> vector<480x32xf32>
    %19 = arith.addf %17, %18 : vector<480x32xf32>
    %cst_15 = arith.constant 0.000000e+00 : f32
    %20 = vector.broadcast %cst_15 : f32 to vector<480x32xf32>
    %21 = arith.maximumf %19, %20 : vector<480x32xf32>
    %cst_16 = arith.constant dense<0.000000e+00> : vector<32xf32>
    %22 = vector.multi_reduction <add>, %6, %cst_16 [0] : vector<32x32xf32> to vector<32xf32>
    %23 = vector.shape_cast %22 : vector<32xf32> to vector<1x32xf32>
    %cst_17 = arith.constant 3.200000e+01 : f32
    %24 = vector.broadcast %cst_17 : f32 to vector<1x32xf32>
    %25 = arith.divf %23, %24 : vector<1x32xf32>
    %26 = arith.mulf %6, %6 : vector<32x32xf32>
    %cst_18 = arith.constant dense<0.000000e+00> : vector<32xf32>
    %27 = vector.multi_reduction <add>, %26, %cst_18 [0] : vector<32x32xf32> to vector<32xf32>
    %28 = vector.shape_cast %27 : vector<32xf32> to vector<1x32xf32>
    %cst_19 = arith.constant 3.200000e+01 : f32
    %29 = vector.broadcast %cst_19 : f32 to vector<1x32xf32>
    %30 = arith.divf %28, %29 : vector<1x32xf32>
    %31 = arith.mulf %25, %25 : vector<1x32xf32>
    %32 = arith.subf %30, %31 : vector<1x32xf32>
    %33 = vector.broadcast %25 : vector<1x32xf32> to vector<32x32xf32>
    %34 = arith.subf %6, %33 : vector<32x32xf32>
    %cst_20 = arith.constant 9.99999974E-6 : f32
    %35 = vector.broadcast %cst_20 : f32 to vector<1x32xf32>
    %36 = arith.addf %32, %35 : vector<1x32xf32>
    %37 = math.rsqrt %36 : vector<1x32xf32>
    %38 = vector.broadcast %37 : vector<1x32xf32> to vector<32x32xf32>
    %39 = arith.mulf %34, %38 : vector<32x32xf32>
    %40 = vector.broadcast %0 : vector<1x32xf32> to vector<32x32xf32>
    %41 = arith.mulf %39, %40 : vector<32x32xf32>
    %42 = vector.broadcast %1 : vector<1x32xf32> to vector<32x32xf32>
    %43 = arith.addf %41, %42 : vector<32x32xf32>
    %cst_21 = arith.constant dense<0.000000e+00> : vector<2x32xf32>
    %44 = tpu.matmul %16, %43, %cst_21 {dimension_numbers = #tpu.dot_dimension_numbers<[1], [0], [0], [1], [0, 0, 1, 1], [], []>} : vector<2x32xf32>, vector<32x32xf32>, vector<2x32xf32> -> vector<2x32xf32>
    %c10 = arith.constant 10 : index
    %c0_22 = arith.constant 0 : index
    %c0_23 = arith.constant 0 : index
    %45 = vector.load %arg6[%c10, %c0_22, %c0_23] : memref<17x32x32xf32, #tpu.memory_space<vmem>>, vector<1x32x32xf32>
    %46 = vector.shape_cast %45 : vector<1x32x32xf32> to vector<32x32xf32>
    %cst_24 = arith.constant dense<0.000000e+00> : vector<2x32xf32>
    %47 = tpu.matmul %44, %46, %cst_24 {dimension_numbers = #tpu.dot_dimension_numbers<[1], [0], [0], [1], [0, 0, 1, 1], [], []>} : vector<2x32xf32>, vector<32x32xf32>, vector<2x32xf32> -> vector<2x32xf32>
    %cst_25 = arith.constant dense<0.000000e+00> : vector<480x32xf32>
    %48 = tpu.matmul %10, %5, %cst_25 {dimension_numbers = #tpu.dot_dimension_numbers<[1], [0], [0], [1], [0, 0, 1, 1], [], []>} : vector<480x32xf32>, vector<32x32xf32>, vector<480x32xf32> -> vector<480x32xf32>
    %49 = arith.mulf %48, %21 : vector<480x32xf32>
    %cst_26 = arith.constant dense<0.000000e+00> : vector<32x32xf32>
    %50 = tpu.matmul %14, %49, %cst_26 {dimension_numbers = #tpu.dot_dimension_numbers<[1], [0], [0], [1], [0, 0, 1, 1], [], []>} : vector<32x480xf32>, vector<480x32xf32>, vector<32x32xf32> -> vector<32x32xf32>
    %c0_27 = arith.constant 0 : index
    %c0_28 = arith.constant 0 : index
    %c0_29 = arith.constant 0 : index
    %51 = vector.load %arg6[%c0_27, %c0_28, %c0_29] : memref<17x32x32xf32, #tpu.memory_space<vmem>>, vector<1x32x32xf32>
    %52 = vector.shape_cast %51 : vector<1x32x32xf32> to vector<32x32xf32>
    %cst_30 = arith.constant dense<0.000000e+00> : vector<32x32xf32>
    %53 = tpu.matmul %50, %52, %cst_30 {dimension_numbers = #tpu.dot_dimension_numbers<[1], [0], [0], [1], [0, 0, 1, 1], [], []>} : vector<32x32xf32>, vector<32x32xf32>, vector<32x32xf32> -> vector<32x32xf32>
    %c5_31 = arith.constant 5 : index
    %c0_32 = arith.constant 0 : index
    %c0_33 = arith.constant 0 : index
    %54 = vector.load %arg6[%c5_31, %c0_32, %c0_33] : memref<17x32x32xf32, #tpu.memory_space<vmem>>, vector<1x32x32xf32>
    %55 = vector.shape_cast %54 : vector<1x32x32xf32> to vector<32x32xf32>
    %cst_34 = arith.constant dense<0.000000e+00> : vector<32x32xf32>
    %56 = tpu.matmul %5, %55, %cst_34 {dimension_numbers = #tpu.dot_dimension_numbers<[1], [0], [0], [1], [0, 0, 1, 1], [], []>} : vector<32x32xf32>, vector<32x32xf32>, vector<32x32xf32> -> vector<32x32xf32>
    %57 = arith.addf %53, %56 : vector<32x32xf32>
    %c0_35 = arith.constant 0 : index
    %c0_36 = arith.constant 0 : index
    %58 = vector.load %arg7[%c0_35, %c0_36] : memref<11x160xf32, #tpu.memory_space<vmem>>, vector<1x32xf32>
    %59 = vector.broadcast %58 : vector<1x32xf32> to vector<32x32xf32>
    %60 = arith.addf %57, %59 : vector<32x32xf32>
    %cst_37 = arith.constant dense<0.000000e+00> : vector<32xf32>
    %61 = vector.multi_reduction <add>, %60, %cst_37 [0] : vector<32x32xf32> to vector<32xf32>
    %62 = vector.shape_cast %61 : vector<32xf32> to vector<1x32xf32>
    %cst_38 = arith.constant 3.200000e+01 : f32
    %63 = vector.broadcast %cst_38 : f32 to vector<1x32xf32>
    %64 = arith.divf %62, %63 : vector<1x32xf32>
    %65 = arith.mulf %60, %60 : vector<32x32xf32>
    %cst_39 = arith.constant dense<0.000000e+00> : vector<32xf32>
    %66 = vector.multi_reduction <add>, %65, %cst_39 [0] : vector<32x32xf32> to vector<32xf32>
    %67 = vector.shape_cast %66 : vector<32xf32> to vector<1x32xf32>
    %cst_40 = arith.constant 3.200000e+01 : f32
    %68 = vector.broadcast %cst_40 : f32 to vector<1x32xf32>
    %69 = arith.divf %67, %68 : vector<1x32xf32>
    %70 = arith.mulf %64, %64 : vector<1x32xf32>
    %71 = arith.subf %69, %70 : vector<1x32xf32>
    %72 = vector.broadcast %64 : vector<1x32xf32> to vector<32x32xf32>
    %73 = arith.subf %60, %72 : vector<32x32xf32>
    %cst_41 = arith.constant 9.99999974E-6 : f32
    %74 = vector.broadcast %cst_41 : f32 to vector<1x32xf32>
    %75 = arith.addf %71, %74 : vector<1x32xf32>
    %76 = math.rsqrt %75 : vector<1x32xf32>
    %77 = vector.broadcast %76 : vector<1x32xf32> to vector<32x32xf32>
    %78 = arith.mulf %73, %77 : vector<32x32xf32>
    %79 = vector.broadcast %0 : vector<1x32xf32> to vector<32x32xf32>
    %80 = arith.mulf %78, %79 : vector<32x32xf32>
    %81 = vector.broadcast %1 : vector<1x32xf32> to vector<32x32xf32>
    %82 = arith.addf %80, %81 : vector<32x32xf32>
    %83 = arith.negf %82 : vector<32x32xf32>
    %84 = math.exp %83 : vector<32x32xf32>
    %cst_42 = arith.constant 1.000000e+00 : f32
    %85 = vector.broadcast %cst_42 : f32 to vector<32x32xf32>
    %86 = arith.addf %85, %84 : vector<32x32xf32>
    %87 = arith.divf %85, %86 : vector<32x32xf32>
    %88 = arith.mulf %82, %87 : vector<32x32xf32>
    %cst_43 = arith.constant dense<0.000000e+00> : vector<2x32xf32>
    %89 = tpu.matmul %16, %88, %cst_43 {dimension_numbers = #tpu.dot_dimension_numbers<[1], [0], [0], [1], [0, 0, 1, 1], [], []>} : vector<2x32xf32>, vector<32x32xf32>, vector<2x32xf32> -> vector<2x32xf32>
    %c11 = arith.constant 11 : index
    %c0_44 = arith.constant 0 : index
    %c0_45 = arith.constant 0 : index
    %90 = vector.load %arg6[%c11, %c0_44, %c0_45] : memref<17x32x32xf32, #tpu.memory_space<vmem>>, vector<1x32x32xf32>
    %91 = vector.shape_cast %90 : vector<1x32x32xf32> to vector<32x32xf32>
    %cst_46 = arith.constant dense<0.000000e+00> : vector<2x32xf32>
    %92 = tpu.matmul %89, %91, %cst_46 {dimension_numbers = #tpu.dot_dimension_numbers<[1], [0], [0], [1], [0, 0, 1, 1], [], []>} : vector<2x32xf32>, vector<32x32xf32>, vector<2x32xf32> -> vector<2x32xf32>
    %93 = arith.addf %47, %92 : vector<2x32xf32>
    %cst_47 = arith.constant dense<0.000000e+00> : vector<480x32xf32>
    %94 = tpu.matmul %10, %88, %cst_47 {dimension_numbers = #tpu.dot_dimension_numbers<[1], [0], [0], [1], [0, 0, 1, 1], [], []>} : vector<480x32xf32>, vector<32x32xf32>, vector<480x32xf32> -> vector<480x32xf32>
    %95 = arith.mulf %94, %21 : vector<480x32xf32>
    %cst_48 = arith.constant dense<0.000000e+00> : vector<32x32xf32>
    %96 = tpu.matmul %14, %95, %cst_48 {dimension_numbers = #tpu.dot_dimension_numbers<[1], [0], [0], [1], [0, 0, 1, 1], [], []>} : vector<32x480xf32>, vector<480x32xf32>, vector<32x32xf32> -> vector<32x32xf32>
    %c1 = arith.constant 1 : index
    %c0_49 = arith.constant 0 : index
    %c0_50 = arith.constant 0 : index
    %97 = vector.load %arg6[%c1, %c0_49, %c0_50] : memref<17x32x32xf32, #tpu.memory_space<vmem>>, vector<1x32x32xf32>
    %98 = vector.shape_cast %97 : vector<1x32x32xf32> to vector<32x32xf32>
    %cst_51 = arith.constant dense<0.000000e+00> : vector<32x32xf32>
    %99 = tpu.matmul %96, %98, %cst_51 {dimension_numbers = #tpu.dot_dimension_numbers<[1], [0], [0], [1], [0, 0, 1, 1], [], []>} : vector<32x32xf32>, vector<32x32xf32>, vector<32x32xf32> -> vector<32x32xf32>
    %c6_52 = arith.constant 6 : index
    %c0_53 = arith.constant 0 : index
    %c0_54 = arith.constant 0 : index
    %100 = vector.load %arg6[%c6_52, %c0_53, %c0_54] : memref<17x32x32xf32, #tpu.memory_space<vmem>>, vector<1x32x32xf32>
    %101 = vector.shape_cast %100 : vector<1x32x32xf32> to vector<32x32xf32>
    %cst_55 = arith.constant dense<0.000000e+00> : vector<32x32xf32>
    %102 = tpu.matmul %88, %101, %cst_55 {dimension_numbers = #tpu.dot_dimension_numbers<[1], [0], [0], [1], [0, 0, 1, 1], [], []>} : vector<32x32xf32>, vector<32x32xf32>, vector<32x32xf32> -> vector<32x32xf32>
    %103 = arith.addf %99, %102 : vector<32x32xf32>
    %c1_56 = arith.constant 1 : index
    %c0_57 = arith.constant 0 : index
    %104 = vector.load %arg7[%c1_56, %c0_57] : memref<11x160xf32, #tpu.memory_space<vmem>>, vector<1x32xf32>
    %105 = vector.broadcast %104 : vector<1x32xf32> to vector<32x32xf32>
    %106 = arith.addf %103, %105 : vector<32x32xf32>
    %107 = arith.negf %106 : vector<32x32xf32>
    %108 = math.exp %107 : vector<32x32xf32>
    %cst_58 = arith.constant 1.000000e+00 : f32
    %109 = vector.broadcast %cst_58 : f32 to vector<32x32xf32>
    %110 = arith.addf %109, %108 : vector<32x32xf32>
    %111 = arith.divf %109, %110 : vector<32x32xf32>
    %112 = arith.mulf %106, %111 : vector<32x32xf32>
    %cst_59 = arith.constant dense<0.000000e+00> : vector<32xf32>
    %113 = vector.multi_reduction <add>, %112, %cst_59 [0] : vector<32x32xf32> to vector<32xf32>
    %114 = vector.shape_cast %113 : vector<32xf32> to vector<1x32xf32>
    %cst_60 = arith.constant 3.200000e+01 : f32
    %115 = vector.broadcast %cst_60 : f32 to vector<1x32xf32>
    %116 = arith.divf %114, %115 : vector<1x32xf32>
    %117 = arith.mulf %112, %112 : vector<32x32xf32>
    %cst_61 = arith.constant dense<0.000000e+00> : vector<32xf32>
    %118 = vector.multi_reduction <add>, %117, %cst_61 [0] : vector<32x32xf32> to vector<32xf32>
    %119 = vector.shape_cast %118 : vector<32xf32> to vector<1x32xf32>
    %cst_62 = arith.constant 3.200000e+01 : f32
    %120 = vector.broadcast %cst_62 : f32 to vector<1x32xf32>
    %121 = arith.divf %119, %120 : vector<1x32xf32>
    %122 = arith.mulf %116, %116 : vector<1x32xf32>
    %123 = arith.subf %121, %122 : vector<1x32xf32>
    %124 = vector.broadcast %116 : vector<1x32xf32> to vector<32x32xf32>
    %125 = arith.subf %112, %124 : vector<32x32xf32>
    %cst_63 = arith.constant 9.99999974E-6 : f32
    %126 = vector.broadcast %cst_63 : f32 to vector<1x32xf32>
    %127 = arith.addf %123, %126 : vector<1x32xf32>
    %128 = math.rsqrt %127 : vector<1x32xf32>
    %129 = vector.broadcast %128 : vector<1x32xf32> to vector<32x32xf32>
    %130 = arith.mulf %125, %129 : vector<32x32xf32>
    %131 = vector.broadcast %0 : vector<1x32xf32> to vector<32x32xf32>
    %132 = arith.mulf %130, %131 : vector<32x32xf32>
    %133 = vector.broadcast %1 : vector<1x32xf32> to vector<32x32xf32>
    %134 = arith.addf %132, %133 : vector<32x32xf32>
    %cst_64 = arith.constant dense<0.000000e+00> : vector<2x32xf32>
    %135 = tpu.matmul %16, %134, %cst_64 {dimension_numbers = #tpu.dot_dimension_numbers<[1], [0], [0], [1], [0, 0, 1, 1], [], []>} : vector<2x32xf32>, vector<32x32xf32>, vector<2x32xf32> -> vector<2x32xf32>
    %c12 = arith.constant 12 : index
    %c0_65 = arith.constant 0 : index
    %c0_66 = arith.constant 0 : index
    %136 = vector.load %arg6[%c12, %c0_65, %c0_66] : memref<17x32x32xf32, #tpu.memory_space<vmem>>, vector<1x32x32xf32>
    %137 = vector.shape_cast %136 : vector<1x32x32xf32> to vector<32x32xf32>
    %cst_67 = arith.constant dense<0.000000e+00> : vector<2x32xf32>
    %138 = tpu.matmul %135, %137, %cst_67 {dimension_numbers = #tpu.dot_dimension_numbers<[1], [0], [0], [1], [0, 0, 1, 1], [], []>} : vector<2x32xf32>, vector<32x32xf32>, vector<2x32xf32> -> vector<2x32xf32>
    %139 = arith.addf %93, %138 : vector<2x32xf32>
    %cst_68 = arith.constant dense<0.000000e+00> : vector<480x32xf32>
    %140 = tpu.matmul %10, %134, %cst_68 {dimension_numbers = #tpu.dot_dimension_numbers<[1], [0], [0], [1], [0, 0, 1, 1], [], []>} : vector<480x32xf32>, vector<32x32xf32>, vector<480x32xf32> -> vector<480x32xf32>
    %141 = arith.mulf %140, %21 : vector<480x32xf32>
    %cst_69 = arith.constant dense<0.000000e+00> : vector<32x32xf32>
    %142 = tpu.matmul %14, %141, %cst_69 {dimension_numbers = #tpu.dot_dimension_numbers<[1], [0], [0], [1], [0, 0, 1, 1], [], []>} : vector<32x480xf32>, vector<480x32xf32>, vector<32x32xf32> -> vector<32x32xf32>
    %c2 = arith.constant 2 : index
    %c0_70 = arith.constant 0 : index
    %c0_71 = arith.constant 0 : index
    %143 = vector.load %arg6[%c2, %c0_70, %c0_71] : memref<17x32x32xf32, #tpu.memory_space<vmem>>, vector<1x32x32xf32>
    %144 = vector.shape_cast %143 : vector<1x32x32xf32> to vector<32x32xf32>
    %cst_72 = arith.constant dense<0.000000e+00> : vector<32x32xf32>
    %145 = tpu.matmul %142, %144, %cst_72 {dimension_numbers = #tpu.dot_dimension_numbers<[1], [0], [0], [1], [0, 0, 1, 1], [], []>} : vector<32x32xf32>, vector<32x32xf32>, vector<32x32xf32> -> vector<32x32xf32>
    %c7 = arith.constant 7 : index
    %c0_73 = arith.constant 0 : index
    %c0_74 = arith.constant 0 : index
    %146 = vector.load %arg6[%c7, %c0_73, %c0_74] : memref<17x32x32xf32, #tpu.memory_space<vmem>>, vector<1x32x32xf32>
    %147 = vector.shape_cast %146 : vector<1x32x32xf32> to vector<32x32xf32>
    %cst_75 = arith.constant dense<0.000000e+00> : vector<32x32xf32>
    %148 = tpu.matmul %134, %147, %cst_75 {dimension_numbers = #tpu.dot_dimension_numbers<[1], [0], [0], [1], [0, 0, 1, 1], [], []>} : vector<32x32xf32>, vector<32x32xf32>, vector<32x32xf32> -> vector<32x32xf32>
    %149 = arith.addf %145, %148 : vector<32x32xf32>
    %c2_76 = arith.constant 2 : index
    %c0_77 = arith.constant 0 : index
    %150 = vector.load %arg7[%c2_76, %c0_77] : memref<11x160xf32, #tpu.memory_space<vmem>>, vector<1x32xf32>
    %151 = vector.broadcast %150 : vector<1x32xf32> to vector<32x32xf32>
    %152 = arith.addf %149, %151 : vector<32x32xf32>
    %cst_78 = arith.constant dense<0.000000e+00> : vector<32xf32>
    %153 = vector.multi_reduction <add>, %152, %cst_78 [0] : vector<32x32xf32> to vector<32xf32>
    %154 = vector.shape_cast %153 : vector<32xf32> to vector<1x32xf32>
    %cst_79 = arith.constant 3.200000e+01 : f32
    %155 = vector.broadcast %cst_79 : f32 to vector<1x32xf32>
    %156 = arith.divf %154, %155 : vector<1x32xf32>
    %157 = arith.mulf %152, %152 : vector<32x32xf32>
    %cst_80 = arith.constant dense<0.000000e+00> : vector<32xf32>
    %158 = vector.multi_reduction <add>, %157, %cst_80 [0] : vector<32x32xf32> to vector<32xf32>
    %159 = vector.shape_cast %158 : vector<32xf32> to vector<1x32xf32>
    %cst_81 = arith.constant 3.200000e+01 : f32
    %160 = vector.broadcast %cst_81 : f32 to vector<1x32xf32>
    %161 = arith.divf %159, %160 : vector<1x32xf32>
    %162 = arith.mulf %156, %156 : vector<1x32xf32>
    %163 = arith.subf %161, %162 : vector<1x32xf32>
    %164 = vector.broadcast %156 : vector<1x32xf32> to vector<32x32xf32>
    %165 = arith.subf %152, %164 : vector<32x32xf32>
    %cst_82 = arith.constant 9.99999974E-6 : f32
    %166 = vector.broadcast %cst_82 : f32 to vector<1x32xf32>
    %167 = arith.addf %163, %166 : vector<1x32xf32>
    %168 = math.rsqrt %167 : vector<1x32xf32>
    %169 = vector.broadcast %168 : vector<1x32xf32> to vector<32x32xf32>
    %170 = arith.mulf %165, %169 : vector<32x32xf32>
    %171 = vector.broadcast %0 : vector<1x32xf32> to vector<32x32xf32>
    %172 = arith.mulf %170, %171 : vector<32x32xf32>
    %173 = vector.broadcast %1 : vector<1x32xf32> to vector<32x32xf32>
    %174 = arith.addf %172, %173 : vector<32x32xf32>
    %175 = arith.negf %174 : vector<32x32xf32>
    %176 = math.exp %175 : vector<32x32xf32>
    %cst_83 = arith.constant 1.000000e+00 : f32
    %177 = vector.broadcast %cst_83 : f32 to vector<32x32xf32>
    %178 = arith.addf %177, %176 : vector<32x32xf32>
    %179 = arith.divf %177, %178 : vector<32x32xf32>
    %180 = arith.mulf %174, %179 : vector<32x32xf32>
    %cst_84 = arith.constant dense<0.000000e+00> : vector<2x32xf32>
    %181 = tpu.matmul %16, %180, %cst_84 {dimension_numbers = #tpu.dot_dimension_numbers<[1], [0], [0], [1], [0, 0, 1, 1], [], []>} : vector<2x32xf32>, vector<32x32xf32>, vector<2x32xf32> -> vector<2x32xf32>
    %c13 = arith.constant 13 : index
    %c0_85 = arith.constant 0 : index
    %c0_86 = arith.constant 0 : index
    %182 = vector.load %arg6[%c13, %c0_85, %c0_86] : memref<17x32x32xf32, #tpu.memory_space<vmem>>, vector<1x32x32xf32>
    %183 = vector.shape_cast %182 : vector<1x32x32xf32> to vector<32x32xf32>
    %cst_87 = arith.constant dense<0.000000e+00> : vector<2x32xf32>
    %184 = tpu.matmul %181, %183, %cst_87 {dimension_numbers = #tpu.dot_dimension_numbers<[1], [0], [0], [1], [0, 0, 1, 1], [], []>} : vector<2x32xf32>, vector<32x32xf32>, vector<2x32xf32> -> vector<2x32xf32>
    %185 = arith.addf %139, %184 : vector<2x32xf32>
    %cst_88 = arith.constant dense<0.000000e+00> : vector<480x32xf32>
    %186 = tpu.matmul %10, %180, %cst_88 {dimension_numbers = #tpu.dot_dimension_numbers<[1], [0], [0], [1], [0, 0, 1, 1], [], []>} : vector<480x32xf32>, vector<32x32xf32>, vector<480x32xf32> -> vector<480x32xf32>
    %187 = arith.mulf %186, %21 : vector<480x32xf32>
    %cst_89 = arith.constant dense<0.000000e+00> : vector<32x32xf32>
    %188 = tpu.matmul %14, %187, %cst_89 {dimension_numbers = #tpu.dot_dimension_numbers<[1], [0], [0], [1], [0, 0, 1, 1], [], []>} : vector<32x480xf32>, vector<480x32xf32>, vector<32x32xf32> -> vector<32x32xf32>
    %c3 = arith.constant 3 : index
    %c0_90 = arith.constant 0 : index
    %c0_91 = arith.constant 0 : index
    %189 = vector.load %arg6[%c3, %c0_90, %c0_91] : memref<17x32x32xf32, #tpu.memory_space<vmem>>, vector<1x32x32xf32>
    %190 = vector.shape_cast %189 : vector<1x32x32xf32> to vector<32x32xf32>
    %cst_92 = arith.constant dense<0.000000e+00> : vector<32x32xf32>
    %191 = tpu.matmul %188, %190, %cst_92 {dimension_numbers = #tpu.dot_dimension_numbers<[1], [0], [0], [1], [0, 0, 1, 1], [], []>} : vector<32x32xf32>, vector<32x32xf32>, vector<32x32xf32> -> vector<32x32xf32>
    %c8 = arith.constant 8 : index
    %c0_93 = arith.constant 0 : index
    %c0_94 = arith.constant 0 : index
    %192 = vector.load %arg6[%c8, %c0_93, %c0_94] : memref<17x32x32xf32, #tpu.memory_space<vmem>>, vector<1x32x32xf32>
    %193 = vector.shape_cast %192 : vector<1x32x32xf32> to vector<32x32xf32>
    %cst_95 = arith.constant dense<0.000000e+00> : vector<32x32xf32>
    %194 = tpu.matmul %180, %193, %cst_95 {dimension_numbers = #tpu.dot_dimension_numbers<[1], [0], [0], [1], [0, 0, 1, 1], [], []>} : vector<32x32xf32>, vector<32x32xf32>, vector<32x32xf32> -> vector<32x32xf32>
    %195 = arith.addf %191, %194 : vector<32x32xf32>
    %c3_96 = arith.constant 3 : index
    %c0_97 = arith.constant 0 : index
    %196 = vector.load %arg7[%c3_96, %c0_97] : memref<11x160xf32, #tpu.memory_space<vmem>>, vector<1x32xf32>
    %197 = vector.broadcast %196 : vector<1x32xf32> to vector<32x32xf32>
    %198 = arith.addf %195, %197 : vector<32x32xf32>
    %cst_98 = arith.constant dense<0.000000e+00> : vector<32xf32>
    %199 = vector.multi_reduction <add>, %198, %cst_98 [0] : vector<32x32xf32> to vector<32xf32>
    %200 = vector.shape_cast %199 : vector<32xf32> to vector<1x32xf32>
    %cst_99 = arith.constant 3.200000e+01 : f32
    %201 = vector.broadcast %cst_99 : f32 to vector<1x32xf32>
    %202 = arith.divf %200, %201 : vector<1x32xf32>
    %203 = arith.mulf %198, %198 : vector<32x32xf32>
    %cst_100 = arith.constant dense<0.000000e+00> : vector<32xf32>
    %204 = vector.multi_reduction <add>, %203, %cst_100 [0] : vector<32x32xf32> to vector<32xf32>
    %205 = vector.shape_cast %204 : vector<32xf32> to vector<1x32xf32>
    %cst_101 = arith.constant 3.200000e+01 : f32
    %206 = vector.broadcast %cst_101 : f32 to vector<1x32xf32>
    %207 = arith.divf %205, %206 : vector<1x32xf32>
    %208 = arith.mulf %202, %202 : vector<1x32xf32>
    %209 = arith.subf %207, %208 : vector<1x32xf32>
    %210 = vector.broadcast %202 : vector<1x32xf32> to vector<32x32xf32>
    %211 = arith.subf %198, %210 : vector<32x32xf32>
    %cst_102 = arith.constant 9.99999974E-6 : f32
    %212 = vector.broadcast %cst_102 : f32 to vector<1x32xf32>
    %213 = arith.addf %209, %212 : vector<1x32xf32>
    %214 = math.rsqrt %213 : vector<1x32xf32>
    %215 = vector.broadcast %214 : vector<1x32xf32> to vector<32x32xf32>
    %216 = arith.mulf %211, %215 : vector<32x32xf32>
    %217 = vector.broadcast %0 : vector<1x32xf32> to vector<32x32xf32>
    %218 = arith.mulf %216, %217 : vector<32x32xf32>
    %219 = vector.broadcast %1 : vector<1x32xf32> to vector<32x32xf32>
    %220 = arith.addf %218, %219 : vector<32x32xf32>
    %221 = arith.negf %220 : vector<32x32xf32>
    %222 = math.exp %221 : vector<32x32xf32>
    %cst_103 = arith.constant 1.000000e+00 : f32
    %223 = vector.broadcast %cst_103 : f32 to vector<32x32xf32>
    %224 = arith.addf %223, %222 : vector<32x32xf32>
    %225 = arith.divf %223, %224 : vector<32x32xf32>
    %226 = arith.mulf %220, %225 : vector<32x32xf32>
    %cst_104 = arith.constant dense<0.000000e+00> : vector<2x32xf32>
    %227 = tpu.matmul %16, %226, %cst_104 {dimension_numbers = #tpu.dot_dimension_numbers<[1], [0], [0], [1], [0, 0, 1, 1], [], []>} : vector<2x32xf32>, vector<32x32xf32>, vector<2x32xf32> -> vector<2x32xf32>
    %c14 = arith.constant 14 : index
    %c0_105 = arith.constant 0 : index
    %c0_106 = arith.constant 0 : index
    %228 = vector.load %arg6[%c14, %c0_105, %c0_106] : memref<17x32x32xf32, #tpu.memory_space<vmem>>, vector<1x32x32xf32>
    %229 = vector.shape_cast %228 : vector<1x32x32xf32> to vector<32x32xf32>
    %cst_107 = arith.constant dense<0.000000e+00> : vector<2x32xf32>
    %230 = tpu.matmul %227, %229, %cst_107 {dimension_numbers = #tpu.dot_dimension_numbers<[1], [0], [0], [1], [0, 0, 1, 1], [], []>} : vector<2x32xf32>, vector<32x32xf32>, vector<2x32xf32> -> vector<2x32xf32>
    %231 = arith.addf %185, %230 : vector<2x32xf32>
    %cst_108 = arith.constant dense<0.000000e+00> : vector<480x32xf32>
    %232 = tpu.matmul %10, %226, %cst_108 {dimension_numbers = #tpu.dot_dimension_numbers<[1], [0], [0], [1], [0, 0, 1, 1], [], []>} : vector<480x32xf32>, vector<32x32xf32>, vector<480x32xf32> -> vector<480x32xf32>
    %233 = arith.mulf %232, %21 : vector<480x32xf32>
    %cst_109 = arith.constant dense<0.000000e+00> : vector<32x32xf32>
    %234 = tpu.matmul %14, %233, %cst_109 {dimension_numbers = #tpu.dot_dimension_numbers<[1], [0], [0], [1], [0, 0, 1, 1], [], []>} : vector<32x480xf32>, vector<480x32xf32>, vector<32x32xf32> -> vector<32x32xf32>
    %c4 = arith.constant 4 : index
    %c0_110 = arith.constant 0 : index
    %c0_111 = arith.constant 0 : index
    %235 = vector.load %arg6[%c4, %c0_110, %c0_111] : memref<17x32x32xf32, #tpu.memory_space<vmem>>, vector<1x32x32xf32>
    %236 = vector.shape_cast %235 : vector<1x32x32xf32> to vector<32x32xf32>
    %cst_112 = arith.constant dense<0.000000e+00> : vector<32x32xf32>
    %237 = tpu.matmul %234, %236, %cst_112 {dimension_numbers = #tpu.dot_dimension_numbers<[1], [0], [0], [1], [0, 0, 1, 1], [], []>} : vector<32x32xf32>, vector<32x32xf32>, vector<32x32xf32> -> vector<32x32xf32>
    %c9 = arith.constant 9 : index
    %c0_113 = arith.constant 0 : index
    %c0_114 = arith.constant 0 : index
    %238 = vector.load %arg6[%c9, %c0_113, %c0_114] : memref<17x32x32xf32, #tpu.memory_space<vmem>>, vector<1x32x32xf32>
    %239 = vector.shape_cast %238 : vector<1x32x32xf32> to vector<32x32xf32>
    %cst_115 = arith.constant dense<0.000000e+00> : vector<32x32xf32>
    %240 = tpu.matmul %226, %239, %cst_115 {dimension_numbers = #tpu.dot_dimension_numbers<[1], [0], [0], [1], [0, 0, 1, 1], [], []>} : vector<32x32xf32>, vector<32x32xf32>, vector<32x32xf32> -> vector<32x32xf32>
    %241 = arith.addf %237, %240 : vector<32x32xf32>
    %c4_116 = arith.constant 4 : index
    %c0_117 = arith.constant 0 : index
    %242 = vector.load %arg7[%c4_116, %c0_117] : memref<11x160xf32, #tpu.memory_space<vmem>>, vector<1x32xf32>
    %243 = vector.broadcast %242 : vector<1x32xf32> to vector<32x32xf32>
    %244 = arith.addf %241, %243 : vector<32x32xf32>
    %cst_118 = arith.constant dense<0.000000e+00> : vector<32xf32>
    %245 = vector.multi_reduction <add>, %244, %cst_118 [0] : vector<32x32xf32> to vector<32xf32>
    %246 = vector.shape_cast %245 : vector<32xf32> to vector<1x32xf32>
    %cst_119 = arith.constant 3.200000e+01 : f32
    %247 = vector.broadcast %cst_119 : f32 to vector<1x32xf32>
    %248 = arith.divf %246, %247 : vector<1x32xf32>
    %249 = arith.mulf %244, %244 : vector<32x32xf32>
    %cst_120 = arith.constant dense<0.000000e+00> : vector<32xf32>
    %250 = vector.multi_reduction <add>, %249, %cst_120 [0] : vector<32x32xf32> to vector<32xf32>
    %251 = vector.shape_cast %250 : vector<32xf32> to vector<1x32xf32>
    %cst_121 = arith.constant 3.200000e+01 : f32
    %252 = vector.broadcast %cst_121 : f32 to vector<1x32xf32>
    %253 = arith.divf %251, %252 : vector<1x32xf32>
    %254 = arith.mulf %248, %248 : vector<1x32xf32>
    %255 = arith.subf %253, %254 : vector<1x32xf32>
    %256 = vector.broadcast %248 : vector<1x32xf32> to vector<32x32xf32>
    %257 = arith.subf %244, %256 : vector<32x32xf32>
    %cst_122 = arith.constant 9.99999974E-6 : f32
    %258 = vector.broadcast %cst_122 : f32 to vector<1x32xf32>
    %259 = arith.addf %255, %258 : vector<1x32xf32>
    %260 = math.rsqrt %259 : vector<1x32xf32>
    %261 = vector.broadcast %260 : vector<1x32xf32> to vector<32x32xf32>
    %262 = arith.mulf %257, %261 : vector<32x32xf32>
    %263 = vector.broadcast %0 : vector<1x32xf32> to vector<32x32xf32>
    %264 = arith.mulf %262, %263 : vector<32x32xf32>
    %265 = vector.broadcast %1 : vector<1x32xf32> to vector<32x32xf32>
    %266 = arith.addf %264, %265 : vector<32x32xf32>
    %267 = arith.negf %266 : vector<32x32xf32>
    %268 = math.exp %267 : vector<32x32xf32>
    %cst_123 = arith.constant 1.000000e+00 : f32
    %269 = vector.broadcast %cst_123 : f32 to vector<32x32xf32>
    %270 = arith.addf %269, %268 : vector<32x32xf32>
    %271 = arith.divf %269, %270 : vector<32x32xf32>
    %272 = arith.mulf %266, %271 : vector<32x32xf32>
    %cst_124 = arith.constant dense<0.000000e+00> : vector<2x32xf32>
    %273 = tpu.matmul %16, %272, %cst_124 {dimension_numbers = #tpu.dot_dimension_numbers<[1], [0], [0], [1], [0, 0, 1, 1], [], []>} : vector<2x32xf32>, vector<32x32xf32>, vector<2x32xf32> -> vector<2x32xf32>
    %c15 = arith.constant 15 : index
    %c0_125 = arith.constant 0 : index
    %c0_126 = arith.constant 0 : index
    %274 = vector.load %arg6[%c15, %c0_125, %c0_126] : memref<17x32x32xf32, #tpu.memory_space<vmem>>, vector<1x32x32xf32>
    %275 = vector.shape_cast %274 : vector<1x32x32xf32> to vector<32x32xf32>
    %cst_127 = arith.constant dense<0.000000e+00> : vector<2x32xf32>
    %276 = tpu.matmul %273, %275, %cst_127 {dimension_numbers = #tpu.dot_dimension_numbers<[1], [0], [0], [1], [0, 0, 1, 1], [], []>} : vector<2x32xf32>, vector<32x32xf32>, vector<2x32xf32> -> vector<2x32xf32>
    %277 = arith.addf %231, %276 : vector<2x32xf32>
    %c7_128 = arith.constant 7 : index
    %c0_129 = arith.constant 0 : index
    %278 = vector.load %arg7[%c7_128, %c0_129] : memref<11x160xf32, #tpu.memory_space<vmem>>, vector<1x32xf32>
    %279 = vector.broadcast %278 : vector<1x32xf32> to vector<2x32xf32>
    %280 = arith.addf %277, %279 : vector<2x32xf32>
    %cst_130 = arith.constant 0.000000e+00 : f32
    %281 = vector.broadcast %cst_130 : f32 to vector<2x32xf32>
    %282 = arith.maximumf %280, %281 : vector<2x32xf32>
    %c16 = arith.constant 16 : index
    %c0_131 = arith.constant 0 : index
    %c0_132 = arith.constant 0 : index
    %283 = vector.load %arg6[%c16, %c0_131, %c0_132] : memref<17x32x32xf32, #tpu.memory_space<vmem>>, vector<1x32x32xf32>
    %284 = vector.shape_cast %283 : vector<1x32x32xf32> to vector<32x32xf32>
    %cst_133 = arith.constant dense<0.000000e+00> : vector<2x32xf32>
    %285 = tpu.matmul %282, %284, %cst_133 {dimension_numbers = #tpu.dot_dimension_numbers<[1], [0], [0], [1], [0, 0, 1, 1], [], []>} : vector<2x32xf32>, vector<32x32xf32>, vector<2x32xf32> -> vector<2x32xf32>
    %c8_134 = arith.constant 8 : index
    %c0_135 = arith.constant 0 : index
    %286 = vector.load %arg7[%c8_134, %c0_135] : memref<11x160xf32, #tpu.memory_space<vmem>>, vector<1x32xf32>
    %287 = vector.broadcast %286 : vector<1x32xf32> to vector<2x32xf32>
    %288 = arith.addf %285, %287 : vector<2x32xf32>
    %cst_136 = arith.constant 0.000000e+00 : f32
    %289 = vector.broadcast %cst_136 : f32 to vector<2x32xf32>
    %290 = arith.maximumf %288, %289 : vector<2x32xf32>
    %c0_137 = arith.constant 0 : index
    %c0_138 = arith.constant 0 : index
    %291 = vector.load %arg8[%c0_137, %c0_138] : memref<192x160xf32, #tpu.memory_space<vmem>>, vector<32x160xf32>
    %cst_139 = arith.constant dense<0.000000e+00> : vector<2x160xf32>
    %292 = tpu.matmul %290, %291, %cst_139 {dimension_numbers = #tpu.dot_dimension_numbers<[1], [0], [0], [1], [0, 0, 1, 1], [], []>} : vector<2x32xf32>, vector<32x160xf32>, vector<2x160xf32> -> vector<2x160xf32>
    %c9_140 = arith.constant 9 : index
    %c0_141 = arith.constant 0 : index
    %293 = vector.load %arg7[%c9_140, %c0_141] : memref<11x160xf32, #tpu.memory_space<vmem>>, vector<1x160xf32>
    %294 = vector.broadcast %293 : vector<1x160xf32> to vector<2x160xf32>
    %295 = arith.addf %292, %294 : vector<2x160xf32>
    %cst_142 = arith.constant 0.000000e+00 : f32
    %296 = vector.broadcast %cst_142 : f32 to vector<2x160xf32>
    %297 = arith.maximumf %295, %296 : vector<2x160xf32>
    %c32 = arith.constant 32 : index
    %c0_143 = arith.constant 0 : index
    %298 = vector.load %arg8[%c32, %c0_143] : memref<192x160xf32, #tpu.memory_space<vmem>>, vector<160x8xf32>
    %cst_144 = arith.constant dense<0.000000e+00> : vector<2x8xf32>
    %299 = tpu.matmul %297, %298, %cst_144 {dimension_numbers = #tpu.dot_dimension_numbers<[1], [0], [0], [1], [0, 0, 1, 1], [], []>} : vector<2x160xf32>, vector<160x8xf32>, vector<2x8xf32> -> vector<2x8xf32>
    %c10_145 = arith.constant 10 : index
    %c0_146 = arith.constant 0 : index
    %300 = vector.load %arg7[%c10_145, %c0_146] : memref<11x160xf32, #tpu.memory_space<vmem>>, vector<1x8xf32>
    %301 = vector.broadcast %300 : vector<1x8xf32> to vector<2x8xf32>
    %302 = arith.addf %299, %301 : vector<2x8xf32>
    %c0_147 = arith.constant 0 : index
    %c0_148 = arith.constant 0 : index
    %303 = vector.load %arg9[%c0_147, %c0_148] : memref<2x8xf32, #tpu.memory_space<vmem>>, vector<2x8xf32>
    tpu.vector_store %arg9[%c0_147, %c0_148], %302 {strides = array<i32>} : memref<2x8xf32, #tpu.memory_space<vmem>>, vector<2x8xf32>,
    %cst_149 = arith.constant dense<0xFF800000> : vector<2xf32>
    %304 = vector.multi_reduction <maximumf>, %302, %cst_149 [1] : vector<2x8xf32> to vector<2xf32>
    %305 = vector.shape_cast %304 : vector<2xf32> to vector<2x1xf32>
    %306 = vector.broadcast %305 : vector<2x1xf32> to vector<2x8xf32>
    %307 = arith.subf %302, %306 : vector<2x8xf32>
    %308 = math.exp %307 : vector<2x8xf32>
    %cst_150 = arith.constant dense<0.000000e+00> : vector<2xf32>
    %309 = vector.multi_reduction <add>, %308, %cst_150 [1] : vector<2x8xf32> to vector<2xf32>
    %310 = vector.shape_cast %309 : vector<2xf32> to vector<2x1xf32>
    %311 = math.log %310 : vector<2x1xf32>
    %312 = vector.broadcast %311 : vector<2x1xf32> to vector<2x8xf32>
    %313 = arith.subf %307, %312 : vector<2x8xf32>
    %c0_151 = arith.constant 0 : index
    %c0_152 = arith.constant 0 : index
    %314 = vector.load %arg10[%c0_151, %c0_152] : memref<2x8xf32, #tpu.memory_space<vmem>>, vector<2x8xf32>
    tpu.vector_store %arg10[%c0_151, %c0_152], %313 {strides = array<i32>} : memref<2x8xf32, #tpu.memory_space<vmem>>, vector<2x8xf32>,
    return
  }
}

</mosaic_0001>

<bundles_post_ra>
// kernel: gin_attribute_forward.1
= control target key start
LH: loop header
LB: loop body
LE: loop exit
PB: predicated region body
PF: predicated region fallthrough
CT: control target
= control target key end

     0   :  { %16 = vsyncpa [#allocation3], 0  ;;  %vm44_vm0 = vcmask 130048   ;;  %s13657_s0 = inlined_call_operand.vmem [shape: f32[32,16], index: 0, kind: input, shape index: {}]   ;;  %s13658_s1 = inlined_call_operand.vmem [shape: bf16[480,32], index: 1, kind: input, shape index: {}]   ;;  %s13659_s2 = inlined_call_operand.vmem [shape: bf16[480,32], index: 2, kind: input, shape index: {}]   ;;  %s13660_s3 = inlined_call_operand.vmem [shape: bf16[32,480], index: 3, kind: input, shape index: {}]   ;;  %s13661_s4 = inlined_call_operand.vmem [shape: bf16[2,32], index: 4, kind: input, shape index: {}]   ;;  %s13662_s5 = inlined_call_operand.vmem [shape: f32[16,128], index: 5, kind: input, shape index: {}]   ;;  %s13663_s6 = inlined_call_operand.vmem [shape: f32[17,32,32], index: 6, kind: input, shape index: {}]   ;;  %s13664_s7 = inlined_call_operand.vmem [shape: f32[11,160], index: 7, kind: input, shape index: {}]   ;;  %s13665_s8 = inlined_call_operand.vmem [shape: f32[192,160], index: 8, kind: input, shape index: {}]   ;;  %s13666_s9 = inlined_call_operand.hbm [shape: f32[2,8], index: 9, kind: output, shape index: {0}]   ;;  %s13667_s10 = inlined_call_operand.hbm [shape: f32[2,8], index: 10, kind: output, shape index: {1}]  }
   0x1   :  { %v42_v0 = vld [vmem:[%s13662_s5] sm:$0xff]  ;;  %v43_v1 = vld [vmem:[%s13662_s5 + $0x8] sm:$0xff] }
   0x2   :  { %v38_v2 = vld [vmem:[%s13657_s0] sm:$0xff]  ;;  %v9985_v3 = vpack.c.bf16 %v43_v1, %v42_v0 }
   0x3   :  { %9010 = vmatprep.mubr.msk.f32.mxu0 %vm44_vm0, %v38_v2  ;;  %v36_v4 = vld [vmem:[%s13664_s7 + $0x5] ss:$0 sm:$0xff] }
   0x4   :  { %17 = vsyncpa [#allocation5], 0  ;;  %9986 = vmatprep.subr.bf16.mxu0 %v9985_v3  ;;  %s10879_s21 = smov 32   ;;  %v39_v5 = vld [vmem:[%s13657_s0 + $0x8] sm:$0xff]  ;;  %v37_v6 = vld [vmem:[%s13664_s7 + $0x6] ss:$0 sm:$0xff] }
   0x5   :  { %1634 = vrot.lane.b32.xlu1 %v36_v4, %s10879_s21  ;;  %9988 = vmatpush3.bf16.msra.mxu0 %v9985_v3  ;;  %v40_v7 = vld [vmem:[%s13657_s0 + $0x10] sm:$0xff]  ;;  %v41_v8 = vld [vmem:[%s13657_s0 + $0x18] sm:$0xff]  ;;  %vm1587_vm1 = vcmask 523520   ;;  %v10977_v10 = vld [vmem:[%s13659_s2] sm:$0xff]   ;;  %vm424_vm2 = vcmask 261120   ;;  %v13670_v59 = vmov 0.0|0.0  }
   0x6   :  { %v8011_v14 = vunpack.c.l.bf16 %v10977_v10  ;;  %10005 = vmatprep.subr.bf16.mxu0 %v13670_v59  ;;  %vm10881_vm3 = vmmov 0   ;;  %s10883_s0 = smov 96   ;;  %s10884_s11 = smov 64   ;;  %vm2168_vm4 = vcmask 785408   ;;  %vm7262_vm5 = vcmask 58368  }
   0x8   :  { %9011 = vmatmul.mubr.msk.f32.vlgmr.msra.gmra.mrb[0].mxu0 %vm44_vm0, %v39_v5  ;;  %9024 = vmatprep.mubr.msk.f32.mxu1 %vm424_vm2, %v8011_v14 }
   0x9   :  { %1642 = vrot.lane.b32.xlu1 %v37_v6, %s10879_s21  ;;  %9013 = vmatprep.mubr.msk.f32.mxu0 %vm44_vm0, %v40_v7 }
   0xc   :  { %9014 = vmatmul.mubr.msk.f32.gmra.mrb[2].mxu0 %vm44_vm0, %v41_v8 }
  0x77   :  { %v1635_v58 = vpop.permute.xlu1 %1634 }
  0x7b   :  { %v1643_v1 = vpop.permute.xlu1 %1642 }
  0xdb   :  { %v10972_v9 = vpop.f32.mrb[0].mxu0 }
  0xdc   :  { %13912 = vst [vmem:[#allocation8_spill] sm:$0xff] %v10972_v9  ;;  %v1589_v11 = vsel %vm1587_vm1, %v10972_v9, 0.0  ;;  %v1604_v12 = vmul.f32 %v10972_v9, %v10972_v9  ;;  %v10983_v13 = vpop.f32.mrb[1].mxu0 }
  0xdd   :  { %13913 = vst [vmem:[#allocation9_spill] sm:$0xff] %v10983_v13  ;;  %v1588_v15 = vsel %vm1587_vm1, %v10983_v13, 0.0  ;;  %v1603_v16 = vmul.f32 %v10983_v13, %v10983_v13  ;;  %v10992_v17 = vpack.i.bf16 %v10972_v9, %v10983_v13  ;;  %v10998_v20 = vpack.c.bf16 %v10972_v9, %v10983_v13 }
  0xde   :  { %v1608_v18 = vsel %vm1587_vm1, %v1604_v12, 0.0  ;;  %v1590_v19 = vadd.f32 %v1589_v11, %v1588_v15  ;;  %v13668_v15 = vmov 0.0  }
  0xdf   :  { %v1607_v21 = vsel %vm1587_vm1, %v1603_v16, 0.0  ;;  %10700 = vrot.lane.b32.xlu0 %v10992_v17, %s10879_s21  ;;  %v11003_v22 = vpop.f32.mrb[2].mxu0  ;;  %9220 = vmatprep.mubr.msk.f32.mxu0 %vm10881_vm3, %v13668_v15  ;;  %v8156_v15 = vld [vmem:[%s13658_s1 + $0xe0] sm:$0xff]  }
  0xe0   :  { %13914 = vst [vmem:[#allocation10_spill] sm:$0xff] %v11003_v22  ;;  %v1609_v23 = vadd.f32 %v1608_v18, %v1607_v21  ;;  %v1606_v24 = vmul.f32 %v11003_v22, %v11003_v22  ;;  %v11007_v25 = vpop.f32.mrb[3].mxu0  ;;  %v1593_v31 = vsel %vm1587_vm1, %v11003_v22, 0.0 }
  0xe1   :  { %13915 = vst [vmem:[#allocation11_spill] sm:$0xff] %v11007_v25  ;;  %v1591_v26 = vsel %vm1587_vm1, %v11007_v25, 0.0  ;;  %v1605_v27 = vmul.f32 %v11007_v25, %v11007_v25  ;;  %v10704_v28 = vpack.i.bf16 %v11003_v22, %v11007_v25  ;;  %v11017_v30 = vpack.c.bf16 %v11003_v22, %v11007_v25 }
  0xe2   :  { %v1592_v29 = vadd.f32 %v1591_v26, %v1590_v19  ;;  %v1612_v35 = vsel %vm1587_vm1, %v1606_v24, 0.0 }
  0xe3   :  { %v1610_v32 = vsel %vm1587_vm1, %v1605_v27, 0.0  ;;  %10705 = vrot.lane.b32.xlu0 %v10704_v28, %s10879_s21 }
  0xe4   :  { %v1594_v33 = vadd.f32 %v1593_v31, %v1592_v29  ;;  %v1611_v34 = vadd.f32 %v1610_v32, %v1609_v23  ;;  %v8158_v29 = vld [vmem:[%s13659_s2 + $0x8] sm:$0xff]   ;;  %v8012_v31 = vunpack.c.h.bf16 %v10977_v10 }
  0xe5   :  { %v8016_v32 = vunpack.c.h.bf16 %v8158_v29 }
  0xe6   :  { %v1613_v36 = vadd.f32 %v1612_v35, %v1611_v34  ;;  %v1595_v37 = vrot.slane %v1594_v33, 4  ;;  %v8160_v34 = vld [vmem:[%s13659_s2 + $0x18] sm:$0xff]  }
  0xe7   :  { %v8023_v10 = vunpack.c.l.bf16 %v8160_v34 }
  0xe8   :  { %v1614_v38 = vrot.slane %v1613_v36, 4  ;;  %v1596_v39 = vadd.f32 %v1595_v37, %v1594_v33  ;;  %v8024_v37 = vunpack.c.h.bf16 %v8160_v34 }
  0xea   :  { %v1615_v40 = vadd.f32 %v1614_v38, %v1613_v36  ;;  %v1597_v41 = vrot.slane %v1596_v39, 2  ;;  %v8161_v36 = vld [vmem:[%s13659_s2 + $0x20] sm:$0xff]  }
  0xeb   :  { %v8027_v38 = vunpack.c.l.bf16 %v8161_v36 }
  0xec   :  { %v1616_v42 = vrot.slane %v1615_v40, 2  ;;  %v1598_v43 = vadd.f32 %v1597_v41, %v1596_v39  ;;  %v8162_v39 = vld [vmem:[%s13659_s2 + $0x28] sm:$0xff]  }
  0xed   :  { %v8031_v41 = vunpack.c.l.bf16 %v8162_v39 }
  0xee   :  { %v1617_v44 = vadd.f32 %v1616_v42, %v1615_v40  ;;  %v1599_v45 = vrot.slane %v1598_v43, 1  ;;  %v8028_v40 = vunpack.c.h.bf16 %v8161_v36  ;;  %v8163_v42 = vld [vmem:[%s13659_s2 + $0x30] sm:$0xff]  }
  0xef   :  { %v8130_v36 = vld [vmem:[%s13658_s1 + $0x10] sm:$0xff]  }
  0xf0   :  { %v1618_v46 = vrot.slane %v1617_v44, 1  ;;  %v1600_v47 = vadd.f32 %v1599_v45, %v1598_v43  ;;  %v8032_v43 = vunpack.c.h.bf16 %v8162_v39  ;;  %v8164_v45 = vld [vmem:[%s13659_s2 + $0x38] sm:$0xff]   ;;  %v8173_v39 = vld [vmem:[%s13659_s2 + $0x80] sm:$0xff]  }
  0xf2   :  { %v1619_v48 = vadd.f32 %v1618_v46, %v1617_v44  ;;  %v1602_v49 = vmul.f32 0.03125, %v1600_v47  ;;  %v8035_v44 = vunpack.c.l.bf16 %v8163_v42  ;;  %v8036_v46 = vunpack.c.h.bf16 %v8163_v42 }
  0xf3   :  { %v8039_v47 = vunpack.c.l.bf16 %v8164_v45 }
  0xf4   :  { %v1620_v50 = vmul.f32 0.03125, %v1619_v48  ;;  %v1621_v51 = vmul.f32 %v1602_v49, %v1602_v49  ;;  %v1623_v52 = vsub.f32 %v10983_v13, %v1602_v49  ;;  %v1624_v53 = vsub.f32 %v10972_v9, %v1602_v49  ;;  %v8165_v48 = vld [vmem:[%s13659_s2 + $0x40] sm:$0xff]  }
  0xf5   :  { %v1625_v54 = vsub.f32 %v11007_v25, %v1602_v49  ;;  %v1626_v55 = vsub.f32 %v11003_v22, %v1602_v49  ;;  %v8040_v49 = vunpack.c.h.bf16 %v8164_v45  ;;  %v8174_v45 = vld [vmem:[%s13659_s2 + $0x88] sm:$0xff]  }
  0xf6   :  { %v1622_v56 = vsub.f32 %v1620_v50, %v1621_v51  ;;  %v8043_v50 = vunpack.c.l.bf16 %v8165_v48  ;;  %v8166_v51 = vld [vmem:[%s13659_s2 + $0x48] sm:$0xff]  }
  0xf8   :  { %v1627_v57 = vadd.f32 1e-05, %v1622_v56 }
  0xfa   :  { %10729 = vrsqrt.f32 %v1627_v57 }
 0x104   :  { %v10730_v60 = vpop.eup %10729 }
 0x105   :  { %v1629_v61 = vmul.f32 %v10730_v60, %v1623_v52  ;;  %v1630_v62 = vmul.f32 %v10730_v60, %v1624_v53  ;;  %v1631_v63 = vmul.f32 %v10730_v60, %v1625_v54  ;;  %v1632_v0 = vmul.f32 %v10730_v60, %v1626_v55  ;;  %v8167_v54 = vld [vmem:[%s13659_s2 + $0x50] sm:$0xff]  }
 0x106   :  { %v8044_v52 = vunpack.c.h.bf16 %v8165_v48  ;;  %v8047_v53 = vunpack.c.l.bf16 %v8166_v51  ;;  %v8048_v55 = vunpack.c.h.bf16 %v8166_v51  ;;  %v8076_v48 = vunpack.c.h.bf16 %v8173_v39  ;;  %v8175_v51 = vld [vmem:[%s13659_s2 + $0x90] sm:$0xff]  }
 0x107   :  { %v1637_v2 = vmul.f32 %v1635_v58, %v1629_v61  ;;  %v1638_v3 = vmul.f32 %v1635_v58, %v1630_v62  ;;  %v1639_v4 = vmul.f32 %v1635_v58, %v1631_v63  ;;  %v1640_v5 = vmul.f32 %v1635_v58, %v1632_v0  ;;  %v8168_v62 = vld [vmem:[%s13659_s2 + $0x58] sm:$0xff]  }
 0x108   :  { %v8051_v58 = vunpack.c.l.bf16 %v8167_v54 }
 0x109   :  { %v1645_v6 = vadd.f32 %v1643_v1, %v1637_v2  ;;  %v1646_v7 = vadd.f32 %v1643_v1, %v1638_v3  ;;  %v1647_v8 = vadd.f32 %v1643_v1, %v1639_v4  ;;  %v1648_v11 = vadd.f32 %v1643_v1, %v1640_v5 }
 0x10a   :  { %v8052_v2 = vunpack.c.h.bf16 %v8167_v54  ;;  %v8055_v5 = vunpack.c.l.bf16 %v8168_v62  ;;  %v8080_v54 = vunpack.c.h.bf16 %v8174_v45 }
 0x10b   :  { %v10714_v12 = vpack.i.bf16 %v1648_v11, %v1647_v8  ;;  %v10709_v14 = vpack.i.bf16 %v1646_v7, %v1645_v6 }
 0x10d   :  { %10715 = vrot.lane.b32.xlu1 %v10714_v12, %s10883_s0  ;;  %10710 = vrot.lane.b32.xlu0 %v10709_v14, %s10883_s0  ;;  %v406_v12 = vld [vmem:[%s13661_s4] sm:$0x1] }
 0x10e   :  { %v8169_v14 = vld [vmem:[%s13659_s2 + $0x60] sm:$0xff]  }
 0x111   :  { %10725 = vrot.lane.b32.xlu1 %v10704_v28, %s10884_s11  ;;  %10720 = vrot.lane.b32.xlu0 %v10992_v17, %s10884_s11  ;;  %v8015_v28 = vunpack.c.l.bf16 %v8158_v29  ;;  %v8159_v17 = vld [vmem:[%s13659_s2 + $0x10] sm:$0xff]  }
 0x112   :  { %v8019_v33 = vunpack.c.l.bf16 %v8159_v17  ;;  %v8020_v35 = vunpack.c.h.bf16 %v8159_v17  ;;  %v8171_v17 = vld [vmem:[%s13659_s2 + $0x70] sm:$0xff]  }
 0x151   :  { %v10701_v16 = vpop.permute.xlu0 %10700 }
 0x152   :  { %v10703_v18 = vunpack.i.h.bf16 %v10701_v16  ;;  %v10702_v19 = vunpack.i.l.bf16 %v10701_v16  ;;  %v7890_v16 = vld [vmem:[%s13658_s1] sm:$0xff]  }
 0x153   :  { %v11103_v29 = vunpack.c.l.bf16 %v7890_v16  ;;  %v11122_v34 = vunpack.c.h.bf16 %v7890_v16  ;;  %v8179_v16 = vld [vmem:[%s13659_s2 + $0xb0] sm:$0xff]  }
 0x154   :  { %v9989_v21 = vpack.c.bf16 %v10703_v18, %v10702_v19 }
 0x155   :  { %v10706_v23 = vpop.permute.xlu0 %10705  ;;  %13917 = vst [vmem:[#allocation13_spill] sm:$0xff] %v11103_v29  ;;  %13918 = vst [vmem:[#allocation14_spill] sm:$0xff] %v11122_v34 }
 0x156   :  { %v10708_v24 = vunpack.i.h.bf16 %v10706_v23  ;;  %v10707_v26 = vunpack.i.l.bf16 %v10706_v23  ;;  %9990 = vmatprep.subr.bf16.mxu1 %v9989_v21  ;;  %v11098_v23 = vunpack.c.l.bf16 %v406_v12 }
 0x157   :  { %9992 = vmatpush3.bf16.msra.mxu1 %v9989_v21  ;;  %v8056_v21 = vunpack.c.h.bf16 %v8168_v62 }
 0x158   :  { %v9993_v27 = vpack.c.bf16 %v10708_v24, %v10707_v26  ;;  %13916 = vst [vmem:[#allocation12_spill] sm:$0xff] %v11098_v23  ;;  %v8059_v24 = vunpack.c.l.bf16 %v8169_v14 }
 0x15a   :  { %9994 = vmatprep.subr.bf16.mxu1 %v9993_v27 }
 0x15b   :  { %9996 = vmatpush3.bf16.msra.mxu1 %v9993_v27  ;;  %v8170_v27 = vld [vmem:[%s13659_s2 + $0x68] sm:$0xff]  }
 0x15e   :  { %9025 = vmatmul.mubr.msk.f32.vlgmr.msra.gmra.mrb[0].mxu1 %vm424_vm2, %v8012_v31  ;;  %v8060_v31 = vunpack.c.h.bf16 %v8169_v14 }
 0x15f   :  { %9027 = vmatprep.mubr.msk.f32.mxu1 %vm424_vm2, %v8015_v28  ;;  %v8063_v28 = vunpack.c.l.bf16 %v8170_v27 }
 0x162   :  { %9028 = vmatmul.mubr.msk.f32.gmra.mrb[2].mxu1 %vm424_vm2, %v8016_v32  ;;  %v8129_v32 = vld [vmem:[%s13658_s1 + $0x8] sm:$0xff]  }
 0x163   :  { %9030 = vmatprep.mubr.msk.f32.mxu1 %vm424_vm2, %v8019_v33  ;;  %v8064_v33 = vunpack.c.h.bf16 %v8170_v27  ;;  %v8180_v27 = vld [vmem:[%s13659_s2 + $0xb8] sm:$0xff]  }
 0x166   :  { %9031 = vmatmul.mubr.msk.f32.gmra.mrb[4].mxu1 %vm424_vm2, %v8020_v35  ;;  %v8172_v35 = vld [vmem:[%s13659_s2 + $0x78] sm:$0xff]  }
 0x167   :  { %9033 = vmatprep.mubr.msk.f32.mxu1 %vm424_vm2, %v8023_v10  ;;  %v11128_v10 = vunpack.c.l.bf16 %v8129_v32  ;;  %v8072_v42 = vunpack.c.h.bf16 %v8172_v35 }
 0x169   :  { %13919 = vst [vmem:[#allocation15_spill] sm:$0xff] %v11128_v10 }
 0x16a   :  { %9034 = vmatmul.mubr.msk.f32.gmra.mrb[6].mxu1 %vm424_vm2, %v8024_v37  ;;  %v8068_v37 = vunpack.c.h.bf16 %v8171_v17 }
 0x16b   :  { %9036 = vmatprep.mubr.msk.f32.mxu1 %vm424_vm2, %v8027_v38  ;;  %v8071_v38 = vunpack.c.l.bf16 %v8172_v35 }
 0x16e   :  { %9037 = vmatmul.mubr.msk.f32.gmra.mrb[8].mxu1 %vm424_vm2, %v8028_v40  ;;  %v11144_v40 = vunpack.c.l.bf16 %v8130_v36 }
 0x16f   :  { %9039 = vmatprep.mubr.msk.f32.mxu1 %vm424_vm2, %v8031_v41  ;;  %v8131_v41 = vld [vmem:[%s13658_s1 + $0x18] sm:$0xff]  }
 0x170   :  { %13921 = vst [vmem:[#allocation17_spill] sm:$0xff] %v11144_v40 }
 0x172   :  { %9040 = vmatmul.mubr.msk.f32.gmra.mrb[10].mxu1 %vm424_vm2, %v8032_v43  ;;  %v8075_v43 = vunpack.c.l.bf16 %v8173_v39 }
 0x173   :  { %9042 = vmatprep.mubr.msk.f32.mxu1 %vm424_vm2, %v8035_v44  ;;  %v11153_v44 = vunpack.c.h.bf16 %v8130_v36  ;;  %v8139_v36 = vld [vmem:[%s13658_s1 + $0x58] sm:$0xff]  }
 0x175   :  { %13922 = vst [vmem:[#allocation18_spill] sm:$0xff] %v11153_v44 }
 0x176   :  { %9043 = vmatmul.mubr.msk.f32.gmra.mrb[12].mxu1 %vm424_vm2, %v8036_v46  ;;  %v11160_v46 = vunpack.c.l.bf16 %v8131_v41 }
 0x177   :  { %9045 = vmatprep.mubr.msk.f32.mxu1 %vm424_vm2, %v8039_v47  ;;  %v8132_v47 = vld [vmem:[%s13658_s1 + $0x20] sm:$0xff]  }
 0x178   :  { %13923 = vst [vmem:[#allocation19_spill] sm:$0xff] %v11160_v46 }
 0x17a   :  { %9046 = vmatmul.mubr.msk.f32.gmra.mrb[14].mxu1 %vm424_vm2, %v8040_v49  ;;  %v8079_v49 = vunpack.c.l.bf16 %v8174_v45 }
 0x17b   :  { %9048 = vmatprep.mubr.msk.f32.mxu1 %vm424_vm2, %v8043_v50  ;;  %v11169_v50 = vunpack.c.h.bf16 %v8131_v41  ;;  %v8182_v41 = vld [vmem:[%s13659_s2 + $0xc8] sm:$0xff]  }
 0x17d   :  { %13924 = vst [vmem:[#allocation20_spill] sm:$0xff] %v11169_v50 }
 0x17e   :  { %9049 = vmatmul.mubr.msk.f32.gmra.mrb[16].mxu1 %vm424_vm2, %v8044_v52  ;;  %v11176_v52 = vunpack.c.l.bf16 %v8132_v47 }
 0x17f   :  { %v10716_v56 = vpop.permute.xlu1 %10715  ;;  %v10711_v57 = vpop.permute.xlu0 %10710  ;;  %9051 = vmatprep.mubr.msk.f32.mxu1 %vm424_vm2, %v8047_v53  ;;  %v8133_v53 = vld [vmem:[%s13658_s1 + $0x28] sm:$0xff]  }
 0x180   :  { %v10713_v60 = vunpack.i.h.bf16 %v10711_v57  ;;  %v10712_v61 = vunpack.i.l.bf16 %v10711_v57  ;;  %v10718_v63 = vunpack.i.h.bf16 %v10716_v56  ;;  %v10717_v0 = vunpack.i.l.bf16 %v10716_v56  ;;  %13925 = vst [vmem:[#allocation21_spill] sm:$0xff] %v11176_v52  ;;  %v8176_v57 = vld [vmem:[%s13659_s2 + $0x98] sm:$0xff]  }
 0x181   :  { %v11185_v56 = vunpack.c.h.bf16 %v8132_v47  ;;  %v8087_v62 = vunpack.c.l.bf16 %v8176_v57  ;;  %v8111_v47 = vunpack.c.l.bf16 %v8182_v41 }
 0x182   :  { %v10006_v1 = vpack.c.bf16 %v10713_v60, %v10712_v61  ;;  %9052 = vmatmul.mubr.msk.f32.gmra.mrb[18].mxu1 %vm424_vm2, %v8048_v55  ;;  %v10009_v18 = vpack.c.bf16 %v10718_v63, %v10717_v0  ;;  %v8083_v55 = vunpack.c.l.bf16 %v8175_v51  ;;  %v8134_v60 = vld [vmem:[%s13658_s1 + $0x30] sm:$0xff]   ;;  %v8084_v61 = vunpack.c.h.bf16 %v8175_v51  ;;  %v8177_v0 = vld [vmem:[%s13659_s2 + $0xa0] sm:$0xff]  }
 0x183   :  { %v10726_v3 = vpop.permute.xlu1 %10725  ;;  %v10721_v4 = vpop.permute.xlu0 %10720  ;;  %9054 = vmatprep.mubr.msk.f32.mxu1 %vm424_vm2, %v8051_v58  ;;  %13926 = vst [vmem:[#allocation22_spill] sm:$0xff] %v11185_v56  ;;  %v11192_v58 = vunpack.c.l.bf16 %v8133_v53  ;;  %v11201_v63 = vunpack.c.h.bf16 %v8133_v53  ;;  %v8141_v53 = vld [vmem:[%s13658_s1 + $0x68] sm:$0xff]  }
 0x184   :  { %v10728_v6 = vunpack.i.h.bf16 %v10726_v3  ;;  %v10727_v7 = vunpack.i.l.bf16 %v10726_v3  ;;  %v10723_v8 = vunpack.i.h.bf16 %v10721_v4  ;;  %v10722_v11 = vunpack.i.l.bf16 %v10721_v4  ;;  %10007 = vmatpush3.bf16.msra.mxu0 %v10006_v1 }
 0x185   :  { %10008 = vmatprep.subr.bf16.mxu0 %v13670_v59  ;;  %13927 = vst [vmem:[#allocation23_spill] sm:$0xff] %v11192_v58  ;;  %13928 = vst [vmem:[#allocation24_spill] sm:$0xff] %v11201_v63  ;;  %v11208_v1 = vunpack.c.l.bf16 %v8134_v60  ;;  %v8088_v3 = vunpack.c.h.bf16 %v8176_v57  ;;  %v8091_v4 = vunpack.c.l.bf16 %v8177_v0  ;;  %v11544_v59 = vunpack.c.l.bf16 %v8156_v15 }
 0x186   :  { %v9997_v19 = vpack.c.bf16 %v10723_v8, %v10722_v11  ;;  %9055 = vmatmul.mubr.msk.f32.gmra.mrb[20].mxu1 %vm424_vm2, %v8052_v2  ;;  %v10001_v26 = vpack.c.bf16 %v10728_v6, %v10727_v7  ;;  %v8135_v2 = vld [vmem:[%s13658_s1 + $0x38] sm:$0xff]   ;;  %v8178_v6 = vld [vmem:[%s13659_s2 + $0xa8] sm:$0xff]   ;;  %v8136_v8 = vld [vmem:[%s13658_s1 + $0x40] sm:$0xff]   ;;  %v8092_v11 = vunpack.c.h.bf16 %v8177_v0 }
 0x187   :  { %9057 = vmatprep.mubr.msk.f32.mxu1 %vm424_vm2, %v8055_v5  ;;  %13929 = vst [vmem:[#allocation25_spill] sm:$0xff] %v11208_v1  ;;  %v11217_v5 = vunpack.c.h.bf16 %v8134_v60  ;;  %v11224_v7 = vunpack.c.l.bf16 %v8135_v2  ;;  %v8095_v12 = vunpack.c.l.bf16 %v8178_v6  ;;  %v11233_v14 = vunpack.c.h.bf16 %v8135_v2  ;;  %v8184_v60 = vld [vmem:[%s13659_s2 + $0xd8] sm:$0xff]   ;;  %13973 = vst [vmem:[#allocation69_spill] sm:$0xff] %v11544_v59 }
 0x188   :  { %9998 = vmatprep.subr.bf16.mxu1 %v9997_v19  ;;  %10010 = vmatpush3.bf16.msra.mxu0 %v10009_v18  ;;  %v11240_v18 = vunpack.c.l.bf16 %v8136_v8  ;;  %v8119_v2 = vunpack.c.l.bf16 %v8184_v60 }
 0x189   :  { %10000 = vmatpush3.bf16.msra.mxu1 %v9997_v19  ;;  %10012 = vmatprep.subr.bf16.mxu0 %v10998_v20  ;;  %13930 = vst [vmem:[#allocation26_spill] sm:$0xff] %v11217_v5  ;;  %13931 = vst [vmem:[#allocation27_spill] sm:$0xff] %v11224_v7  ;;  %v8137_v19 = vld [vmem:[%s13658_s1 + $0x48] sm:$0xff]  }
 0x18a   :  { %9058 = vmatmul.mubr.msk.f32.gmra.mrb[22].mxu1 %vm424_vm2, %v8056_v21  ;;  %10002 = vmatprep.subr.bf16.mxu1 %v10001_v26  ;;  %13932 = vst [vmem:[#allocation28_spill] sm:$0xff] %v11233_v14  ;;  %13933 = vst [vmem:[#allocation29_spill] sm:$0xff] %v11240_v18  ;;  %v8096_v21 = vunpack.c.h.bf16 %v8178_v6 }
 0x18b   :  { %9221 = vmatmul.mubr.msk.f32.vlgmr.msra.gmra.mrb[4].mxu0 %vm424_vm2, %v11098_v23  ;;  %9060 = vmatprep.mubr.msk.f32.mxu1 %vm424_vm2, %v8059_v24  ;;  %v8099_v24 = vunpack.c.l.bf16 %v8179_v16 }
 0x18c   :  { %10014 = vmatpush3.bf16.msra.mxu0 %v10998_v20  ;;  %9231 = vmatprep.mubr.msk.f32.mxu0 %vm424_vm2, %v11103_v29  ;;  %v8067_v20 = vunpack.c.l.bf16 %v8171_v17  ;;  %v8100_v17 = vunpack.c.h.bf16 %v8179_v16 }
 0x18d   :  { %10004 = vmatpush3.bf16.msra.mxu1 %v10001_v26  ;;  %10016 = vmatprep.subr.bf16.mxu0 %v11017_v30  ;;  %v11249_v26 = vunpack.c.h.bf16 %v8136_v8  ;;  %v8143_v8 = vld [vmem:[%s13658_s1 + $0x78] sm:$0xff]  }
 0x18e   :  { %9061 = vmatmul.mubr.msk.f32.gmra.mrb[24].mxu1 %vm424_vm2, %v8060_v31  ;;  %v11256_v31 = vunpack.c.l.bf16 %v8137_v19 }
 0x18f   :  { %9063 = vmatprep.mubr.msk.f32.mxu1 %vm424_vm2, %v8063_v28  ;;  %13934 = vst [vmem:[#allocation30_spill] sm:$0xff] %v11249_v26  ;;  %v8138_v28 = vld [vmem:[%s13658_s1 + $0x50] sm:$0xff]  }
 0x190   :  { %10018 = vmatpush3.bf16.msra.mxu0 %v11017_v30  ;;  %v11137_v30 = vunpack.c.h.bf16 %v8129_v32  ;;  %13935 = vst [vmem:[#allocation31_spill] sm:$0xff] %v11256_v31  ;;  %v8103_v32 = vunpack.c.l.bf16 %v8180_v27  ;;  %v11272_v35 = vunpack.c.l.bf16 %v8138_v28  ;;  %v11281_v39 = vunpack.c.h.bf16 %v8138_v28 }
 0x191   :  { %v11358_v28 = vunpack.c.h.bf16 %v8143_v8 }
 0x192   :  { %9064 = vmatmul.mubr.msk.f32.gmra.mrb[26].mxu1 %vm424_vm2, %v8064_v33  ;;  %13920 = vst [vmem:[#allocation16_spill] sm:$0xff] %v11137_v30  ;;  %v11265_v33 = vunpack.c.h.bf16 %v8137_v19  ;;  %13937 = vst [vmem:[#allocation33_spill] sm:$0xff] %v11272_v35  ;;  %v8186_v19 = vld [vmem:[%s13659_s2 + $0xe8] sm:$0xff]  }
 0x193   :  { %9066 = vmatprep.mubr.msk.f32.mxu1 %vm424_vm2, %v8067_v20  ;;  %9232 = vmatmul.mubr.msk.f32.vlgmr.msra.gmra.mrb[6].mxu0 %vm424_vm2, %v11122_v34  ;;  %v8181_v20 = vld [vmem:[%s13659_s2 + $0xc0] sm:$0xff]   ;;  %13938 = vst [vmem:[#allocation34_spill] sm:$0xff] %v11281_v39  ;;  %13948 = vst [vmem:[#allocation44_spill] sm:$0xff] %v11358_v28 }
 0x194   :  { %9234 = vmatprep.mubr.msk.f32.mxu0 %vm424_vm2, %v11128_v10  ;;  %13936 = vst [vmem:[#allocation32_spill] sm:$0xff] %v11265_v33  ;;  %v8108_v45 = vunpack.c.h.bf16 %v8181_v20 }
 0x196   :  { %9067 = vmatmul.mubr.msk.f32.gmra.mrb[28].mxu1 %vm424_vm2, %v8068_v37  ;;  %v8104_v37 = vunpack.c.h.bf16 %v8180_v27  ;;  %v8127_v27 = vunpack.c.l.bf16 %v8186_v19 }
 0x197   :  { %9069 = vmatprep.mubr.msk.f32.mxu1 %vm424_vm2, %v8071_v38  ;;  %9235 = vmatmul.mubr.msk.f32.gmra.mrb[8].mxu0 %vm424_vm2, %v11137_v30  ;;  %v8107_v38 = vunpack.c.l.bf16 %v8181_v20 }
 0x198   :  { %9237 = vmatprep.mubr.msk.f32.mxu0 %vm424_vm2, %v11144_v40 }
 0x19a   :  { %9070 = vmatmul.mubr.msk.f32.gmra.mrb[30].mxu1 %vm424_vm2, %v8072_v42  ;;  %v11288_v42 = vunpack.c.l.bf16 %v8139_v36 }
 0x19b   :  { %9072 = vmatprep.mubr.msk.f32.mxu1 %vm424_vm2, %v8075_v43  ;;  %9238 = vmatmul.mubr.msk.f32.gmra.mrb[10].mxu0 %vm424_vm2, %v11153_v44  ;;  %v8140_v43 = vld [vmem:[%s13658_s1 + $0x60] sm:$0xff]  }
 0x19c   :  { %9240 = vmatprep.mubr.msk.f32.mxu0 %vm424_vm2, %v11160_v46  ;;  %13939 = vst [vmem:[#allocation35_spill] sm:$0xff] %v11288_v42  ;;  %v11304_v51 = vunpack.c.l.bf16 %v8140_v43  ;;  %v11313_v57 = vunpack.c.h.bf16 %v8140_v43 }
 0x19e   :  { %9073 = vmatmul.mubr.msk.f32.gmra.mrb[32].mxu1 %vm424_vm2, %v8076_v48  ;;  %v11297_v48 = vunpack.c.h.bf16 %v8139_v36  ;;  %13941 = vst [vmem:[#allocation37_spill] sm:$0xff] %v11304_v51  ;;  %13942 = vst [vmem:[#allocation38_spill] sm:$0xff] %v11313_v57  ;;  %v8145_v36 = vld [vmem:[%s13658_s1 + $0x88] sm:$0xff]  }
 0x19f   :  { %9075 = vmatprep.mubr.msk.f32.mxu1 %vm424_vm2, %v8079_v49  ;;  %9241 = vmatmul.mubr.msk.f32.gmra.mrb[12].mxu0 %vm424_vm2, %v11169_v50  ;;  %v8183_v49 = vld [vmem:[%s13659_s2 + $0xd0] sm:$0xff]   ;;  %v11390_v43 = vunpack.c.h.bf16 %v8145_v36 }
 0x1a0   :  { %9243 = vmatprep.mubr.msk.f32.mxu0 %vm424_vm2, %v11176_v52  ;;  %13940 = vst [vmem:[#allocation36_spill] sm:$0xff] %v11297_v48  ;;  %v8116_v0 = vunpack.c.h.bf16 %v8183_v49 }
 0x1a1   :  { %13952 = vst [vmem:[#allocation48_spill] sm:$0xff] %v11390_v43 }
 0x1a2   :  { %9076 = vmatmul.mubr.msk.f32.gmra.mrb[34].mxu1 %vm424_vm2, %v8080_v54  ;;  %v8112_v54 = vunpack.c.h.bf16 %v8182_v41  ;;  %v8146_v41 = vld [vmem:[%s13658_s1 + $0x90] sm:$0xff]  }
 0x1a3   :  { %9078 = vmatprep.mubr.msk.f32.mxu1 %vm424_vm2, %v8083_v55  ;;  %9244 = vmatmul.mubr.msk.f32.gmra.mrb[14].mxu0 %vm424_vm2, %v11185_v56  ;;  %v8115_v55 = vunpack.c.l.bf16 %v8183_v49  ;;  %v11405_v49 = vunpack.c.h.bf16 %v8146_v41 }
 0x1a4   :  { %9246 = vmatprep.mubr.msk.f32.mxu0 %vm424_vm2, %v11192_v58 }
 0x1a5   :  { %13954 = vst [vmem:[#allocation50_spill] sm:$0xff] %v11405_v49 }
 0x1a6   :  { %9079 = vmatmul.mubr.msk.f32.gmra.mrb[36].mxu1 %vm424_vm2, %v8084_v61  ;;  %v11320_v61 = vunpack.c.l.bf16 %v8141_v53 }
 0x1a7   :  { %9081 = vmatprep.mubr.msk.f32.mxu1 %vm424_vm2, %v8087_v62  ;;  %9247 = vmatmul.mubr.msk.f32.gmra.mrb[16].mxu0 %vm424_vm2, %v11201_v63  ;;  %v8142_v62 = vld [vmem:[%s13658_s1 + $0x70] sm:$0xff]  }
 0x1a8   :  { %9249 = vmatprep.mubr.msk.f32.mxu0 %vm424_vm2, %v11208_v1  ;;  %13943 = vst [vmem:[#allocation39_spill] sm:$0xff] %v11320_v61  ;;  %v11336_v6 = vunpack.c.l.bf16 %v8142_v62  ;;  %v11345_v16 = vunpack.c.h.bf16 %v8142_v62  ;;  %v8149_v62 = vld [vmem:[%s13658_s1 + $0xa8] sm:$0xff]  }
 0x1aa   :  { %9082 = vmatmul.mubr.msk.f32.gmra.mrb[38].mxu1 %vm424_vm2, %v8088_v3  ;;  %v11329_v3 = vunpack.c.h.bf16 %v8141_v53  ;;  %13945 = vst [vmem:[#allocation41_spill] sm:$0xff] %v11336_v6  ;;  %13946 = vst [vmem:[#allocation42_spill] sm:$0xff] %v11345_v16 }
 0x1ab   :  { %9084 = vmatprep.mubr.msk.f32.mxu1 %vm424_vm2, %v8091_v4  ;;  %9250 = vmatmul.mubr.msk.f32.gmra.mrb[18].mxu0 %vm424_vm2, %v11217_v5  ;;  %v8185_v4 = vld [vmem:[%s13659_s2 + $0xe0] sm:$0xff]  }
 0x1ac   :  { %9252 = vmatprep.mubr.msk.f32.mxu0 %vm424_vm2, %v11224_v7  ;;  %13944 = vst [vmem:[#allocation40_spill] sm:$0xff] %v11329_v3 }
 0x1ae   :  { %9085 = vmatmul.mubr.msk.f32.gmra.mrb[40].mxu1 %vm424_vm2, %v8092_v11  ;;  %v8120_v11 = vunpack.c.h.bf16 %v8184_v60 }
 0x1af   :  { %9087 = vmatprep.mubr.msk.f32.mxu1 %vm424_vm2, %v8095_v12  ;;  %9253 = vmatmul.mubr.msk.f32.gmra.mrb[20].mxu0 %vm424_vm2, %v11233_v14  ;;  %v8123_v12 = vunpack.c.l.bf16 %v8185_v4 }
 0x1b0   :  { %9255 = vmatprep.mubr.msk.f32.mxu0 %vm424_vm2, %v11240_v18 }
 0x1b2   :  { %9088 = vmatmul.mubr.msk.f32.gmra.mrb[42].mxu1 %vm424_vm2, %v8096_v21  ;;  %v11352_v21 = vunpack.c.l.bf16 %v8143_v8  ;;  %v11450_v8 = vunpack.c.h.bf16 %v8149_v62 }
 0x1b3   :  { %9090 = vmatprep.mubr.msk.f32.mxu1 %vm424_vm2, %v8099_v24  ;;  %9256 = vmatmul.mubr.msk.f32.gmra.mrb[22].mxu0 %vm424_vm2, %v11249_v26  ;;  %v8124_v24 = vunpack.c.h.bf16 %v8185_v4  ;;  %v8150_v4 = vld [vmem:[%s13658_s1 + $0xb0] sm:$0xff]  }
 0x1b4   :  { %9258 = vmatprep.mubr.msk.f32.mxu0 %vm424_vm2, %v11256_v31  ;;  %13947 = vst [vmem:[#allocation43_spill] sm:$0xff] %v11352_v21  ;;  %13960 = vst [vmem:[#allocation56_spill] sm:$0xff] %v11450_v8 }
 0x1b6   :  { %9091 = vmatmul.mubr.msk.f32.gmra.mrb[44].mxu1 %vm424_vm2, %v8100_v17  ;;  %v8144_v17 = vld [vmem:[%s13658_s1 + $0x80] sm:$0xff]  }
 0x1b7   :  { %9093 = vmatprep.mubr.msk.f32.mxu1 %vm424_vm2, %v8103_v32  ;;  %9259 = vmatmul.mubr.msk.f32.gmra.mrb[24].mxu0 %vm424_vm2, %v11265_v33  ;;  %v8128_v32 = vunpack.c.h.bf16 %v8186_v19  ;;  %v11366_v20 = vunpack.c.l.bf16 %v8144_v17  ;;  %v11465_v19 = vunpack.c.h.bf16 %v8150_v4 }
 0x1b8   :  { %9261 = vmatprep.mubr.msk.f32.mxu0 %vm424_vm2, %v11272_v35 }
 0x1b9   :  { %13949 = vst [vmem:[#allocation45_spill] sm:$0xff] %v11366_v20  ;;  %13962 = vst [vmem:[#allocation58_spill] sm:$0xff] %v11465_v19 }
 0x1ba   :  { %9094 = vmatmul.mubr.msk.f32.gmra.mrb[46].mxu1 %vm424_vm2, %v8104_v37  ;;  %v11376_v37 = vunpack.c.h.bf16 %v8144_v17 }
 0x1bb   :  { %9096 = vmatprep.mubr.msk.f32.mxu1 %vm424_vm2, %v8107_v38  ;;  %9262 = vmatmul.mubr.msk.f32.gmra.mrb[26].mxu0 %vm424_vm2, %v11281_v39  ;;  %v11379_v38 = vunpack.c.l.bf16 %v8145_v36  ;;  %v8153_v36 = vld [vmem:[%s13658_s1 + $0xc8] sm:$0xff]  }
 0x1bc   :  { %9264 = vmatprep.mubr.msk.f32.mxu0 %vm424_vm2, %v11288_v42  ;;  %13950 = vst [vmem:[#allocation46_spill] sm:$0xff] %v11376_v37 }
 0x1bd   :  { %13951 = vst [vmem:[#allocation47_spill] sm:$0xff] %v11379_v38 }
 0x1be   :  { %9097 = vmatmul.mubr.msk.f32.gmra.mrb[48].mxu1 %vm424_vm2, %v8108_v45  ;;  %v11394_v45 = vunpack.c.l.bf16 %v8146_v41 }
 0x1bf   :  { %9099 = vmatprep.mubr.msk.f32.mxu1 %vm424_vm2, %v8111_v47  ;;  %9265 = vmatmul.mubr.msk.f32.gmra.mrb[28].mxu0 %vm424_vm2, %v11297_v48  ;;  %v8147_v47 = vld [vmem:[%s13658_s1 + $0x98] sm:$0xff]  }
 0x1c0   :  { %9267 = vmatprep.mubr.msk.f32.mxu0 %vm424_vm2, %v11304_v51  ;;  %13953 = vst [vmem:[#allocation49_spill] sm:$0xff] %v11394_v45  ;;  %v11409_v53 = vunpack.c.l.bf16 %v8147_v47 }
 0x1c2   :  { %9100 = vmatmul.mubr.msk.f32.gmra.mrb[50].mxu1 %vm424_vm2, %v8112_v54  ;;  %13955 = vst [vmem:[#allocation51_spill] sm:$0xff] %v11409_v53  ;;  %v8148_v54 = vld [vmem:[%s13658_s1 + $0xa0] sm:$0xff]  }
 0x1c3   :  { %9102 = vmatprep.mubr.msk.f32.mxu1 %vm424_vm2, %v8115_v55  ;;  %9268 = vmatmul.mubr.msk.f32.gmra.mrb[30].mxu0 %vm424_vm2, %v11313_v57  ;;  %v11420_v55 = vunpack.c.h.bf16 %v8147_v47  ;;  %v11424_v60 = vunpack.c.l.bf16 %v8148_v54  ;;  %v11499_v47 = vunpack.c.l.bf16 %v8153_v36 }
 0x1c4   :  { %9270 = vmatprep.mubr.msk.f32.mxu0 %vm424_vm2, %v11320_v61 }
 0x1c5   :  { %13956 = vst [vmem:[#allocation52_spill] sm:$0xff] %v11420_v55  ;;  %13957 = vst [vmem:[#allocation53_spill] sm:$0xff] %v11424_v60 }
 0x1c6   :  { %9103 = vmatmul.mubr.msk.f32.gmra.mrb[52].mxu1 %vm424_vm2, %v8116_v0  ;;  %v11435_v0 = vunpack.c.h.bf16 %v8148_v54  ;;  %13967 = vst [vmem:[#allocation63_spill] sm:$0xff] %v11499_v47  ;;  %v8154_v54 = vld [vmem:[%s13658_s1 + $0xd0] sm:$0xff]  }
 0x1c7   :  { %9105 = vmatprep.mubr.msk.f32.mxu1 %vm424_vm2, %v8119_v2  ;;  %9271 = vmatmul.mubr.msk.f32.gmra.mrb[32].mxu0 %vm424_vm2, %v11329_v3  ;;  %v11439_v2 = vunpack.c.l.bf16 %v8149_v62  ;;  %v11510_v62 = vunpack.c.h.bf16 %v8153_v36 }
 0x1c8   :  { %9273 = vmatprep.mubr.msk.f32.mxu0 %vm424_vm2, %v11336_v6  ;;  %13958 = vst [vmem:[#allocation54_spill] sm:$0xff] %v11435_v0 }
 0x1c9   :  { %13959 = vst [vmem:[#allocation55_spill] sm:$0xff] %v11439_v2  ;;  %13968 = vst [vmem:[#allocation64_spill] sm:$0xff] %v11510_v62 }
 0x1ca   :  { %9106 = vmatmul.mubr.msk.f32.gmra.mrb[54].mxu1 %vm424_vm2, %v8120_v11  ;;  %v11454_v11 = vunpack.c.l.bf16 %v8150_v4  ;;  %v11514_v4 = vunpack.c.l.bf16 %v8154_v54 }
 0x1cb   :  { %9108 = vmatprep.mubr.msk.f32.mxu1 %vm424_vm2, %v8123_v12  ;;  %9274 = vmatmul.mubr.msk.f32.gmra.mrb[34].mxu0 %vm424_vm2, %v11345_v16  ;;  %v8151_v12 = vld [vmem:[%s13658_s1 + $0xb8] sm:$0xff]  }
 0x1cc   :  { %9276 = vmatprep.mubr.msk.f32.mxu0 %vm424_vm2, %v11352_v21  ;;  %13961 = vst [vmem:[#allocation57_spill] sm:$0xff] %v11454_v11  ;;  %v11480_v17 = vunpack.c.h.bf16 %v8151_v12  ;;  %13969 = vst [vmem:[#allocation65_spill] sm:$0xff] %v11514_v4 }
 0x1ce   :  { %9109 = vmatmul.mubr.msk.f32.gmra.mrb[56].mxu1 %vm424_vm2, %v8124_v24  ;;  %v11469_v24 = vunpack.c.l.bf16 %v8151_v12  ;;  %13964 = vst [vmem:[#allocation60_spill] sm:$0xff] %v11480_v17  ;;  %v8155_v12 = vld [vmem:[%s13658_s1 + $0xd8] sm:$0xff]  }
 0x1cf   :  { %9111 = vmatprep.mubr.msk.f32.mxu1 %vm424_vm2, %v8127_v27  ;;  %9277 = vmatmul.mubr.msk.f32.gmra.mrb[36].mxu0 %vm424_vm2, %v11358_v28  ;;  %v8152_v27 = vld [vmem:[%s13658_s1 + $0xc0] sm:$0xff]   ;;  %v11529_v36 = vunpack.c.l.bf16 %v8155_v12 }
 0x1d0   :  { %9279 = vmatprep.mubr.msk.f32.mxu0 %vm424_vm2, %v11366_v20  ;;  %13963 = vst [vmem:[#allocation59_spill] sm:$0xff] %v11469_v24  ;;  %v11495_v41 = vunpack.c.h.bf16 %v8152_v27 }
 0x1d1   :  { %13971 = vst [vmem:[#allocation67_spill] sm:$0xff] %v11529_v36 }
 0x1d2   :  { %9112 = vmatmul.mubr.msk.f32.gmra.mrb[58].mxu1 %vm424_vm2, %v8128_v32  ;;  %v11484_v32 = vunpack.c.l.bf16 %v8152_v27  ;;  %13966 = vst [vmem:[#allocation62_spill] sm:$0xff] %v11495_v41  ;;  %v11525_v27 = vunpack.c.h.bf16 %v8154_v54  ;;  %v11540_v54 = vunpack.c.h.bf16 %v8155_v12  ;;  %v11555_v12 = vunpack.c.h.bf16 %v8156_v15 }
 0x1d3   :  { %9122 = vmatprep.mubr.msk.f32.mxu1 %vm424_vm2, %v11103_v29  ;;  %9280 = vmatmul.mubr.msk.f32.gmra.mrb[38].mxu0 %vm424_vm2, %v11376_v37 }
 0x1d4   :  { %9282 = vmatprep.mubr.msk.f32.mxu0 %vm424_vm2, %v11379_v38  ;;  %13965 = vst [vmem:[#allocation61_spill] sm:$0xff] %v11484_v32  ;;  %13970 = vst [vmem:[#allocation66_spill] sm:$0xff] %v11525_v27 }
 0x1d5   :  { %13972 = vst [vmem:[#allocation68_spill] sm:$0xff] %v11540_v54  ;;  %13974 = vst [vmem:[#allocation70_spill] sm:$0xff] %v11555_v12 }
 0x1d6   :  { %9123 = vmatmul.mubr.msk.f32.vlgmr.msra.gmra.mrb[0].mxu1 %vm424_vm2, %v11122_v34 }
 0x1d7   :  { %9125 = vmatprep.mubr.msk.f32.mxu1 %vm424_vm2, %v11128_v10  ;;  %9283 = vmatmul.mubr.msk.f32.gmra.mrb[40].mxu0 %vm424_vm2, %v11390_v43 }
 0x1d8   :  { %9285 = vmatprep.mubr.msk.f32.mxu0 %vm424_vm2, %v11394_v45 }
 0x1da   :  { %9126 = vmatmul.mubr.msk.f32.gmra.mrb[2].mxu1 %vm424_vm2, %v11137_v30 }
 0x1db   :  { %9128 = vmatprep.mubr.msk.f32.mxu1 %vm424_vm2, %v11144_v40  ;;  %9286 = vmatmul.mubr.msk.f32.gmra.mrb[42].mxu0 %vm424_vm2, %v11405_v49 }
 0x1dc   :  { %9288 = vmatprep.mubr.msk.f32.mxu0 %vm424_vm2, %v11409_v53 }
 0x1de   :  { %9129 = vmatmul.mubr.msk.f32.gmra.mrb[4].mxu1 %vm424_vm2, %v11153_v44 }
 0x1df   :  { %9131 = vmatprep.mubr.msk.f32.mxu1 %vm424_vm2, %v11160_v46  ;;  %9289 = vmatmul.mubr.msk.f32.gmra.mrb[44].mxu0 %vm424_vm2, %v11420_v55 }
 0x1e0   :  { %9291 = vmatprep.mubr.msk.f32.mxu0 %vm424_vm2, %v11424_v60 }
 0x1e2   :  { %9132 = vmatmul.mubr.msk.f32.gmra.mrb[6].mxu1 %vm424_vm2, %v11169_v50 }
 0x1e3   :  { %9134 = vmatprep.mubr.msk.f32.mxu1 %vm424_vm2, %v11176_v52  ;;  %9292 = vmatmul.mubr.msk.f32.gmra.mrb[46].mxu0 %vm424_vm2, %v11435_v0 }
 0x1e4   :  { %9294 = vmatprep.mubr.msk.f32.mxu0 %vm424_vm2, %v11439_v2 }
 0x1e6   :  { %9135 = vmatmul.mubr.msk.f32.gmra.mrb[8].mxu1 %vm424_vm2, %v11185_v56 }
 0x1e7   :  { %9137 = vmatprep.mubr.msk.f32.mxu1 %vm424_vm2, %v11192_v58  ;;  %9295 = vmatmul.mubr.msk.f32.gmra.mrb[48].mxu0 %vm424_vm2, %v11450_v8 }
 0x1e8   :  { %9297 = vmatprep.mubr.msk.f32.mxu0 %vm424_vm2, %v11454_v11 }
 0x1ea   :  { %9138 = vmatmul.mubr.msk.f32.gmra.mrb[10].mxu1 %vm424_vm2, %v11201_v63 }
 0x1eb   :  { %9140 = vmatprep.mubr.msk.f32.mxu1 %vm424_vm2, %v11208_v1  ;;  %9298 = vmatmul.mubr.msk.f32.gmra.mrb[50].mxu0 %vm424_vm2, %v11465_v19 }
 0x1ec   :  { %9300 = vmatprep.mubr.msk.f32.mxu0 %vm424_vm2, %v11469_v24 }
 0x1ee   :  { %9141 = vmatmul.mubr.msk.f32.gmra.mrb[12].mxu1 %vm424_vm2, %v11217_v5 }
 0x1ef   :  { %9143 = vmatprep.mubr.msk.f32.mxu1 %vm424_vm2, %v11224_v7  ;;  %9301 = vmatmul.mubr.msk.f32.gmra.mrb[52].mxu0 %vm424_vm2, %v11480_v17 }
 0x1f0   :  { %9303 = vmatprep.mubr.msk.f32.mxu0 %vm424_vm2, %v11484_v32 }
 0x1f2   :  { %9144 = vmatmul.mubr.msk.f32.gmra.mrb[14].mxu1 %vm424_vm2, %v11233_v14 }
 0x1f3   :  { %9146 = vmatprep.mubr.msk.f32.mxu1 %vm424_vm2, %v11240_v18  ;;  %9304 = vmatmul.mubr.msk.f32.gmra.mrb[54].mxu0 %vm424_vm2, %v11495_v41 }
 0x1f4   :  { %9306 = vmatprep.mubr.msk.f32.mxu0 %vm424_vm2, %v11499_v47 }
 0x1f6   :  { %9147 = vmatmul.mubr.msk.f32.gmra.mrb[16].mxu1 %vm424_vm2, %v11249_v26 }
 0x1f7   :  { %9149 = vmatprep.mubr.msk.f32.mxu1 %vm424_vm2, %v11256_v31  ;;  %9307 = vmatmul.mubr.msk.f32.gmra.mrb[56].mxu0 %vm424_vm2, %v11510_v62 }
 0x1f8   :  { %9309 = vmatprep.mubr.msk.f32.mxu0 %vm424_vm2, %v11514_v4 }
 0x1fa   :  { %9150 = vmatmul.mubr.msk.f32.gmra.mrb[18].mxu1 %vm424_vm2, %v11265_v33 }
 0x1fb   :  { %9152 = vmatprep.mubr.msk.f32.mxu1 %vm424_vm2, %v11272_v35  ;;  %9310 = vmatmul.mubr.msk.f32.gmra.mrb[58].mxu0 %vm424_vm2, %v11525_v27  ;;  %v8157_v35 = vld [vmem:[%s13658_s1 + $0xe8] sm:$0xff]   ;;  %s10885_s1 = smov [#allocation2]  }
 0x1fc   :  { %9312 = vmatprep.mubr.msk.f32.mxu0 %vm424_vm2, %v11529_v36  ;;  %s7283_s16 = sshll.u32 %s10885_s1, 4  ;;  %s7284_s16 = int_to_ptr.vmem [resolvable:$true] %s7283_s16 }
 0x1fd   :  { %p10836_p1 = scmp.lt.s32.totalorder %s7284_s16, %s7284_s16 }
 0x1fe   :  { %9153 = vmatmul.mubr.msk.f32.gmra.mrb[20].mxu1 %vm424_vm2, %v11281_v39  ;;  %v11559_v39 = vunpack.c.l.bf16 %v8157_v35 }
 0x1ff   :  { %9155 = vmatprep.mubr.msk.f32.mxu1 %vm424_vm2, %v11288_v42  ;;  %9313 = vmatmul.mubr.msk.f32.gmra.mrb[60].mxu0 %vm424_vm2, %v11540_v54  ;;  %v11567_v42 = vunpack.c.h.bf16 %v8157_v35 }
 0x200   :  { %9315 = vmatprep.mubr.msk.f32.mxu0 %vm424_vm2, %v11544_v59  ;;  %13975 = vst [vmem:[#allocation71_spill] sm:$0xff] %v11559_v39 }
 0x201   :  { %13976 = vst [vmem:[#allocation72_spill] sm:$0xff] %v11567_v42 }
 0x202   :  { %9156 = vmatmul.mubr.msk.f32.gmra.mrb[22].mxu1 %vm424_vm2, %v11297_v48 }
 0x203   :  { %9158 = vmatprep.mubr.msk.f32.mxu1 %vm424_vm2, %v11304_v51  ;;  %9316 = vmatmul.mubr.msk.f32.gmra.mrb[62].mxu0 %vm424_vm2, %v11555_v12 }
 0x204   :  { %9318 = vmatprep.mubr.msk.f32.mxu0 %vm424_vm2, %v11559_v39 }
 0x206   :  { %9159 = vmatmul.mubr.msk.f32.gmra.mrb[24].mxu1 %vm424_vm2, %v11313_v57 }
 0x207   :  { %9161 = vmatprep.mubr.msk.f32.mxu1 %vm424_vm2, %v11320_v61  ;;  %9319 = vmatmul.mubr.msk.f32.gmra.mrb[64].mxu0 %vm424_vm2, %v11567_v42 }
 0x20a   :  { %9162 = vmatmul.mubr.msk.f32.gmra.mrb[26].mxu1 %vm424_vm2, %v11329_v3 }
 0x20b   :  { %9164 = vmatprep.mubr.msk.f32.mxu1 %vm424_vm2, %v11336_v6 }
 0x20e   :  { %9165 = vmatmul.mubr.msk.f32.gmra.mrb[28].mxu1 %vm424_vm2, %v11345_v16 }
 0x20f   :  { %9167 = vmatprep.mubr.msk.f32.mxu1 %vm424_vm2, %v11352_v21 }
 0x212   :  { %9168 = vmatmul.mubr.msk.f32.gmra.mrb[30].mxu1 %vm424_vm2, %v11358_v28 }
 0x213   :  { %9170 = vmatprep.mubr.msk.f32.mxu1 %vm424_vm2, %v11366_v20 }
 0x216   :  { %9171 = vmatmul.mubr.msk.f32.gmra.mrb[32].mxu1 %vm424_vm2, %v11376_v37 }
 0x217   :  { %9173 = vmatprep.mubr.msk.f32.mxu1 %vm424_vm2, %v11379_v38 }
 0x21a   :  { %9174 = vmatmul.mubr.msk.f32.gmra.mrb[34].mxu1 %vm424_vm2, %v11390_v43 }
 0x21b   :  { %9176 = vmatprep.mubr.msk.f32.mxu1 %vm424_vm2, %v11394_v45 }
 0x21e   :  { %9177 = vmatmul.mubr.msk.f32.gmra.mrb[36].mxu1 %vm424_vm2, %v11405_v49 }
 0x21f   :  { %9179 = vmatprep.mubr.msk.f32.mxu1 %vm424_vm2, %v11409_v53 }
 0x222   :  { %9180 = vmatmul.mubr.msk.f32.gmra.mrb[38].mxu1 %vm424_vm2, %v11420_v55 }
 0x223   :  { %9182 = vmatprep.mubr.msk.f32.mxu1 %vm424_vm2, %v11424_v60 }
 0x226   :  { %9183 = vmatmul.mubr.msk.f32.gmra.mrb[40].mxu1 %vm424_vm2, %v11435_v0 }
 0x227   :  { %9185 = vmatprep.mubr.msk.f32.mxu1 %vm424_vm2, %v11439_v2 }
 0x22a   :  { %9186 = vmatmul.mubr.msk.f32.gmra.mrb[42].mxu1 %vm424_vm2, %v11450_v8 }
 0x22b   :  { %9188 = vmatprep.mubr.msk.f32.mxu1 %vm424_vm2, %v11454_v11 }
 0x22e   :  { %9189 = vmatmul.mubr.msk.f32.gmra.mrb[44].mxu1 %vm424_vm2, %v11465_v19 }
 0x22f   :  { %9191 = vmatprep.mubr.msk.f32.mxu1 %vm424_vm2, %v11469_v24 }
 0x232   :  { %9192 = vmatmul.mubr.msk.f32.gmra.mrb[46].mxu1 %vm424_vm2, %v11480_v17 }
 0x233   :  { %9194 = vmatprep.mubr.msk.f32.mxu1 %vm424_vm2, %v11484_v32 }
 0x236   :  { %9195 = vmatmul.mubr.msk.f32.gmra.mrb[48].mxu1 %vm424_vm2, %v11495_v41 }
 0x237   :  { %9197 = vmatprep.mubr.msk.f32.mxu1 %vm424_vm2, %v11499_v47 }
 0x23a   :  { %9198 = vmatmul.mubr.msk.f32.gmra.mrb[50].mxu1 %vm424_vm2, %v11510_v62 }
 0x23b   :  { %9200 = vmatprep.mubr.msk.f32.mxu1 %vm424_vm2, %v11514_v4 }
 0x23e   :  { %9201 = vmatmul.mubr.msk.f32.gmra.mrb[52].mxu1 %vm424_vm2, %v11525_v27 }
 0x23f   :  { %9203 = vmatprep.mubr.msk.f32.mxu1 %vm424_vm2, %v11529_v36 }
 0x242   :  { %9204 = vmatmul.mubr.msk.f32.gmra.mrb[54].mxu1 %vm424_vm2, %v11540_v54 }
 0x243   :  { %9206 = vmatprep.mubr.msk.f32.mxu1 %vm424_vm2, %v11544_v59 }
 0x246   :  { %9207 = vmatmul.mubr.msk.f32.gmra.mrb[56].mxu1 %vm424_vm2, %v11555_v12  ;;  %v11648_v12 = vld [vmem:[%s13660_s3] sm:$0xff] }
 0x247   :  { %9209 = vmatprep.mubr.msk.f32.mxu1 %vm424_vm2, %v11559_v39  ;;  %v11651_v62 = vunpack.c.h.bf16 %v11648_v12 }
 0x249   :  { %13978 = vst [vmem:[#allocation74_spill] sm:$0xff] %v11651_v62  ;;  %2245 = vmatprep.mubr.f32.mxu0 %v11651_v62 }
 0x24a   :  { %9210 = vmatmul.mubr.msk.f32.gmra.mrb[58].mxu1 %vm424_vm2, %v11567_v42 }
 0x24b   :  { %9390 = vmatprep.mubr.msk.f32.mxu1 %vm424_vm2, %v11103_v29 }
 0x25e   :  { %v11643_v15 = vpop.f32.mrb[4].mxu0 }
 0x25f   :  { %13977 = vst [vmem:[#allocation73_spill] sm:$0xff] %v11643_v15  ;;  %v9222_v35 = vpop.f32.mrb[5].mxu0 }
 0x266   :  { %v9233_v36 = vpop.f32.mrb[6].mxu0 }
 0x267   :  { %v1809_v54 = vpop.f32.mrb[7].mxu0 }
 0x26a   :  { %v9236_v27 = vpop.f32.mrb[8].mxu0 }
 0x26b   :  { %v1819_v4 = vpop.f32.mrb[9].mxu0 }
 0x26e   :  { %v9239_v59 = vpop.f32.mrb[10].mxu0 }
 0x26f   :  { %v1829_v39 = vpop.f32.mrb[11].mxu0 }
 0x272   :  { %v9242_v29 = vpop.f32.mrb[12].mxu0 }
 0x273   :  { %v1839_v42 = vpop.f32.mrb[13].mxu0 }
 0x276   :  { %v11654_v15 = vpop.f32.mrb[14].mxu0 }
 0x277   :  { %v11656_v35 = vpop.f32.mrb[15].mxu0 }
 0x27a   :  { %v11658_v47 = vpop.f32.mrb[16].mxu0 }
 0x27b   :  { %v11660_v41 = vpop.f32.mrb[17].mxu0 }
 0x27e   :  { %v11662_v32 = vpop.f32.mrb[18].mxu0 }
 0x27f   :  { %v11664_v17 = vpop.f32.mrb[19].mxu0 }
 0x282   :  { %v11666_v24 = vpop.f32.mrb[20].mxu0 }
 0x283   :  { %v11668_v19 = vpop.f32.mrb[21].mxu0 }
 0x286   :  { %v11670_v11 = vpop.f32.mrb[22].mxu0 }
 0x287   :  { %v11672_v62 = vpop.f32.mrb[23].mxu0 }
 0x28a   :  { %v11674_v8 = vpop.f32.mrb[24].mxu0 }
 0x28b   :  { %v11676_v2 = vpop.f32.mrb[25].mxu0 }
 0x28e   :  { %v11678_v0 = vpop.f32.mrb[26].mxu0 }
 0x28f   :  { %v11680_v60 = vpop.f32.mrb[27].mxu0 }
 0x292   :  { %v11682_v55 = vpop.f32.mrb[28].mxu0 }
 0x293   :  { %v11684_v53 = vpop.f32.mrb[29].mxu0 }
 0x296   :  { %v11686_v49 = vpop.f32.mrb[30].mxu0 }
 0x297   :  { %v11688_v45 = vpop.f32.mrb[31].mxu0 }
 0x29a   :  { %v11690_v43 = vpop.f32.mrb[32].mxu0 }
 0x29b   :  { %v11692_v38 = vpop.f32.mrb[33].mxu0 }
 0x29e   :  { %v11694_v37 = vpop.f32.mrb[34].mxu0 }
 0x29f   :  { %v11696_v20 = vpop.f32.mrb[35].mxu0 }
 0x2a2   :  { %v11698_v28 = vpop.f32.mrb[36].mxu0 }
 0x2a3   :  { %v11700_v21 = vpop.f32.mrb[37].mxu0 }
 0x2a6   :  { %v11702_v16 = vpop.f32.mrb[38].mxu0 }
 0x2a7   :  { %v11704_v6 = vpop.f32.mrb[39].mxu0 }
 0x2a9   :  { %v9124_v3 = vpop.f32.mrb[0].mxu1 }
 0x2aa   :  { %v11706_v61 = vmax.f32 %v9124_v3, 0.0  ;;  %v1228_v57 = vpop.f32.mrb[1].mxu1  ;;  %v11708_v51 = vpop.f32.mrb[40].mxu0 }
 0x2ab   :  { %v11710_v48 = vmax.f32 %v1228_v57, 0.0  ;;  %v11712_v33 = vpop.f32.mrb[41].mxu0 }
 0x2ac   :  { %13979 = vst [vmem:[#allocation75_spill] sm:$0xff] %v11706_v61  ;;  %v11715_v31 = vmul.f32 %v9233_v36, %v11706_v61 }
 0x2ad   :  { %13980 = vst [vmem:[#allocation76_spill] sm:$0xff] %v11710_v48  ;;  %v11718_v26 = vmul.f32 %v1809_v54, %v11710_v48  ;;  %v9127_v18 = vpop.f32.mrb[2].mxu1 }
 0x2ae   :  { %v11720_v14 = vmax.f32 %v9127_v18, 0.0  ;;  %v1238_v7 = vpop.f32.mrb[3].mxu1  ;;  %v11722_v5 = vpop.f32.mrb[42].mxu0 }
 0x2af   :  { %v11726_v1 = vmax.f32 %v1238_v7, 0.0  ;;  %v11728_v57 = vpop.f32.mrb[43].mxu0 }
 0x2b0   :  { %13981 = vst [vmem:[#allocation77_spill] sm:$0xff] %v11720_v14  ;;  %v11731_v63 = vmul.f32 %v9236_v27, %v11720_v14 }
 0x2b1   :  { %13982 = vst [vmem:[#allocation78_spill] sm:$0xff] %v11726_v1  ;;  %v11734_v36 = vmul.f32 %v1819_v4, %v11726_v1  ;;  %v9130_v54 = vpop.f32.mrb[4].mxu1 }
 0x2b2   :  { %v11736_v48 = vmax.f32 %v9130_v54, 0.0  ;;  %v1248_v18 = vpop.f32.mrb[5].mxu1  ;;  %v11738_v61 = vpop.f32.mrb[44].mxu0 }
 0x2b3   :  { %v11742_v3 = vmax.f32 %v1248_v18, 0.0  ;;  %v11744_v7 = vpop.f32.mrb[45].mxu0 }
 0x2b4   :  { %13983 = vst [vmem:[#allocation79_spill] sm:$0xff] %v11736_v48  ;;  %v11747_v56 = vmul.f32 %v9239_v59, %v11736_v48 }
 0x2b5   :  { %13984 = vst [vmem:[#allocation80_spill] sm:$0xff] %v11742_v3  ;;  %v11750_v27 = vmul.f32 %v1829_v39, %v11742_v3  ;;  %v9133_v4 = vpop.f32.mrb[6].mxu1 }
 0x2b6   :  { %v11752_v1 = vmax.f32 %v9133_v4, 0.0  ;;  %v1258_v54 = vpop.f32.mrb[7].mxu1  ;;  %v11754_v14 = vpop.f32.mrb[46].mxu0 }
 0x2b7   :  { %v11758_v58 = vmax.f32 %v1258_v54, 0.0  ;;  %v11760_v18 = vpop.f32.mrb[47].mxu0 }
 0x2b8   :  { %13985 = vst [vmem:[#allocation81_spill] sm:$0xff] %v11752_v1  ;;  %v11763_v50 = vmul.f32 %v9242_v29, %v11752_v1 }
 0x2b9   :  { %13986 = vst [vmem:[#allocation82_spill] sm:$0xff] %v11758_v58  ;;  %v11766_v59 = vmul.f32 %v1839_v42, %v11758_v58  ;;  %v9136_v39 = vpop.f32.mrb[8].mxu1 }
 0x2ba   :  { %v11768_v3 = vmax.f32 %v9136_v39, 0.0  ;;  %v1268_v4 = vpop.f32.mrb[9].mxu1  ;;  %v11770_v48 = vpop.f32.mrb[48].mxu0 }
 0x2bb   :  { %v11774_v52 = vmax.f32 %v1268_v4, 0.0  ;;  %v11776_v54 = vpop.f32.mrb[49].mxu0 }
 0x2bc   :  { %13987 = vst [vmem:[#allocation83_spill] sm:$0xff] %v11768_v3  ;;  %v11780_v29 = vmul.f32 %v11654_v15, %v11768_v3 }
 0x2bd   :  { %13988 = vst [vmem:[#allocation84_spill] sm:$0xff] %v11774_v52  ;;  %v11784_v42 = vmul.f32 %v11656_v35, %v11774_v52  ;;  %v9139_v39 = vpop.f32.mrb[10].mxu1 }
 0x2be   :  { %v11786_v58 = vmax.f32 %v9139_v39, 0.0  ;;  %v1278_v1 = vpop.f32.mrb[11].mxu1  ;;  %v11788_v44 = vpop.f32.mrb[50].mxu0 }
 0x2bf   :  { %v11792_v46 = vmax.f32 %v1278_v1, 0.0  ;;  %v11794_v40 = vpop.f32.mrb[51].mxu0 }
 0x2c0   :  { %13989 = vst [vmem:[#allocation85_spill] sm:$0xff] %v11786_v58  ;;  %v11798_v15 = vmul.f32 %v11658_v47, %v11786_v58 }
 0x2c1   :  { %13990 = vst [vmem:[#allocation86_spill] sm:$0xff] %v11792_v46  ;;  %v11802_v35 = vmul.f32 %v11660_v41, %v11792_v46  ;;  %v9142_v39 = vpop.f32.mrb[12].mxu1 }
 0x2c2   :  { %v11804_v52 = vmax.f32 %v9142_v39, 0.0  ;;  %v1288_v3 = vpop.f32.mrb[13].mxu1  ;;  %v11806_v30 = vpop.f32.mrb[52].mxu0 }
 0x2c3   :  { %v11810_v4 = vmax.f32 %v1288_v3, 0.0  ;;  %v11812_v10 = vpop.f32.mrb[53].mxu0 }
 0x2c4   :  { %13991 = vst [vmem:[#allocation87_spill] sm:$0xff] %v11804_v52  ;;  %v11816_v47 = vmul.f32 %v11662_v32, %v11804_v52 }
 0x2c5   :  { %13992 = vst [vmem:[#allocation88_spill] sm:$0xff] %v11810_v4  ;;  %v11820_v41 = vmul.f32 %v11664_v17, %v11810_v4  ;;  %v9145_v39 = vpop.f32.mrb[14].mxu1 }
 0x2c6   :  { %v11822_v46 = vmax.f32 %v9145_v39, 0.0  ;;  %v1298_v58 = vpop.f32.mrb[15].mxu1  ;;  %v11824_v34 = vpop.f32.mrb[54].mxu0 }
 0x2c7   :  { %v11828_v1 = vmax.f32 %v1298_v58, 0.0  ;;  %v11830_v23 = vpop.f32.mrb[55].mxu0 }
 0x2c8   :  { %13993 = vst [vmem:[#allocation89_spill] sm:$0xff] %v11822_v46  ;;  %v11834_v32 = vmul.f32 %v11666_v24, %v11822_v46 }
 0x2c9   :  { %13994 = vst [vmem:[#allocation90_spill] sm:$0xff] %v11828_v1  ;;  %v11838_v17 = vmul.f32 %v11668_v19, %v11828_v1  ;;  %v9148_v39 = vpop.f32.mrb[16].mxu1 }
 0x2ca   :  { %v11840_v4 = vmax.f32 %v9148_v39, 0.0  ;;  %v1308_v52 = vpop.f32.mrb[17].mxu1  ;;  %v11842_v22 = vpop.f32.mrb[56].mxu0 }
 0x2cb   :  { %13996 = vst [vmem:[#allocation92_spill] sm:$0xff] %v11842_v22  ;;  %v11846_v3 = vmax.f32 %v1308_v52, 0.0  ;;  %v11848_v25 = vpop.f32.mrb[57].mxu0 }
 0x2cc   :  { %13995 = vst [vmem:[#allocation91_spill] sm:$0xff] %v11840_v4  ;;  %v2125_v24 = vmul.f32 %v11670_v11, %v11840_v4 }
 0x2cd   :  { %13997 = vst [vmem:[#allocation93_spill] sm:$0xff] %v11846_v3  ;;  %v2124_v19 = vmul.f32 %v11672_v62, %v11846_v3  ;;  %v9151_v1 = vpop.f32.mrb[18].mxu1  ;;  %v14000_v3 = vpack.c.bf16 %v11715_v31, %v11718_v26  ;;  %v14001_v26 = vpack.c.bf16 %v11731_v63, %v11734_v36  ;;  %v14002_v63 = vpack.c.bf16 %v11747_v56, %v11750_v27 }
 0x2ce   :  { %v11854_v46 = vmax.f32 %v9151_v1, 0.0  ;;  %v1318_v39 = vpop.f32.mrb[19].mxu1  ;;  %v11856_v9 = vpop.f32.mrb[58].mxu0  ;;  %v14003_v56 = vpack.c.bf16 %v11763_v50, %v11766_v59 }
 0x2cf   :  { %v10019_v13 = vpack.c.bf16 %v2125_v24, %v2124_v19  ;;  %v11858_v22 = vmax.f32 %v1318_v39, 0.0  ;;  %v11860_v58 = vpop.f32.mrb[59].mxu0 }
 0x2d0   :  { %13999 = vst [vmem:[#allocation95_spill] sm:$0xff] %v11860_v58  ;;  %v2127_v52 = vmul.f32 %v11674_v8, %v11854_v46 }
 0x2d1   :  { %13998 = vst [vmem:[#allocation94_spill] sm:$0xff] %v11858_v22  ;;  %v2126_v11 = vmul.f32 %v11676_v2, %v11858_v22  ;;  %v9154_v4 = vpop.f32.mrb[20].mxu1  ;;  %10020 = vmatprep.subr.bf16.mxu0 %v10019_v13 }
 0x2d2   :  { %v11866_v62 = vmax.f32 %v9154_v4, 0.0  ;;  %v1328_v1 = vpop.f32.mrb[21].mxu1  ;;  %10022 = vmatpush3.bf16.msra.mxu0 %v14000_v3  ;;  %v11871_v24 = vpop.f32.mrb[60].mxu0 }
 0x2d3   :  { %v10023_v19 = vpack.c.bf16 %v2127_v52, %v2126_v11  ;;  %v11873_v39 = vmax.f32 %v1328_v1, 0.0  ;;  %v11875_v58 = vpop.f32.mrb[61].mxu0 }
 0x2d4   :  { %v2129_v8 = vmul.f32 %v11678_v0, %v11866_v62 }
 0x2d5   :  { %v2128_v13 = vmul.f32 %v11680_v60, %v11873_v39  ;;  %v9157_v2 = vpop.f32.mrb[22].mxu1  ;;  %10024 = vmatprep.subr.bf16.mxu0 %v10023_v19 }
 0x2d6   :  { %v11881_v4 = vmax.f32 %v9157_v2, 0.0  ;;  %v1338_v22 = vpop.f32.mrb[23].mxu1  ;;  %10026 = vmatpush3.bf16.msra.mxu0 %v14001_v26  ;;  %v11886_v31 = vpop.f32.mrb[62].mxu0 }
 0x2d7   :  { %v10027_v3 = vpack.c.bf16 %v2129_v8, %v2128_v13  ;;  %v11888_v52 = vmax.f32 %v1338_v22, 0.0  ;;  %v11890_v11 = vpop.f32.mrb[63].mxu0 }
 0x2d8   :  { %v2131_v0 = vmul.f32 %v11682_v55, %v11881_v4 }
 0x2d9   :  { %v2130_v60 = vmul.f32 %v11684_v53, %v11888_v52  ;;  %v9160_v1 = vpop.f32.mrb[24].mxu1  ;;  %10028 = vmatprep.subr.bf16.mxu0 %v10027_v3 }
 0x2da   :  { %v11896_v19 = vmax.f32 %v9160_v1, 0.0  ;;  %v1348_v2 = vpop.f32.mrb[25].mxu1  ;;  %10030 = vmatpush3.bf16.msra.mxu0 %v14002_v63  ;;  %v11901_v36 = vpop.f32.mrb[64].mxu0 }
 0x2db   :  { %v10031_v22 = vpack.c.bf16 %v2131_v0, %v2130_v60  ;;  %v11903_v8 = vmax.f32 %v1348_v2, 0.0  ;;  %v11905_v13 = vpop.f32.mrb[65].mxu0 }
 0x2dc   :  { %v2133_v55 = vmul.f32 %v11686_v49, %v11896_v19 }
 0x2dd   :  { %v2132_v53 = vmul.f32 %v11688_v45, %v11903_v8  ;;  %v9163_v26 = vpop.f32.mrb[26].mxu1  ;;  %10032 = vmatprep.subr.bf16.mxu0 %v10031_v22  ;;  %v14004_v22 = vpack.c.bf16 %v11780_v29, %v11784_v42 }
 0x2de   :  { %v11911_v3 = vmax.f32 %v9163_v26, 0.0  ;;  %v1358_v1 = vpop.f32.mrb[27].mxu1  ;;  %10034 = vmatpush3.bf16.msra.mxu0 %v14003_v56 }
 0x2df   :  { %v10035_v27 = vpack.c.bf16 %v2133_v55, %v2132_v53  ;;  %v11916_v0 = vmax.f32 %v1358_v1, 0.0  ;;  %v14005_v1 = vpack.c.bf16 %v11798_v15, %v11802_v35 }
 0x2e0   :  { %v2135_v60 = vmul.f32 %v11690_v43, %v11911_v3 }
 0x2e1   :  { %v2134_v49 = vmul.f32 %v11692_v38, %v11916_v0  ;;  %v9166_v2 = vpop.f32.mrb[28].mxu1  ;;  %10036 = vmatprep.subr.bf16.mxu0 %v10035_v27 }
 0x2e2   :  { %v11922_v45 = vmax.f32 %v9166_v2, 0.0  ;;  %v1368_v63 = vpop.f32.mrb[29].mxu1  ;;  %10038 = vmatpush3.bf16.msra.mxu0 %v14004_v22  ;;  %v384_v2 = vld [vmem:[%s13660_s3 + $0x10] sm:$0xff]  ;;  %v11959_v22 = vunpack.c.l.bf16 %v11648_v12 }
 0x2e3   :  { %v10039_v50 = vpack.c.bf16 %v2135_v60, %v2134_v49  ;;  %v11927_v59 = vmax.f32 %v1368_v63, 0.0  ;;  %v14006_v49 = vpack.c.bf16 %v11816_v47, %v11820_v41 }
 0x2e4   :  { %v2137_v55 = vmul.f32 %v11694_v37, %v11922_v45 }
 0x2e5   :  { %v2136_v43 = vmul.f32 %v11696_v20, %v11927_v59  ;;  %v9169_v53 = vpop.f32.mrb[30].mxu1  ;;  %10040 = vmatprep.subr.bf16.mxu0 %v10039_v50  ;;  %v14007_v50 = vpack.c.bf16 %v11834_v32, %v11838_v17  ;;  %v11979_v32 = vunpack.c.l.bf16 %v384_v2 }
 0x2e6   :  { %v11933_v38 = vmax.f32 %v9169_v53, 0.0  ;;  %v1378_v26 = vpop.f32.mrb[31].mxu1  ;;  %10042 = vmatpush3.bf16.msra.mxu0 %v14005_v1 }
 0x2e7   :  { %v10043_v29 = vpack.c.bf16 %v2137_v55, %v2136_v43  ;;  %v11938_v42 = vmax.f32 %v1378_v26, 0.0  ;;  %v11966_v55 = vunpack.c.h.bf16 %v384_v2 }
 0x2e8   :  { %v2139_v56 = vmul.f32 %v11698_v28, %v11933_v38 }
 0x2e9   :  { %v2138_v37 = vmul.f32 %v11700_v21, %v11938_v42  ;;  %v9172_v27 = vpop.f32.mrb[32].mxu1  ;;  %10044 = vmatprep.subr.bf16.mxu0 %v10043_v29 }
 0x2ea   :  { %v11944_v20 = vmax.f32 %v9172_v27, 0.0  ;;  %v1388_v60 = vpop.f32.mrb[33].mxu1  ;;  %10046 = vmatpush3.bf16.msra.mxu0 %v14006_v49 }
 0x2eb   :  { %v10047_v15 = vpack.c.bf16 %v2139_v56, %v2138_v37  ;;  %v11949_v35 = vmax.f32 %v1388_v60, 0.0 }
 0x2ec   :  { %v2141_v28 = vmul.f32 %v11702_v16, %v11944_v20  ;;  %v14008_v16 = vmov 0.0|0.0  }
 0x2ed   :  { %v2140_v21 = vmul.f32 %v11704_v6, %v11949_v35  ;;  %v9175_v63 = vpop.f32.mrb[34].mxu1  ;;  %10048 = vmatprep.subr.bf16.mxu0 %v10047_v15  ;;  %v386_v6 = vld [vmem:[%s13660_s3 + $0x20] sm:$0xff] }
 0x2ee   :  { %v11961_v47 = vmax.f32 %v9175_v63, 0.0  ;;  %v1398_v41 = vpop.f32.mrb[35].mxu1  ;;  %10050 = vmatpush3.bf16.msra.mxu0 %v14007_v50  ;;  %v11984_v56 = vunpack.c.h.bf16 %v386_v6  ;;  %v11997_v15 = vunpack.c.l.bf16 %v386_v6 }
 0x2ef   :  { %v10052_v43 = vpack.c.bf16 %v2141_v28, %v2140_v21  ;;  %v11968_v53 = vmax.f32 %v1398_v41, 0.0  ;;  %10051 = vmatprep.subr.bf16.mxu0 %v14008_v16 }
 0x2f0   :  { %v2143_v12 = vmul.f32 %v11708_v51, %v11961_v47  ;;  %14009 = vst [vmem:[#allocation96_spill] sm:$0xff] %v11997_v15 }
 0x2f1   :  { %v2142_v26 = vmul.f32 %v11712_v33, %v11968_v53  ;;  %v9178_v1 = vpop.f32.mrb[36].mxu1  ;;  %2246 = vmatmul.mubr.f32.vlgmr.msra.gmra.mrb[66].mxu0 %v11959_v22  ;;  %v388_v33 = vld [vmem:[%s13660_s3 + $0x30] sm:$0xff] }
 0x2f2   :  { %v11981_v17 = vmax.f32 %v9178_v1, 0.0  ;;  %v1408_v29 = vpop.f32.mrb[37].mxu1  ;;  %10053 = vmatpush1.bf16.msra.mxu0 %v10052_v43  ;;  %2250 = vmatprep.mubr.f32.mxu0 %v11966_v55  ;;  %v12002_v21 = vunpack.c.h.bf16 %v388_v33  ;;  %v12017_v6 = vunpack.c.l.bf16 %v388_v33 }
 0x2f3   :  { %v10055_v37 = vpack.c.bf16 %v2143_v12, %v2142_v26  ;;  %v11986_v27 = vmax.f32 %v1408_v29, 0.0  ;;  %10054 = vmatprep.subr.bf16.mxu0 %v14008_v16 }
 0x2f4   :  { %v2145_v51 = vmul.f32 %v11722_v5, %v11981_v17  ;;  %14010 = vst [vmem:[#allocation97_spill] sm:$0xff] %v12002_v21  ;;  %v12010_v5 = vld [vmem:[%s13660_s3 + $0x8] sm:$0xff]  ;;  %14012 = vst [vmem:[#allocation99_spill] sm:$0xff] %v12017_v6 }
 0x2f5   :  { %v2144_v60 = vmul.f32 %v11728_v57, %v11986_v27  ;;  %v9181_v49 = vpop.f32.mrb[38].mxu1  ;;  %2251 = vmatmul.mubr.f32.gmra.mrb[68].mxu0 %v11979_v32  ;;  %v12023_v1 = vunpack.c.h.bf16 %v12010_v5 }
 0x2f6   :  { %v11999_v2 = vmax.f32 %v9181_v49, 0.0  ;;  %v1418_v28 = vpop.f32.mrb[39].mxu1  ;;  %10056 = vmatpush1.bf16.msra.mxu0 %v10055_v37  ;;  %2255 = vmatprep.mubr.f32.mxu0 %v11984_v56 }
 0x2f7   :  { %v10058_v63 = vpack.c.bf16 %v2145_v51, %v2144_v60  ;;  %v12004_v41 = vmax.f32 %v1418_v28, 0.0  ;;  %10057 = vmatprep.subr.bf16.mxu0 %v14008_v16  ;;  %14014 = vst [vmem:[#allocation101_spill] sm:$0xff] %v12023_v1 }
 0x2f8   :  { %v2147_v57 = vmul.f32 %v11738_v61, %v11999_v2 }
 0x2f9   :  { %14011 = vst [vmem:[#allocation98_spill] sm:$0xff] %v12004_v41  ;;  %v2146_v50 = vmul.f32 %v11744_v7, %v12004_v41  ;;  %v9184_v43 = vpop.f32.mrb[40].mxu1  ;;  %2256 = vmatmul.mubr.f32.gmra.mrb[70].mxu0 %v11997_v15 }
 0x2fa   :  { %v12019_v12 = vmax.f32 %v9184_v43, 0.0  ;;  %v1428_v26 = vpop.f32.mrb[41].mxu1  ;;  %10059 = vmatpush1.bf16.msra.mxu0 %v10058_v63  ;;  %2260 = vmatprep.mubr.f32.mxu0 %v12002_v21 }
 0x2fb   :  { %v10061_v29 = vpack.c.bf16 %v2147_v57, %v2146_v50  ;;  %v12025_v37 = vmax.f32 %v1428_v26, 0.0  ;;  %10060 = vmatprep.subr.bf16.mxu0 %v14008_v16 }
 0x2fc   :  { %14013 = vst [vmem:[#allocation100_spill] sm:$0xff] %v12019_v12  ;;  %v2149_v61 = vmul.f32 %v11754_v14, %v12019_v12 }
 0x2fd   :  { %14015 = vst [vmem:[#allocation102_spill] sm:$0xff] %v12025_v37  ;;  %v2148_v7 = vmul.f32 %v11760_v18, %v12025_v37  ;;  %v9187_v33 = vpop.f32.mrb[42].mxu1  ;;  %2261 = vmatmul.mubr.f32.gmra.mrb[72].mxu0 %v12017_v6 }
 0x2fe   :  { %v12033_v51 = vmax.f32 %v9187_v33, 0.0  ;;  %v1438_v60 = vpop.f32.mrb[43].mxu1  ;;  %10062 = vmatpush1.bf16.msra.mxu0 %v10061_v29  ;;  %7494 = vmatprep.mubr.msk.f32.mxu0 %vm2168_vm4, %v12023_v1 }
 0x2ff   :  { %v10064_v49 = vpack.c.bf16 %v2149_v61, %v2148_v7  ;;  %v12037_v28 = vmax.f32 %v1438_v60, 0.0  ;;  %10063 = vmatprep.subr.bf16.mxu0 %v14008_v16 }
 0x300   :  { %14016 = vst [vmem:[#allocation103_spill] sm:$0xff] %v12033_v51  ;;  %v2151_v14 = vmul.f32 %v11770_v48, %v12033_v51 }
 0x301   :  { %14017 = vst [vmem:[#allocation104_spill] sm:$0xff] %v12037_v28  ;;  %v2150_v18 = vmul.f32 %v11776_v54, %v12037_v28  ;;  %v9190_v63 = vpop.f32.mrb[44].mxu1 }
 0x302   :  { %v12044_v57 = vmax.f32 %v9190_v63, 0.0  ;;  %v1448_v50 = vpop.f32.mrb[45].mxu1  ;;  %10065 = vmatpush1.bf16.msra.mxu0 %v10064_v49 }
 0x303   :  { %v10067_v43 = vpack.c.bf16 %v2151_v14, %v2150_v18  ;;  %v12046_v26 = vmax.f32 %v1448_v50, 0.0  ;;  %10066 = vmatprep.subr.bf16.mxu0 %v14008_v16 }
 0x304   :  { %14018 = vst [vmem:[#allocation105_spill] sm:$0xff] %v12044_v57  ;;  %v2153_v29 = vmul.f32 %v11788_v44, %v12044_v57 }
 0x305   :  { %14019 = vst [vmem:[#allocation106_spill] sm:$0xff] %v12046_v26  ;;  %v2152_v61 = vmul.f32 %v11794_v40, %v12046_v26  ;;  %v9193_v48 = vpop.f32.mrb[46].mxu1 }
 0x306   :  { %v12053_v7 = vmax.f32 %v9193_v48, 0.0  ;;  %v1458_v54 = vpop.f32.mrb[47].mxu1  ;;  %10068 = vmatpush1.bf16.msra.mxu0 %v10067_v43 }
 0x307   :  { %v10070_v33 = vpack.c.bf16 %v2153_v29, %v2152_v61  ;;  %v12055_v60 = vmax.f32 %v1458_v54, 0.0  ;;  %10069 = vmatprep.subr.bf16.mxu0 %v14008_v16 }
 0x308   :  { %14020 = vst [vmem:[#allocation107_spill] sm:$0xff] %v12053_v7  ;;  %v2155_v49 = vmul.f32 %v11806_v30, %v12053_v7 }
 0x309   :  { %14021 = vst [vmem:[#allocation108_spill] sm:$0xff] %v12055_v60  ;;  %v2154_v14 = vmul.f32 %v11812_v10, %v12055_v60  ;;  %v9196_v44 = vpop.f32.mrb[48].mxu1 }
 0x30a   :  { %v12062_v18 = vmax.f32 %v9196_v44, 0.0  ;;  %v1468_v40 = vpop.f32.mrb[49].mxu1  ;;  %10071 = vmatpush1.bf16.msra.mxu0 %v10070_v33  ;;  %v14026_v33 = vld [vmem:[#allocation92_spill] sm:$0xff] }
 0x30b   :  { %v10073_v63 = vpack.c.bf16 %v2155_v49, %v2154_v14  ;;  %v12064_v50 = vmax.f32 %v1468_v40, 0.0  ;;  %10072 = vmatprep.subr.bf16.mxu0 %v14008_v16 }
 0x30c   :  { %14022 = vst [vmem:[#allocation109_spill] sm:$0xff] %v12062_v18  ;;  %v2157_v43 = vmul.f32 %v11824_v34, %v12062_v18 }
 0x30d   :  { %14023 = vst [vmem:[#allocation110_spill] sm:$0xff] %v12064_v50  ;;  %v2156_v29 = vmul.f32 %v11830_v23, %v12064_v50  ;;  %v9199_v30 = vpop.f32.mrb[50].mxu1 }
 0x30e   :  { %v12071_v61 = vmax.f32 %v9199_v30, 0.0  ;;  %v1478_v10 = vpop.f32.mrb[51].mxu1  ;;  %10074 = vmatpush1.bf16.msra.mxu0 %v10073_v63 }
 0x30f   :  { %v10076_v48 = vpack.c.bf16 %v2157_v43, %v2156_v29  ;;  %v12073_v54 = vmax.f32 %v1478_v10, 0.0  ;;  %10075 = vmatprep.subr.bf16.mxu0 %v14008_v16  ;;  %v14029_v43 = vld [vmem:[#allocation95_spill] sm:$0xff] }
 0x310   :  { %14024 = vst [vmem:[#allocation111_spill] sm:$0xff] %v12071_v61  ;;  %v2159_v49 = vmul.f32 %v14026_v33, %v12071_v61 }
 0x311   :  { %14025 = vst [vmem:[#allocation112_spill] sm:$0xff] %v12073_v54  ;;  %v2158_v14 = vmul.f32 %v11848_v25, %v12073_v54  ;;  %v9202_v34 = vpop.f32.mrb[52].mxu1 }
 0x312   :  { %v12080_v44 = vmax.f32 %v9202_v34, 0.0  ;;  %v1488_v23 = vpop.f32.mrb[53].mxu1  ;;  %10077 = vmatpush1.bf16.msra.mxu0 %v10076_v48 }
 0x313   :  { %v10079_v40 = vpack.c.bf16 %v2159_v49, %v2158_v14  ;;  %v12082_v30 = vmax.f32 %v1488_v23, 0.0  ;;  %10078 = vmatprep.subr.bf16.mxu0 %v14008_v16 }
 0x314   :  { %14027 = vst [vmem:[#allocation92_spill] sm:$0xff] %v12080_v44  ;;  %v2161_v63 = vmul.f32 %v11856_v9, %v12080_v44 }
 0x315   :  { %14028 = vst [vmem:[#allocation113_spill] sm:$0xff] %v12082_v30  ;;  %v2160_v29 = vmul.f32 %v14029_v43, %v12082_v30  ;;  %v9205_v10 = vpop.f32.mrb[54].mxu1 }
 0x316   :  { %v12089_v33 = vmax.f32 %v9205_v10, 0.0  ;;  %v1498_v25 = vpop.f32.mrb[55].mxu1  ;;  %10080 = vmatpush1.bf16.msra.mxu0 %v10079_v40 }
 0x317   :  { %v10082_v34 = vpack.c.bf16 %v2161_v63, %v2160_v29  ;;  %v12091_v54 = vmax.f32 %v1498_v25, 0.0  ;;  %10081 = vmatprep.subr.bf16.mxu0 %v14008_v16 }
 0x318   :  { %14030 = vst [vmem:[#allocation95_spill] sm:$0xff] %v12089_v33  ;;  %v2163_v48 = vmul.f32 %v11871_v24, %v12089_v33 }
 0x319   :  { %14031 = vst [vmem:[#allocation114_spill] sm:$0xff] %v12091_v54  ;;  %v2162_v49 = vmul.f32 %v11875_v58, %v12091_v54  ;;  %v9208_v9 = vpop.f32.mrb[56].mxu1 }
 0x31a   :  { %v12098_v14 = vmax.f32 %v9208_v9, 0.0  ;;  %v1508_v23 = vpop.f32.mrb[57].mxu1  ;;  %10083 = vmatpush1.bf16.msra.mxu0 %v10082_v34 }
 0x31b   :  { %v10085_v43 = vpack.c.bf16 %v2163_v48, %v2162_v49  ;;  %v12100_v10 = vmax.f32 %v1508_v23, 0.0  ;;  %10084 = vmatprep.subr.bf16.mxu0 %v14008_v16  ;;  %v385_v23 = vld [vmem:[%s13660_s3 + $0x18] sm:$0xff] }
 0x31c   :  { %14032 = vst [vmem:[#allocation115_spill] sm:$0xff] %v12098_v14  ;;  %v2165_v40 = vmul.f32 %v11886_v31, %v12098_v14  ;;  %v7498_v31 = vld [vmem:[%s13663_s6 + $0xa0] sm:$0xff] }
 0x31d   :  { %14033 = vst [vmem:[#allocation116_spill] sm:$0xff] %v12100_v10  ;;  %v2164_v63 = vmul.f32 %v11890_v11, %v12100_v10  ;;  %v9211_v24 = vpop.f32.mrb[58].mxu1  ;;  %v7499_v11 = vld [vmem:[%s13663_s6 + $0xa8] sm:$0xff] }
 0x31e   :  { %v12107_v29 = vmax.f32 %v9211_v24, 0.0  ;;  %v1518_v58 = vpop.f32.mrb[59].mxu1  ;;  %10086 = vmatpush1.bf16.msra.mxu0 %v10085_v43  ;;  %v7500_v43 = vld [vmem:[%s13663_s6 + $0xb0] sm:$0xff]  ;;  %v387_v24 = vld [vmem:[%s13660_s3 + $0x28] sm:$0xff] }
 0x31f   :  { %v10088_v25 = vpack.c.bf16 %v2165_v40, %v2164_v63  ;;  %v12109_v9 = vmax.f32 %v1518_v58, 0.0  ;;  %10087 = vmatprep.subr.bf16.mxu0 %v14008_v16  ;;  %v7501_v40 = vld [vmem:[%s13663_s6 + $0xb8] sm:$0xff]  ;;  %v12133_v63 = vunpack.c.l.bf16 %v12010_v5 }
 0x320   :  { %14034 = vst [vmem:[#allocation117_spill] sm:$0xff] %v12107_v29  ;;  %v2167_v34 = vmul.f32 %v11901_v36, %v12107_v29  ;;  %v10093_v36 = vpack.c.bf16 %v7499_v11, %v7498_v31  ;;  %v10097_v58 = vpack.c.bf16 %v7501_v40, %v7500_v43  ;;  %v389_v5 = vld [vmem:[%s13660_s3 + $0x38] sm:$0xff]  ;;  %v12151_v31 = vunpack.c.l.bf16 %v387_v24  ;;  %v2351_v40 = vld [vmem:[%s13663_s6] sm:$0xff] }
 0x321   :  { %14035 = vst [vmem:[#allocation118_spill] sm:$0xff] %v12109_v9  ;;  %v2166_v48 = vmul.f32 %v11905_v13, %v12109_v9  ;;  %14036 = vst [vmem:[#allocation119_spill] sm:$0xff] %v12133_v63  ;;  %v12135_v13 = vunpack.c.h.bf16 %v385_v23  ;;  %v12155_v11 = vunpack.c.h.bf16 %v389_v5  ;;  %v14046_v43 = vld [vmem:[#allocation10_spill] sm:$0xff] }
 0x322   :  { %10089 = vmatpush1.bf16.msra.mxu0 %v10088_v25  ;;  %v12141_v25 = vunpack.c.l.bf16 %v385_v23  ;;  %14040 = vst [vmem:[#allocation123_spill] sm:$0xff] %v12151_v31  ;;  %v14044_v23 = vld [vmem:[#allocation8_spill] sm:$0xff] }
 0x323   :  { %v10091_v49 = vpack.c.bf16 %v2167_v34, %v2166_v48  ;;  %10090 = vmatprep.subr.bf16.mxu0 %v14008_v16  ;;  %14037 = vst [vmem:[#allocation120_spill] sm:$0xff] %v12135_v13  ;;  %v12145_v34 = vunpack.c.h.bf16 %v387_v24  ;;  %14041 = vst [vmem:[#allocation124_spill] sm:$0xff] %v12155_v11  ;;  %v12158_v48 = vunpack.c.l.bf16 %v389_v5  ;;  %v2352_v24 = vld [vmem:[%s13663_s6 + $0x8] sm:$0xff]  ;;  %v2353_v5 = vld [vmem:[%s13663_s6 + $0x10] sm:$0xff] }
 0x324   :  { %14038 = vst [vmem:[#allocation121_spill] sm:$0xff] %v12141_v25 }
 0x325   :  { %14039 = vst [vmem:[#allocation122_spill] sm:$0xff] %v12145_v34  ;;  %14042 = vst [vmem:[#allocation125_spill] sm:$0xff] %v12158_v48 }
 0x326   :  { %10092 = vmatpush1.bf16.msra.mxu0 %v10091_v49  ;;  %v14043_v49 = vld [vmem:[#allocation9_spill] sm:$0xff] }
 0x327   :  { %10094 = vmatprep.subr.bf16.mxu0 %v10093_v36 }
 0x329   :  { %2331 = vmatmul.mubr.f32.vlgmr.msra.gmra.mrb[74].mxu0 %v12133_v63 }
 0x32a   :  { %7495 = vmatprep.mubr.msk.f32.mxu0 %vm2168_vm4, %v12135_v13  ;;  %10096 = vmatpush3.bf16.msra.mxu0 %v10093_v36  ;;  %v14045_v36 = vld [vmem:[#allocation11_spill] sm:$0xff] }
 0x32b   :  { %10098 = vmatprep.subr.bf16.mxu0 %v10097_v58 }
 0x32d   :  { %2336 = vmatmul.mubr.f32.gmra.mrb[76].mxu0 %v12141_v25 }
 0x32e   :  { %7496 = vmatprep.mubr.msk.f32.mxu0 %vm2168_vm4, %v12145_v34  ;;  %10100 = vmatpush3.bf16.msra.mxu0 %v10097_v58  ;;  %v10101_v58 = vpack.c.bf16 %v2352_v24, %v2351_v40 }
 0x330   :  { %10102 = vmatprep.subr.bf16.mxu0 %v10101_v58 }
 0x331   :  { %2341 = vmatmul.mubr.f32.gmra.mrb[78].mxu0 %v12151_v31 }
 0x332   :  { %7497 = vmatprep.mubr.msk.f32.mxu0 %vm2168_vm4, %v12155_v11 }
 0x335   :  { %2346 = vmatmul.mubr.f32.gmra.mrb[80].mxu0 %v12158_v48 }
 0x336   :  { %9329 = vmatprep.mubr.msk.f32.mxu0 %vm424_vm2, %v14043_v49  ;;  %v2354_v49 = vld [vmem:[%s13663_s6 + $0x18] sm:$0xff] }
 0x339   :  { %9330 = vmatmul.mubr.msk.f32.vlgmr.msra.gmra.mrb[82].mxu0 %vm424_vm2, %v14044_v23  ;;  %v10105_v23 = vpack.c.bf16 %v2354_v49, %v2353_v5 }
 0x33a   :  { %9332 = vmatprep.mubr.msk.f32.mxu0 %vm424_vm2, %v14045_v36  ;;  %10104 = vmatpush3.bf16.msra.mxu0 %v10101_v58 }
 0x33b   :  { %10106 = vmatprep.subr.bf16.mxu0 %v10105_v23 }
 0x33d   :  { %9333 = vmatmul.mubr.msk.f32.gmra.mrb[84].mxu0 %vm424_vm2, %v14046_v43 }
 0x33e   :  { %10108 = vmatpush3.bf16.msra.mxu0 %v10105_v23 }
 0x33f   :  { %10109 = vmatprep.subr.bf16.mxu0 %v14008_v16 }
 0x3c4   :  { %v8422_v36 = vpop.f32.mrb[66].mxu0 }
 0x3c5   :  { %v8423_v43 = vpop.f32.mrb[67].mxu0 }
 0x3c6   :  { %v8424_v48 = vadd.f32 %v8423_v43, %v8422_v36 }
 0x3c8   :  { %v8425_v11 = vpop.f32.mrb[68].mxu0 }
 0x3c9   :  { %v8426_v40 = vpop.f32.mrb[69].mxu0 }
 0x3ca   :  { %v8427_v24 = vadd.f32 %v8426_v40, %v8425_v11 }
 0x3cc   :  { %v8428_v58 = vpop.f32.mrb[70].mxu0 }
 0x3cd   :  { %v8429_v31 = vpop.f32.mrb[71].mxu0 }
 0x3ce   :  { %v8430_v34 = vadd.f32 %v8429_v31, %v8428_v58 }
 0x3d0   :  { %v8431_v25 = vpop.f32.mrb[72].mxu0 }
 0x3d1   :  { %v8432_v13 = vpop.f32.mrb[73].mxu0 }
 0x3d2   :  { %v8433_v63 = vadd.f32 %v8432_v13, %v8431_v25  ;;  %v14047_v13 = vmov 0.0  }
 0x3fc   :  { %v2332_v9 = vpop.f32.mrb[74].mxu0 }
 0x3fd   :  { %v2333_v29 = vadd.f32 %v8424_v48, %v2332_v9  ;;  %v2334_v10 = vpop.f32.mrb[75].mxu0 }
 0x3fe   :  { %v2550_v10 = vld [vmem:[%s13664_s7] ss:$0 sm:$0xff] }
 0x3ff   :  { %9343 = vmatprep.mubr.msk.f32.mxu0 %vm424_vm2, %v2333_v29 }
 0x400   :  { %v2337_v5 = vpop.f32.mrb[76].mxu0 }
 0x401   :  { %v2338_v49 = vadd.f32 %v8427_v24, %v2337_v5  ;;  %v2339_v23 = vpop.f32.mrb[77].mxu0 }
 0x403   :  { %9344 = vmatmul.mubr.msk.f32.vlgmr.msra.gmra.mrb[82].mxu0 %vm424_vm2, %v2338_v49 }
 0x404   :  { %v2342_v36 = vpop.f32.mrb[78].mxu0 }
 0x405   :  { %v2343_v43 = vadd.f32 %v8430_v34, %v2342_v36  ;;  %v2344_v14 = vpop.f32.mrb[79].mxu0 }
 0x407   :  { %9346 = vmatprep.mubr.msk.f32.mxu0 %vm424_vm2, %v2343_v43 }
 0x408   :  { %v2347_v11 = vpop.f32.mrb[80].mxu0 }
 0x409   :  { %v2348_v31 = vadd.f32 %v8433_v63, %v2347_v11  ;;  %v2349_v40 = vpop.f32.mrb[81].mxu0 }
 0x40b   :  { %9347 = vmatmul.mubr.msk.f32.gmra.mrb[84].mxu0 %vm424_vm2, %v2348_v31 }
 0x40c   :  { %9357 = vmatprep.mubr.msk.f32.mxu0 %vm10881_vm3, %v14047_v13 }
 0x4d6   :  { %v9345_v29 = vpop.f32.mrb[82].mxu0 }
 0x4d7   :  { %v2552_v9 = vadd.f32 %v9345_v29, %v2550_v10  ;;  %v2531_v25 = vpop.f32.mrb[83].mxu0 }
 0x4d8   :  { %v2551_v48 = vadd.f32 %v2550_v10, %v2531_v25 }
 0x4d9   :  { %v2556_v14 = vsel %vm424_vm2, %v2552_v9, 0.0  ;;  %v2570_v34 = vmul.f32 %v2552_v9, %v2552_v9 }
 0x4da   :  { %v2555_v24 = vsel %vm424_vm2, %v2551_v48, 0.0  ;;  %v2569_v63 = vmul.f32 %v2551_v48, %v2551_v48 }
 0x4db   :  { %v2574_v58 = vsel %vm424_vm2, %v2570_v34, 0.0  ;;  %v2557_v5 = vadd.f32 %v2556_v14, %v2555_v24 }
 0x4dc   :  { %v2573_v49 = vsel %vm424_vm2, %v2569_v63, 0.0 }
 0x4dd   :  { %v2575_v23 = vadd.f32 %v2574_v58, %v2573_v49 }
 0x4de   :  { %v9348_v36 = vpop.f32.mrb[84].mxu0 }
 0x4df   :  { %v2554_v43 = vadd.f32 %v9348_v36, %v2550_v10  ;;  %v2541_v11 = vpop.f32.mrb[85].mxu0 }
 0x4e0   :  { %v2553_v31 = vadd.f32 %v2550_v10, %v2541_v11 }
 0x4e1   :  { %v2572_v40 = vmul.f32 %v2554_v43, %v2554_v43  ;;  %v2560_v33 = vsel %vm424_vm2, %v2554_v43, 0.0 }
 0x4e2   :  { %v2558_v29 = vsel %vm424_vm2, %v2553_v31, 0.0  ;;  %v2571_v25 = vmul.f32 %v2553_v31, %v2553_v31 }
 0x4e3   :  { %v2559_v54 = vadd.f32 %v2558_v29, %v2557_v5  ;;  %v2578_v14 = vsel %vm424_vm2, %v2572_v40, 0.0 }
 0x4e4   :  { %v2576_v30 = vsel %vm424_vm2, %v2571_v25, 0.0 }
 0x4e5   :  { %v2561_v44 = vadd.f32 %v2560_v33, %v2559_v54  ;;  %v2577_v61 = vadd.f32 %v2576_v30, %v2575_v23 }
 0x4e7   :  { %v2562_v34 = vrot.slane %v2561_v44, 4  ;;  %v2579_v24 = vadd.f32 %v2578_v14, %v2577_v61 }
 0x4e9   :  { %v2563_v63 = vadd.f32 %v2562_v34, %v2561_v44  ;;  %v2580_v58 = vrot.slane %v2579_v24, 4 }
 0x4eb   :  { %v2564_v49 = vrot.slane %v2563_v63, 2  ;;  %v2581_v36 = vadd.f32 %v2580_v58, %v2579_v24 }
 0x4ed   :  { %v2565_v10 = vadd.f32 %v2564_v49, %v2563_v63  ;;  %v2582_v11 = vrot.slane %v2581_v36, 2 }
 0x4ef   :  { %v2566_v50 = vrot.slane %v2565_v10, 1  ;;  %v2583_v18 = vadd.f32 %v2582_v11, %v2581_v36 }
 0x4f1   :  { %v2567_v60 = vadd.f32 %v2566_v50, %v2565_v10  ;;  %v2584_v5 = vrot.slane %v2583_v18, 1  ;;  %v12204_v50 = vld [vmem:[%s13664_s7 + $0x5] ss:$0 sm:$0xff] }
 0x4f2   :  { %14048 = vst [vmem:[#allocation9_spill] sm:$0xff] %v12204_v50 }
 0x4f3   :  { %v2568_v29 = vmul.f32 0.03125, %v2567_v60  ;;  %v2585_v7 = vadd.f32 %v2584_v5, %v2583_v18 }
 0x4f5   :  { %v2586_v26 = vmul.f32 0.03125, %v2585_v7  ;;  %v2587_v25 = vmul.f32 %v2568_v29, %v2568_v29  ;;  %v2591_v54 = vsub.f32 %v2553_v31, %v2568_v29  ;;  %v2589_v30 = vsub.f32 %v2551_v48, %v2568_v29 }
 0x4f6   :  { %v2590_v33 = vsub.f32 %v2552_v9, %v2568_v29  ;;  %v2592_v23 = vsub.f32 %v2554_v43, %v2568_v29  ;;  %v12213_v9 = vld [vmem:[%s13664_s7 + $0x6] ss:$0 sm:$0xff] }
 0x4f7   :  { %v2588_v40 = vsub.f32 %v2586_v26, %v2587_v25  ;;  %14049 = vst [vmem:[#allocation8_spill] sm:$0xff] %v12213_v9 }
 0x4f9   :  { %v2593_v61 = vadd.f32 1e-05, %v2588_v40 }
 0x4fb   :  { %10731 = vrsqrt.f32 %v2593_v61 }
 0x505   :  { %v10732_v44 = vpop.eup %10731 }
 0x506   :  { %v2597_v14 = vmul.f32 %v10732_v44, %v2591_v54  ;;  %v2595_v34 = vmul.f32 %v10732_v44, %v2589_v30  ;;  %v2596_v24 = vmul.f32 %v10732_v44, %v2590_v33  ;;  %v2598_v63 = vmul.f32 %v10732_v44, %v2592_v23 }
 0x508   :  { %v2601_v7 = vmul.f32 %v12204_v50, %v2597_v14  ;;  %v2599_v60 = vmul.f32 %v12204_v50, %v2595_v34  ;;  %v2600_v18 = vmul.f32 %v12204_v50, %v2596_v24  ;;  %v2602_v26 = vmul.f32 %v12204_v50, %v2598_v63  ;;  %v14123_v50 = vld [vmem:[#allocation85_spill] sm:$0xff] }
 0x50a   :  { %v2603_v48 = vadd.f32 %v12213_v9, %v2599_v60  ;;  %v2604_v43 = vadd.f32 %v12213_v9, %v2600_v18  ;;  %v2605_v31 = vadd.f32 %v12213_v9, %v2601_v7  ;;  %v2606_v58 = vadd.f32 %v12213_v9, %v2602_v26 }
 0x50c   :  { %v7510_v49 = vmul.f32 -1.442695, %v2603_v48  ;;  %v7511_v36 = vmul.f32 -1.442695, %v2604_v43  ;;  %v7512_v10 = vmul.f32 -1.442695, %v2605_v31 }
 0x50d   :  { %v7513_v11 = vmul.f32 -1.442695, %v2606_v58 }
 0x50e   :  { %10733 = vpow2.f32 %v7510_v49  ;;  %v7518_v49 = vld [vmem:[%s13663_s6 + $0x178] sm:$0xff] }
 0x50f   :  { %10735 = vpow2.f32 %v7511_v36  ;;  %v14051_v36 = vld [vmem:[#allocation12_spill] sm:$0xff] }
 0x510   :  { %10737 = vpow2.f32 %v7512_v10  ;;  %v14052_v10 = vld [vmem:[#allocation14_spill] sm:$0xff] }
 0x511   :  { %10739 = vpow2.f32 %v7513_v11 }
 0x518   :  { %v10734_v5 = vpop.eup %10733 }
 0x519   :  { %v10736_v29 = vpop.eup %10735  ;;  %v2619_v25 = vadd.f32 1.0, %v10734_v5  ;;  %v14053_v5 = vld [vmem:[#allocation15_spill] sm:$0xff] }
 0x51a   :  { %v10738_v54 = vpop.eup %10737  ;;  %v2620_v30 = vadd.f32 1.0, %v10736_v29  ;;  %v14054_v29 = vld [vmem:[#allocation16_spill] sm:$0xff] }
 0x51b   :  { %v10740_v33 = vpop.eup %10739  ;;  %10741 = vrcp.f32 %v2619_v25  ;;  %v2621_v23 = vadd.f32 1.0, %v10738_v54  ;;  %v14055_v25 = vld [vmem:[#allocation17_spill] sm:$0xff]  ;;  %v14056_v54 = vld [vmem:[#allocation18_spill] sm:$0xff] }
 0x51c   :  { %10743 = vrcp.f32 %v2620_v30  ;;  %v2622_v40 = vadd.f32 1.0, %v10740_v33  ;;  %v14057_v30 = vld [vmem:[#allocation19_spill] sm:$0xff]  ;;  %v14058_v33 = vld [vmem:[#allocation20_spill] sm:$0xff] }
 0x51d   :  { %10745 = vrcp.f32 %v2621_v23  ;;  %v14059_v23 = vld [vmem:[#allocation21_spill] sm:$0xff] }
 0x51e   :  { %10747 = vrcp.f32 %v2622_v40  ;;  %v14060_v40 = vld [vmem:[#allocation22_spill] sm:$0xff] }
 0x525   :  { %v10742_v61 = vpop.eup %10741 }
 0x526   :  { %v10744_v44 = vpop.eup %10743  ;;  %v12219_v14 = vmul.f32 %v10742_v61, %v2603_v48  ;;  %v7515_v48 = vld [vmem:[%s13663_s6 + $0x160] sm:$0xff] }
 0x527   :  { %v10746_v34 = vpop.eup %10745  ;;  %v12221_v24 = vmul.f32 %v10744_v44, %v2604_v43  ;;  %v7516_v43 = vld [vmem:[%s13663_s6 + $0x168] sm:$0xff]  ;;  %v14061_v61 = vld [vmem:[#allocation23_spill] sm:$0xff] }
 0x528   :  { %v10748_v63 = vpop.eup %10747  ;;  %v12223_v7 = vmul.f32 %v10746_v34, %v2605_v31  ;;  %v10116_v31 = vpack.c.bf16 %v7516_v43, %v7515_v48  ;;  %v14062_v44 = vld [vmem:[#allocation24_spill] sm:$0xff]  ;;  %v14063_v34 = vld [vmem:[#allocation25_spill] sm:$0xff]  ;;  %v14068_v43 = vld [vmem:[#allocation30_spill] sm:$0xff] }
 0x529   :  { %v10110_v60 = vpack.c.bf16 %v12221_v24, %v12219_v14  ;;  %v12227_v18 = vmul.f32 %v10748_v63, %v2606_v58  ;;  %v7517_v58 = vld [vmem:[%s13663_s6 + $0x170] sm:$0xff] }
 0x52a   :  { %v10119_v11 = vpack.c.bf16 %v7518_v49, %v7517_v58  ;;  %v14064_v63 = vld [vmem:[#allocation26_spill] sm:$0xff]  ;;  %v14067_v48 = vld [vmem:[#allocation29_spill] sm:$0xff]  ;;  %v14070_v58 = vld [vmem:[#allocation32_spill] sm:$0xff] }
 0x52b   :  { %14050 = vst [vmem:[#allocation11_spill] sm:$0xff] %v12227_v18  ;;  %10111 = vmatpush3.bf16.msra.mxu0 %v10110_v60  ;;  %10128 = vmatprep.subr.bf16.mxu1 %v10110_v60  ;;  %v10113_v26 = vpack.c.bf16 %v12227_v18, %v12223_v7  ;;  %v14071_v49 = vld [vmem:[#allocation33_spill] sm:$0xff] }
 0x52c   :  { %10130 = vmatpush3.bf16.msra.mxu1 %v10110_v60  ;;  %10112 = vmatprep.subr.bf16.mxu0 %v14008_v16  ;;  %v14065_v60 = vld [vmem:[#allocation27_spill] sm:$0xff] }
 0x52d   :  { %10132 = vmatprep.subr.bf16.mxu1 %v10113_v26 }
 0x52f   :  { %10114 = vmatpush3.bf16.msra.mxu0 %v10113_v26 }
 0x530   :  { %10134 = vmatpush3.bf16.msra.mxu1 %v10113_v26  ;;  %10115 = vmatprep.subr.bf16.mxu0 %v14008_v16  ;;  %v14066_v26 = vld [vmem:[#allocation28_spill] sm:$0xff] }
 0x532   :  { %9358 = vmatmul.mubr.msk.f32.vlgmr.msra.gmra.mrb[86].mxu0 %vm424_vm2, %v14051_v36  ;;  %v14122_v36 = vld [vmem:[#allocation84_spill] sm:$0xff] }
 0x533   :  { %9391 = vmatmul.mubr.msk.f32.vlgmr.msra.gmra.mrb[60].mxu1 %vm424_vm2, %v14052_v10  ;;  %10117 = vmatpush3.bf16.msra.mxu0 %v10116_v31  ;;  %v14069_v31 = vld [vmem:[#allocation31_spill] sm:$0xff] }
 0x534   :  { %9393 = vmatprep.mubr.msk.f32.mxu1 %vm424_vm2, %v14053_v5  ;;  %10118 = vmatprep.subr.bf16.mxu0 %v14008_v16 }
 0x535   :  { %9368 = vmatprep.mubr.msk.f32.mxu0 %vm10881_vm3, %v14047_v13 }
 0x537   :  { %9394 = vmatmul.mubr.msk.f32.gmra.mrb[62].mxu1 %vm424_vm2, %v14054_v29  ;;  %10120 = vmatpush3.bf16.msra.mxu0 %v10119_v11  ;;  %v14072_v11 = vld [vmem:[#allocation34_spill] sm:$0xff]  ;;  %v14116_v29 = vld [vmem:[#allocation73_spill] sm:$0xff] }
 0x538   :  { %9396 = vmatprep.mubr.msk.f32.mxu1 %vm424_vm2, %v14055_v25  ;;  %10121 = vmatprep.subr.bf16.mxu0 %v14008_v16  ;;  %v14115_v25 = vld [vmem:[#allocation78_spill] sm:$0xff] }
 0x53b   :  { %9397 = vmatmul.mubr.msk.f32.gmra.mrb[64].mxu1 %vm424_vm2, %v14056_v54 }
 0x53c   :  { %9399 = vmatprep.mubr.msk.f32.mxu1 %vm424_vm2, %v14057_v30  ;;  %v14114_v30 = vld [vmem:[#allocation77_spill] sm:$0xff] }
 0x53f   :  { %9400 = vmatmul.mubr.msk.f32.gmra.mrb[66].mxu1 %vm424_vm2, %v14058_v33 }
 0x540   :  { %9402 = vmatprep.mubr.msk.f32.mxu1 %vm424_vm2, %v14059_v23 }
 0x543   :  { %9403 = vmatmul.mubr.msk.f32.gmra.mrb[68].mxu1 %vm424_vm2, %v14060_v40 }
 0x544   :  { %9405 = vmatprep.mubr.msk.f32.mxu1 %vm424_vm2, %v14061_v61 }
 0x547   :  { %9406 = vmatmul.mubr.msk.f32.gmra.mrb[70].mxu1 %vm424_vm2, %v14062_v44 }
 0x548   :  { %9408 = vmatprep.mubr.msk.f32.mxu1 %vm424_vm2, %v14063_v34  ;;  %v14112_v34 = vld [vmem:[#allocation75_spill] sm:$0xff] }
 0x54b   :  { %9409 = vmatmul.mubr.msk.f32.gmra.mrb[72].mxu1 %vm424_vm2, %v14064_v63 }
 0x54c   :  { %9411 = vmatprep.mubr.msk.f32.mxu1 %vm424_vm2, %v14065_v60  ;;  %v14073_v60 = vld [vmem:[#allocation35_spill] sm:$0xff] }
 0x54f   :  { %9412 = vmatmul.mubr.msk.f32.gmra.mrb[74].mxu1 %vm424_vm2, %v14066_v26  ;;  %v14074_v26 = vld [vmem:[#allocation36_spill] sm:$0xff] }
 0x550   :  { %9414 = vmatprep.mubr.msk.f32.mxu1 %vm424_vm2, %v14067_v48  ;;  %v14075_v48 = vld [vmem:[#allocation37_spill] sm:$0xff] }
 0x553   :  { %9415 = vmatmul.mubr.msk.f32.gmra.mrb[76].mxu1 %vm424_vm2, %v14068_v43  ;;  %v14076_v43 = vld [vmem:[#allocation38_spill] sm:$0xff] }
 0x554   :  { %9417 = vmatprep.mubr.msk.f32.mxu1 %vm424_vm2, %v14069_v31  ;;  %v14077_v31 = vld [vmem:[#allocation39_spill] sm:$0xff] }
 0x557   :  { %9418 = vmatmul.mubr.msk.f32.gmra.mrb[78].mxu1 %vm424_vm2, %v14070_v58  ;;  %v14078_v58 = vld [vmem:[#allocation40_spill] sm:$0xff] }
 0x558   :  { %9420 = vmatprep.mubr.msk.f32.mxu1 %vm424_vm2, %v14071_v49  ;;  %v14079_v49 = vld [vmem:[#allocation41_spill] sm:$0xff] }
 0x55b   :  { %9421 = vmatmul.mubr.msk.f32.gmra.mrb[80].mxu1 %vm424_vm2, %v14072_v11  ;;  %v14080_v11 = vld [vmem:[#allocation42_spill] sm:$0xff] }
 0x55c   :  { %9423 = vmatprep.mubr.msk.f32.mxu1 %vm424_vm2, %v14073_v60  ;;  %v14081_v60 = vld [vmem:[#allocation43_spill] sm:$0xff] }
 0x55f   :  { %9424 = vmatmul.mubr.msk.f32.gmra.mrb[82].mxu1 %vm424_vm2, %v14074_v26  ;;  %v14082_v26 = vld [vmem:[#allocation44_spill] sm:$0xff] }
 0x560   :  { %9426 = vmatprep.mubr.msk.f32.mxu1 %vm424_vm2, %v14075_v48  ;;  %v14083_v48 = vld [vmem:[#allocation45_spill] sm:$0xff] }
 0x563   :  { %9427 = vmatmul.mubr.msk.f32.gmra.mrb[84].mxu1 %vm424_vm2, %v14076_v43  ;;  %v14084_v43 = vld [vmem:[#allocation46_spill] sm:$0xff] }
 0x564   :  { %9429 = vmatprep.mubr.msk.f32.mxu1 %vm424_vm2, %v14077_v31  ;;  %v14085_v31 = vld [vmem:[#allocation47_spill] sm:$0xff] }
 0x567   :  { %9430 = vmatmul.mubr.msk.f32.gmra.mrb[86].mxu1 %vm424_vm2, %v14078_v58  ;;  %v14086_v58 = vld [vmem:[#allocation48_spill] sm:$0xff] }
 0x568   :  { %9432 = vmatprep.mubr.msk.f32.mxu1 %vm424_vm2, %v14079_v49  ;;  %v14087_v49 = vld [vmem:[#allocation49_spill] sm:$0xff] }
 0x56b   :  { %9433 = vmatmul.mubr.msk.f32.gmra.mrb[88].mxu1 %vm424_vm2, %v14080_v11  ;;  %v14088_v11 = vld [vmem:[#allocation50_spill] sm:$0xff] }
 0x56c   :  { %9435 = vmatprep.mubr.msk.f32.mxu1 %vm424_vm2, %v14081_v60  ;;  %v14089_v60 = vld [vmem:[#allocation51_spill] sm:$0xff] }
 0x56f   :  { %9436 = vmatmul.mubr.msk.f32.gmra.mrb[90].mxu1 %vm424_vm2, %v14082_v26  ;;  %v14090_v26 = vld [vmem:[#allocation52_spill] sm:$0xff] }
 0x570   :  { %9438 = vmatprep.mubr.msk.f32.mxu1 %vm424_vm2, %v14083_v48  ;;  %v14091_v48 = vld [vmem:[#allocation53_spill] sm:$0xff] }
 0x573   :  { %9439 = vmatmul.mubr.msk.f32.gmra.mrb[92].mxu1 %vm424_vm2, %v14084_v43  ;;  %v14092_v43 = vld [vmem:[#allocation54_spill] sm:$0xff] }
 0x574   :  { %9441 = vmatprep.mubr.msk.f32.mxu1 %vm424_vm2, %v14085_v31  ;;  %v14093_v31 = vld [vmem:[#allocation55_spill] sm:$0xff] }
 0x577   :  { %9442 = vmatmul.mubr.msk.f32.gmra.mrb[94].mxu1 %vm424_vm2, %v14086_v58  ;;  %v14094_v58 = vld [vmem:[#allocation56_spill] sm:$0xff] }
 0x578   :  { %9444 = vmatprep.mubr.msk.f32.mxu1 %vm424_vm2, %v14087_v49  ;;  %v14095_v49 = vld [vmem:[#allocation57_spill] sm:$0xff] }
 0x57b   :  { %9445 = vmatmul.mubr.msk.f32.gmra.mrb[96].mxu1 %vm424_vm2, %v14088_v11  ;;  %v14096_v11 = vld [vmem:[#allocation58_spill] sm:$0xff] }
 0x57c   :  { %9447 = vmatprep.mubr.msk.f32.mxu1 %vm424_vm2, %v14089_v60  ;;  %v14097_v60 = vld [vmem:[#allocation59_spill] sm:$0xff] }
 0x57f   :  { %9448 = vmatmul.mubr.msk.f32.gmra.mrb[98].mxu1 %vm424_vm2, %v14090_v26  ;;  %v14098_v26 = vld [vmem:[#allocation60_spill] sm:$0xff] }
 0x580   :  { %9450 = vmatprep.mubr.msk.f32.mxu1 %vm424_vm2, %v14091_v48  ;;  %v14099_v48 = vld [vmem:[#allocation61_spill] sm:$0xff] }
 0x583   :  { %9451 = vmatmul.mubr.msk.f32.gmra.mrb[100].mxu1 %vm424_vm2, %v14092_v43  ;;  %v14100_v43 = vld [vmem:[#allocation62_spill] sm:$0xff] }
 0x584   :  { %9453 = vmatprep.mubr.msk.f32.mxu1 %vm424_vm2, %v14093_v31  ;;  %v14101_v31 = vld [vmem:[#allocation63_spill] sm:$0xff] }
 0x587   :  { %9454 = vmatmul.mubr.msk.f32.gmra.mrb[102].mxu1 %vm424_vm2, %v14094_v58  ;;  %v14102_v58 = vld [vmem:[#allocation64_spill] sm:$0xff] }
 0x588   :  { %9456 = vmatprep.mubr.msk.f32.mxu1 %vm424_vm2, %v14095_v49  ;;  %v14103_v49 = vld [vmem:[#allocation65_spill] sm:$0xff] }
 0x58b   :  { %9457 = vmatmul.mubr.msk.f32.gmra.mrb[104].mxu1 %vm424_vm2, %v14096_v11  ;;  %v14104_v11 = vld [vmem:[#allocation66_spill] sm:$0xff] }
 0x58c   :  { %9459 = vmatprep.mubr.msk.f32.mxu1 %vm424_vm2, %v14097_v60  ;;  %v14105_v60 = vld [vmem:[#allocation67_spill] sm:$0xff] }
 0x58f   :  { %9460 = vmatmul.mubr.msk.f32.gmra.mrb[106].mxu1 %vm424_vm2, %v14098_v26  ;;  %v14106_v26 = vld [vmem:[#allocation68_spill] sm:$0xff] }
 0x590   :  { %9462 = vmatprep.mubr.msk.f32.mxu1 %vm424_vm2, %v14099_v48  ;;  %v14107_v48 = vld [vmem:[#allocation69_spill] sm:$0xff] }
 0x593   :  { %9463 = vmatmul.mubr.msk.f32.gmra.mrb[108].mxu1 %vm424_vm2, %v14100_v43  ;;  %v14108_v43 = vld [vmem:[#allocation70_spill] sm:$0xff] }
 0x594   :  { %9465 = vmatprep.mubr.msk.f32.mxu1 %vm424_vm2, %v14101_v31  ;;  %v14109_v31 = vld [vmem:[#allocation71_spill] sm:$0xff] }
 0x597   :  { %9466 = vmatmul.mubr.msk.f32.gmra.mrb[110].mxu1 %vm424_vm2, %v14102_v58  ;;  %v14110_v58 = vld [vmem:[#allocation72_spill] sm:$0xff] }
 0x598   :  { %9468 = vmatprep.mubr.msk.f32.mxu1 %vm424_vm2, %v14103_v49  ;;  %v14111_v49 = vld [vmem:[#allocation74_spill] sm:$0xff] }
 0x59b   :  { %9469 = vmatmul.mubr.msk.f32.gmra.mrb[112].mxu1 %vm424_vm2, %v14104_v11 }
 0x59c   :  { %9471 = vmatprep.mubr.msk.f32.mxu1 %vm424_vm2, %v14105_v60  ;;  %v7430_v60 = vld [vmem:[%s13663_s6 + $0x140] sm:$0xff] }
 0x59f   :  { %9472 = vmatmul.mubr.msk.f32.gmra.mrb[114].mxu1 %vm424_vm2, %v14106_v26  ;;  %v7431_v26 = vld [vmem:[%s13663_s6 + $0x148] sm:$0xff] }
 0x5a0   :  { %9474 = vmatprep.mubr.msk.f32.mxu1 %vm424_vm2, %v14107_v48  ;;  %v10122_v48 = vpack.c.bf16 %v7431_v26, %v7430_v60  ;;  %v14113_v60 = vld [vmem:[#allocation76_spill] sm:$0xff] }
 0x5a3   :  { %9475 = vmatmul.mubr.msk.f32.gmra.mrb[116].mxu1 %vm424_vm2, %v14108_v43  ;;  %v7432_v43 = vld [vmem:[%s13663_s6 + $0x150] sm:$0xff] }
 0x5a4   :  { %9477 = vmatprep.mubr.msk.f32.mxu1 %vm424_vm2, %v14109_v31  ;;  %v7433_v31 = vld [vmem:[%s13663_s6 + $0x158] sm:$0xff] }
 0x5a5   :  { %v10125_v40 = vpack.c.bf16 %v7433_v31, %v7432_v43  ;;  %v14117_v31 = vld [vmem:[#allocation79_spill] sm:$0xff] }
 0x5a7   :  { %9478 = vmatmul.mubr.msk.f32.gmra.mrb[118].mxu1 %vm424_vm2, %v14110_v58 }
 0x5a8   :  { %4378 = vmatprep.mubr.f32.mxu1 %v14111_v49 }
 0x605   :  { %v2701_v58 = vpop.f32.mrb[86].mxu0 }
 0x606   :  { %9369 = vmatmul.mubr.msk.f32.vlgmr.msra.gmra.mrb[88].mxu0 %vm424_vm2, %v2701_v58  ;;  %v9392_v11 = vpop.f32.mrb[60].mxu1  ;;  %v9359_v63 = vpop.f32.mrb[87].mxu0 }
 0x607   :  { %10123 = vmatpush3.bf16.msra.mxu0 %v10122_v48  ;;  %v3222_v44 = vmul.f32 %v9392_v11, %v14112_v34  ;;  %v2922_v61 = vpop.f32.mrb[61].mxu1  ;;  %9379 = vmatprep.mubr.msk.f32.mxu0 %vm10881_vm3, %v14047_v13 }
 0x608   :  { %v3221_v26 = vmul.f32 %v2922_v61, %v14113_v60  ;;  %10124 = vmatprep.subr.bf16.mxu0 %v14008_v16  ;;  %v14118_v61 = vld [vmem:[#allocation80_spill] sm:$0xff] }
 0x60a   :  { %v10137_v23 = vpack.c.bf16 %v3222_v44, %v3221_v26  ;;  %v9395_v33 = vpop.f32.mrb[62].mxu1 }
 0x60b   :  { %10126 = vmatpush3.bf16.msra.mxu0 %v10125_v40  ;;  %v3224_v54 = vmul.f32 %v9395_v33, %v14114_v30  ;;  %v2932_v58 = vpop.f32.mrb[63].mxu1  ;;  %v14119_v40 = vld [vmem:[#allocation81_spill] sm:$0xff]  ;;  %v14120_v30 = vld [vmem:[#allocation82_spill] sm:$0xff] }
 0x60c   :  { %v3223_v63 = vmul.f32 %v2932_v58, %v14115_v25 }
 0x60e   :  { %v10141_v48 = vpack.c.bf16 %v3224_v54, %v3223_v63  ;;  %9380 = vmatmul.mubr.msk.f32.vlgmr.msra.gmra.mrb[90].mxu0 %vm424_vm2, %v14116_v29  ;;  %v9398_v43 = vpop.f32.mrb[64].mxu1  ;;  %v14121_v63 = vld [vmem:[#allocation83_spill] sm:$0xff] }
 0x60f   :  { %v3226_v11 = vmul.f32 %v9398_v43, %v14117_v31  ;;  %v2942_v34 = vpop.f32.mrb[65].mxu1  ;;  %3345 = vmatprep.mubr.f32.mxu0 %v14111_v49 }
 0x610   :  { %v3225_v60 = vmul.f32 %v2942_v34, %v14118_v61  ;;  %v14124_v34 = vld [vmem:[#allocation86_spill] sm:$0xff] }
 0x612   :  { %v10145_v44 = vpack.c.bf16 %v3226_v11, %v3225_v60  ;;  %v9401_v26 = vpop.f32.mrb[66].mxu1 }
 0x613   :  { %v3228_v5 = vmul.f32 %v9401_v26, %v14119_v40  ;;  %v2952_v33 = vpop.f32.mrb[67].mxu1  ;;  %v14125_v26 = vld [vmem:[#allocation87_spill] sm:$0xff] }
 0x614   :  { %v3227_v10 = vmul.f32 %v2952_v33, %v14120_v30  ;;  %v14126_v33 = vld [vmem:[#allocation88_spill] sm:$0xff] }
 0x616   :  { %v10149_v58 = vpack.c.bf16 %v3228_v5, %v3227_v10  ;;  %v9404_v54 = vpop.f32.mrb[68].mxu1 }
 0x617   :  { %v3230_v25 = vmul.f32 %v9404_v54, %v14121_v63  ;;  %v2962_v29 = vpop.f32.mrb[69].mxu1  ;;  %v14127_v54 = vld [vmem:[#allocation89_spill] sm:$0xff] }
 0x618   :  { %v3229_v9 = vmul.f32 %v2962_v29, %v14122_v36  ;;  %v14129_v36 = vld [vmem:[#allocation91_spill] sm:$0xff] }
 0x61a   :  { %v10153_v43 = vpack.c.bf16 %v3230_v25, %v3229_v9  ;;  %v9407_v31 = vpop.f32.mrb[70].mxu1  ;;  %v14128_v9 = vld [vmem:[#allocation90_spill] sm:$0xff] }
 0x61b   :  { %v3232_v49 = vmul.f32 %v9407_v31, %v14123_v50  ;;  %v2972_v13 = vpop.f32.mrb[71].mxu1 }
 0x61c   :  { %v3231_v60 = vmul.f32 %v2972_v13, %v14124_v34 }
 0x61e   :  { %v10157_v11 = vpack.c.bf16 %v3232_v49, %v3231_v60  ;;  %v9410_v61 = vpop.f32.mrb[72].mxu1  ;;  %v14130_v60 = vld [vmem:[#allocation93_spill] sm:$0xff] }
 0x61f   :  { %v3234_v40 = vmul.f32 %v9410_v61, %v14125_v26  ;;  %v2982_v18 = vpop.f32.mrb[73].mxu1 }
 0x620   :  { %v3233_v10 = vmul.f32 %v2982_v18, %v14126_v33 }
 0x622   :  { %v10161_v5 = vpack.c.bf16 %v3234_v40, %v3233_v10  ;;  %v9413_v30 = vpop.f32.mrb[74].mxu1  ;;  %v14131_v10 = vld [vmem:[#allocation94_spill] sm:$0xff] }
 0x623   :  { %v12404_v63 = vmul.f32 %v9413_v30, %v14127_v54  ;;  %v2992_v29 = vpop.f32.mrb[75].mxu1 }
 0x624   :  { %v3235_v25 = vmul.f32 %v2992_v29, %v14128_v9 }
 0x626   :  { %v10165_v31 = vpack.c.bf16 %v12404_v63, %v3235_v25  ;;  %v9416_v50 = vpop.f32.mrb[76].mxu1 }
 0x627   :  { %v3238_v13 = vmul.f32 %v9416_v50, %v14129_v36  ;;  %v3002_v49 = vpop.f32.mrb[77].mxu1 }
 0x628   :  { %v3237_v34 = vmul.f32 %v3002_v49, %v14130_v60 }
 0x62a   :  { %v10135_v61 = vpack.c.bf16 %v3238_v13, %v3237_v34  ;;  %v9419_v26 = vpop.f32.mrb[78].mxu1 }
 0x62b   :  { %v3240_v18 = vmul.f32 %v9419_v26, %v11854_v46  ;;  %v3012_v40 = vpop.f32.mrb[79].mxu1 }
 0x62c   :  { %v3239_v33 = vmul.f32 %v3012_v40, %v14131_v10  ;;  %10136 = vmatprep.subr.bf16.mxu0 %v10135_v61 }
 0x62d   :  { %10138 = vmatpush3.bf16.msra.mxu0 %v10137_v23 }
 0x62e   :  { %v10139_v30 = vpack.c.bf16 %v3240_v18, %v3239_v33  ;;  %v9422_v54 = vpop.f32.mrb[80].mxu1 }
 0x62f   :  { %v3242_v29 = vmul.f32 %v9422_v54, %v11866_v62  ;;  %v3022_v63 = vpop.f32.mrb[81].mxu1 }
 0x630   :  { %v3241_v25 = vmul.f32 %v3022_v63, %v11873_v39  ;;  %10140 = vmatprep.subr.bf16.mxu0 %v10139_v30 }
 0x631   :  { %10142 = vmatpush3.bf16.msra.mxu0 %v10141_v48 }
 0x632   :  { %v10143_v50 = vpack.c.bf16 %v3242_v29, %v3241_v25  ;;  %v9425_v49 = vpop.f32.mrb[82].mxu1 }
 0x633   :  { %v3244_v34 = vmul.f32 %v9425_v49, %v11881_v4  ;;  %v3032_v13 = vpop.f32.mrb[83].mxu1 }
 0x634   :  { %v3243_v26 = vmul.f32 %v3032_v13, %v11888_v52  ;;  %10144 = vmatprep.subr.bf16.mxu0 %v10143_v50 }
 0x635   :  { %10146 = vmatpush3.bf16.msra.mxu0 %v10145_v44 }
 0x636   :  { %v10147_v61 = vpack.c.bf16 %v3244_v34, %v3243_v26  ;;  %v9428_v23 = vpop.f32.mrb[84].mxu1 }
 0x637   :  { %v3246_v33 = vmul.f32 %v9428_v23, %v11896_v19  ;;  %v3042_v18 = vpop.f32.mrb[85].mxu1 }
 0x638   :  { %v3245_v54 = vmul.f32 %v3042_v18, %v11903_v8  ;;  %10148 = vmatprep.subr.bf16.mxu0 %v10147_v61 }
 0x639   :  { %10150 = vmatpush3.bf16.msra.mxu0 %v10149_v58 }
 0x63a   :  { %v10151_v40 = vpack.c.bf16 %v3246_v33, %v3245_v54  ;;  %v9431_v48 = vpop.f32.mrb[86].mxu1 }
 0x63b   :  { %v3248_v30 = vmul.f32 %v9431_v48, %v11911_v3  ;;  %v3052_v29 = vpop.f32.mrb[87].mxu1 }
 0x63c   :  { %v3247_v63 = vmul.f32 %v3052_v29, %v11916_v0  ;;  %10152 = vmatprep.subr.bf16.mxu0 %v10151_v40 }
 0x63d   :  { %10154 = vmatpush3.bf16.msra.mxu0 %v10153_v43 }
 0x63e   :  { %v10155_v25 = vpack.c.bf16 %v3248_v30, %v3247_v63  ;;  %v9434_v44 = vpop.f32.mrb[88].mxu1 }
 0x63f   :  { %v3250_v50 = vmul.f32 %v9434_v44, %v11922_v45  ;;  %v3062_v49 = vpop.f32.mrb[89].mxu1 }
 0x640   :  { %v3249_v34 = vmul.f32 %v3062_v49, %v11927_v59  ;;  %10156 = vmatprep.subr.bf16.mxu0 %v10155_v25 }
 0x641   :  { %10158 = vmatpush3.bf16.msra.mxu0 %v10157_v11 }
 0x642   :  { %v10159_v13 = vpack.c.bf16 %v3250_v50, %v3249_v34  ;;  %v9437_v58 = vpop.f32.mrb[90].mxu1 }
 0x643   :  { %v3252_v26 = vmul.f32 %v9437_v58, %v11933_v38  ;;  %v3072_v61 = vpop.f32.mrb[91].mxu1 }
 0x644   :  { %v3251_v23 = vmul.f32 %v3072_v61, %v11938_v42  ;;  %10160 = vmatprep.subr.bf16.mxu0 %v10159_v13 }
 0x645   :  { %10162 = vmatpush3.bf16.msra.mxu0 %v10161_v5 }
 0x646   :  { %v10163_v33 = vpack.c.bf16 %v3252_v26, %v3251_v23  ;;  %v9440_v43 = vpop.f32.mrb[92].mxu1 }
 0x647   :  { %v3254_v18 = vmul.f32 %v9440_v43, %v11944_v20  ;;  %v3082_v54 = vpop.f32.mrb[93].mxu1 }
 0x648   :  { %v3253_v40 = vmul.f32 %v3082_v54, %v11949_v35  ;;  %10164 = vmatprep.subr.bf16.mxu0 %v10163_v33 }
 0x649   :  { %10166 = vmatpush3.bf16.msra.mxu0 %v10165_v31 }
 0x64a   :  { %v10168_v48 = vpack.c.bf16 %v3254_v18, %v3253_v40  ;;  %v9443_v11 = vpop.f32.mrb[94].mxu1  ;;  %10167 = vmatprep.subr.bf16.mxu0 %v14008_v16 }
 0x64b   :  { %v3256_v30 = vmul.f32 %v9443_v11, %v11961_v47  ;;  %v3092_v29 = vpop.f32.mrb[95].mxu1 }
 0x64c   :  { %v3255_v63 = vmul.f32 %v3092_v29, %v11968_v53  ;;  %3346 = vmatmul.mubr.f32.vlgmr.msra.gmra.mrb[92].mxu0 %v11959_v22 }
 0x64d   :  { %10169 = vmatpush1.bf16.msra.mxu0 %v10168_v48  ;;  %3350 = vmatprep.mubr.f32.mxu0 %v11966_v55 }
 0x64e   :  { %v10171_v5 = vpack.c.bf16 %v3256_v30, %v3255_v63  ;;  %v9446_v25 = vpop.f32.mrb[96].mxu1  ;;  %10170 = vmatprep.subr.bf16.mxu0 %v14008_v16 }
 0x64f   :  { %v3258_v31 = vmul.f32 %v9446_v25, %v11981_v17  ;;  %v3102_v44 = vpop.f32.mrb[97].mxu1 }
 0x650   :  { %v3257_v50 = vmul.f32 %v3102_v44, %v11986_v27  ;;  %3351 = vmatmul.mubr.f32.gmra.mrb[94].mxu0 %v11979_v32 }
 0x651   :  { %10172 = vmatpush1.bf16.msra.mxu0 %v10171_v5  ;;  %3355 = vmatprep.mubr.f32.mxu0 %v11984_v56 }
 0x652   :  { %v10174_v49 = vpack.c.bf16 %v3258_v31, %v3257_v50  ;;  %v9449_v34 = vpop.f32.mrb[98].mxu1  ;;  %10173 = vmatprep.subr.bf16.mxu0 %v14008_v16  ;;  %v14132_v31 = vld [vmem:[#allocation106_spill] sm:$0xff] }
 0x653   :  { %v3260_v13 = vmul.f32 %v9449_v34, %v11999_v2  ;;  %v3112_v58 = vpop.f32.mrb[99].mxu1  ;;  %v14133_v34 = vld [vmem:[#allocation107_spill] sm:$0xff] }
 0x654   :  { %v3259_v26 = vmul.f32 %v3112_v58, %v12004_v41  ;;  %3356 = vmatmul.mubr.f32.gmra.mrb[96].mxu0 %v11997_v15 }
 0x655   :  { %10175 = vmatpush1.bf16.msra.mxu0 %v10174_v49  ;;  %3360 = vmatprep.mubr.f32.mxu0 %v12002_v21 }
 0x656   :  { %v10177_v61 = vpack.c.bf16 %v3260_v13, %v3259_v26  ;;  %v9452_v23 = vpop.f32.mrb[100].mxu1  ;;  %10176 = vmatprep.subr.bf16.mxu0 %v14008_v16  ;;  %v14134_v26 = vld [vmem:[#allocation108_spill] sm:$0xff] }
 0x657   :  { %v3262_v33 = vmul.f32 %v9452_v23, %v12019_v12  ;;  %v3122_v43 = vpop.f32.mrb[101].mxu1 }
 0x658   :  { %v3261_v18 = vmul.f32 %v3122_v43, %v12025_v37  ;;  %3361 = vmatmul.mubr.f32.gmra.mrb[98].mxu0 %v12017_v6  ;;  %v14135_v43 = vld [vmem:[#allocation109_spill] sm:$0xff] }
 0x659   :  { %10178 = vmatpush1.bf16.msra.mxu0 %v10177_v61  ;;  %7581 = vmatprep.mubr.msk.f32.mxu0 %vm2168_vm4, %v12023_v1 }
 0x65a   :  { %v10180_v54 = vpack.c.bf16 %v3262_v33, %v3261_v18  ;;  %v9455_v40 = vpop.f32.mrb[102].mxu1  ;;  %10179 = vmatprep.subr.bf16.mxu0 %v14008_v16 }
 0x65b   :  { %v3264_v48 = vmul.f32 %v9455_v40, %v12033_v51  ;;  %v3132_v11 = vpop.f32.mrb[103].mxu1  ;;  %v14136_v40 = vld [vmem:[#allocation110_spill] sm:$0xff] }
 0x65c   :  { %v3263_v30 = vmul.f32 %v3132_v11, %v12037_v28 }
 0x65d   :  { %10181 = vmatpush1.bf16.msra.mxu0 %v10180_v54 }
 0x65e   :  { %v10183_v29 = vpack.c.bf16 %v3264_v48, %v3263_v30  ;;  %v9458_v63 = vpop.f32.mrb[104].mxu1  ;;  %10182 = vmatprep.subr.bf16.mxu0 %v14008_v16 }
 0x65f   :  { %v3266_v5 = vmul.f32 %v9458_v63, %v12044_v57  ;;  %v3142_v25 = vpop.f32.mrb[105].mxu1 }
 0x660   :  { %v3265_v44 = vmul.f32 %v3142_v25, %v14132_v31  ;;  %v14138_v25 = vld [vmem:[#allocation112_spill] sm:$0xff] }
 0x661   :  { %10184 = vmatpush1.bf16.msra.mxu0 %v10183_v29  ;;  %v14137_v29 = vld [vmem:[#allocation111_spill] sm:$0xff] }
 0x662   :  { %v10186_v50 = vpack.c.bf16 %v3266_v5, %v3265_v44  ;;  %v9461_v49 = vpop.f32.mrb[106].mxu1  ;;  %10185 = vmatprep.subr.bf16.mxu0 %v14008_v16 }
 0x663   :  { %v3268_v13 = vmul.f32 %v9461_v49, %v14133_v34  ;;  %v3152_v58 = vpop.f32.mrb[107].mxu1 }
 0x664   :  { %v3267_v61 = vmul.f32 %v3152_v58, %v14134_v26 }
 0x665   :  { %10187 = vmatpush1.bf16.msra.mxu0 %v10186_v50 }
 0x666   :  { %v10189_v23 = vpack.c.bf16 %v3268_v13, %v3267_v61  ;;  %v9464_v33 = vpop.f32.mrb[108].mxu1  ;;  %10188 = vmatprep.subr.bf16.mxu0 %v14008_v16  ;;  %v14139_v13 = vld [vmem:[#allocation92_spill] sm:$0xff] }
 0x667   :  { %v3270_v18 = vmul.f32 %v9464_v33, %v14135_v43  ;;  %v3162_v54 = vpop.f32.mrb[109].mxu1  ;;  %v14140_v33 = vld [vmem:[#allocation113_spill] sm:$0xff] }
 0x668   :  { %v3269_v48 = vmul.f32 %v3162_v54, %v14136_v40  ;;  %v14142_v40 = vld [vmem:[#allocation114_spill] sm:$0xff] }
 0x669   :  { %10190 = vmatpush1.bf16.msra.mxu0 %v10189_v23 }
 0x66a   :  { %v10192_v11 = vpack.c.bf16 %v3270_v18, %v3269_v48  ;;  %v9467_v30 = vpop.f32.mrb[110].mxu1  ;;  %10191 = vmatprep.subr.bf16.mxu0 %v14008_v16  ;;  %v14141_v48 = vld [vmem:[#allocation95_spill] sm:$0xff] }
 0x66b   :  { %v3272_v63 = vmul.f32 %v9467_v30, %v14137_v29  ;;  %v3172_v5 = vpop.f32.mrb[111].mxu1 }
 0x66c   :  { %v3271_v44 = vmul.f32 %v3172_v5, %v14138_v25  ;;  %v14144_v25 = vld [vmem:[#allocation116_spill] sm:$0xff] }
 0x66d   :  { %10193 = vmatpush1.bf16.msra.mxu0 %v10192_v11 }
 0x66e   :  { %v10195_v50 = vpack.c.bf16 %v3272_v63, %v3271_v44  ;;  %v9470_v49 = vpop.f32.mrb[112].mxu1  ;;  %10194 = vmatprep.subr.bf16.mxu0 %v14008_v16  ;;  %v14143_v44 = vld [vmem:[#allocation115_spill] sm:$0xff] }
 0x66f   :  { %v3274_v58 = vmul.f32 %v9470_v49, %v14139_v13  ;;  %v3182_v61 = vpop.f32.mrb[113].mxu1 }
 0x670   :  { %v3273_v54 = vmul.f32 %v3182_v61, %v14140_v33 }
 0x671   :  { %10196 = vmatpush1.bf16.msra.mxu0 %v10195_v50 }
 0x672   :  { %v10198_v23 = vpack.c.bf16 %v3274_v58, %v3273_v54  ;;  %v9473_v18 = vpop.f32.mrb[114].mxu1  ;;  %10197 = vmatprep.subr.bf16.mxu0 %v14008_v16  ;;  %v14145_v54 = vld [vmem:[#allocation117_spill] sm:$0xff] }
 0x673   :  { %v3276_v30 = vmul.f32 %v9473_v18, %v14141_v48  ;;  %v3192_v29 = vpop.f32.mrb[115].mxu1 }
 0x674   :  { %v3275_v5 = vmul.f32 %v3192_v29, %v14142_v40  ;;  %v7589_v29 = vld [vmem:[%s13663_s6 + $0xc0] sm:$0xff] }
 0x675   :  { %10199 = vmatpush1.bf16.msra.mxu0 %v10198_v23  ;;  %v7590_v23 = vld [vmem:[%s13663_s6 + $0xc8] sm:$0xff] }
 0x676   :  { %v10201_v11 = vpack.c.bf16 %v3276_v30, %v3275_v5  ;;  %v9476_v63 = vpop.f32.mrb[116].mxu1  ;;  %10200 = vmatprep.subr.bf16.mxu0 %v14008_v16  ;;  %v14146_v30 = vld [vmem:[#allocation118_spill] sm:$0xff] }
 0x677   :  { %v3278_v49 = vmul.f32 %v9476_v63, %v14143_v44  ;;  %v3202_v13 = vpop.f32.mrb[117].mxu1  ;;  %v7591_v63 = vld [vmem:[%s13663_s6 + $0xd0] sm:$0xff] }
 0x678   :  { %v3277_v61 = vmul.f32 %v3202_v13, %v14144_v25 }
 0x679   :  { %10202 = vmatpush1.bf16.msra.mxu0 %v10201_v11  ;;  %v10209_v11 = vpack.c.bf16 %v7590_v23, %v7589_v29  ;;  %v14152_v29 = vld [vmem:[#allocation124_spill] sm:$0xff]  ;;  %v14153_v23 = vld [vmem:[#allocation125_spill] sm:$0xff] }
 0x67a   :  { %v10204_v50 = vpack.c.bf16 %v3278_v49, %v3277_v61  ;;  %v9479_v58 = vpop.f32.mrb[118].mxu1  ;;  %10203 = vmatprep.subr.bf16.mxu0 %v14008_v16  ;;  %v7592_v49 = vld [vmem:[%s13663_s6 + $0xd8] sm:$0xff] }
 0x67b   :  { %v3280_v18 = vmul.f32 %v9479_v58, %v14145_v54  ;;  %v3212_v48 = vpop.f32.mrb[119].mxu1  ;;  %v10213_v61 = vpack.c.bf16 %v7592_v49, %v7591_v63  ;;  %v14147_v58 = vld [vmem:[#allocation119_spill] sm:$0xff]  ;;  %v14148_v54 = vld [vmem:[#allocation120_spill] sm:$0xff] }
 0x67c   :  { %v3279_v5 = vmul.f32 %v3212_v48, %v14146_v30  ;;  %v14149_v48 = vld [vmem:[#allocation121_spill] sm:$0xff] }
 0x67d   :  { %10205 = vmatpush1.bf16.msra.mxu0 %v10204_v50  ;;  %v14150_v50 = vld [vmem:[#allocation122_spill] sm:$0xff] }
 0x67e   :  { %v10207_v13 = vpack.c.bf16 %v3280_v18, %v3279_v5  ;;  %10206 = vmatprep.subr.bf16.mxu0 %v14008_v16  ;;  %v14151_v18 = vld [vmem:[#allocation123_spill] sm:$0xff] }
 0x67f   :  { %v14154_v5 = vld [vmem:[#allocation11_spill] sm:$0xff] }
 0x681   :  { %10208 = vmatpush1.bf16.msra.mxu0 %v10207_v13  ;;  %v7585_v13 = vld [vmem:[%s13663_s6 + $0x20] sm:$0xff] }
 0x682   :  { %10210 = vmatprep.subr.bf16.mxu0 %v10209_v11 }
 0x684   :  { %3431 = vmatmul.mubr.f32.vlgmr.msra.gmra.mrb[100].mxu0 %v14147_v58 }
 0x685   :  { %7582 = vmatprep.mubr.msk.f32.mxu0 %vm2168_vm4, %v14148_v54  ;;  %10212 = vmatpush3.bf16.msra.mxu0 %v10209_v11  ;;  %v7586_v11 = vld [vmem:[%s13663_s6 + $0x28] sm:$0xff] }
 0x686   :  { %10214 = vmatprep.subr.bf16.mxu0 %v10213_v61  ;;  %v10217_v63 = vpack.c.bf16 %v7586_v11, %v7585_v13 }
 0x688   :  { %3436 = vmatmul.mubr.f32.gmra.mrb[102].mxu0 %v14149_v48 }
 0x689   :  { %7583 = vmatprep.mubr.msk.f32.mxu0 %vm2168_vm4, %v14150_v50  ;;  %10216 = vmatpush3.bf16.msra.mxu0 %v10213_v61 }
 0x68a   :  { %10218 = vmatprep.subr.bf16.mxu0 %v10217_v63 }
 0x68c   :  { %3441 = vmatmul.mubr.f32.gmra.mrb[104].mxu0 %v14151_v18 }
 0x68d   :  { %7584 = vmatprep.mubr.msk.f32.mxu0 %vm2168_vm4, %v14152_v29 }
 0x690   :  { %3446 = vmatmul.mubr.f32.gmra.mrb[106].mxu0 %v14153_v23 }
 0x691   :  { %9488 = vmatprep.mubr.msk.f32.mxu0 %vm424_vm2, %v12219_v14  ;;  %v7587_v14 = vld [vmem:[%s13663_s6 + $0x30] sm:$0xff] }
 0x694   :  { %9489 = vmatmul.mubr.msk.f32.vlgmr.msra.gmra.mrb[108].mxu0 %vm424_vm2, %v12221_v24  ;;  %v7588_v24 = vld [vmem:[%s13663_s6 + $0x38] sm:$0xff] }
 0x695   :  { %9491 = vmatprep.mubr.msk.f32.mxu0 %vm424_vm2, %v12223_v7  ;;  %10220 = vmatpush3.bf16.msra.mxu0 %v10217_v63  ;;  %v10221_v49 = vpack.c.bf16 %v7588_v24, %v7587_v14 }
 0x697   :  { %10222 = vmatprep.subr.bf16.mxu0 %v10221_v49 }
 0x698   :  { %9492 = vmatmul.mubr.msk.f32.gmra.mrb[110].mxu0 %vm424_vm2, %v14154_v5 }
 0x699   :  { %10224 = vmatpush3.bf16.msra.mxu0 %v10221_v49 }
 0x69a   :  { %10225 = vmatprep.subr.bf16.mxu0 %v14008_v16 }
 0x6d9   :  { %v2779_v7 = vpop.f32.mrb[88].mxu0 }
 0x6da   :  { %v9370_v61 = vpop.f32.mrb[89].mxu0 }
 0x6e1   :  { %v2852_v5 = vpop.f32.mrb[90].mxu0 }
 0x6e2   :  { %v12518_v23 = vadd.f32 %v2852_v5, %v2779_v7  ;;  %v9381_v13 = vpop.f32.mrb[91].mxu0 }
 0x71f   :  { %v8561_v11 = vpop.f32.mrb[92].mxu0 }
 0x720   :  { %v8562_v63 = vpop.f32.mrb[93].mxu0 }
 0x721   :  { %v8563_v29 = vadd.f32 %v8562_v63, %v8561_v11 }
 0x723   :  { %v8564_v18 = vpop.f32.mrb[94].mxu0 }
 0x724   :  { %v8565_v50 = vpop.f32.mrb[95].mxu0 }
 0x725   :  { %v8566_v48 = vadd.f32 %v8565_v50, %v8564_v18 }
 0x727   :  { %v8567_v54 = vpop.f32.mrb[96].mxu0 }
 0x728   :  { %v8568_v58 = vpop.f32.mrb[97].mxu0 }
 0x729   :  { %v8569_v30 = vadd.f32 %v8568_v58, %v8567_v54 }
 0x72b   :  { %v8570_v25 = vpop.f32.mrb[98].mxu0 }
 0x72c   :  { %v8571_v14 = vpop.f32.mrb[99].mxu0 }
 0x72d   :  { %v8572_v24 = vadd.f32 %v8571_v14, %v8570_v25  ;;  %v14155_v25 = vmov 0.0  }
 0x757   :  { %v3432_v61 = vpop.f32.mrb[100].mxu0 }
 0x758   :  { %v3433_v49 = vadd.f32 %v8563_v29, %v3432_v61  ;;  %v3434_v44 = vpop.f32.mrb[101].mxu0 }
 0x759   :  { %v3655_v44 = vld [vmem:[%s13664_s7 + $0x1] ss:$0 sm:$0xff] }
 0x75a   :  { %9502 = vmatprep.mubr.msk.f32.mxu0 %vm424_vm2, %v3433_v49 }
 0x75b   :  { %v3437_v7 = vpop.f32.mrb[102].mxu0 }
 0x75c   :  { %v3438_v5 = vadd.f32 %v8566_v48, %v3437_v7  ;;  %v3439_v13 = vpop.f32.mrb[103].mxu0 }
 0x75e   :  { %9503 = vmatmul.mubr.msk.f32.vlgmr.msra.gmra.mrb[108].mxu0 %vm424_vm2, %v3438_v5 }
 0x75f   :  { %v3442_v11 = vpop.f32.mrb[104].mxu0 }
 0x760   :  { %v3443_v63 = vadd.f32 %v8569_v30, %v3442_v11  ;;  %v3444_v40 = vpop.f32.mrb[105].mxu0 }
 0x762   :  { %9505 = vmatprep.mubr.msk.f32.mxu0 %vm424_vm2, %v3443_v63 }
 0x763   :  { %v3447_v50 = vpop.f32.mrb[106].mxu0 }
 0x764   :  { %v3448_v54 = vadd.f32 %v8572_v24, %v3447_v50  ;;  %v3449_v58 = vpop.f32.mrb[107].mxu0 }
 0x766   :  { %9506 = vmatmul.mubr.msk.f32.gmra.mrb[110].mxu0 %vm424_vm2, %v3448_v54 }
 0x767   :  { %9516 = vmatprep.mubr.msk.f32.mxu0 %vm10881_vm3, %v14155_v25 }
 0x831   :  { %v9504_v48 = vpop.f32.mrb[108].mxu0 }
 0x832   :  { %v3657_v18 = vadd.f32 %v9504_v48, %v3655_v44  ;;  %v3636_v29 = vpop.f32.mrb[109].mxu0 }
 0x833   :  { %v3656_v14 = vadd.f32 %v3655_v44, %v3636_v29 }
 0x834   :  { %v7602_v30 = vmul.f32 -1.442695, %v3657_v18 }
 0x835   :  { %v7601_v40 = vmul.f32 -1.442695, %v3656_v14 }
 0x836   :  { %10749 = vpow2.f32 %v7602_v30 }
 0x837   :  { %10751 = vpow2.f32 %v7601_v40 }
 0x839   :  { %v9507_v61 = vpop.f32.mrb[110].mxu0 }
 0x83a   :  { %v3659_v24 = vadd.f32 %v9507_v61, %v3655_v44  ;;  %v3646_v49 = vpop.f32.mrb[111].mxu0 }
 0x83b   :  { %v3658_v7 = vadd.f32 %v3655_v44, %v3646_v49 }
 0x83c   :  { %v7604_v5 = vmul.f32 -1.442695, %v3659_v24 }
 0x83d   :  { %v7603_v13 = vmul.f32 -1.442695, %v3658_v7 }
 0x83e   :  { %10753 = vpow2.f32 %v7604_v5 }
 0x83f   :  { %10755 = vpow2.f32 %v7603_v13 }
 0x840   :  { %v10750_v11 = vpop.eup %10749 }
 0x841   :  { %v10752_v63 = vpop.eup %10751  ;;  %v3673_v50 = vadd.f32 1.0, %v10750_v11 }
 0x842   :  { %v3672_v54 = vadd.f32 1.0, %v10752_v63 }
 0x843   :  { %10757 = vrcp.f32 %v3673_v50 }
 0x844   :  { %10759 = vrcp.f32 %v3672_v54 }
 0x848   :  { %v10754_v58 = vpop.eup %10753 }
 0x849   :  { %v10756_v48 = vpop.eup %10755  ;;  %v3675_v29 = vadd.f32 1.0, %v10754_v58 }
 0x84a   :  { %v3674_v33 = vadd.f32 1.0, %v10756_v48 }
 0x84b   :  { %10761 = vrcp.f32 %v3675_v29 }
 0x84c   :  { %10763 = vrcp.f32 %v3674_v33 }
 0x84d   :  { %v10758_v30 = vpop.eup %10757 }
 0x84e   :  { %v10760_v40 = vpop.eup %10759  ;;  %v3685_v61 = vmul.f32 %v10758_v30, %v3657_v18 }
 0x84f   :  { %v3684_v44 = vmul.f32 %v10760_v40, %v3656_v14 }
 0x850   :  { %v3689_v49 = vsel %vm424_vm2, %v3685_v61, 0.0  ;;  %v3703_v5 = vmul.f32 %v3685_v61, %v3685_v61 }
 0x851   :  { %v3688_v13 = vsel %vm424_vm2, %v3684_v44, 0.0  ;;  %v3702_v43 = vmul.f32 %v3684_v44, %v3684_v44 }
 0x852   :  { %v3707_v11 = vsel %vm424_vm2, %v3703_v5, 0.0  ;;  %v3690_v63 = vadd.f32 %v3689_v49, %v3688_v13 }
 0x853   :  { %v3706_v50 = vsel %vm424_vm2, %v3702_v43, 0.0 }
 0x854   :  { %v3708_v54 = vadd.f32 %v3707_v11, %v3706_v50 }
 0x855   :  { %v10762_v58 = vpop.eup %10761 }
 0x856   :  { %v10764_v48 = vpop.eup %10763  ;;  %v3687_v29 = vmul.f32 %v10762_v58, %v3659_v24 }
 0x857   :  { %v3686_v33 = vmul.f32 %v10764_v48, %v3658_v7 }
 0x858   :  { %v3705_v26 = vmul.f32 %v3687_v29, %v3687_v29  ;;  %v3693_v40 = vsel %vm424_vm2, %v3687_v29, 0.0 }
 0x859   :  { %v3691_v18 = vsel %vm424_vm2, %v3686_v33, 0.0  ;;  %v3704_v14 = vmul.f32 %v3686_v33, %v3686_v33 }
 0x85a   :  { %v3692_v30 = vadd.f32 %v3691_v18, %v3690_v63  ;;  %v3711_v49 = vsel %vm424_vm2, %v3705_v26, 0.0 }
 0x85b   :  { %v3709_v34 = vsel %vm424_vm2, %v3704_v14, 0.0 }
 0x85c   :  { %v3694_v31 = vadd.f32 %v3693_v40, %v3692_v30  ;;  %v3710_v57 = vadd.f32 %v3709_v34, %v3708_v54 }
 0x85e   :  { %v3695_v5 = vrot.slane %v3694_v31, 4  ;;  %v3712_v43 = vadd.f32 %v3711_v49, %v3710_v57 }
 0x860   :  { %v3696_v13 = vadd.f32 %v3695_v5, %v3694_v31  ;;  %v3713_v11 = vrot.slane %v3712_v43, 4 }
 0x862   :  { %v3697_v50 = vrot.slane %v3696_v13, 2  ;;  %v3714_v24 = vadd.f32 %v3713_v11, %v3712_v43  ;;  %v14156_v11 = vld [vmem:[#allocation9_spill] sm:$0xff] }
 0x864   :  { %v3698_v7 = vadd.f32 %v3697_v50, %v3696_v13  ;;  %v3715_v58 = vrot.slane %v3714_v24, 2 }
 0x866   :  { %v3699_v48 = vrot.slane %v3698_v7, 1  ;;  %v3716_v28 = vadd.f32 %v3715_v58, %v3714_v24  ;;  %v7607_v58 = vld [vmem:[%s13663_s6 + $0x188] sm:$0xff] }
 0x868   :  { %v3700_v51 = vadd.f32 %v3699_v48, %v3698_v7  ;;  %v3717_v63 = vrot.slane %v3716_v28, 1  ;;  %v7606_v7 = vld [vmem:[%s13663_s6 + $0x180] sm:$0xff] }
 0x86a   :  { %v3701_v18 = vmul.f32 0.03125, %v3700_v51  ;;  %v3718_v1 = vadd.f32 %v3717_v63, %v3716_v28  ;;  %v14157_v28 = vld [vmem:[#allocation8_spill] sm:$0xff]  ;;  %v10232_v63 = vpack.c.bf16 %v7607_v58, %v7606_v7  ;;  %v14173_v7 = vld [vmem:[#allocation27_spill] sm:$0xff] }
 0x86b   :  { %v14174_v58 = vld [vmem:[#allocation28_spill] sm:$0xff] }
 0x86c   :  { %v3719_v6 = vmul.f32 0.03125, %v3718_v1  ;;  %v3720_v14 = vmul.f32 %v3701_v18, %v3701_v18  ;;  %v3724_v30 = vsub.f32 %v3686_v33, %v3701_v18  ;;  %v3722_v34 = vsub.f32 %v3684_v44, %v3701_v18 }
 0x86d   :  { %v3723_v54 = vsub.f32 %v3685_v61, %v3701_v18  ;;  %v3725_v26 = vsub.f32 %v3687_v29, %v3701_v18  ;;  %v7608_v18 = vld [vmem:[%s13663_s6 + $0x190] sm:$0xff] }
 0x86e   :  { %v3721_v40 = vsub.f32 %v3719_v6, %v3720_v14  ;;  %v7609_v14 = vld [vmem:[%s13663_s6 + $0x198] sm:$0xff] }
 0x870   :  { %v3726_v57 = vadd.f32 1e-05, %v3721_v40  ;;  %v14159_v40 = vld [vmem:[#allocation13_spill] sm:$0xff] }
 0x872   :  { %10765 = vrsqrt.f32 %v3726_v57  ;;  %v14160_v57 = vld [vmem:[#allocation14_spill] sm:$0xff] }
 0x87c   :  { %v10766_v31 = vpop.eup %10765 }
 0x87d   :  { %v3730_v49 = vmul.f32 %v10766_v31, %v3724_v30  ;;  %v3728_v5 = vmul.f32 %v10766_v31, %v3722_v34  ;;  %v3729_v43 = vmul.f32 %v10766_v31, %v3723_v54  ;;  %v3731_v13 = vmul.f32 %v10766_v31, %v3725_v26  ;;  %v14158_v30 = vld [vmem:[#allocation12_spill] sm:$0xff]  ;;  %v14161_v31 = vld [vmem:[#allocation15_spill] sm:$0xff] }
 0x87e   :  { %v10235_v34 = vpack.c.bf16 %v7609_v14, %v7608_v18  ;;  %v14177_v18 = vld [vmem:[#allocation31_spill] sm:$0xff]  ;;  %v14178_v14 = vld [vmem:[#allocation32_spill] sm:$0xff] }
 0x87f   :  { %v3734_v50 = vmul.f32 %v14156_v11, %v3730_v49  ;;  %v3732_v24 = vmul.f32 %v14156_v11, %v3728_v5  ;;  %v3733_v51 = vmul.f32 %v14156_v11, %v3729_v43  ;;  %v3735_v1 = vmul.f32 %v14156_v11, %v3731_v13  ;;  %v14162_v49 = vld [vmem:[#allocation16_spill] sm:$0xff]  ;;  %v14163_v5 = vld [vmem:[#allocation17_spill] sm:$0xff]  ;;  %v14164_v43 = vld [vmem:[#allocation18_spill] sm:$0xff] }
 0x880   :  { %v14165_v13 = vld [vmem:[#allocation19_spill] sm:$0xff]  ;;  %v14166_v11 = vld [vmem:[#allocation20_spill] sm:$0xff] }
 0x881   :  { %v12542_v44 = vadd.f32 %v14157_v28, %v3732_v24  ;;  %v12545_v6 = vadd.f32 %v14157_v28, %v3733_v51  ;;  %v12550_v29 = vadd.f32 %v14157_v28, %v3734_v50  ;;  %v12553_v33 = vadd.f32 %v14157_v28, %v3735_v1  ;;  %v14167_v50 = vld [vmem:[#allocation21_spill] sm:$0xff]  ;;  %v14168_v24 = vld [vmem:[#allocation22_spill] sm:$0xff]  ;;  %v14169_v51 = vld [vmem:[#allocation23_spill] sm:$0xff] }
 0x882   :  { %v14170_v1 = vld [vmem:[#allocation24_spill] sm:$0xff]  ;;  %v14171_v28 = vld [vmem:[#allocation25_spill] sm:$0xff] }
 0x883   :  { %v10226_v61 = vpack.c.bf16 %v12545_v6, %v12542_v44  ;;  %v10229_v48 = vpack.c.bf16 %v12553_v33, %v12550_v29 }
 0x885   :  { %10227 = vmatpush3.bf16.msra.mxu0 %v10226_v61 }
 0x886   :  { %10228 = vmatprep.subr.bf16.mxu0 %v14008_v16 }
 0x889   :  { %10230 = vmatpush3.bf16.msra.mxu0 %v10229_v48 }
 0x88a   :  { %10231 = vmatprep.subr.bf16.mxu0 %v14008_v16 }
 0x88c   :  { %9517 = vmatmul.mubr.msk.f32.vlgmr.msra.gmra.mrb[112].mxu0 %vm424_vm2, %v14158_v30 }
 0x88d   :  { %10233 = vmatpush3.bf16.msra.mxu0 %v10232_v63  ;;  %9527 = vmatprep.mubr.msk.f32.mxu0 %vm10881_vm3, %v14155_v25  ;;  %v14176_v63 = vld [vmem:[#allocation30_spill] sm:$0xff] }
 0x88e   :  { %10234 = vmatprep.subr.bf16.mxu0 %v14008_v16 }
 0x891   :  { %10236 = vmatpush3.bf16.msra.mxu0 %v10235_v34  ;;  %v14179_v34 = vld [vmem:[#allocation33_spill] sm:$0xff] }
 0x892   :  { %10238 = vmatprep.subr.bf16.mxu0 %v10226_v61 }
 0x95f   :  { %v3806_v54 = vpop.f32.mrb[112].mxu0 }
 0x960   :  { %9528 = vmatmul.mubr.msk.f32.vlgmr.msra.gmra.mrb[114].mxu0 %vm424_vm2, %v3806_v54  ;;  %v9518_v26 = vpop.f32.mrb[113].mxu0  ;;  %v14180_v54 = vld [vmem:[#allocation34_spill] sm:$0xff] }
 0x961   :  { %10240 = vmatpush3.bf16.msra.mxu0 %v10226_v61  ;;  %9538 = vmatprep.mubr.msk.f32.mxu0 %vm424_vm2, %v14159_v40  ;;  %v14172_v61 = vld [vmem:[#allocation26_spill] sm:$0xff]  ;;  %v14181_v26 = vld [vmem:[#allocation35_spill] sm:$0xff] }
 0x962   :  { %10242 = vmatprep.subr.bf16.mxu0 %v10229_v48 }
 0x965   :  { %10244 = vmatpush3.bf16.msra.mxu0 %v10229_v48  ;;  %v14175_v48 = vld [vmem:[#allocation29_spill] sm:$0xff] }
 0x966   :  { %10341 = vmatprep.subr.bf16.mxu0 %v14008_v16 }
 0x968   :  { %9539 = vmatmul.mubr.msk.f32.vlgmr.msra.gmra.mrb[116].mxu0 %vm424_vm2, %v14160_v57 }
 0x969   :  { %9541 = vmatprep.mubr.msk.f32.mxu0 %vm424_vm2, %v14161_v31 }
 0x96c   :  { %9542 = vmatmul.mubr.msk.f32.gmra.mrb[118].mxu0 %vm424_vm2, %v14162_v49 }
 0x96d   :  { %9544 = vmatprep.mubr.msk.f32.mxu0 %vm424_vm2, %v14163_v5  ;;  %v14224_v5 = vld [vmem:[#allocation79_spill] sm:$0xff] }
 0x970   :  { %9545 = vmatmul.mubr.msk.f32.gmra.mrb[120].mxu0 %vm424_vm2, %v14164_v43 }
 0x971   :  { %9547 = vmatprep.mubr.msk.f32.mxu0 %vm424_vm2, %v14165_v13 }
 0x974   :  { %9548 = vmatmul.mubr.msk.f32.gmra.mrb[122].mxu0 %vm424_vm2, %v14166_v11 }
 0x975   :  { %9550 = vmatprep.mubr.msk.f32.mxu0 %vm424_vm2, %v14167_v50 }
 0x978   :  { %9551 = vmatmul.mubr.msk.f32.gmra.mrb[124].mxu0 %vm424_vm2, %v14168_v24 }
 0x979   :  { %9553 = vmatprep.mubr.msk.f32.mxu0 %vm424_vm2, %v14169_v51 }
 0x97c   :  { %9554 = vmatmul.mubr.msk.f32.gmra.mrb[126].mxu0 %vm424_vm2, %v14170_v1 }
 0x97d   :  { %9556 = vmatprep.mubr.msk.f32.mxu0 %vm424_vm2, %v14171_v28  ;;  %v14221_v28 = vld [vmem:[#allocation76_spill] sm:$0xff] }
 0x980   :  { %9557 = vmatmul.mubr.msk.f32.gmra.mrb[128].mxu0 %vm424_vm2, %v14172_v61 }
 0x981   :  { %9559 = vmatprep.mubr.msk.f32.mxu0 %vm424_vm2, %v14173_v7  ;;  %v14220_v7 = vld [vmem:[#allocation75_spill] sm:$0xff] }
 0x984   :  { %9560 = vmatmul.mubr.msk.f32.gmra.mrb[130].mxu0 %vm424_vm2, %v14174_v58  ;;  %v14182_v58 = vld [vmem:[#allocation36_spill] sm:$0xff] }
 0x985   :  { %9562 = vmatprep.mubr.msk.f32.mxu0 %vm424_vm2, %v14175_v48  ;;  %v14183_v48 = vld [vmem:[#allocation37_spill] sm:$0xff] }
 0x988   :  { %9563 = vmatmul.mubr.msk.f32.gmra.mrb[132].mxu0 %vm424_vm2, %v14176_v63  ;;  %v14184_v63 = vld [vmem:[#allocation38_spill] sm:$0xff] }
 0x989   :  { %9565 = vmatprep.mubr.msk.f32.mxu0 %vm424_vm2, %v14177_v18  ;;  %v14185_v18 = vld [vmem:[#allocation39_spill] sm:$0xff] }
 0x98c   :  { %9566 = vmatmul.mubr.msk.f32.gmra.mrb[134].mxu0 %vm424_vm2, %v14178_v14  ;;  %v14186_v14 = vld [vmem:[#allocation40_spill] sm:$0xff] }
 0x98d   :  { %9568 = vmatprep.mubr.msk.f32.mxu0 %vm424_vm2, %v14179_v34  ;;  %v14187_v34 = vld [vmem:[#allocation41_spill] sm:$0xff] }
 0x990   :  { %9569 = vmatmul.mubr.msk.f32.gmra.mrb[136].mxu0 %vm424_vm2, %v14180_v54  ;;  %v14188_v54 = vld [vmem:[#allocation42_spill] sm:$0xff] }
 0x991   :  { %9571 = vmatprep.mubr.msk.f32.mxu0 %vm424_vm2, %v14181_v26  ;;  %v14189_v26 = vld [vmem:[#allocation43_spill] sm:$0xff] }
 0x994   :  { %9572 = vmatmul.mubr.msk.f32.gmra.mrb[138].mxu0 %vm424_vm2, %v14182_v58  ;;  %v14190_v58 = vld [vmem:[#allocation44_spill] sm:$0xff] }
 0x995   :  { %9574 = vmatprep.mubr.msk.f32.mxu0 %vm424_vm2, %v14183_v48  ;;  %v14191_v48 = vld [vmem:[#allocation45_spill] sm:$0xff] }
 0x998   :  { %9575 = vmatmul.mubr.msk.f32.gmra.mrb[140].mxu0 %vm424_vm2, %v14184_v63  ;;  %v14192_v63 = vld [vmem:[#allocation46_spill] sm:$0xff] }
 0x999   :  { %9577 = vmatprep.mubr.msk.f32.mxu0 %vm424_vm2, %v14185_v18  ;;  %v14193_v18 = vld [vmem:[#allocation47_spill] sm:$0xff] }
 0x99c   :  { %9578 = vmatmul.mubr.msk.f32.gmra.mrb[142].mxu0 %vm424_vm2, %v14186_v14  ;;  %v14194_v14 = vld [vmem:[#allocation48_spill] sm:$0xff] }
 0x99d   :  { %9580 = vmatprep.mubr.msk.f32.mxu0 %vm424_vm2, %v14187_v34  ;;  %v14195_v34 = vld [vmem:[#allocation49_spill] sm:$0xff] }
 0x9a0   :  { %9581 = vmatmul.mubr.msk.f32.gmra.mrb[144].mxu0 %vm424_vm2, %v14188_v54  ;;  %v14196_v54 = vld [vmem:[#allocation50_spill] sm:$0xff] }
 0x9a1   :  { %9583 = vmatprep.mubr.msk.f32.mxu0 %vm424_vm2, %v14189_v26  ;;  %v14197_v26 = vld [vmem:[#allocation51_spill] sm:$0xff] }
 0x9a4   :  { %9584 = vmatmul.mubr.msk.f32.gmra.mrb[146].mxu0 %vm424_vm2, %v14190_v58  ;;  %v14198_v58 = vld [vmem:[#allocation52_spill] sm:$0xff] }
 0x9a5   :  { %9586 = vmatprep.mubr.msk.f32.mxu0 %vm424_vm2, %v14191_v48  ;;  %v14199_v48 = vld [vmem:[#allocation53_spill] sm:$0xff] }
 0x9a8   :  { %9587 = vmatmul.mubr.msk.f32.gmra.mrb[148].mxu0 %vm424_vm2, %v14192_v63  ;;  %v14200_v63 = vld [vmem:[#allocation54_spill] sm:$0xff] }
 0x9a9   :  { %9589 = vmatprep.mubr.msk.f32.mxu0 %vm424_vm2, %v14193_v18  ;;  %v14201_v18 = vld [vmem:[#allocation55_spill] sm:$0xff] }
 0x9ac   :  { %9590 = vmatmul.mubr.msk.f32.gmra.mrb[150].mxu0 %vm424_vm2, %v14194_v14  ;;  %v14202_v14 = vld [vmem:[#allocation56_spill] sm:$0xff] }
 0x9ad   :  { %9592 = vmatprep.mubr.msk.f32.mxu0 %vm424_vm2, %v14195_v34  ;;  %v14203_v34 = vld [vmem:[#allocation57_spill] sm:$0xff] }
 0x9b0   :  { %9593 = vmatmul.mubr.msk.f32.gmra.mrb[152].mxu0 %vm424_vm2, %v14196_v54  ;;  %v14204_v54 = vld [vmem:[#allocation58_spill] sm:$0xff] }
 0x9b1   :  { %9595 = vmatprep.mubr.msk.f32.mxu0 %vm424_vm2, %v14197_v26  ;;  %v14205_v26 = vld [vmem:[#allocation59_spill] sm:$0xff] }
 0x9b4   :  { %9596 = vmatmul.mubr.msk.f32.gmra.mrb[154].mxu0 %vm424_vm2, %v14198_v58  ;;  %v14206_v58 = vld [vmem:[#allocation60_spill] sm:$0xff] }
 0x9b5   :  { %9598 = vmatprep.mubr.msk.f32.mxu0 %vm424_vm2, %v14199_v48  ;;  %v14207_v48 = vld [vmem:[#allocation61_spill] sm:$0xff] }
 0x9b8   :  { %9599 = vmatmul.mubr.msk.f32.gmra.mrb[156].mxu0 %vm424_vm2, %v14200_v63  ;;  %v14208_v63 = vld [vmem:[#allocation62_spill] sm:$0xff] }
 0x9b9   :  { %9601 = vmatprep.mubr.msk.f32.mxu0 %vm424_vm2, %v14201_v18  ;;  %v14209_v18 = vld [vmem:[#allocation63_spill] sm:$0xff] }
 0x9bc   :  { %9602 = vmatmul.mubr.msk.f32.gmra.mrb[158].mxu0 %vm424_vm2, %v14202_v14  ;;  %v14210_v14 = vld [vmem:[#allocation64_spill] sm:$0xff] }
 0x9bd   :  { %9604 = vmatprep.mubr.msk.f32.mxu0 %vm424_vm2, %v14203_v34  ;;  %v14211_v34 = vld [vmem:[#allocation65_spill] sm:$0xff] }
 0x9c0   :  { %9605 = vmatmul.mubr.msk.f32.gmra.mrb[160].mxu0 %vm424_vm2, %v14204_v54  ;;  %v14212_v54 = vld [vmem:[#allocation66_spill] sm:$0xff] }
 0x9c1   :  { %9607 = vmatprep.mubr.msk.f32.mxu0 %vm424_vm2, %v14205_v26  ;;  %v14213_v26 = vld [vmem:[#allocation67_spill] sm:$0xff] }
 0x9c4   :  { %9608 = vmatmul.mubr.msk.f32.gmra.mrb[162].mxu0 %vm424_vm2, %v14206_v58  ;;  %v14214_v58 = vld [vmem:[#allocation68_spill] sm:$0xff] }
 0x9c5   :  { %9610 = vmatprep.mubr.msk.f32.mxu0 %vm424_vm2, %v14207_v48  ;;  %v14215_v48 = vld [vmem:[#allocation69_spill] sm:$0xff] }
 0x9c8   :  { %9611 = vmatmul.mubr.msk.f32.gmra.mrb[164].mxu0 %vm424_vm2, %v14208_v63  ;;  %v14216_v63 = vld [vmem:[#allocation70_spill] sm:$0xff] }
 0x9c9   :  { %9613 = vmatprep.mubr.msk.f32.mxu0 %vm424_vm2, %v14209_v18  ;;  %v14217_v18 = vld [vmem:[#allocation71_spill] sm:$0xff] }
 0x9cc   :  { %9614 = vmatmul.mubr.msk.f32.gmra.mrb[166].mxu0 %vm424_vm2, %v14210_v14  ;;  %v14218_v14 = vld [vmem:[#allocation72_spill] sm:$0xff] }
 0x9cd   :  { %9616 = vmatprep.mubr.msk.f32.mxu0 %vm424_vm2, %v14211_v34 }
 0x9d0   :  { %9617 = vmatmul.mubr.msk.f32.gmra.mrb[168].mxu0 %vm424_vm2, %v14212_v54 }
 0x9d1   :  { %9619 = vmatprep.mubr.msk.f32.mxu0 %vm424_vm2, %v14213_v26 }
 0x9d4   :  { %9620 = vmatmul.mubr.msk.f32.gmra.mrb[170].mxu0 %vm424_vm2, %v14214_v58 }
 0x9d5   :  { %9622 = vmatprep.mubr.msk.f32.mxu0 %vm424_vm2, %v14215_v48 }
 0x9d8   :  { %9623 = vmatmul.mubr.msk.f32.gmra.mrb[172].mxu0 %vm424_vm2, %v14216_v63 }
 0x9d9   :  { %9625 = vmatprep.mubr.msk.f32.mxu0 %vm424_vm2, %v14217_v18  ;;  %v14222_v18 = vld [vmem:[#allocation77_spill] sm:$0xff] }
 0x9dc   :  { %9626 = vmatmul.mubr.msk.f32.gmra.mrb[174].mxu0 %vm424_vm2, %v14218_v14  ;;  %v14223_v14 = vld [vmem:[#allocation78_spill] sm:$0xff] }
 0x9dd   :  { %9675 = vmatprep.mubr.msk.f32.mxu0 %vm10881_vm3, %v14155_v25 }
 0xa33   :  { %v3884_v54 = vpop.f32.mrb[114].mxu0 }
 0xa34   :  { %v12701_v26 = vadd.f32 %v3884_v54, %v12518_v23  ;;  %v9529_v58 = vpop.f32.mrb[115].mxu0  ;;  %v14225_v54 = vld [vmem:[#allocation80_spill] sm:$0xff] }
 0xa36   :  { %14219 = vst [vmem:[#allocation10_spill] sm:$0xff] %v12701_v26 }
 0xa3b   :  { %v9540_v34 = vpop.f32.mrb[116].mxu0 }
 0xa3c   :  { %v4255_v48 = vmul.f32 %v9540_v34, %v14220_v7  ;;  %v3955_v61 = vpop.f32.mrb[117].mxu0  ;;  %v14226_v34 = vld [vmem:[#allocation81_spill] sm:$0xff] }
 0xa3d   :  { %v4254_v63 = vmul.f32 %v3955_v61, %v14221_v28  ;;  %v14227_v61 = vld [vmem:[#allocation82_spill] sm:$0xff] }
 0xa3f   :  { %v10247_v1 = vpack.c.bf16 %v4255_v48, %v4254_v63  ;;  %v9543_v51 = vpop.f32.mrb[118].mxu0 }
 0xa40   :  { %v4257_v24 = vmul.f32 %v9543_v51, %v14222_v18  ;;  %v3965_v50 = vpop.f32.mrb[119].mxu0  ;;  %v14228_v51 = vld [vmem:[#allocation83_spill] sm:$0xff] }
 0xa41   :  { %v4256_v11 = vmul.f32 %v3965_v50, %v14223_v14  ;;  %v14229_v50 = vld [vmem:[#allocation84_spill] sm:$0xff] }
 0xa43   :  { %v10251_v13 = vpack.c.bf16 %v4257_v24, %v4256_v11  ;;  %v9546_v43 = vpop.f32.mrb[120].mxu0 }
 0xa44   :  { %v4259_v49 = vmul.f32 %v9546_v43, %v14224_v5  ;;  %v3975_v23 = vpop.f32.mrb[121].mxu0  ;;  %v14230_v43 = vld [vmem:[#allocation85_spill] sm:$0xff] }
 0xa45   :  { %v4258_v58 = vmul.f32 %v3975_v23, %v14225_v54  ;;  %v14231_v23 = vld [vmem:[#allocation86_spill] sm:$0xff] }
 0xa47   :  { %v10255_v26 = vpack.c.bf16 %v4259_v49, %v4258_v58  ;;  %v9549_v31 = vpop.f32.mrb[122].mxu0 }
 0xa48   :  { %v4261_v7 = vmul.f32 %v9549_v31, %v14226_v34  ;;  %v3985_v57 = vpop.f32.mrb[123].mxu0  ;;  %v14232_v31 = vld [vmem:[#allocation87_spill] sm:$0xff] }
 0xa49   :  { %v4260_v48 = vmul.f32 %v3985_v57, %v14227_v61  ;;  %v14233_v57 = vld [vmem:[#allocation88_spill] sm:$0xff] }
 0xa4b   :  { %v10259_v63 = vpack.c.bf16 %v4261_v7, %v4260_v48  ;;  %v9552_v28 = vpop.f32.mrb[124].mxu0 }
 0xa4c   :  { %v4263_v18 = vmul.f32 %v9552_v28, %v14228_v51  ;;  %v3995_v40 = vpop.f32.mrb[125].mxu0  ;;  %v14234_v28 = vld [vmem:[#allocation89_spill] sm:$0xff] }
 0xa4d   :  { %v4262_v11 = vmul.f32 %v3995_v40, %v14229_v50 }
 0xa4f   :  { %v10263_v24 = vpack.c.bf16 %v4263_v18, %v4262_v11  ;;  %v9555_v14 = vpop.f32.mrb[126].mxu0 }
 0xa50   :  { %v4265_v5 = vmul.f32 %v9555_v14, %v14230_v43  ;;  %v4005_v30 = vpop.f32.mrb[127].mxu0 }
 0xa51   :  { %v4264_v49 = vmul.f32 %v4005_v30, %v14231_v23 }
 0xa53   :  { %v10267_v58 = vpack.c.bf16 %v4265_v5, %v4264_v49  ;;  %v9558_v54 = vpop.f32.mrb[128].mxu0 }
 0xa54   :  { %v4267_v34 = vmul.f32 %v9558_v54, %v14232_v31  ;;  %v4015_v25 = vpop.f32.mrb[129].mxu0 }
 0xa55   :  { %v4266_v7 = vmul.f32 %v4015_v25, %v14233_v57 }
 0xa57   :  { %v10271_v48 = vpack.c.bf16 %v4267_v34, %v4266_v7  ;;  %v9561_v61 = vpop.f32.mrb[130].mxu0 }
 0xa58   :  { %v12718_v51 = vmul.f32 %v9561_v61, %v14234_v28  ;;  %v4025_v40 = vpop.f32.mrb[131].mxu0 }
 0xa59   :  { %v4268_v18 = vmul.f32 %v4025_v40, %v14128_v9 }
 0xa5b   :  { %v10275_v14 = vpack.c.bf16 %v12718_v51, %v4268_v18  ;;  %v9564_v11 = vpop.f32.mrb[132].mxu0 }
 0xa5c   :  { %v4271_v30 = vmul.f32 %v9564_v11, %v14129_v36  ;;  %v4035_v5 = vpop.f32.mrb[133].mxu0 }
 0xa5d   :  { %v4270_v49 = vmul.f32 %v4035_v5, %v14130_v60 }
 0xa5f   :  { %v10245_v54 = vpack.c.bf16 %v4271_v30, %v4270_v49  ;;  %v9567_v31 = vpop.f32.mrb[134].mxu0 }
 0xa60   :  { %v4273_v25 = vmul.f32 %v9567_v31, %v11854_v46  ;;  %v4045_v34 = vpop.f32.mrb[135].mxu0 }
 0xa61   :  { %v4272_v7 = vmul.f32 %v4045_v34, %v14131_v10  ;;  %10246 = vmatprep.subr.bf16.mxu1 %v10245_v54 }
 0xa62   :  { %10248 = vmatpush3.bf16.msra.mxu1 %v10247_v1 }
 0xa63   :  { %v10249_v61 = vpack.c.bf16 %v4273_v25, %v4272_v7  ;;  %v9570_v28 = vpop.f32.mrb[136].mxu0 }
 0xa64   :  { %v4275_v40 = vmul.f32 %v9570_v28, %v11866_v62  ;;  %v4055_v51 = vpop.f32.mrb[137].mxu0 }
 0xa65   :  { %v4274_v18 = vmul.f32 %v4055_v51, %v11873_v39  ;;  %10250 = vmatprep.subr.bf16.mxu1 %v10249_v61 }
 0xa66   :  { %10252 = vmatpush3.bf16.msra.mxu1 %v10251_v13 }
 0xa67   :  { %v10253_v11 = vpack.c.bf16 %v4275_v40, %v4274_v18  ;;  %v9573_v5 = vpop.f32.mrb[138].mxu0 }
 0xa68   :  { %v4277_v30 = vmul.f32 %v9573_v5, %v11881_v4  ;;  %v4065_v49 = vpop.f32.mrb[139].mxu0 }
 0xa69   :  { %v4276_v31 = vmul.f32 %v4065_v49, %v11888_v52  ;;  %10254 = vmatprep.subr.bf16.mxu1 %v10253_v11 }
 0xa6a   :  { %10256 = vmatpush3.bf16.msra.mxu1 %v10255_v26 }
 0xa6b   :  { %v10257_v54 = vpack.c.bf16 %v4277_v30, %v4276_v31  ;;  %v9576_v1 = vpop.f32.mrb[140].mxu0 }
 0xa6c   :  { %v4279_v25 = vmul.f32 %v9576_v1, %v11896_v19  ;;  %v4075_v34 = vpop.f32.mrb[141].mxu0 }
 0xa6d   :  { %v4278_v28 = vmul.f32 %v4075_v34, %v11903_v8  ;;  %10258 = vmatprep.subr.bf16.mxu1 %v10257_v54 }
 0xa6e   :  { %10260 = vmatpush3.bf16.msra.mxu1 %v10259_v63 }
 0xa6f   :  { %v10261_v7 = vpack.c.bf16 %v4279_v25, %v4278_v28  ;;  %v9579_v13 = vpop.f32.mrb[142].mxu0 }
 0xa70   :  { %v4281_v61 = vmul.f32 %v9579_v13, %v11911_v3  ;;  %v4085_v40 = vpop.f32.mrb[143].mxu0 }
 0xa71   :  { %v4280_v51 = vmul.f32 %v4085_v40, %v11916_v0  ;;  %10262 = vmatprep.subr.bf16.mxu1 %v10261_v7 }
 0xa72   :  { %10264 = vmatpush3.bf16.msra.mxu1 %v10263_v24 }
 0xa73   :  { %v10265_v18 = vpack.c.bf16 %v4281_v61, %v4280_v51  ;;  %v9582_v26 = vpop.f32.mrb[144].mxu0 }
 0xa74   :  { %v4283_v11 = vmul.f32 %v9582_v26, %v11922_v45  ;;  %v4095_v5 = vpop.f32.mrb[145].mxu0 }
 0xa75   :  { %v4282_v30 = vmul.f32 %v4095_v5, %v11927_v59  ;;  %10266 = vmatprep.subr.bf16.mxu1 %v10265_v18 }
 0xa76   :  { %10268 = vmatpush3.bf16.msra.mxu1 %v10267_v58 }
 0xa77   :  { %v10269_v49 = vpack.c.bf16 %v4283_v11, %v4282_v30  ;;  %v9585_v63 = vpop.f32.mrb[146].mxu0 }
 0xa78   :  { %v4285_v31 = vmul.f32 %v9585_v63, %v11933_v38  ;;  %v4105_v54 = vpop.f32.mrb[147].mxu0 }
 0xa79   :  { %v4284_v1 = vmul.f32 %v4105_v54, %v11938_v42  ;;  %10270 = vmatprep.subr.bf16.mxu1 %v10269_v49 }
 0xa7a   :  { %10272 = vmatpush3.bf16.msra.mxu1 %v10271_v48 }
 0xa7b   :  { %v10273_v25 = vpack.c.bf16 %v4285_v31, %v4284_v1  ;;  %v9588_v24 = vpop.f32.mrb[148].mxu0 }
 0xa7c   :  { %v4287_v34 = vmul.f32 %v9588_v24, %v11944_v20  ;;  %v4115_v28 = vpop.f32.mrb[149].mxu0 }
 0xa7d   :  { %v4286_v7 = vmul.f32 %v4115_v28, %v11949_v35  ;;  %10274 = vmatprep.subr.bf16.mxu1 %v10273_v25  ;;  %v14235_v28 = vld [vmem:[#allocation99_spill] sm:$0xff] }
 0xa7e   :  { %10276 = vmatpush3.bf16.msra.mxu1 %v10275_v14 }
 0xa7f   :  { %v10278_v13 = vpack.c.bf16 %v4287_v34, %v4286_v7  ;;  %v9591_v58 = vpop.f32.mrb[150].mxu0  ;;  %10277 = vmatprep.subr.bf16.mxu1 %v14008_v16  ;;  %v14236_v7 = vld [vmem:[#allocation101_spill] sm:$0xff] }
 0xa80   :  { %v4289_v61 = vmul.f32 %v9591_v58, %v11961_v47  ;;  %v4125_v40 = vpop.f32.mrb[151].mxu0 }
 0xa81   :  { %v4288_v51 = vmul.f32 %v4125_v40, %v11968_v53  ;;  %4379 = vmatmul.mubr.f32.vlgmr.msra.gmra.mrb[120].mxu1 %v11959_v22 }
 0xa82   :  { %10279 = vmatpush1.bf16.msra.mxu1 %v10278_v13  ;;  %4383 = vmatprep.mubr.f32.mxu1 %v11966_v55 }
 0xa83   :  { %v10281_v48 = vpack.c.bf16 %v4289_v61, %v4288_v51  ;;  %v9594_v18 = vpop.f32.mrb[152].mxu0  ;;  %10280 = vmatprep.subr.bf16.mxu1 %v14008_v16  ;;  %v14237_v61 = vld [vmem:[#allocation103_spill] sm:$0xff] }
 0xa84   :  { %v4291_v14 = vmul.f32 %v9594_v18, %v11981_v17  ;;  %v4135_v26 = vpop.f32.mrb[153].mxu0 }
 0xa85   :  { %v4290_v11 = vmul.f32 %v4135_v26, %v11986_v27  ;;  %4384 = vmatmul.mubr.f32.gmra.mrb[122].mxu1 %v11979_v32 }
 0xa86   :  { %10282 = vmatpush1.bf16.msra.mxu1 %v10281_v48  ;;  %4388 = vmatprep.mubr.f32.mxu1 %v11984_v56  ;;  %v14238_v48 = vld [vmem:[#allocation104_spill] sm:$0xff] }
 0xa87   :  { %v10284_v5 = vpack.c.bf16 %v4291_v14, %v4290_v11  ;;  %v9597_v30 = vpop.f32.mrb[154].mxu0  ;;  %10283 = vmatprep.subr.bf16.mxu1 %v14008_v16  ;;  %v14239_v11 = vld [vmem:[#allocation105_spill] sm:$0xff] }
 0xa88   :  { %v4293_v49 = vmul.f32 %v9597_v30, %v11999_v2  ;;  %v4145_v63 = vpop.f32.mrb[155].mxu0 }
 0xa89   :  { %v4292_v31 = vmul.f32 %v4145_v63, %v12004_v41  ;;  %4389 = vmatmul.mubr.f32.gmra.mrb[124].mxu1 %v11997_v15 }
 0xa8a   :  { %10285 = vmatpush1.bf16.msra.mxu1 %v10284_v5  ;;  %4393 = vmatprep.mubr.f32.mxu1 %v12002_v21 }
 0xa8b   :  { %v10287_v54 = vpack.c.bf16 %v4293_v49, %v4292_v31  ;;  %v9600_v1 = vpop.f32.mrb[156].mxu0  ;;  %10286 = vmatprep.subr.bf16.mxu1 %v14008_v16  ;;  %v14240_v49 = vld [vmem:[#allocation106_spill] sm:$0xff] }
 0xa8c   :  { %v4295_v25 = vmul.f32 %v9600_v1, %v12019_v12  ;;  %v4155_v24 = vpop.f32.mrb[157].mxu0  ;;  %v14241_v1 = vld [vmem:[#allocation107_spill] sm:$0xff] }
 0xa8d   :  { %v4294_v34 = vmul.f32 %v4155_v24, %v12025_v37  ;;  %4394 = vmatmul.mubr.f32.gmra.mrb[126].mxu1 %v14235_v28 }
 0xa8e   :  { %10288 = vmatpush1.bf16.msra.mxu1 %v10287_v54  ;;  %7671 = vmatprep.mubr.msk.f32.mxu1 %vm2168_vm4, %v14236_v7 }
 0xa8f   :  { %v10290_v13 = vpack.c.bf16 %v4295_v25, %v4294_v34  ;;  %v9603_v58 = vpop.f32.mrb[158].mxu0  ;;  %10289 = vmatprep.subr.bf16.mxu1 %v14008_v16  ;;  %v14242_v34 = vld [vmem:[#allocation108_spill] sm:$0xff] }
 0xa90   :  { %v4297_v40 = vmul.f32 %v9603_v58, %v14237_v61  ;;  %v4165_v51 = vpop.f32.mrb[159].mxu0 }
 0xa91   :  { %v4296_v18 = vmul.f32 %v4165_v51, %v14238_v48  ;;  %v14243_v51 = vld [vmem:[#allocation109_spill] sm:$0xff] }
 0xa92   :  { %10291 = vmatpush1.bf16.msra.mxu1 %v10290_v13 }
 0xa93   :  { %v10293_v14 = vpack.c.bf16 %v4297_v40, %v4296_v18  ;;  %v9606_v26 = vpop.f32.mrb[160].mxu0  ;;  %10292 = vmatprep.subr.bf16.mxu1 %v14008_v16 }
 0xa94   :  { %v4299_v5 = vmul.f32 %v9606_v26, %v14239_v11  ;;  %v4175_v30 = vpop.f32.mrb[161].mxu0  ;;  %v14244_v11 = vld [vmem:[#allocation110_spill] sm:$0xff] }
 0xa95   :  { %v4298_v63 = vmul.f32 %v4175_v30, %v14240_v49  ;;  %v14246_v49 = vld [vmem:[#allocation112_spill] sm:$0xff] }
 0xa96   :  { %10294 = vmatpush1.bf16.msra.mxu1 %v10293_v14 }
 0xa97   :  { %v10296_v31 = vpack.c.bf16 %v4299_v5, %v4298_v63  ;;  %v9609_v54 = vpop.f32.mrb[162].mxu0  ;;  %10295 = vmatprep.subr.bf16.mxu1 %v14008_v16  ;;  %v14245_v63 = vld [vmem:[#allocation111_spill] sm:$0xff] }
 0xa98   :  { %v4301_v25 = vmul.f32 %v9609_v54, %v14241_v1  ;;  %v4185_v24 = vpop.f32.mrb[163].mxu0 }
 0xa99   :  { %v4300_v58 = vmul.f32 %v4185_v24, %v14242_v34  ;;  %v14248_v34 = vld [vmem:[#allocation113_spill] sm:$0xff] }
 0xa9a   :  { %10297 = vmatpush1.bf16.msra.mxu1 %v10296_v31 }
 0xa9b   :  { %v10299_v13 = vpack.c.bf16 %v4301_v25, %v4300_v58  ;;  %v9612_v40 = vpop.f32.mrb[164].mxu0  ;;  %10298 = vmatprep.subr.bf16.mxu1 %v14008_v16  ;;  %v14247_v58 = vld [vmem:[#allocation92_spill] sm:$0xff] }
 0xa9c   :  { %v4303_v18 = vmul.f32 %v9612_v40, %v14243_v51  ;;  %v4195_v26 = vpop.f32.mrb[165].mxu0 }
 0xa9d   :  { %v4302_v30 = vmul.f32 %v4195_v26, %v14244_v11  ;;  %v14250_v11 = vld [vmem:[#allocation114_spill] sm:$0xff] }
 0xa9e   :  { %10300 = vmatpush1.bf16.msra.mxu1 %v10299_v13 }
 0xa9f   :  { %v10302_v14 = vpack.c.bf16 %v4303_v18, %v4302_v30  ;;  %v9615_v5 = vpop.f32.mrb[166].mxu0  ;;  %10301 = vmatprep.subr.bf16.mxu1 %v14008_v16  ;;  %v14249_v30 = vld [vmem:[#allocation95_spill] sm:$0xff] }
 0xaa0   :  { %v4305_v54 = vmul.f32 %v9615_v5, %v14245_v63  ;;  %v4205_v1 = vpop.f32.mrb[167].mxu0 }
 0xaa1   :  { %v4304_v24 = vmul.f32 %v4205_v1, %v14246_v49  ;;  %v14252_v49 = vld [vmem:[#allocation116_spill] sm:$0xff] }
 0xaa2   :  { %10303 = vmatpush1.bf16.msra.mxu1 %v10302_v14 }
 0xaa3   :  { %v10305_v31 = vpack.c.bf16 %v4305_v54, %v4304_v24  ;;  %v9618_v25 = vpop.f32.mrb[168].mxu0  ;;  %10304 = vmatprep.subr.bf16.mxu1 %v14008_v16  ;;  %v14251_v24 = vld [vmem:[#allocation115_spill] sm:$0xff] }
 0xaa4   :  { %v4307_v40 = vmul.f32 %v9618_v25, %v14247_v58  ;;  %v4215_v51 = vpop.f32.mrb[169].mxu0 }
 0xaa5   :  { %v4306_v26 = vmul.f32 %v4215_v51, %v14248_v34 }
 0xaa6   :  { %10306 = vmatpush1.bf16.msra.mxu1 %v10305_v31 }
 0xaa7   :  { %v10308_v13 = vpack.c.bf16 %v4307_v40, %v4306_v26  ;;  %v9621_v18 = vpop.f32.mrb[170].mxu0  ;;  %10307 = vmatprep.subr.bf16.mxu1 %v14008_v16  ;;  %v14253_v26 = vld [vmem:[#allocation117_spill] sm:$0xff] }
 0xaa8   :  { %v4309_v5 = vmul.f32 %v9621_v18, %v14249_v30  ;;  %v4225_v63 = vpop.f32.mrb[171].mxu0 }
 0xaa9   :  { %v4308_v1 = vmul.f32 %v4225_v63, %v14250_v11  ;;  %v7679_v63 = vld [vmem:[%s13663_s6 + $0xe0] sm:$0xff] }
 0xaaa   :  { %10309 = vmatpush1.bf16.msra.mxu1 %v10308_v13  ;;  %v7680_v13 = vld [vmem:[%s13663_s6 + $0xe8] sm:$0xff] }
 0xaab   :  { %v10311_v14 = vpack.c.bf16 %v4309_v5, %v4308_v1  ;;  %v9624_v54 = vpop.f32.mrb[172].mxu0  ;;  %10310 = vmatprep.subr.bf16.mxu1 %v14008_v16  ;;  %v14254_v5 = vld [vmem:[#allocation118_spill] sm:$0xff] }
 0xaac   :  { %v4311_v25 = vmul.f32 %v9624_v54, %v14251_v24  ;;  %v4235_v58 = vpop.f32.mrb[173].mxu0  ;;  %v7681_v54 = vld [vmem:[%s13663_s6 + $0xf0] sm:$0xff] }
 0xaad   :  { %v4310_v51 = vmul.f32 %v4235_v58, %v14252_v49 }
 0xaae   :  { %10312 = vmatpush1.bf16.msra.mxu1 %v10311_v14  ;;  %v10319_v14 = vpack.c.bf16 %v7680_v13, %v7679_v63  ;;  %v14260_v63 = vld [vmem:[#allocation124_spill] sm:$0xff]  ;;  %v14261_v13 = vld [vmem:[#allocation125_spill] sm:$0xff] }
 0xaaf   :  { %v10314_v31 = vpack.c.bf16 %v4311_v25, %v4310_v51  ;;  %v9627_v40 = vpop.f32.mrb[174].mxu0  ;;  %10313 = vmatprep.subr.bf16.mxu1 %v14008_v16  ;;  %v7682_v25 = vld [vmem:[%s13663_s6 + $0xf8] sm:$0xff] }
 0xab0   :  { %v4313_v18 = vmul.f32 %v9627_v40, %v14253_v26  ;;  %v4245_v30 = vpop.f32.mrb[175].mxu0  ;;  %v10323_v51 = vpack.c.bf16 %v7682_v25, %v7681_v54  ;;  %v14255_v40 = vld [vmem:[#allocation119_spill] sm:$0xff]  ;;  %v14256_v26 = vld [vmem:[#allocation120_spill] sm:$0xff] }
 0xab1   :  { %v4312_v1 = vmul.f32 %v4245_v30, %v14254_v5  ;;  %v14257_v30 = vld [vmem:[#allocation121_spill] sm:$0xff] }
 0xab2   :  { %10315 = vmatpush1.bf16.msra.mxu1 %v10314_v31  ;;  %v14258_v31 = vld [vmem:[#allocation122_spill] sm:$0xff] }
 0xab3   :  { %v10317_v58 = vpack.c.bf16 %v4313_v18, %v4312_v1  ;;  %10316 = vmatprep.subr.bf16.mxu1 %v14008_v16  ;;  %v14259_v18 = vld [vmem:[#allocation123_spill] sm:$0xff] }
 0xab4   :  { %v7675_v1 = vld [vmem:[%s13663_s6 + $0x40] sm:$0xff] }
 0xab6   :  { %10318 = vmatpush1.bf16.msra.mxu1 %v10317_v58  ;;  %v7676_v58 = vld [vmem:[%s13663_s6 + $0x48] sm:$0xff] }
 0xab7   :  { %10320 = vmatprep.subr.bf16.mxu1 %v10319_v14 }
 0xab9   :  { %4464 = vmatmul.mubr.f32.vlgmr.msra.gmra.mrb[128].mxu1 %v14255_v40 }
 0xaba   :  { %7672 = vmatprep.mubr.msk.f32.mxu1 %vm2168_vm4, %v14256_v26  ;;  %10322 = vmatpush3.bf16.msra.mxu1 %v10319_v14  ;;  %v10327_v14 = vpack.c.bf16 %v7676_v58, %v7675_v1 }
 0xabb   :  { %10324 = vmatprep.subr.bf16.mxu1 %v10323_v51 }
 0xabd   :  { %4469 = vmatmul.mubr.f32.gmra.mrb[130].mxu1 %v14257_v30 }
 0xabe   :  { %7673 = vmatprep.mubr.msk.f32.mxu1 %vm2168_vm4, %v14258_v31  ;;  %10326 = vmatpush3.bf16.msra.mxu1 %v10323_v51 }
 0xabf   :  { %10328 = vmatprep.subr.bf16.mxu1 %v10327_v14 }
 0xac1   :  { %4474 = vmatmul.mubr.f32.gmra.mrb[132].mxu1 %v14259_v18 }
 0xac2   :  { %7674 = vmatprep.mubr.msk.f32.mxu1 %vm2168_vm4, %v14260_v63 }
 0xac5   :  { %4479 = vmatmul.mubr.f32.gmra.mrb[134].mxu1 %v14261_v13 }
 0xac6   :  { %9636 = vmatprep.mubr.msk.f32.mxu1 %vm424_vm2, %v12542_v44  ;;  %v7677_v44 = vld [vmem:[%s13663_s6 + $0x50] sm:$0xff] }
 0xac9   :  { %9637 = vmatmul.mubr.msk.f32.vlgmr.msra.gmra.mrb[136].mxu1 %vm424_vm2, %v12545_v6  ;;  %v7678_v6 = vld [vmem:[%s13663_s6 + $0x58] sm:$0xff] }
 0xaca   :  { %9639 = vmatprep.mubr.msk.f32.mxu1 %vm424_vm2, %v12550_v29  ;;  %10330 = vmatpush3.bf16.msra.mxu1 %v10327_v14  ;;  %v10331_v29 = vpack.c.bf16 %v7678_v6, %v7677_v44 }
 0xacc   :  { %10332 = vmatprep.subr.bf16.mxu1 %v10331_v29 }
 0xacd   :  { %9640 = vmatmul.mubr.msk.f32.gmra.mrb[138].mxu1 %vm424_vm2, %v12553_v33 }
 0xace   :  { %10334 = vmatpush3.bf16.msra.mxu1 %v10331_v29 }
 0xacf   :  { %10335 = vmatprep.subr.bf16.mxu1 %v14008_v16 }
 0xb54   :  { %v8695_v33 = vpop.f32.mrb[120].mxu1 }
 0xb55   :  { %v8696_v54 = vpop.f32.mrb[121].mxu1 }
 0xb56   :  { %v8697_v25 = vadd.f32 %v8696_v54, %v8695_v33 }
 0xb58   :  { %v8698_v51 = vpop.f32.mrb[122].mxu1 }
 0xb59   :  { %v8699_v1 = vpop.f32.mrb[123].mxu1 }
 0xb5a   :  { %v8700_v58 = vadd.f32 %v8699_v1, %v8698_v51 }
 0xb5c   :  { %v8701_v14 = vpop.f32.mrb[124].mxu1 }
 0xb5d   :  { %v8702_v13 = vpop.f32.mrb[125].mxu1 }
 0xb5e   :  { %v8703_v63 = vadd.f32 %v8702_v13, %v8701_v14 }
 0xb60   :  { %v8704_v18 = vpop.f32.mrb[126].mxu1 }
 0xb61   :  { %v8705_v31 = vpop.f32.mrb[127].mxu1 }
 0xb62   :  { %v8706_v30 = vadd.f32 %v8705_v31, %v8704_v18  ;;  %v14262_v31 = vmov 0.0  }
 0xb8c   :  { %v4465_v26 = vpop.f32.mrb[128].mxu1 }
 0xb8d   :  { %v4466_v40 = vadd.f32 %v8697_v25, %v4465_v26  ;;  %v4467_v5 = vpop.f32.mrb[129].mxu1  ;;  %v4688_v26 = vld [vmem:[%s13664_s7 + $0x2] ss:$0 sm:$0xff] }
 0xb8f   :  { %9650 = vmatprep.mubr.msk.f32.mxu1 %vm424_vm2, %v4466_v40 }
 0xb90   :  { %v4470_v44 = vpop.f32.mrb[130].mxu1 }
 0xb91   :  { %v4471_v6 = vadd.f32 %v8700_v58, %v4470_v44  ;;  %v4472_v29 = vpop.f32.mrb[131].mxu1 }
 0xb93   :  { %9651 = vmatmul.mubr.msk.f32.vlgmr.msra.gmra.mrb[136].mxu1 %vm424_vm2, %v4471_v6 }
 0xb94   :  { %v4475_v33 = vpop.f32.mrb[132].mxu1 }
 0xb95   :  { %v4476_v54 = vadd.f32 %v8703_v63, %v4475_v33  ;;  %v4477_v49 = vpop.f32.mrb[133].mxu1 }
 0xb97   :  { %9653 = vmatprep.mubr.msk.f32.mxu1 %vm424_vm2, %v4476_v54 }
 0xb98   :  { %v4480_v51 = vpop.f32.mrb[134].mxu1 }
 0xb99   :  { %v4481_v13 = vadd.f32 %v8706_v30, %v4480_v51  ;;  %v4482_v1 = vpop.f32.mrb[135].mxu1 }
 0xb9b   :  { %9654 = vmatmul.mubr.msk.f32.gmra.mrb[138].mxu1 %vm424_vm2, %v4481_v13 }
 0xb9c   :  { %9664 = vmatprep.mubr.msk.f32.mxu1 %vm10881_vm3, %v14262_v31 }
 0xc66   :  { %v9652_v5 = vpop.f32.mrb[136].mxu1 }
 0xc67   :  { %v4690_v40 = vadd.f32 %v9652_v5, %v4688_v26  ;;  %v4669_v18 = vpop.f32.mrb[137].mxu1 }
 0xc68   :  { %v4689_v25 = vadd.f32 %v4688_v26, %v4669_v18 }
 0xc69   :  { %v4694_v49 = vsel %vm424_vm2, %v4690_v40, 0.0  ;;  %v4708_v63 = vmul.f32 %v4690_v40, %v4690_v40 }
 0xc6a   :  { %v4693_v58 = vsel %vm424_vm2, %v4689_v25, 0.0  ;;  %v4707_v30 = vmul.f32 %v4689_v25, %v4689_v25 }
 0xc6b   :  { %v4712_v14 = vsel %vm424_vm2, %v4708_v63, 0.0  ;;  %v4695_v44 = vadd.f32 %v4694_v49, %v4693_v58 }
 0xc6c   :  { %v4711_v6 = vsel %vm424_vm2, %v4707_v30, 0.0 }
 0xc6d   :  { %v4713_v29 = vadd.f32 %v4712_v14, %v4711_v6 }
 0xc6e   :  { %v9655_v33 = vpop.f32.mrb[138].mxu1 }
 0xc6f   :  { %v4692_v54 = vadd.f32 %v9655_v33, %v4688_v26  ;;  %v4679_v51 = vpop.f32.mrb[139].mxu1 }
 0xc70   :  { %v4691_v13 = vadd.f32 %v4688_v26, %v4679_v51 }
 0xc71   :  { %v4710_v1 = vmul.f32 %v4692_v54, %v4692_v54  ;;  %v4698_v11 = vsel %vm424_vm2, %v4692_v54, 0.0 }
 0xc72   :  { %v4696_v5 = vsel %vm424_vm2, %v4691_v13, 0.0  ;;  %v4709_v18 = vmul.f32 %v4691_v13, %v4691_v13 }
 0xc73   :  { %v4697_v24 = vadd.f32 %v4696_v5, %v4695_v44  ;;  %v4716_v49 = vsel %vm424_vm2, %v4710_v1, 0.0 }
 0xc74   :  { %v4714_v34 = vsel %vm424_vm2, %v4709_v18, 0.0 }
 0xc75   :  { %v4699_v48 = vadd.f32 %v4698_v11, %v4697_v24  ;;  %v4715_v61 = vadd.f32 %v4714_v34, %v4713_v29 }
 0xc77   :  { %v4700_v63 = vrot.slane %v4699_v48, 4  ;;  %v4717_v58 = vadd.f32 %v4716_v49, %v4715_v61 }
 0xc79   :  { %v4701_v30 = vadd.f32 %v4700_v63, %v4699_v48  ;;  %v4718_v14 = vrot.slane %v4717_v58, 4 }
 0xc7b   :  { %v4702_v6 = vrot.slane %v4701_v30, 2  ;;  %v4719_v33 = vadd.f32 %v4718_v14, %v4717_v58 }
 0xc7d   :  { %v4703_v26 = vadd.f32 %v4702_v6, %v4701_v30  ;;  %v4720_v51 = vrot.slane %v4719_v33, 2 }
 0xc7f   :  { %v4704_v7 = vrot.slane %v4703_v26, 1  ;;  %v4721_v28 = vadd.f32 %v4720_v51, %v4719_v33 }
 0xc81   :  { %v4705_v37 = vadd.f32 %v4704_v7, %v4703_v26  ;;  %v4722_v44 = vrot.slane %v4721_v28, 1  ;;  %v12852_v7 = vld [vmem:[%s13664_s7 + $0x5] ss:$0 sm:$0xff] }
 0xc82   :  { %14263 = vst [vmem:[#allocation73_spill] sm:$0xff] %v12852_v7 }
 0xc83   :  { %v4706_v5 = vmul.f32 0.03125, %v4705_v37  ;;  %v4723_v12 = vadd.f32 %v4722_v44, %v4721_v28 }
 0xc85   :  { %v4724_v21 = vmul.f32 0.03125, %v4723_v12  ;;  %v4725_v18 = vmul.f32 %v4706_v5, %v4706_v5  ;;  %v4729_v11 = vsub.f32 %v4691_v13, %v4706_v5  ;;  %v4727_v34 = vsub.f32 %v4689_v25, %v4706_v5 }
 0xc86   :  { %v4728_v24 = vsub.f32 %v4690_v40, %v4706_v5  ;;  %v4730_v29 = vsub.f32 %v4692_v54, %v4706_v5  ;;  %v12861_v40 = vld [vmem:[%s13664_s7 + $0x6] ss:$0 sm:$0xff] }
 0xc87   :  { %v4726_v1 = vsub.f32 %v4724_v21, %v4725_v18  ;;  %14264 = vst [vmem:[#allocation90_spill] sm:$0xff] %v12861_v40 }
 0xc89   :  { %v4731_v61 = vadd.f32 1e-05, %v4726_v1 }
 0xc8b   :  { %10767 = vrsqrt.f32 %v4731_v61 }
 0xc95   :  { %v10768_v48 = vpop.eup %10767 }
 0xc96   :  { %v4735_v49 = vmul.f32 %v10768_v48, %v4729_v11  ;;  %v4733_v63 = vmul.f32 %v10768_v48, %v4727_v34  ;;  %v4734_v58 = vmul.f32 %v10768_v48, %v4728_v24  ;;  %v4736_v30 = vmul.f32 %v10768_v48, %v4730_v29 }
 0xc98   :  { %v4739_v12 = vmul.f32 %v12852_v7, %v4735_v49  ;;  %v4737_v37 = vmul.f32 %v12852_v7, %v4733_v63  ;;  %v4738_v28 = vmul.f32 %v12852_v7, %v4734_v58  ;;  %v4740_v21 = vmul.f32 %v12852_v7, %v4736_v30 }
 0xc9a   :  { %v4743_v25 = vadd.f32 %v12861_v40, %v4739_v12  ;;  %v4741_v54 = vadd.f32 %v12861_v40, %v4737_v37  ;;  %v4742_v13 = vadd.f32 %v12861_v40, %v4738_v28  ;;  %v4744_v14 = vadd.f32 %v12861_v40, %v4740_v21 }
 0xc9c   :  { %v7693_v6 = vmul.f32 -1.442695, %v4743_v25  ;;  %v7691_v33 = vmul.f32 -1.442695, %v4741_v54  ;;  %v7692_v26 = vmul.f32 -1.442695, %v4742_v13 }
 0xc9d   :  { %v7694_v51 = vmul.f32 -1.442695, %v4744_v14 }
 0xc9e   :  { %10769 = vpow2.f32 %v7693_v6  ;;  %v7699_v6 = vld [vmem:[%s13663_s6 + $0x1b8] sm:$0xff] }
 0xc9f   :  { %10771 = vpow2.f32 %v7691_v33 }
 0xca0   :  { %10773 = vpow2.f32 %v7692_v26  ;;  %v14265_v26 = vld [vmem:[#allocation12_spill] sm:$0xff] }
 0xca1   :  { %10775 = vpow2.f32 %v7694_v51  ;;  %v14266_v51 = vld [vmem:[#allocation13_spill] sm:$0xff] }
 0xca8   :  { %v10770_v44 = vpop.eup %10769 }
 0xca9   :  { %v10772_v5 = vpop.eup %10771  ;;  %v4759_v18 = vadd.f32 1.0, %v10770_v44  ;;  %v14267_v44 = vld [vmem:[#allocation14_spill] sm:$0xff] }
 0xcaa   :  { %v10774_v11 = vpop.eup %10773  ;;  %v4757_v34 = vadd.f32 1.0, %v10772_v5  ;;  %v14268_v5 = vld [vmem:[#allocation15_spill] sm:$0xff] }
 0xcab   :  { %v10776_v24 = vpop.eup %10775  ;;  %10777 = vrcp.f32 %v4759_v18  ;;  %v4758_v29 = vadd.f32 1.0, %v10774_v11  ;;  %v14269_v18 = vld [vmem:[#allocation16_spill] sm:$0xff]  ;;  %v14270_v11 = vld [vmem:[#allocation17_spill] sm:$0xff] }
 0xcac   :  { %10779 = vrcp.f32 %v4757_v34  ;;  %v4760_v1 = vadd.f32 1.0, %v10776_v24  ;;  %v14271_v34 = vld [vmem:[#allocation18_spill] sm:$0xff]  ;;  %v14272_v24 = vld [vmem:[#allocation19_spill] sm:$0xff] }
 0xcad   :  { %10781 = vrcp.f32 %v4758_v29  ;;  %v14273_v29 = vld [vmem:[#allocation20_spill] sm:$0xff] }
 0xcae   :  { %10783 = vrcp.f32 %v4760_v1  ;;  %v14274_v1 = vld [vmem:[#allocation21_spill] sm:$0xff] }
 0xcb5   :  { %v10778_v61 = vpop.eup %10777 }
 0xcb6   :  { %v10780_v48 = vpop.eup %10779  ;;  %v12873_v37 = vmul.f32 %v10778_v61, %v4743_v25  ;;  %v7698_v25 = vld [vmem:[%s13663_s6 + $0x1b0] sm:$0xff] }
 0xcb7   :  { %v10782_v49 = vpop.eup %10781  ;;  %v12867_v63 = vmul.f32 %v10780_v48, %v4741_v54  ;;  %v7696_v54 = vld [vmem:[%s13663_s6 + $0x1a0] sm:$0xff]  ;;  %v10345_v33 = vpack.c.bf16 %v7699_v6, %v7698_v25  ;;  %v14275_v61 = vld [vmem:[#allocation22_spill] sm:$0xff] }
 0xcb8   :  { %v10784_v58 = vpop.eup %10783  ;;  %v12869_v30 = vmul.f32 %v10782_v49, %v4742_v13  ;;  %v7697_v13 = vld [vmem:[%s13663_s6 + $0x1a8] sm:$0xff]  ;;  %v14276_v48 = vld [vmem:[#allocation23_spill] sm:$0xff]  ;;  %v14283_v25 = vld [vmem:[#allocation30_spill] sm:$0xff] }
 0xcb9   :  { %v12875_v28 = vmul.f32 %v10784_v58, %v4744_v14  ;;  %v10342_v14 = vpack.c.bf16 %v7697_v13, %v7696_v54  ;;  %v14277_v49 = vld [vmem:[#allocation24_spill] sm:$0xff]  ;;  %v14278_v58 = vld [vmem:[#allocation25_spill] sm:$0xff] }
 0xcba   :  { %v10336_v12 = vpack.c.bf16 %v12869_v30, %v12867_v63  ;;  %v14281_v54 = vld [vmem:[#allocation28_spill] sm:$0xff]  ;;  %v14282_v13 = vld [vmem:[#allocation29_spill] sm:$0xff] }
 0xcbb   :  { %v10339_v21 = vpack.c.bf16 %v12875_v28, %v12873_v37  ;;  %10343 = vmatpush3.bf16.msra.mxu0 %v10342_v14  ;;  %v14284_v14 = vld [vmem:[#allocation31_spill] sm:$0xff]  ;;  %v14285_v6 = vld [vmem:[#allocation32_spill] sm:$0xff] }
 0xcbc   :  { %10337 = vmatpush3.bf16.msra.mxu1 %v10336_v12  ;;  %10344 = vmatprep.subr.bf16.mxu0 %v14008_v16 }
 0xcbd   :  { %10338 = vmatprep.subr.bf16.mxu1 %v14008_v16 }
 0xcbf   :  { %10346 = vmatpush3.bf16.msra.mxu0 %v10345_v33  ;;  %v14286_v33 = vld [vmem:[#allocation33_spill] sm:$0xff] }
 0xcc0   :  { %10340 = vmatpush3.bf16.msra.mxu1 %v10339_v21 }
 0xcc1   :  { %10348 = vmatprep.subr.bf16.mxu1 %v10336_v12 }
 0xcc3   :  { %9665 = vmatmul.mubr.msk.f32.vlgmr.msra.gmra.mrb[140].mxu1 %vm424_vm2, %v14265_v26 }
 0xcc4   :  { %10350 = vmatpush3.bf16.msra.mxu1 %v10336_v12  ;;  %9686 = vmatprep.mubr.msk.f32.mxu1 %vm424_vm2, %v14266_v51  ;;  %v14279_v12 = vld [vmem:[#allocation26_spill] sm:$0xff] }
 0xcc5   :  { %10352 = vmatprep.subr.bf16.mxu1 %v10339_v21 }
 0xcc8   :  { %10354 = vmatpush3.bf16.msra.mxu1 %v10339_v21  ;;  %v14280_v21 = vld [vmem:[#allocation27_spill] sm:$0xff] }
 0xcc9   :  { %10451 = vmatprep.subr.bf16.mxu1 %v14008_v16 }
 0xccb   :  { %9687 = vmatmul.mubr.msk.f32.vlgmr.msra.gmra.mrb[142].mxu1 %vm424_vm2, %v14267_v44  ;;  %v14332_v44 = vld [vmem:[#allocation80_spill] sm:$0xff] }
 0xccc   :  { %9689 = vmatprep.mubr.msk.f32.mxu1 %vm424_vm2, %v14268_v5  ;;  %v14331_v5 = vld [vmem:[#allocation79_spill] sm:$0xff] }
 0xccf   :  { %9690 = vmatmul.mubr.msk.f32.gmra.mrb[144].mxu1 %vm424_vm2, %v14269_v18 }
 0xcd0   :  { %9692 = vmatprep.mubr.msk.f32.mxu1 %vm424_vm2, %v14270_v11 }
 0xcd3   :  { %9693 = vmatmul.mubr.msk.f32.gmra.mrb[146].mxu1 %vm424_vm2, %v14271_v34 }
 0xcd4   :  { %9695 = vmatprep.mubr.msk.f32.mxu1 %vm424_vm2, %v14272_v24  ;;  %v14330_v24 = vld [vmem:[#allocation78_spill] sm:$0xff] }
 0xcd7   :  { %9696 = vmatmul.mubr.msk.f32.gmra.mrb[148].mxu1 %vm424_vm2, %v14273_v29 }
 0xcd8   :  { %9698 = vmatprep.mubr.msk.f32.mxu1 %vm424_vm2, %v14274_v1  ;;  %v14329_v1 = vld [vmem:[#allocation77_spill] sm:$0xff] }
 0xcdb   :  { %9699 = vmatmul.mubr.msk.f32.gmra.mrb[150].mxu1 %vm424_vm2, %v14275_v61 }
 0xcdc   :  { %9701 = vmatprep.mubr.msk.f32.mxu1 %vm424_vm2, %v14276_v48 }
 0xcdf   :  { %9702 = vmatmul.mubr.msk.f32.gmra.mrb[152].mxu1 %vm424_vm2, %v14277_v49 }
 0xce0   :  { %9704 = vmatprep.mubr.msk.f32.mxu1 %vm424_vm2, %v14278_v58 }
 0xce3   :  { %9705 = vmatmul.mubr.msk.f32.gmra.mrb[154].mxu1 %vm424_vm2, %v14279_v12  ;;  %v14287_v12 = vld [vmem:[#allocation34_spill] sm:$0xff] }
 0xce4   :  { %9707 = vmatprep.mubr.msk.f32.mxu1 %vm424_vm2, %v14280_v21  ;;  %v14288_v21 = vld [vmem:[#allocation35_spill] sm:$0xff] }
 0xce7   :  { %9708 = vmatmul.mubr.msk.f32.gmra.mrb[156].mxu1 %vm424_vm2, %v14281_v54  ;;  %v14289_v54 = vld [vmem:[#allocation36_spill] sm:$0xff] }
 0xce8   :  { %9710 = vmatprep.mubr.msk.f32.mxu1 %vm424_vm2, %v14282_v13  ;;  %v14290_v13 = vld [vmem:[#allocation37_spill] sm:$0xff] }
 0xceb   :  { %9711 = vmatmul.mubr.msk.f32.gmra.mrb[158].mxu1 %vm424_vm2, %v14283_v25  ;;  %v14291_v25 = vld [vmem:[#allocation38_spill] sm:$0xff] }
 0xcec   :  { %9713 = vmatprep.mubr.msk.f32.mxu1 %vm424_vm2, %v14284_v14  ;;  %v14292_v14 = vld [vmem:[#allocation39_spill] sm:$0xff] }
 0xcef   :  { %9714 = vmatmul.mubr.msk.f32.gmra.mrb[160].mxu1 %vm424_vm2, %v14285_v6  ;;  %v14293_v6 = vld [vmem:[#allocation40_spill] sm:$0xff] }
 0xcf0   :  { %9716 = vmatprep.mubr.msk.f32.mxu1 %vm424_vm2, %v14286_v33  ;;  %v14294_v33 = vld [vmem:[#allocation41_spill] sm:$0xff] }
 0xcf3   :  { %9717 = vmatmul.mubr.msk.f32.gmra.mrb[162].mxu1 %vm424_vm2, %v14287_v12  ;;  %v14295_v12 = vld [vmem:[#allocation42_spill] sm:$0xff] }
 0xcf4   :  { %9719 = vmatprep.mubr.msk.f32.mxu1 %vm424_vm2, %v14288_v21  ;;  %v14296_v21 = vld [vmem:[#allocation43_spill] sm:$0xff] }
 0xcf7   :  { %9720 = vmatmul.mubr.msk.f32.gmra.mrb[164].mxu1 %vm424_vm2, %v14289_v54  ;;  %v14297_v54 = vld [vmem:[#allocation44_spill] sm:$0xff] }
 0xcf8   :  { %9722 = vmatprep.mubr.msk.f32.mxu1 %vm424_vm2, %v14290_v13  ;;  %v14298_v13 = vld [vmem:[#allocation45_spill] sm:$0xff] }
 0xcfb   :  { %9723 = vmatmul.mubr.msk.f32.gmra.mrb[166].mxu1 %vm424_vm2, %v14291_v25  ;;  %v14299_v25 = vld [vmem:[#allocation46_spill] sm:$0xff] }
 0xcfc   :  { %9725 = vmatprep.mubr.msk.f32.mxu1 %vm424_vm2, %v14292_v14  ;;  %v14300_v14 = vld [vmem:[#allocation47_spill] sm:$0xff] }
 0xcff   :  { %9726 = vmatmul.mubr.msk.f32.gmra.mrb[168].mxu1 %vm424_vm2, %v14293_v6  ;;  %v14301_v6 = vld [vmem:[#allocation48_spill] sm:$0xff] }
 0xd00   :  { %9728 = vmatprep.mubr.msk.f32.mxu1 %vm424_vm2, %v14294_v33  ;;  %v14302_v33 = vld [vmem:[#allocation49_spill] sm:$0xff] }
 0xd03   :  { %9729 = vmatmul.mubr.msk.f32.gmra.mrb[170].mxu1 %vm424_vm2, %v14295_v12  ;;  %v14303_v12 = vld [vmem:[#allocation50_spill] sm:$0xff] }
 0xd04   :  { %9731 = vmatprep.mubr.msk.f32.mxu1 %vm424_vm2, %v14296_v21  ;;  %v14304_v21 = vld [vmem:[#allocation51_spill] sm:$0xff] }
 0xd07   :  { %9732 = vmatmul.mubr.msk.f32.gmra.mrb[172].mxu1 %vm424_vm2, %v14297_v54  ;;  %v14305_v54 = vld [vmem:[#allocation52_spill] sm:$0xff] }
 0xd08   :  { %9734 = vmatprep.mubr.msk.f32.mxu1 %vm424_vm2, %v14298_v13  ;;  %v14306_v13 = vld [vmem:[#allocation53_spill] sm:$0xff] }
 0xd0b   :  { %9735 = vmatmul.mubr.msk.f32.gmra.mrb[174].mxu1 %vm424_vm2, %v14299_v25  ;;  %v14307_v25 = vld [vmem:[#allocation54_spill] sm:$0xff] }
 0xd0c   :  { %9737 = vmatprep.mubr.msk.f32.mxu1 %vm424_vm2, %v14300_v14  ;;  %v14308_v14 = vld [vmem:[#allocation55_spill] sm:$0xff] }
 0xd0f   :  { %9738 = vmatmul.mubr.msk.f32.gmra.mrb[176].mxu1 %vm424_vm2, %v14301_v6  ;;  %v14309_v6 = vld [vmem:[#allocation56_spill] sm:$0xff] }
 0xd10   :  { %9740 = vmatprep.mubr.msk.f32.mxu1 %vm424_vm2, %v14302_v33  ;;  %v14310_v33 = vld [vmem:[#allocation57_spill] sm:$0xff] }
 0xd13   :  { %9741 = vmatmul.mubr.msk.f32.gmra.mrb[178].mxu1 %vm424_vm2, %v14303_v12  ;;  %v14311_v12 = vld [vmem:[#allocation58_spill] sm:$0xff] }
 0xd14   :  { %9743 = vmatprep.mubr.msk.f32.mxu1 %vm424_vm2, %v14304_v21  ;;  %v14312_v21 = vld [vmem:[#allocation59_spill] sm:$0xff] }
 0xd17   :  { %9744 = vmatmul.mubr.msk.f32.gmra.mrb[180].mxu1 %vm424_vm2, %v14305_v54  ;;  %v14313_v54 = vld [vmem:[#allocation60_spill] sm:$0xff] }
 0xd18   :  { %9746 = vmatprep.mubr.msk.f32.mxu1 %vm424_vm2, %v14306_v13  ;;  %v14314_v13 = vld [vmem:[#allocation61_spill] sm:$0xff] }
 0xd1b   :  { %9747 = vmatmul.mubr.msk.f32.gmra.mrb[182].mxu1 %vm424_vm2, %v14307_v25  ;;  %v14315_v25 = vld [vmem:[#allocation62_spill] sm:$0xff] }
 0xd1c   :  { %9749 = vmatprep.mubr.msk.f32.mxu1 %vm424_vm2, %v14308_v14  ;;  %v14316_v14 = vld [vmem:[#allocation63_spill] sm:$0xff] }
 0xd1f   :  { %9750 = vmatmul.mubr.msk.f32.gmra.mrb[184].mxu1 %vm424_vm2, %v14309_v6  ;;  %v14317_v6 = vld [vmem:[#allocation64_spill] sm:$0xff] }
 0xd20   :  { %9752 = vmatprep.mubr.msk.f32.mxu1 %vm424_vm2, %v14310_v33  ;;  %v14318_v33 = vld [vmem:[#allocation65_spill] sm:$0xff] }
 0xd23   :  { %9753 = vmatmul.mubr.msk.f32.gmra.mrb[186].mxu1 %vm424_vm2, %v14311_v12  ;;  %v14319_v12 = vld [vmem:[#allocation66_spill] sm:$0xff] }
 0xd24   :  { %9755 = vmatprep.mubr.msk.f32.mxu1 %vm424_vm2, %v14312_v21  ;;  %v14320_v21 = vld [vmem:[#allocation67_spill] sm:$0xff] }
 0xd27   :  { %9756 = vmatmul.mubr.msk.f32.gmra.mrb[188].mxu1 %vm424_vm2, %v14313_v54  ;;  %v14321_v54 = vld [vmem:[#allocation68_spill] sm:$0xff] }
 0xd28   :  { %9758 = vmatprep.mubr.msk.f32.mxu1 %vm424_vm2, %v14314_v13  ;;  %v14322_v13 = vld [vmem:[#allocation69_spill] sm:$0xff] }
 0xd2b   :  { %9759 = vmatmul.mubr.msk.f32.gmra.mrb[190].mxu1 %vm424_vm2, %v14315_v25  ;;  %v14323_v25 = vld [vmem:[#allocation70_spill] sm:$0xff] }
 0xd2c   :  { %9761 = vmatprep.mubr.msk.f32.mxu1 %vm424_vm2, %v14316_v14  ;;  %v14324_v14 = vld [vmem:[#allocation71_spill] sm:$0xff] }
 0xd2f   :  { %9762 = vmatmul.mubr.msk.f32.gmra.mrb[192].mxu1 %vm424_vm2, %v14317_v6  ;;  %v14325_v6 = vld [vmem:[#allocation72_spill] sm:$0xff] }
 0xd30   :  { %9764 = vmatprep.mubr.msk.f32.mxu1 %vm424_vm2, %v14318_v33 }
 0xd33   :  { %9765 = vmatmul.mubr.msk.f32.gmra.mrb[194].mxu1 %vm424_vm2, %v14319_v12 }
 0xd34   :  { %9767 = vmatprep.mubr.msk.f32.mxu1 %vm424_vm2, %v14320_v21 }
 0xd37   :  { %9768 = vmatmul.mubr.msk.f32.gmra.mrb[196].mxu1 %vm424_vm2, %v14321_v54  ;;  %v14326_v54 = vld [vmem:[#allocation74_spill] sm:$0xff] }
 0xd38   :  { %9770 = vmatprep.mubr.msk.f32.mxu1 %vm424_vm2, %v14322_v13  ;;  %v14327_v13 = vld [vmem:[#allocation75_spill] sm:$0xff] }
 0xd3b   :  { %9771 = vmatmul.mubr.msk.f32.gmra.mrb[198].mxu1 %vm424_vm2, %v14323_v25  ;;  %v14328_v25 = vld [vmem:[#allocation76_spill] sm:$0xff] }
 0xd3c   :  { %9773 = vmatprep.mubr.msk.f32.mxu1 %vm424_vm2, %v14324_v14 }
 0xd3f   :  { %9774 = vmatmul.mubr.msk.f32.gmra.mrb[200].mxu1 %vm424_vm2, %v14325_v6 }
 0xd40   :  { %9823 = vmatprep.mubr.msk.f32.mxu1 %vm10881_vm3, %v14262_v31 }
 0xd96   :  { %v4839_v12 = vpop.f32.mrb[140].mxu1 }
 0xd97   :  { %9676 = vmatmul.mubr.msk.f32.vlgmr.msra.gmra.mrb[176].mxu0 %vm424_vm2, %v4839_v12  ;;  %v9666_v21 = vpop.f32.mrb[141].mxu1 }
 0xd98   :  { %5411 = vmatprep.mubr.f32.mxu0 %v14326_v54 }
 0xd9e   :  { %v9688_v33 = vpop.f32.mrb[142].mxu1 }
 0xd9f   :  { %v5288_v58 = vmul.f32 %v9688_v33, %v14327_v13  ;;  %v4988_v49 = vpop.f32.mrb[143].mxu1  ;;  %v14333_v33 = vld [vmem:[#allocation81_spill] sm:$0xff] }
 0xda0   :  { %v5287_v48 = vmul.f32 %v4988_v49, %v14328_v25  ;;  %v14334_v49 = vld [vmem:[#allocation82_spill] sm:$0xff] }
 0xda2   :  { %v10357_v61 = vpack.c.bf16 %v5288_v58, %v5287_v48  ;;  %v9691_v14 = vpop.f32.mrb[144].mxu1 }
 0xda3   :  { %v5290_v29 = vmul.f32 %v9691_v14, %v14329_v1  ;;  %v4998_v6 = vpop.f32.mrb[145].mxu1  ;;  %v14335_v14 = vld [vmem:[#allocation83_spill] sm:$0xff] }
 0xda4   :  { %v5289_v34 = vmul.f32 %v4998_v6, %v14330_v24 }
 0xda6   :  { %v10361_v11 = vpack.c.bf16 %v5290_v29, %v5289_v34  ;;  %v9694_v18 = vpop.f32.mrb[146].mxu1 }
 0xda7   :  { %v5292_v12 = vmul.f32 %v9694_v18, %v14331_v5  ;;  %v5008_v21 = vpop.f32.mrb[147].mxu1 }
 0xda8   :  { %v5291_v54 = vmul.f32 %v5008_v21, %v14332_v44 }
 0xdaa   :  { %v10365_v51 = vpack.c.bf16 %v5292_v12, %v5291_v54  ;;  %v9697_v26 = vpop.f32.mrb[148].mxu1 }
 0xdab   :  { %v5294_v13 = vmul.f32 %v9697_v26, %v14333_v33  ;;  %v5018_v40 = vpop.f32.mrb[149].mxu1  ;;  %v14336_v26 = vld [vmem:[#allocation87_spill] sm:$0xff] }
 0xdac   :  { %v5293_v48 = vmul.f32 %v5018_v40, %v14334_v49 }
 0xdae   :  { %v10369_v58 = vpack.c.bf16 %v5294_v13, %v5293_v48  ;;  %v9700_v25 = vpop.f32.mrb[150].mxu1 }
 0xdaf   :  { %v5296_v1 = vmul.f32 %v9700_v25, %v14335_v14  ;;  %v5028_v7 = vpop.f32.mrb[151].mxu1  ;;  %v14337_v25 = vld [vmem:[#allocation89_spill] sm:$0xff] }
 0xdb0   :  { %v5295_v34 = vmul.f32 %v5028_v7, %v14229_v50 }
 0xdb2   :  { %v10373_v29 = vpack.c.bf16 %v5296_v1, %v5295_v34  ;;  %v9703_v6 = vpop.f32.mrb[152].mxu1 }
 0xdb3   :  { %v5298_v18 = vmul.f32 %v9703_v6, %v14230_v43  ;;  %v5038_v5 = vpop.f32.mrb[153].mxu1 }
 0xdb4   :  { %v5297_v54 = vmul.f32 %v5038_v5, %v14231_v23 }
 0xdb6   :  { %v10377_v12 = vpack.c.bf16 %v5298_v18, %v5297_v54  ;;  %v9706_v21 = vpop.f32.mrb[154].mxu1 }
 0xdb7   :  { %v5300_v33 = vmul.f32 %v9706_v21, %v14336_v26  ;;  %v5048_v44 = vpop.f32.mrb[155].mxu1 }
 0xdb8   :  { %v5299_v40 = vmul.f32 %v5048_v44, %v14233_v57 }
 0xdba   :  { %v10381_v13 = vpack.c.bf16 %v5300_v33, %v5299_v40  ;;  %v9709_v48 = vpop.f32.mrb[156].mxu1 }
 0xdbb   :  { %v13035_v14 = vmul.f32 %v9709_v48, %v14337_v25  ;;  %v5058_v7 = vpop.f32.mrb[157].mxu1 }
 0xdbc   :  { %v5301_v1 = vmul.f32 %v5058_v7, %v14128_v9 }
 0xdbe   :  { %v10385_v34 = vpack.c.bf16 %v13035_v14, %v5301_v1  ;;  %v9712_v6 = vpop.f32.mrb[158].mxu1 }
 0xdbf   :  { %v5304_v5 = vmul.f32 %v9712_v6, %v14129_v36  ;;  %v5068_v18 = vpop.f32.mrb[159].mxu1 }
 0xdc0   :  { %v5303_v54 = vmul.f32 %v5068_v18, %v14130_v60 }
 0xdc2   :  { %v10355_v21 = vpack.c.bf16 %v5304_v5, %v5303_v54  ;;  %v9715_v26 = vpop.f32.mrb[160].mxu1 }
 0xdc3   :  { %v5306_v44 = vmul.f32 %v9715_v26, %v11854_v46  ;;  %v5078_v33 = vpop.f32.mrb[161].mxu1 }
 0xdc4   :  { %v5305_v40 = vmul.f32 %v5078_v33, %v14131_v10  ;;  %10356 = vmatprep.subr.bf16.mxu0 %v10355_v21 }
 0xdc5   :  { %10358 = vmatpush3.bf16.msra.mxu0 %v10357_v61 }
 0xdc6   :  { %v10359_v48 = vpack.c.bf16 %v5306_v44, %v5305_v40  ;;  %v9718_v25 = vpop.f32.mrb[162].mxu1 }
 0xdc7   :  { %v5308_v7 = vmul.f32 %v9718_v25, %v11866_v62  ;;  %v5088_v14 = vpop.f32.mrb[163].mxu1 }
 0xdc8   :  { %v5307_v1 = vmul.f32 %v5088_v14, %v11873_v39  ;;  %10360 = vmatprep.subr.bf16.mxu0 %v10359_v48 }
 0xdc9   :  { %10362 = vmatpush3.bf16.msra.mxu0 %v10361_v11 }
 0xdca   :  { %v10363_v6 = vpack.c.bf16 %v5308_v7, %v5307_v1  ;;  %v9721_v18 = vpop.f32.mrb[164].mxu1 }
 0xdcb   :  { %v5310_v5 = vmul.f32 %v9721_v18, %v11881_v4  ;;  %v5098_v54 = vpop.f32.mrb[165].mxu1 }
 0xdcc   :  { %v5309_v26 = vmul.f32 %v5098_v54, %v11888_v52  ;;  %10364 = vmatprep.subr.bf16.mxu0 %v10363_v6 }
 0xdcd   :  { %10366 = vmatpush3.bf16.msra.mxu0 %v10365_v51 }
 0xdce   :  { %v10367_v21 = vpack.c.bf16 %v5310_v5, %v5309_v26  ;;  %v9724_v61 = vpop.f32.mrb[166].mxu1 }
 0xdcf   :  { %v5312_v44 = vmul.f32 %v9724_v61, %v11896_v19  ;;  %v5108_v33 = vpop.f32.mrb[167].mxu1 }
 0xdd0   :  { %v5311_v25 = vmul.f32 %v5108_v33, %v11903_v8  ;;  %10368 = vmatprep.subr.bf16.mxu0 %v10367_v21 }
 0xdd1   :  { %10370 = vmatpush3.bf16.msra.mxu0 %v10369_v58 }
 0xdd2   :  { %v10371_v40 = vpack.c.bf16 %v5312_v44, %v5311_v25  ;;  %v9727_v11 = vpop.f32.mrb[168].mxu1 }
 0xdd3   :  { %v5314_v48 = vmul.f32 %v9727_v11, %v11911_v3  ;;  %v5118_v7 = vpop.f32.mrb[169].mxu1 }
 0xdd4   :  { %v5313_v14 = vmul.f32 %v5118_v7, %v11916_v0  ;;  %10372 = vmatprep.subr.bf16.mxu0 %v10371_v40 }
 0xdd5   :  { %10374 = vmatpush3.bf16.msra.mxu0 %v10373_v29 }
 0xdd6   :  { %v10375_v1 = vpack.c.bf16 %v5314_v48, %v5313_v14  ;;  %v9730_v51 = vpop.f32.mrb[170].mxu1 }
 0xdd7   :  { %v5316_v6 = vmul.f32 %v9730_v51, %v11922_v45  ;;  %v5128_v18 = vpop.f32.mrb[171].mxu1 }
 0xdd8   :  { %v5315_v5 = vmul.f32 %v5128_v18, %v11927_v59  ;;  %10376 = vmatprep.subr.bf16.mxu0 %v10375_v1 }
 0xdd9   :  { %10378 = vmatpush3.bf16.msra.mxu0 %v10377_v12 }
 0xdda   :  { %v10379_v54 = vpack.c.bf16 %v5316_v6, %v5315_v5  ;;  %v9733_v58 = vpop.f32.mrb[172].mxu1 }
 0xddb   :  { %v5318_v26 = vmul.f32 %v9733_v58, %v11933_v38  ;;  %v5138_v21 = vpop.f32.mrb[173].mxu1 }
 0xddc   :  { %v5317_v61 = vmul.f32 %v5138_v21, %v11938_v42  ;;  %10380 = vmatprep.subr.bf16.mxu0 %v10379_v54  ;;  %v14338_v21 = vld [vmem:[#allocation97_spill] sm:$0xff] }
 0xddd   :  { %10382 = vmatpush3.bf16.msra.mxu0 %v10381_v13 }
 0xdde   :  { %v10383_v44 = vpack.c.bf16 %v5318_v26, %v5317_v61  ;;  %v9736_v29 = vpop.f32.mrb[174].mxu1 }
 0xddf   :  { %v5320_v33 = vmul.f32 %v9736_v29, %v11944_v20  ;;  %v5148_v25 = vpop.f32.mrb[175].mxu1  ;;  %v14339_v29 = vld [vmem:[#allocation100_spill] sm:$0xff] }
 0xde0   :  { %v5319_v40 = vmul.f32 %v5148_v25, %v11949_v35  ;;  %10384 = vmatprep.subr.bf16.mxu0 %v10383_v44 }
 0xde1   :  { %10386 = vmatpush3.bf16.msra.mxu0 %v10385_v34 }
 0xde2   :  { %v10388_v11 = vpack.c.bf16 %v5320_v33, %v5319_v40  ;;  %v9739_v12 = vpop.f32.mrb[176].mxu1  ;;  %10387 = vmatprep.subr.bf16.mxu0 %v14008_v16  ;;  %v14340_v40 = vld [vmem:[#allocation102_spill] sm:$0xff] }
 0xde3   :  { %v5322_v48 = vmul.f32 %v9739_v12, %v11961_v47  ;;  %v5158_v7 = vpop.f32.mrb[177].mxu1  ;;  %v14341_v12 = vld [vmem:[#allocation99_spill] sm:$0xff] }
 0xde4   :  { %v5321_v14 = vmul.f32 %v5158_v7, %v11968_v53  ;;  %5412 = vmatmul.mubr.f32.vlgmr.msra.gmra.mrb[178].mxu0 %v11959_v22 }
 0xde5   :  { %10389 = vmatpush1.bf16.msra.mxu0 %v10388_v11  ;;  %5416 = vmatprep.mubr.f32.mxu0 %v11966_v55 }
 0xde6   :  { %v10391_v13 = vpack.c.bf16 %v5322_v48, %v5321_v14  ;;  %v9742_v1 = vpop.f32.mrb[178].mxu1  ;;  %10390 = vmatprep.subr.bf16.mxu0 %v14008_v16  ;;  %v14342_v48 = vld [vmem:[#allocation101_spill] sm:$0xff] }
 0xde7   :  { %v5324_v34 = vmul.f32 %v9742_v1, %v11981_v17  ;;  %v5168_v51 = vpop.f32.mrb[179].mxu1 }
 0xde8   :  { %v5323_v6 = vmul.f32 %v5168_v51, %v11986_v27  ;;  %5417 = vmatmul.mubr.f32.gmra.mrb[180].mxu0 %v11979_v32  ;;  %v14344_v51 = vld [vmem:[#allocation104_spill] sm:$0xff] }
 0xde9   :  { %10392 = vmatpush1.bf16.msra.mxu0 %v10391_v13  ;;  %5421 = vmatprep.mubr.f32.mxu0 %v11984_v56  ;;  %v14343_v13 = vld [vmem:[#allocation103_spill] sm:$0xff] }
 0xdea   :  { %v10394_v18 = vpack.c.bf16 %v5324_v34, %v5323_v6  ;;  %v9745_v5 = vpop.f32.mrb[180].mxu1  ;;  %10393 = vmatprep.subr.bf16.mxu0 %v14008_v16 }
 0xdeb   :  { %v5326_v54 = vmul.f32 %v9745_v5, %v11999_v2  ;;  %v5178_v58 = vpop.f32.mrb[181].mxu1 }
 0xdec   :  { %v5325_v26 = vmul.f32 %v5178_v58, %v12004_v41  ;;  %5422 = vmatmul.mubr.f32.gmra.mrb[182].mxu0 %v11997_v15 }
 0xded   :  { %10395 = vmatpush1.bf16.msra.mxu0 %v10394_v18  ;;  %5426 = vmatprep.mubr.f32.mxu0 %v14338_v21 }
 0xdee   :  { %v10397_v61 = vpack.c.bf16 %v5326_v54, %v5325_v26  ;;  %v9748_v44 = vpop.f32.mrb[182].mxu1  ;;  %10396 = vmatprep.subr.bf16.mxu0 %v14008_v16  ;;  %v14345_v54 = vld [vmem:[#allocation105_spill] sm:$0xff] }
 0xdef   :  { %v5328_v33 = vmul.f32 %v9748_v44, %v14339_v29  ;;  %v5188_v25 = vpop.f32.mrb[183].mxu1 }
 0xdf0   :  { %v5327_v11 = vmul.f32 %v5188_v25, %v14340_v40  ;;  %5427 = vmatmul.mubr.f32.gmra.mrb[184].mxu0 %v14341_v12 }
 0xdf1   :  { %10398 = vmatpush1.bf16.msra.mxu0 %v10397_v61  ;;  %7761 = vmatprep.mubr.msk.f32.mxu0 %vm2168_vm4, %v14342_v48  ;;  %v14346_v61 = vld [vmem:[#allocation106_spill] sm:$0xff]  ;;  %v14348_v48 = vld [vmem:[#allocation108_spill] sm:$0xff] }
 0xdf2   :  { %v10400_v7 = vpack.c.bf16 %v5328_v33, %v5327_v11  ;;  %v9751_v14 = vpop.f32.mrb[184].mxu1  ;;  %10399 = vmatprep.subr.bf16.mxu0 %v14008_v16  ;;  %v14347_v11 = vld [vmem:[#allocation107_spill] sm:$0xff] }
 0xdf3   :  { %v5330_v1 = vmul.f32 %v9751_v14, %v14343_v13  ;;  %v5198_v34 = vpop.f32.mrb[185].mxu1 }
 0xdf4   :  { %v5329_v6 = vmul.f32 %v5198_v34, %v14344_v51  ;;  %v14350_v51 = vld [vmem:[#allocation110_spill] sm:$0xff] }
 0xdf5   :  { %10401 = vmatpush1.bf16.msra.mxu0 %v10400_v7 }
 0xdf6   :  { %v10403_v18 = vpack.c.bf16 %v5330_v1, %v5329_v6  ;;  %v9754_v5 = vpop.f32.mrb[186].mxu1  ;;  %10402 = vmatprep.subr.bf16.mxu0 %v14008_v16  ;;  %v14349_v6 = vld [vmem:[#allocation109_spill] sm:$0xff] }
 0xdf7   :  { %v5332_v58 = vmul.f32 %v9754_v5, %v14345_v54  ;;  %v5208_v26 = vpop.f32.mrb[187].mxu1 }
 0xdf8   :  { %v5331_v44 = vmul.f32 %v5208_v26, %v14346_v61  ;;  %v14352_v61 = vld [vmem:[#allocation112_spill] sm:$0xff] }
 0xdf9   :  { %10404 = vmatpush1.bf16.msra.mxu0 %v10403_v18 }
 0xdfa   :  { %v10406_v33 = vpack.c.bf16 %v5332_v58, %v5331_v44  ;;  %v9757_v25 = vpop.f32.mrb[188].mxu1  ;;  %10405 = vmatprep.subr.bf16.mxu0 %v14008_v16  ;;  %v14351_v44 = vld [vmem:[#allocation111_spill] sm:$0xff] }
 0xdfb   :  { %v5334_v14 = vmul.f32 %v9757_v25, %v14347_v11  ;;  %v5218_v13 = vpop.f32.mrb[189].mxu1 }
 0xdfc   :  { %v5333_v34 = vmul.f32 %v5218_v13, %v14348_v48  ;;  %v14354_v48 = vld [vmem:[#allocation113_spill] sm:$0xff] }
 0xdfd   :  { %10407 = vmatpush1.bf16.msra.mxu0 %v10406_v33 }
 0xdfe   :  { %v10409_v7 = vpack.c.bf16 %v5334_v14, %v5333_v34  ;;  %v9760_v1 = vpop.f32.mrb[190].mxu1  ;;  %10408 = vmatprep.subr.bf16.mxu0 %v14008_v16  ;;  %v14353_v34 = vld [vmem:[#allocation92_spill] sm:$0xff] }
 0xdff   :  { %v5336_v5 = vmul.f32 %v9760_v1, %v14349_v6  ;;  %v5228_v54 = vpop.f32.mrb[191].mxu1 }
 0xe00   :  { %v5335_v26 = vmul.f32 %v5228_v54, %v14350_v51  ;;  %v14356_v51 = vld [vmem:[#allocation114_spill] sm:$0xff] }
 0xe01   :  { %10410 = vmatpush1.bf16.msra.mxu0 %v10409_v7 }
 0xe02   :  { %v10412_v18 = vpack.c.bf16 %v5336_v5, %v5335_v26  ;;  %v9763_v58 = vpop.f32.mrb[192].mxu1  ;;  %10411 = vmatprep.subr.bf16.mxu0 %v14008_v16  ;;  %v14355_v26 = vld [vmem:[#allocation95_spill] sm:$0xff] }
 0xe03   :  { %v5338_v25 = vmul.f32 %v9763_v58, %v14351_v44  ;;  %v5238_v11 = vpop.f32.mrb[193].mxu1 }
 0xe04   :  { %v5337_v13 = vmul.f32 %v5238_v11, %v14352_v61  ;;  %v14358_v61 = vld [vmem:[#allocation116_spill] sm:$0xff] }
 0xe05   :  { %10413 = vmatpush1.bf16.msra.mxu0 %v10412_v18 }
 0xe06   :  { %v10415_v33 = vpack.c.bf16 %v5338_v25, %v5337_v13  ;;  %v9766_v14 = vpop.f32.mrb[194].mxu1  ;;  %10414 = vmatprep.subr.bf16.mxu0 %v14008_v16  ;;  %v14357_v13 = vld [vmem:[#allocation115_spill] sm:$0xff] }
 0xe07   :  { %v5340_v1 = vmul.f32 %v9766_v14, %v14353_v34  ;;  %v5248_v6 = vpop.f32.mrb[195].mxu1 }
 0xe08   :  { %v5339_v54 = vmul.f32 %v5248_v6, %v14354_v48 }
 0xe09   :  { %10416 = vmatpush1.bf16.msra.mxu0 %v10415_v33 }
 0xe0a   :  { %v10418_v7 = vpack.c.bf16 %v5340_v1, %v5339_v54  ;;  %v9769_v5 = vpop.f32.mrb[196].mxu1  ;;  %10417 = vmatprep.subr.bf16.mxu0 %v14008_v16  ;;  %v14359_v54 = vld [vmem:[#allocation117_spill] sm:$0xff] }
 0xe0b   :  { %v5342_v58 = vmul.f32 %v9769_v5, %v14355_v26  ;;  %v5258_v44 = vpop.f32.mrb[197].mxu1 }
 0xe0c   :  { %v5341_v11 = vmul.f32 %v5258_v44, %v14356_v51  ;;  %v7769_v44 = vld [vmem:[%s13663_s6 + $0x100] sm:$0xff] }
 0xe0d   :  { %10419 = vmatpush1.bf16.msra.mxu0 %v10418_v7  ;;  %v7770_v7 = vld [vmem:[%s13663_s6 + $0x108] sm:$0xff] }
 0xe0e   :  { %v10421_v18 = vpack.c.bf16 %v5342_v58, %v5341_v11  ;;  %v9772_v25 = vpop.f32.mrb[198].mxu1  ;;  %10420 = vmatprep.subr.bf16.mxu0 %v14008_v16  ;;  %v14360_v58 = vld [vmem:[#allocation118_spill] sm:$0xff] }
 0xe0f   :  { %v5344_v14 = vmul.f32 %v9772_v25, %v14357_v13  ;;  %v5268_v34 = vpop.f32.mrb[199].mxu1  ;;  %v7771_v25 = vld [vmem:[%s13663_s6 + $0x110] sm:$0xff] }
 0xe10   :  { %v5343_v6 = vmul.f32 %v5268_v34, %v14358_v61 }
 0xe11   :  { %10422 = vmatpush1.bf16.msra.mxu0 %v10421_v18  ;;  %v10429_v18 = vpack.c.bf16 %v7770_v7, %v7769_v44  ;;  %v14366_v44 = vld [vmem:[#allocation124_spill] sm:$0xff]  ;;  %v14367_v7 = vld [vmem:[#allocation125_spill] sm:$0xff] }
 0xe12   :  { %v10424_v33 = vpack.c.bf16 %v5344_v14, %v5343_v6  ;;  %v9775_v1 = vpop.f32.mrb[200].mxu1  ;;  %10423 = vmatprep.subr.bf16.mxu0 %v14008_v16  ;;  %v7772_v14 = vld [vmem:[%s13663_s6 + $0x118] sm:$0xff] }
 0xe13   :  { %v5346_v5 = vmul.f32 %v9775_v1, %v14359_v54  ;;  %v5278_v26 = vpop.f32.mrb[201].mxu1  ;;  %v10433_v6 = vpack.c.bf16 %v7772_v14, %v7771_v25  ;;  %v14361_v1 = vld [vmem:[#allocation119_spill] sm:$0xff]  ;;  %v14362_v54 = vld [vmem:[#allocation120_spill] sm:$0xff]  ;;  %v14368_v25 = vld [vmem:[#allocation10_spill] sm:$0xff] }
 0xe14   :  { %v5345_v11 = vmul.f32 %v5278_v26, %v14360_v58  ;;  %v14363_v26 = vld [vmem:[#allocation121_spill] sm:$0xff] }
 0xe15   :  { %10425 = vmatpush1.bf16.msra.mxu0 %v10424_v33  ;;  %v14364_v33 = vld [vmem:[#allocation122_spill] sm:$0xff] }
 0xe16   :  { %v10427_v34 = vpack.c.bf16 %v5346_v5, %v5345_v11  ;;  %10426 = vmatprep.subr.bf16.mxu0 %v14008_v16  ;;  %v14365_v5 = vld [vmem:[#allocation123_spill] sm:$0xff] }
 0xe17   :  { %v7765_v11 = vld [vmem:[%s13663_s6 + $0x60] sm:$0xff] }
 0xe19   :  { %10428 = vmatpush1.bf16.msra.mxu0 %v10427_v34  ;;  %v7766_v34 = vld [vmem:[%s13663_s6 + $0x68] sm:$0xff] }
 0xe1a   :  { %10430 = vmatprep.subr.bf16.mxu0 %v10429_v18 }
 0xe1c   :  { %5497 = vmatmul.mubr.f32.vlgmr.msra.gmra.mrb[186].mxu0 %v14361_v1 }
 0xe1d   :  { %7762 = vmatprep.mubr.msk.f32.mxu0 %vm2168_vm4, %v14362_v54  ;;  %10432 = vmatpush3.bf16.msra.mxu0 %v10429_v18  ;;  %v10437_v18 = vpack.c.bf16 %v7766_v34, %v7765_v11 }
 0xe1e   :  { %10434 = vmatprep.subr.bf16.mxu0 %v10433_v6 }
 0xe20   :  { %5502 = vmatmul.mubr.f32.gmra.mrb[188].mxu0 %v14363_v26 }
 0xe21   :  { %7763 = vmatprep.mubr.msk.f32.mxu0 %vm2168_vm4, %v14364_v33  ;;  %10436 = vmatpush3.bf16.msra.mxu0 %v10433_v6 }
 0xe22   :  { %10438 = vmatprep.subr.bf16.mxu0 %v10437_v18 }
 0xe24   :  { %5507 = vmatmul.mubr.f32.gmra.mrb[190].mxu0 %v14365_v5 }
 0xe25   :  { %7764 = vmatprep.mubr.msk.f32.mxu0 %vm2168_vm4, %v14366_v44 }
 0xe28   :  { %5512 = vmatmul.mubr.f32.gmra.mrb[192].mxu0 %v14367_v7 }
 0xe29   :  { %9784 = vmatprep.mubr.msk.f32.mxu0 %vm424_vm2, %v12867_v63 }
 0xe2c   :  { %9785 = vmatmul.mubr.msk.f32.vlgmr.msra.gmra.mrb[194].mxu0 %vm424_vm2, %v12869_v30 }
 0xe2d   :  { %9787 = vmatprep.mubr.msk.f32.mxu0 %vm424_vm2, %v12873_v37  ;;  %10440 = vmatpush3.bf16.msra.mxu0 %v10437_v18  ;;  %v7767_v37 = vld [vmem:[%s13663_s6 + $0x70] sm:$0xff] }
 0xe30   :  { %9788 = vmatmul.mubr.msk.f32.gmra.mrb[196].mxu0 %vm424_vm2, %v12875_v28  ;;  %v7768_v28 = vld [vmem:[%s13663_s6 + $0x78] sm:$0xff] }
 0xe31   :  { %v10441_v6 = vpack.c.bf16 %v7768_v28, %v7767_v37 }
 0xe33   :  { %10442 = vmatprep.subr.bf16.mxu0 %v10441_v6 }
 0xe34   :  { %10444 = vmatpush3.bf16.msra.mxu0 %v10441_v6 }
 0xe35   :  { %10445 = vmatprep.subr.bf16.mxu0 %v14008_v16 }
 0xe6a   :  { %v4917_v63 = vpop.f32.mrb[176].mxu0 }
 0xe6b   :  { %v13143_v30 = vadd.f32 %v4917_v63, %v14368_v25  ;;  %v9677_v14 = vpop.f32.mrb[177].mxu0 }
 0xe6d   :  { %14369 = vst [vmem:[#allocation91_spill] sm:$0xff] %v13143_v30 }
 0xeb7   :  { %v8829_v11 = vpop.f32.mrb[178].mxu0 }
 0xeb8   :  { %v8830_v34 = vpop.f32.mrb[179].mxu0 }
 0xeb9   :  { %v8831_v18 = vadd.f32 %v8830_v34, %v8829_v11 }
 0xebb   :  { %v8832_v7 = vpop.f32.mrb[180].mxu0 }
 0xebc   :  { %v8833_v63 = vpop.f32.mrb[181].mxu0 }
 0xebd   :  { %v8834_v25 = vadd.f32 %v8833_v63, %v8832_v7 }
 0xebf   :  { %v8835_v14 = vpop.f32.mrb[182].mxu0 }
 0xec0   :  { %v8836_v30 = vpop.f32.mrb[183].mxu0 }
 0xec1   :  { %v8837_v44 = vadd.f32 %v8836_v30, %v8835_v14 }
 0xec3   :  { %v8838_v5 = vpop.f32.mrb[184].mxu0 }
 0xec4   :  { %v8839_v33 = vpop.f32.mrb[185].mxu0 }
 0xec5   :  { %v8840_v26 = vadd.f32 %v8839_v33, %v8838_v5 }
 0xeef   :  { %v5498_v54 = vpop.f32.mrb[186].mxu0 }
 0xef0   :  { %v5499_v1 = vadd.f32 %v8831_v18, %v5498_v54  ;;  %v5500_v58 = vpop.f32.mrb[187].mxu0  ;;  %v5721_v54 = vld [vmem:[%s13664_s7 + $0x3] ss:$0 sm:$0xff] }
 0xef2   :  { %9798 = vmatprep.mubr.msk.f32.mxu0 %vm424_vm2, %v5499_v1 }
 0xef3   :  { %v5503_v37 = vpop.f32.mrb[188].mxu0 }
 0xef4   :  { %v5504_v28 = vadd.f32 %v8834_v25, %v5503_v37  ;;  %v5505_v6 = vpop.f32.mrb[189].mxu0 }
 0xef6   :  { %9799 = vmatmul.mubr.msk.f32.vlgmr.msra.gmra.mrb[194].mxu0 %vm424_vm2, %v5504_v28 }
 0xef7   :  { %v5508_v11 = vpop.f32.mrb[190].mxu0 }
 0xef8   :  { %v5509_v34 = vadd.f32 %v8837_v44, %v5508_v11  ;;  %v5510_v61 = vpop.f32.mrb[191].mxu0 }
 0xefa   :  { %9801 = vmatprep.mubr.msk.f32.mxu0 %vm424_vm2, %v5509_v34 }
 0xefb   :  { %v5513_v7 = vpop.f32.mrb[192].mxu0 }
 0xefc   :  { %v5514_v30 = vadd.f32 %v8840_v26, %v5513_v7  ;;  %v5515_v63 = vpop.f32.mrb[193].mxu0 }
 0xefe   :  { %9802 = vmatmul.mubr.msk.f32.gmra.mrb[196].mxu0 %vm424_vm2, %v5514_v30 }
 0xeff   :  { %9812 = vmatprep.mubr.msk.f32.mxu0 %vm10881_vm3, %v14262_v31 }
 0xfc9   :  { %v9800_v58 = vpop.f32.mrb[194].mxu0 }
 0xfca   :  { %v5723_v1 = vadd.f32 %v9800_v58, %v5721_v54  ;;  %v5702_v33 = vpop.f32.mrb[195].mxu0 }
 0xfcb   :  { %v5722_v5 = vadd.f32 %v5721_v54, %v5702_v33 }
 0xfcc   :  { %v5727_v61 = vsel %vm424_vm2, %v5723_v1, 0.0  ;;  %v5741_v44 = vmul.f32 %v5723_v1, %v5723_v1 }
 0xfcd   :  { %v5726_v18 = vsel %vm424_vm2, %v5722_v5, 0.0  ;;  %v5740_v26 = vmul.f32 %v5722_v5, %v5722_v5 }
 0xfce   :  { %v5745_v25 = vsel %vm424_vm2, %v5741_v44, 0.0  ;;  %v5728_v14 = vadd.f32 %v5727_v61, %v5726_v18 }
 0xfcf   :  { %v5744_v37 = vsel %vm424_vm2, %v5740_v26, 0.0 }
 0xfd0   :  { %v5746_v28 = vadd.f32 %v5745_v25, %v5744_v37 }
 0xfd1   :  { %v9803_v6 = vpop.f32.mrb[196].mxu0 }
 0xfd2   :  { %v5725_v11 = vadd.f32 %v9803_v6, %v5721_v54  ;;  %v5712_v34 = vpop.f32.mrb[197].mxu0 }
 0xfd3   :  { %v5724_v7 = vadd.f32 %v5721_v54, %v5712_v34 }
 0xfd4   :  { %v5743_v30 = vmul.f32 %v5725_v11, %v5725_v11  ;;  %v5731_v13 = vsel %vm424_vm2, %v5725_v11, 0.0 }
 0xfd5   :  { %v5729_v63 = vsel %vm424_vm2, %v5724_v7, 0.0  ;;  %v5742_v58 = vmul.f32 %v5724_v7, %v5724_v7 }
 0xfd6   :  { %v5730_v33 = vadd.f32 %v5729_v63, %v5728_v14  ;;  %v5749_v61 = vsel %vm424_vm2, %v5743_v30, 0.0 }
 0xfd7   :  { %v5747_v51 = vsel %vm424_vm2, %v5742_v58, 0.0 }
 0xfd8   :  { %v5732_v48 = vadd.f32 %v5731_v13, %v5730_v33  ;;  %v5748_v12 = vadd.f32 %v5747_v51, %v5746_v28 }
 0xfda   :  { %v5733_v44 = vrot.slane %v5732_v48, 4  ;;  %v5750_v18 = vadd.f32 %v5749_v61, %v5748_v12 }
 0xfdc   :  { %v5734_v26 = vadd.f32 %v5733_v44, %v5732_v48  ;;  %v5751_v25 = vrot.slane %v5750_v18, 4 }
 0xfde   :  { %v5735_v37 = vrot.slane %v5734_v26, 2  ;;  %v5752_v6 = vadd.f32 %v5751_v25, %v5750_v18  ;;  %v14370_v25 = vld [vmem:[#allocation73_spill] sm:$0xff] }
 0xfe0   :  { %v5736_v54 = vadd.f32 %v5735_v37, %v5734_v26  ;;  %v5753_v34 = vrot.slane %v5752_v6, 2 }
 0xfe2   :  { %v5737_v40 = vrot.slane %v5736_v54, 1  ;;  %v5754_v29 = vadd.f32 %v5753_v34, %v5752_v6 }
 0xfe4   :  { %v5738_v21 = vadd.f32 %v5737_v40, %v5736_v54  ;;  %v5755_v14 = vrot.slane %v5754_v29, 1 }
 0xfe6   :  { %v5739_v63 = vmul.f32 0.03125, %v5738_v21  ;;  %v5756_v15 = vadd.f32 %v5755_v14, %v5754_v29  ;;  %v14371_v29 = vld [vmem:[#allocation90_spill] sm:$0xff] }
 0xfe8   :  { %v5757_v41 = vmul.f32 0.03125, %v5756_v15  ;;  %v5758_v58 = vmul.f32 %v5739_v63, %v5739_v63  ;;  %v5762_v13 = vsub.f32 %v5724_v7, %v5739_v63  ;;  %v5760_v51 = vsub.f32 %v5722_v5, %v5739_v63 }
 0xfe9   :  { %v5761_v28 = vsub.f32 %v5723_v1, %v5739_v63  ;;  %v5763_v30 = vsub.f32 %v5725_v11, %v5739_v63 }
 0xfea   :  { %v5759_v33 = vsub.f32 %v5757_v41, %v5758_v58 }
 0xfec   :  { %v5764_v12 = vadd.f32 1e-05, %v5759_v33 }
 0xfee   :  { %10785 = vrsqrt.f32 %v5764_v12 }
 0xff8   :  { %v10786_v48 = vpop.eup %10785 }
 0xff9   :  { %v5768_v61 = vmul.f32 %v10786_v48, %v5762_v13  ;;  %v5766_v44 = vmul.f32 %v10786_v48, %v5760_v51  ;;  %v5767_v18 = vmul.f32 %v10786_v48, %v5761_v28  ;;  %v5769_v26 = vmul.f32 %v10786_v48, %v5763_v30 }
 0xffb   :  { %v5772_v37 = vmul.f32 %v14370_v25, %v5768_v61  ;;  %v5770_v40 = vmul.f32 %v14370_v25, %v5766_v44  ;;  %v5771_v21 = vmul.f32 %v14370_v25, %v5767_v18  ;;  %v5773_v15 = vmul.f32 %v14370_v25, %v5769_v26 }
 0xffd   :  { %v5776_v5 = vadd.f32 %v14371_v29, %v5772_v37  ;;  %v5774_v1 = vadd.f32 %v14371_v29, %v5770_v40  ;;  %v5775_v41 = vadd.f32 %v14371_v29, %v5771_v21  ;;  %v5777_v11 = vadd.f32 %v14371_v29, %v5773_v15  ;;  %v7786_v15 = vld [vmem:[%s13663_s6 + $0x1c0] sm:$0xff]  ;;  %v7787_v29 = vld [vmem:[%s13663_s6 + $0x1c8] sm:$0xff] }
 0xfff   :  { %v7783_v7 = vmul.f32 -1.442695, %v5776_v5  ;;  %v7781_v6 = vmul.f32 -1.442695, %v5774_v1  ;;  %v7782_v54 = vmul.f32 -1.442695, %v5775_v41 }
0x1000   :  { %v7784_v34 = vmul.f32 -1.442695, %v5777_v11 }
0x1001   :  { %10787 = vpow2.f32 %v7783_v7  ;;  %v14372_v7 = vld [vmem:[#allocation12_spill] sm:$0xff] }
0x1002   :  { %10789 = vpow2.f32 %v7781_v6  ;;  %v14373_v6 = vld [vmem:[#allocation13_spill] sm:$0xff] }
0x1003   :  { %10791 = vpow2.f32 %v7782_v54  ;;  %v14374_v54 = vld [vmem:[#allocation14_spill] sm:$0xff] }
0x1004   :  { %10793 = vpow2.f32 %v7784_v34  ;;  %v14375_v34 = vld [vmem:[#allocation15_spill] sm:$0xff] }
0x100b   :  { %v10788_v14 = vpop.eup %10787 }
0x100c   :  { %v10790_v63 = vpop.eup %10789  ;;  %v5792_v58 = vadd.f32 1.0, %v10788_v14  ;;  %v14376_v14 = vld [vmem:[#allocation16_spill] sm:$0xff] }
0x100d   :  { %v10792_v13 = vpop.eup %10791  ;;  %v5790_v51 = vadd.f32 1.0, %v10790_v63  ;;  %v14377_v63 = vld [vmem:[#allocation17_spill] sm:$0xff] }
0x100e   :  { %v10794_v28 = vpop.eup %10793  ;;  %10795 = vrcp.f32 %v5792_v58  ;;  %v5791_v30 = vadd.f32 1.0, %v10792_v13  ;;  %v14378_v58 = vld [vmem:[#allocation18_spill] sm:$0xff]  ;;  %v14379_v13 = vld [vmem:[#allocation19_spill] sm:$0xff] }
0x100f   :  { %10797 = vrcp.f32 %v5790_v51  ;;  %v5793_v33 = vadd.f32 1.0, %v10794_v28  ;;  %v14380_v51 = vld [vmem:[#allocation20_spill] sm:$0xff]  ;;  %v14381_v28 = vld [vmem:[#allocation21_spill] sm:$0xff] }
0x1010   :  { %10799 = vrcp.f32 %v5791_v30  ;;  %v14382_v30 = vld [vmem:[#allocation22_spill] sm:$0xff] }
0x1011   :  { %10801 = vrcp.f32 %v5793_v33  ;;  %v14383_v33 = vld [vmem:[#allocation23_spill] sm:$0xff] }
0x1018   :  { %v10796_v12 = vpop.eup %10795 }
0x1019   :  { %v10798_v48 = vpop.eup %10797  ;;  %v13183_v37 = vmul.f32 %v10796_v12, %v5776_v5  ;;  %v7788_v5 = vld [vmem:[%s13663_s6 + $0x1d0] sm:$0xff]  ;;  %v14384_v12 = vld [vmem:[#allocation24_spill] sm:$0xff] }
0x101a   :  { %v10800_v61 = vpop.eup %10799  ;;  %v13177_v44 = vmul.f32 %v10798_v48, %v5774_v1  ;;  %v10452_v1 = vpack.c.bf16 %v7787_v29, %v7786_v15  ;;  %v14385_v48 = vld [vmem:[#allocation25_spill] sm:$0xff]  ;;  %v14390_v15 = vld [vmem:[#allocation30_spill] sm:$0xff]  ;;  %v14391_v29 = vld [vmem:[#allocation31_spill] sm:$0xff] }
0x101b   :  { %v10802_v18 = vpop.eup %10801  ;;  %v13179_v26 = vmul.f32 %v10800_v61, %v5775_v41  ;;  %v7789_v41 = vld [vmem:[%s13663_s6 + $0x1d8] sm:$0xff] }
0x101c   :  { %v13185_v40 = vmul.f32 %v10802_v18, %v5777_v11  ;;  %10453 = vmatpush3.bf16.msra.mxu1 %v10452_v1  ;;  %v10455_v11 = vpack.c.bf16 %v7789_v41, %v7788_v5  ;;  %v14386_v61 = vld [vmem:[#allocation26_spill] sm:$0xff]  ;;  %v14387_v18 = vld [vmem:[#allocation27_spill] sm:$0xff]  ;;  %v14392_v5 = vld [vmem:[#allocation32_spill] sm:$0xff] }
0x101d   :  { %v10446_v25 = vpack.c.bf16 %v13179_v26, %v13177_v44  ;;  %10454 = vmatprep.subr.bf16.mxu1 %v14008_v16  ;;  %v14393_v1 = vld [vmem:[#allocation33_spill] sm:$0xff]  ;;  %v14394_v41 = vld [vmem:[#allocation34_spill] sm:$0xff] }
0x101e   :  { %v10449_v21 = vpack.c.bf16 %v13185_v40, %v13183_v37 }
0x101f   :  { %10447 = vmatpush3.bf16.msra.mxu0 %v10446_v25 }
0x1020   :  { %10448 = vmatprep.subr.bf16.mxu0 %v14008_v16  ;;  %10456 = vmatpush3.bf16.msra.mxu1 %v10455_v11  ;;  %v14395_v11 = vld [vmem:[#allocation35_spill] sm:$0xff] }
0x1023   :  { %10450 = vmatpush3.bf16.msra.mxu0 %v10449_v21 }
0x1024   :  { %10458 = vmatprep.subr.bf16.mxu0 %v10446_v25 }
0x1026   :  { %9813 = vmatmul.mubr.msk.f32.vlgmr.msra.gmra.mrb[198].mxu0 %vm424_vm2, %v14372_v7 }
0x1027   :  { %10460 = vmatpush3.bf16.msra.mxu0 %v10446_v25  ;;  %9834 = vmatprep.mubr.msk.f32.mxu0 %vm424_vm2, %v14373_v6  ;;  %v14388_v25 = vld [vmem:[#allocation28_spill] sm:$0xff] }
0x1028   :  { %10462 = vmatprep.subr.bf16.mxu0 %v10449_v21  ;;  %v14396_v6 = vld [vmem:[#allocation36_spill] sm:$0xff] }
0x102b   :  { %10464 = vmatpush3.bf16.msra.mxu0 %v10449_v21  ;;  %v14389_v21 = vld [vmem:[#allocation29_spill] sm:$0xff] }
0x102c   :  { %10561 = vmatprep.subr.bf16.mxu0 %v14008_v16 }
0x102e   :  { %9835 = vmatmul.mubr.msk.f32.vlgmr.msra.gmra.mrb[200].mxu0 %vm424_vm2, %v14374_v54  ;;  %v14397_v54 = vld [vmem:[#allocation37_spill] sm:$0xff] }
0x102f   :  { %9837 = vmatprep.mubr.msk.f32.mxu0 %vm424_vm2, %v14375_v34  ;;  %v14398_v34 = vld [vmem:[#allocation38_spill] sm:$0xff] }
0x1032   :  { %9838 = vmatmul.mubr.msk.f32.gmra.mrb[202].mxu0 %vm424_vm2, %v14376_v14  ;;  %v14399_v14 = vld [vmem:[#allocation39_spill] sm:$0xff] }
0x1033   :  { %9840 = vmatprep.mubr.msk.f32.mxu0 %vm424_vm2, %v14377_v63  ;;  %v14400_v63 = vld [vmem:[#allocation40_spill] sm:$0xff] }
0x1036   :  { %9841 = vmatmul.mubr.msk.f32.gmra.mrb[204].mxu0 %vm424_vm2, %v14378_v58  ;;  %v14401_v58 = vld [vmem:[#allocation41_spill] sm:$0xff] }
0x1037   :  { %9843 = vmatprep.mubr.msk.f32.mxu0 %vm424_vm2, %v14379_v13  ;;  %v14402_v13 = vld [vmem:[#allocation42_spill] sm:$0xff] }
0x103a   :  { %9844 = vmatmul.mubr.msk.f32.gmra.mrb[206].mxu0 %vm424_vm2, %v14380_v51  ;;  %v14403_v51 = vld [vmem:[#allocation43_spill] sm:$0xff] }
0x103b   :  { %9846 = vmatprep.mubr.msk.f32.mxu0 %vm424_vm2, %v14381_v28  ;;  %v14404_v28 = vld [vmem:[#allocation44_spill] sm:$0xff] }
0x103e   :  { %9847 = vmatmul.mubr.msk.f32.gmra.mrb[208].mxu0 %vm424_vm2, %v14382_v30  ;;  %v14405_v30 = vld [vmem:[#allocation45_spill] sm:$0xff] }
0x103f   :  { %9849 = vmatprep.mubr.msk.f32.mxu0 %vm424_vm2, %v14383_v33  ;;  %v14406_v33 = vld [vmem:[#allocation46_spill] sm:$0xff] }
0x1042   :  { %9850 = vmatmul.mubr.msk.f32.gmra.mrb[210].mxu0 %vm424_vm2, %v14384_v12  ;;  %v14407_v12 = vld [vmem:[#allocation47_spill] sm:$0xff] }
0x1043   :  { %9852 = vmatprep.mubr.msk.f32.mxu0 %vm424_vm2, %v14385_v48  ;;  %v14408_v48 = vld [vmem:[#allocation48_spill] sm:$0xff] }
0x1046   :  { %9853 = vmatmul.mubr.msk.f32.gmra.mrb[212].mxu0 %vm424_vm2, %v14386_v61  ;;  %v14409_v61 = vld [vmem:[#allocation49_spill] sm:$0xff] }
0x1047   :  { %9855 = vmatprep.mubr.msk.f32.mxu0 %vm424_vm2, %v14387_v18  ;;  %v14410_v18 = vld [vmem:[#allocation50_spill] sm:$0xff] }
0x104a   :  { %9856 = vmatmul.mubr.msk.f32.gmra.mrb[214].mxu0 %vm424_vm2, %v14388_v25  ;;  %v14411_v25 = vld [vmem:[#allocation51_spill] sm:$0xff] }
0x104b   :  { %9858 = vmatprep.mubr.msk.f32.mxu0 %vm424_vm2, %v14389_v21  ;;  %v14412_v21 = vld [vmem:[#allocation52_spill] sm:$0xff] }
0x104e   :  { %9859 = vmatmul.mubr.msk.f32.gmra.mrb[216].mxu0 %vm424_vm2, %v14390_v15  ;;  %v14413_v15 = vld [vmem:[#allocation53_spill] sm:$0xff] }
0x104f   :  { %9861 = vmatprep.mubr.msk.f32.mxu0 %vm424_vm2, %v14391_v29  ;;  %v14414_v29 = vld [vmem:[#allocation54_spill] sm:$0xff] }
0x1052   :  { %9862 = vmatmul.mubr.msk.f32.gmra.mrb[218].mxu0 %vm424_vm2, %v14392_v5  ;;  %v14415_v5 = vld [vmem:[#allocation55_spill] sm:$0xff] }
0x1053   :  { %9864 = vmatprep.mubr.msk.f32.mxu0 %vm424_vm2, %v14393_v1  ;;  %v14416_v1 = vld [vmem:[#allocation56_spill] sm:$0xff] }
0x1056   :  { %9865 = vmatmul.mubr.msk.f32.gmra.mrb[220].mxu0 %vm424_vm2, %v14394_v41  ;;  %v14417_v41 = vld [vmem:[#allocation57_spill] sm:$0xff] }
0x1057   :  { %9867 = vmatprep.mubr.msk.f32.mxu0 %vm424_vm2, %v14395_v11  ;;  %v14418_v11 = vld [vmem:[#allocation58_spill] sm:$0xff] }
0x105a   :  { %9868 = vmatmul.mubr.msk.f32.gmra.mrb[222].mxu0 %vm424_vm2, %v14396_v6  ;;  %v14419_v6 = vld [vmem:[#allocation59_spill] sm:$0xff] }
0x105b   :  { %9870 = vmatprep.mubr.msk.f32.mxu0 %vm424_vm2, %v14397_v54  ;;  %v14420_v54 = vld [vmem:[#allocation60_spill] sm:$0xff] }
0x105e   :  { %9871 = vmatmul.mubr.msk.f32.gmra.mrb[224].mxu0 %vm424_vm2, %v14398_v34  ;;  %v14421_v34 = vld [vmem:[#allocation61_spill] sm:$0xff] }
0x105f   :  { %9873 = vmatprep.mubr.msk.f32.mxu0 %vm424_vm2, %v14399_v14  ;;  %v14422_v14 = vld [vmem:[#allocation62_spill] sm:$0xff] }
0x1062   :  { %9874 = vmatmul.mubr.msk.f32.gmra.mrb[226].mxu0 %vm424_vm2, %v14400_v63  ;;  %v14423_v63 = vld [vmem:[#allocation63_spill] sm:$0xff] }
0x1063   :  { %9876 = vmatprep.mubr.msk.f32.mxu0 %vm424_vm2, %v14401_v58  ;;  %v14424_v58 = vld [vmem:[#allocation64_spill] sm:$0xff] }
0x1066   :  { %9877 = vmatmul.mubr.msk.f32.gmra.mrb[228].mxu0 %vm424_vm2, %v14402_v13  ;;  %v14425_v13 = vld [vmem:[#allocation65_spill] sm:$0xff] }
0x1067   :  { %9879 = vmatprep.mubr.msk.f32.mxu0 %vm424_vm2, %v14403_v51  ;;  %v14426_v51 = vld [vmem:[#allocation66_spill] sm:$0xff] }
0x106a   :  { %9880 = vmatmul.mubr.msk.f32.gmra.mrb[230].mxu0 %vm424_vm2, %v14404_v28  ;;  %v14427_v28 = vld [vmem:[#allocation67_spill] sm:$0xff] }
0x106b   :  { %9882 = vmatprep.mubr.msk.f32.mxu0 %vm424_vm2, %v14405_v30  ;;  %v14428_v30 = vld [vmem:[#allocation68_spill] sm:$0xff] }
0x106e   :  { %9883 = vmatmul.mubr.msk.f32.gmra.mrb[232].mxu0 %vm424_vm2, %v14406_v33  ;;  %v14429_v33 = vld [vmem:[#allocation69_spill] sm:$0xff] }
0x106f   :  { %9885 = vmatprep.mubr.msk.f32.mxu0 %vm424_vm2, %v14407_v12  ;;  %v14430_v12 = vld [vmem:[#allocation70_spill] sm:$0xff] }
0x1072   :  { %9886 = vmatmul.mubr.msk.f32.gmra.mrb[234].mxu0 %vm424_vm2, %v14408_v48  ;;  %v14431_v48 = vld [vmem:[#allocation71_spill] sm:$0xff] }
0x1073   :  { %9888 = vmatprep.mubr.msk.f32.mxu0 %vm424_vm2, %v14409_v61  ;;  %v14432_v61 = vld [vmem:[#allocation72_spill] sm:$0xff] }
0x1076   :  { %9889 = vmatmul.mubr.msk.f32.gmra.mrb[236].mxu0 %vm424_vm2, %v14410_v18 }
0x1077   :  { %9891 = vmatprep.mubr.msk.f32.mxu0 %vm424_vm2, %v14411_v25 }
0x107a   :  { %9892 = vmatmul.mubr.msk.f32.gmra.mrb[238].mxu0 %vm424_vm2, %v14412_v21  ;;  %v14433_v21 = vld [vmem:[#allocation74_spill] sm:$0xff] }
0x107b   :  { %9894 = vmatprep.mubr.msk.f32.mxu0 %vm424_vm2, %v14413_v15 }
0x107e   :  { %9895 = vmatmul.mubr.msk.f32.gmra.mrb[240].mxu0 %vm424_vm2, %v14414_v29  ;;  %v14434_v29 = vld [vmem:[#allocation75_spill] sm:$0xff] }
0x107f   :  { %9897 = vmatprep.mubr.msk.f32.mxu0 %vm424_vm2, %v14415_v5 }
0x1082   :  { %9898 = vmatmul.mubr.msk.f32.gmra.mrb[242].mxu0 %vm424_vm2, %v14416_v1 }
0x1083   :  { %9900 = vmatprep.mubr.msk.f32.mxu0 %vm424_vm2, %v14417_v41  ;;  %v14435_v41 = vld [vmem:[#allocation76_spill] sm:$0xff] }
0x1086   :  { %9901 = vmatmul.mubr.msk.f32.gmra.mrb[244].mxu0 %vm424_vm2, %v14418_v11 }
0x1087   :  { %9903 = vmatprep.mubr.msk.f32.mxu0 %vm424_vm2, %v14419_v6 }
0x108a   :  { %9904 = vmatmul.mubr.msk.f32.gmra.mrb[246].mxu0 %vm424_vm2, %v14420_v54 }
0x108b   :  { %9906 = vmatprep.mubr.msk.f32.mxu0 %vm424_vm2, %v14421_v34  ;;  %v14436_v34 = vld [vmem:[#allocation77_spill] sm:$0xff] }
0x108e   :  { %9907 = vmatmul.mubr.msk.f32.gmra.mrb[248].mxu0 %vm424_vm2, %v14422_v14 }
0x108f   :  { %9909 = vmatprep.mubr.msk.f32.mxu0 %vm424_vm2, %v14423_v63 }
0x1092   :  { %9910 = vmatmul.mubr.msk.f32.gmra.mrb[250].mxu0 %vm424_vm2, %v14424_v58 }
0x1093   :  { %9912 = vmatprep.mubr.msk.f32.mxu0 %vm424_vm2, %v14425_v13 }
0x1096   :  { %9913 = vmatmul.mubr.msk.f32.gmra.mrb[252].mxu0 %vm424_vm2, %v14426_v51 }
0x1097   :  { %9915 = vmatprep.mubr.msk.f32.mxu0 %vm424_vm2, %v14427_v28  ;;  %v14437_v28 = vld [vmem:[#allocation79_spill] sm:$0xff] }
0x109a   :  { %9916 = vmatmul.mubr.msk.f32.gmra.mrb[254].mxu0 %vm424_vm2, %v14428_v30 }
0x109b   :  { %9918 = vmatprep.mubr.msk.f32.mxu0 %vm424_vm2, %v14429_v33 }
0x109e   :  { %9919 = vmatmul.mubr.msk.f32.gmra.mrb[0].mxu0 %vm424_vm2, %v14430_v12  ;;  %v14438_v12 = vld [vmem:[#allocation80_spill] sm:$0xff] }
0x109f   :  { %9921 = vmatprep.mubr.msk.f32.mxu0 %vm424_vm2, %v14431_v48 }
0x10a2   :  { %9922 = vmatmul.mubr.msk.f32.gmra.mrb[2].mxu0 %vm424_vm2, %v14432_v61 }
0x10a3   :  { %9971 = vmatprep.mubr.msk.f32.mxu0 %vm10881_vm3, %v14262_v31 }
0x10f9   :  { %v5872_v18 = vpop.f32.mrb[198].mxu0 }
0x10fa   :  { %9824 = vmatmul.mubr.msk.f32.vlgmr.msra.gmra.mrb[202].mxu1 %vm424_vm2, %v5872_v18  ;;  %v9814_v25 = vpop.f32.mrb[199].mxu0 }
0x10fb   :  { %6444 = vmatprep.mubr.f32.mxu1 %v14433_v21  ;;  %v14439_v25 = vld [vmem:[#allocation81_spill] sm:$0xff] }
0x1101   :  { %v9836_v15 = vpop.f32.mrb[200].mxu0 }
0x1102   :  { %v6321_v5 = vmul.f32 %v9836_v15, %v14434_v29  ;;  %v6021_v1 = vpop.f32.mrb[201].mxu0 }
0x1103   :  { %v6320_v11 = vmul.f32 %v6021_v1, %v14435_v41  ;;  %v14440_v41 = vld [vmem:[#allocation83_spill] sm:$0xff] }
0x1105   :  { %v10467_v6 = vpack.c.bf16 %v6321_v5, %v6320_v11  ;;  %v9839_v54 = vpop.f32.mrb[202].mxu0 }
0x1106   :  { %v6323_v14 = vmul.f32 %v9839_v54, %v14436_v34  ;;  %v6031_v63 = vpop.f32.mrb[203].mxu0 }
0x1107   :  { %v6322_v58 = vmul.f32 %v6031_v63, %v14330_v24 }
0x1109   :  { %v10471_v13 = vpack.c.bf16 %v6323_v14, %v6322_v58  ;;  %v9842_v51 = vpop.f32.mrb[204].mxu0 }
0x110a   :  { %v6325_v30 = vmul.f32 %v9842_v51, %v14437_v28  ;;  %v6041_v33 = vpop.f32.mrb[205].mxu0 }
0x110b   :  { %v6324_v48 = vmul.f32 %v6041_v33, %v14438_v12  ;;  %v14441_v33 = vld [vmem:[#allocation87_spill] sm:$0xff] }
0x110d   :  { %v10475_v61 = vpack.c.bf16 %v6325_v30, %v6324_v48  ;;  %v9845_v18 = vpop.f32.mrb[206].mxu0 }
0x110e   :  { %v6327_v21 = vmul.f32 %v9845_v18, %v14439_v25  ;;  %v6051_v15 = vpop.f32.mrb[207].mxu0 }
0x110f   :  { %v6326_v29 = vmul.f32 %v6051_v15, %v14334_v49 }
0x1111   :  { %v10479_v5 = vpack.c.bf16 %v6327_v21, %v6326_v29  ;;  %v9848_v1 = vpop.f32.mrb[208].mxu0  ;;  %v14442_v21 = vld [vmem:[#allocation89_spill] sm:$0xff] }
0x1112   :  { %v6329_v11 = vmul.f32 %v9848_v1, %v14440_v41  ;;  %v6061_v54 = vpop.f32.mrb[209].mxu0 }
0x1113   :  { %v6328_v24 = vmul.f32 %v6061_v54, %v14229_v50 }
0x1115   :  { %v10483_v34 = vpack.c.bf16 %v6329_v11, %v6328_v24  ;;  %v9851_v14 = vpop.f32.mrb[210].mxu0 }
0x1116   :  { %v6331_v63 = vmul.f32 %v9851_v14, %v14230_v43  ;;  %v6071_v58 = vpop.f32.mrb[211].mxu0 }
0x1117   :  { %v6330_v51 = vmul.f32 %v6071_v58, %v14231_v23 }
0x1119   :  { %v10487_v28 = vpack.c.bf16 %v6331_v63, %v6330_v51  ;;  %v9854_v30 = vpop.f32.mrb[212].mxu0 }
0x111a   :  { %v6333_v12 = vmul.f32 %v9854_v30, %v14441_v33  ;;  %v6081_v48 = vpop.f32.mrb[213].mxu0 }
0x111b   :  { %v6332_v49 = vmul.f32 %v6081_v48, %v14233_v57 }
0x111d   :  { %v10491_v18 = vpack.c.bf16 %v6333_v12, %v6332_v49  ;;  %v9857_v25 = vpop.f32.mrb[214].mxu0 }
0x111e   :  { %v13345_v15 = vmul.f32 %v9857_v25, %v14442_v21  ;;  %v6091_v50 = vpop.f32.mrb[215].mxu0 }
0x111f   :  { %v6334_v29 = vmul.f32 %v6091_v50, %v14128_v9 }
0x1121   :  { %v10495_v43 = vpack.c.bf16 %v13345_v15, %v6334_v29  ;;  %v9860_v1 = vpop.f32.mrb[216].mxu0 }
0x1122   :  { %v6337_v23 = vmul.f32 %v9860_v1, %v14129_v36  ;;  %v6101_v41 = vpop.f32.mrb[217].mxu0 }
0x1123   :  { %v6336_v11 = vmul.f32 %v6101_v41, %v14130_v60 }
0x1125   :  { %v10465_v54 = vpack.c.bf16 %v6337_v23, %v6336_v11  ;;  %v9863_v24 = vpop.f32.mrb[218].mxu0 }
0x1126   :  { %v6339_v57 = vmul.f32 %v9863_v24, %v11854_v46  ;;  %v6111_v14 = vpop.f32.mrb[219].mxu0 }
0x1127   :  { %v6338_v63 = vmul.f32 %v6111_v14, %v14131_v10  ;;  %10466 = vmatprep.subr.bf16.mxu1 %v10465_v54 }
0x1128   :  { %10468 = vmatpush3.bf16.msra.mxu1 %v10467_v6 }
0x1129   :  { %v10469_v58 = vpack.c.bf16 %v6339_v57, %v6338_v63  ;;  %v9866_v51 = vpop.f32.mrb[220].mxu0  ;;  %v14443_v57 = vld [vmem:[#allocation98_spill] sm:$0xff]  ;;  %v14444_v63 = vld [vmem:[#allocation96_spill] sm:$0xff] }
0x112a   :  { %v6341_v9 = vmul.f32 %v9866_v51, %v11866_v62  ;;  %v6121_v30 = vpop.f32.mrb[221].mxu0 }
0x112b   :  { %v6340_v33 = vmul.f32 %v6121_v30, %v11873_v39  ;;  %10470 = vmatprep.subr.bf16.mxu1 %v10469_v58 }
0x112c   :  { %10472 = vmatpush3.bf16.msra.mxu1 %v10471_v13 }
0x112d   :  { %v10473_v36 = vpack.c.bf16 %v6341_v9, %v6340_v33  ;;  %v9869_v60 = vpop.f32.mrb[222].mxu0  ;;  %v14447_v9 = vld [vmem:[#allocation102_spill] sm:$0xff]  ;;  %v14448_v33 = vld [vmem:[#allocation99_spill] sm:$0xff] }
0x112e   :  { %v6343_v12 = vmul.f32 %v9869_v60, %v11881_v4  ;;  %v6131_v48 = vpop.f32.mrb[223].mxu0 }
0x112f   :  { %v6342_v46 = vmul.f32 %v6131_v48, %v11888_v52  ;;  %10474 = vmatprep.subr.bf16.mxu1 %v10473_v36 }
0x1130   :  { %10476 = vmatpush3.bf16.msra.mxu1 %v10475_v61 }
0x1131   :  { %v10477_v10 = vpack.c.bf16 %v6343_v12, %v6342_v46  ;;  %v9872_v6 = vpop.f32.mrb[224].mxu0  ;;  %v14450_v12 = vld [vmem:[#allocation103_spill] sm:$0xff] }
0x1132   :  { %v6345_v49 = vmul.f32 %v9872_v6, %v11896_v19  ;;  %v6141_v25 = vpop.f32.mrb[225].mxu0 }
0x1133   :  { %v6344_v62 = vmul.f32 %v6141_v25, %v11903_v8  ;;  %10478 = vmatprep.subr.bf16.mxu1 %v10477_v10  ;;  %v14451_v10 = vld [vmem:[#allocation104_spill] sm:$0xff] }
0x1134   :  { %10480 = vmatpush3.bf16.msra.mxu1 %v10479_v5 }
0x1135   :  { %v10481_v39 = vpack.c.bf16 %v6345_v49, %v6344_v62  ;;  %v9875_v13 = vpop.f32.mrb[226].mxu0  ;;  %v14452_v62 = vld [vmem:[#allocation105_spill] sm:$0xff] }
0x1136   :  { %v6347_v21 = vmul.f32 %v9875_v13, %v11911_v3  ;;  %v6151_v15 = vpop.f32.mrb[227].mxu0 }
0x1137   :  { %v6346_v4 = vmul.f32 %v6151_v15, %v11916_v0  ;;  %10482 = vmatprep.subr.bf16.mxu1 %v10481_v39 }
0x1138   :  { %10484 = vmatpush3.bf16.msra.mxu1 %v10483_v34 }
0x1139   :  { %v10485_v52 = vpack.c.bf16 %v6347_v21, %v6346_v4  ;;  %v9878_v61 = vpop.f32.mrb[228].mxu0  ;;  %v14453_v21 = vld [vmem:[#allocation106_spill] sm:$0xff] }
0x113a   :  { %v6349_v50 = vmul.f32 %v9878_v61, %v11922_v45  ;;  %v6161_v29 = vpop.f32.mrb[229].mxu0  ;;  %v14454_v61 = vld [vmem:[#allocation107_spill] sm:$0xff] }
0x113b   :  { %v6348_v19 = vmul.f32 %v6161_v29, %v11927_v59  ;;  %10486 = vmatprep.subr.bf16.mxu1 %v10485_v52 }
0x113c   :  { %10488 = vmatpush3.bf16.msra.mxu1 %v10487_v28 }
0x113d   :  { %v10489_v8 = vpack.c.bf16 %v6349_v50, %v6348_v19  ;;  %v9881_v5 = vpop.f32.mrb[230].mxu0  ;;  %v14455_v19 = vld [vmem:[#allocation108_spill] sm:$0xff] }
0x113e   :  { %v6351_v1 = vmul.f32 %v9881_v5, %v11933_v38  ;;  %v6171_v23 = vpop.f32.mrb[231].mxu0 }
0x113f   :  { %v6350_v3 = vmul.f32 %v6171_v23, %v11938_v42  ;;  %10490 = vmatprep.subr.bf16.mxu1 %v10489_v8  ;;  %v14456_v23 = vld [vmem:[#allocation109_spill] sm:$0xff] }
0x1140   :  { %10492 = vmatpush3.bf16.msra.mxu1 %v10491_v18 }
0x1141   :  { %v10493_v0 = vpack.c.bf16 %v6351_v1, %v6350_v3  ;;  %v9884_v34 = vpop.f32.mrb[232].mxu0 }
0x1142   :  { %v6353_v41 = vmul.f32 %v9884_v34, %v11944_v20  ;;  %v6181_v11 = vpop.f32.mrb[233].mxu0  ;;  %v14457_v34 = vld [vmem:[#allocation110_spill] sm:$0xff] }
0x1143   :  { %v6352_v45 = vmul.f32 %v6181_v11, %v11949_v35  ;;  %10494 = vmatprep.subr.bf16.mxu1 %v10493_v0 }
0x1144   :  { %10496 = vmatpush3.bf16.msra.mxu1 %v10495_v43 }
0x1145   :  { %v10498_v59 = vpack.c.bf16 %v6353_v41, %v6352_v45  ;;  %v9887_v28 = vpop.f32.mrb[234].mxu0  ;;  %10497 = vmatprep.subr.bf16.mxu1 %v14008_v16 }
0x1146   :  { %v6355_v38 = vmul.f32 %v9887_v28, %v11961_v47  ;;  %v6191_v54 = vpop.f32.mrb[235].mxu0 }
0x1147   :  { %v6354_v42 = vmul.f32 %v6191_v54, %v11968_v53  ;;  %6445 = vmatmul.mubr.f32.vlgmr.msra.gmra.mrb[204].mxu1 %v11959_v22  ;;  %v14459_v54 = vld [vmem:[#allocation112_spill] sm:$0xff] }
0x1148   :  { %10499 = vmatpush1.bf16.msra.mxu1 %v10498_v59  ;;  %6449 = vmatprep.mubr.f32.mxu1 %v11966_v55  ;;  %v14458_v59 = vld [vmem:[#allocation111_spill] sm:$0xff] }
0x1149   :  { %v10501_v20 = vpack.c.bf16 %v6355_v38, %v6354_v42  ;;  %v9890_v18 = vpop.f32.mrb[236].mxu0  ;;  %10500 = vmatprep.subr.bf16.mxu1 %v14008_v16 }
0x114a   :  { %v6357_v35 = vmul.f32 %v9890_v18, %v11981_v17  ;;  %v6201_v43 = vpop.f32.mrb[237].mxu0  ;;  %v14445_v17 = vld [vmem:[#allocation97_spill] sm:$0xff] }
0x114b   :  { %v6356_v24 = vmul.f32 %v6201_v43, %v11986_v27  ;;  %6450 = vmatmul.mubr.f32.gmra.mrb[206].mxu1 %v11979_v32  ;;  %v14446_v32 = vld [vmem:[#allocation100_spill] sm:$0xff] }
0x114c   :  { %10502 = vmatpush1.bf16.msra.mxu1 %v10501_v20  ;;  %6454 = vmatprep.mubr.f32.mxu1 %v11984_v56 }
0x114d   :  { %v10504_v47 = vpack.c.bf16 %v6357_v35, %v6356_v24  ;;  %v9893_v53 = vpop.f32.mrb[238].mxu0  ;;  %10503 = vmatprep.subr.bf16.mxu1 %v14008_v16  ;;  %v14460_v35 = vld [vmem:[#allocation92_spill] sm:$0xff] }
0x114e   :  { %v6359_v22 = vmul.f32 %v9893_v53, %v11999_v2  ;;  %v6211_v55 = vpop.f32.mrb[239].mxu0  ;;  %v14449_v2 = vld [vmem:[#allocation101_spill] sm:$0xff] }
0x114f   :  { %v6358_v14 = vmul.f32 %v6211_v55, %v14443_v57  ;;  %6455 = vmatmul.mubr.f32.gmra.mrb[208].mxu1 %v14444_v63  ;;  %v14462_v57 = vld [vmem:[#allocation95_spill] sm:$0xff] }
0x1150   :  { %10505 = vmatpush1.bf16.msra.mxu1 %v10504_v47  ;;  %6459 = vmatprep.mubr.f32.mxu1 %v14445_v17  ;;  %v14461_v47 = vld [vmem:[#allocation113_spill] sm:$0xff]  ;;  %v14463_v17 = vld [vmem:[#allocation114_spill] sm:$0xff] }
0x1151   :  { %v10507_v27 = vpack.c.bf16 %v6359_v22, %v6358_v14  ;;  %v9896_v58 = vpop.f32.mrb[240].mxu0  ;;  %10506 = vmatprep.subr.bf16.mxu1 %v14008_v16 }
0x1152   :  { %v6361_v56 = vmul.f32 %v9896_v58, %v14446_v32  ;;  %v6221_v51 = vpop.f32.mrb[241].mxu0 }
0x1153   :  { %v6360_v30 = vmul.f32 %v6221_v51, %v14447_v9  ;;  %6460 = vmatmul.mubr.f32.gmra.mrb[210].mxu1 %v14448_v33 }
0x1154   :  { %10508 = vmatpush1.bf16.msra.mxu1 %v10507_v27  ;;  %7851 = vmatprep.mubr.msk.f32.mxu1 %vm2168_vm4, %v14449_v2 }
0x1155   :  { %v10510_v36 = vpack.c.bf16 %v6361_v56, %v6360_v30  ;;  %v9899_v60 = vpop.f32.mrb[242].mxu0  ;;  %10509 = vmatprep.subr.bf16.mxu1 %v14008_v16  ;;  %v14464_v56 = vld [vmem:[#allocation115_spill] sm:$0xff]  ;;  %v14465_v30 = vld [vmem:[#allocation116_spill] sm:$0xff] }
0x1156   :  { %v6363_v48 = vmul.f32 %v9899_v60, %v14450_v12  ;;  %v6231_v46 = vpop.f32.mrb[243].mxu0  ;;  %v14466_v60 = vld [vmem:[#allocation117_spill] sm:$0xff] }
0x1157   :  { %v6362_v6 = vmul.f32 %v6231_v46, %v14451_v10  ;;  %v7859_v46 = vld [vmem:[%s13663_s6 + $0x120] sm:$0xff]  ;;  %v7860_v10 = vld [vmem:[%s13663_s6 + $0x128] sm:$0xff] }
0x1158   :  { %10511 = vmatpush1.bf16.msra.mxu1 %v10510_v36 }
0x1159   :  { %v10513_v49 = vpack.c.bf16 %v6363_v48, %v6362_v6  ;;  %v9902_v25 = vpop.f32.mrb[244].mxu0  ;;  %10512 = vmatprep.subr.bf16.mxu1 %v14008_v16  ;;  %v14467_v6 = vld [vmem:[#allocation118_spill] sm:$0xff] }
0x115a   :  { %v6365_v39 = vmul.f32 %v9902_v25, %v14452_v62  ;;  %v6241_v13 = vpop.f32.mrb[245].mxu0  ;;  %v10539_v62 = vpack.c.bf16 %v7860_v10, %v7859_v46 }
0x115b   :  { %v6364_v15 = vmul.f32 %v6241_v13, %v14453_v21  ;;  %v7862_v13 = vld [vmem:[%s13663_s6 + $0x138] sm:$0xff] }
0x115c   :  { %10514 = vmatpush1.bf16.msra.mxu1 %v10513_v49 }
0x115d   :  { %v10516_v4 = vpack.c.bf16 %v6365_v39, %v6364_v15  ;;  %v9905_v52 = vpop.f32.mrb[246].mxu0  ;;  %10515 = vmatprep.subr.bf16.mxu1 %v14008_v16  ;;  %v7861_v39 = vld [vmem:[%s13663_s6 + $0x130] sm:$0xff]  ;;  %v14468_v15 = vld [vmem:[#allocation119_spill] sm:$0xff] }
0x115e   :  { %v6367_v50 = vmul.f32 %v9905_v52, %v14454_v61  ;;  %v6251_v29 = vpop.f32.mrb[247].mxu0  ;;  %v10543_v21 = vpack.c.bf16 %v7862_v13, %v7861_v39  ;;  %v14470_v52 = vld [vmem:[#allocation121_spill] sm:$0xff]  ;;  %v14471_v61 = vld [vmem:[#allocation122_spill] sm:$0xff] }
0x115f   :  { %v6366_v8 = vmul.f32 %v6251_v29, %v14455_v19  ;;  %v14473_v29 = vld [vmem:[#allocation124_spill] sm:$0xff]  ;;  %v14474_v19 = vld [vmem:[#allocation125_spill] sm:$0xff] }
0x1160   :  { %10517 = vmatpush1.bf16.msra.mxu1 %v10516_v4  ;;  %v14469_v4 = vld [vmem:[#allocation120_spill] sm:$0xff] }
0x1161   :  { %v10519_v5 = vpack.c.bf16 %v6367_v50, %v6366_v8  ;;  %v9908_v1 = vpop.f32.mrb[248].mxu0  ;;  %10518 = vmatprep.subr.bf16.mxu1 %v14008_v16  ;;  %v14472_v50 = vld [vmem:[#allocation123_spill] sm:$0xff] }
0x1162   :  { %v6369_v3 = vmul.f32 %v9908_v1, %v14456_v23  ;;  %v6261_v0 = vpop.f32.mrb[249].mxu0  ;;  %v7855_v8 = vld [vmem:[%s13663_s6 + $0x80] sm:$0xff] }
0x1163   :  { %v6368_v41 = vmul.f32 %v6261_v0, %v14457_v34  ;;  %v14475_v23 = vld [vmem:[#allocation91_spill] sm:$0xff] }
0x1164   :  { %10520 = vmatpush1.bf16.msra.mxu1 %v10519_v5  ;;  %v7856_v5 = vld [vmem:[%s13663_s6 + $0x88] sm:$0xff] }
0x1165   :  { %v10522_v11 = vpack.c.bf16 %v6369_v3, %v6368_v41  ;;  %v9911_v45 = vpop.f32.mrb[250].mxu0  ;;  %10521 = vmatprep.subr.bf16.mxu1 %v14008_v16  ;;  %v10547_v1 = vpack.c.bf16 %v7856_v5, %v7855_v8 }
0x1166   :  { %v6371_v28 = vmul.f32 %v9911_v45, %v14458_v59  ;;  %v6271_v38 = vpop.f32.mrb[251].mxu0 }
0x1167   :  { %v6370_v42 = vmul.f32 %v6271_v38, %v14459_v54 }
0x1168   :  { %10523 = vmatpush1.bf16.msra.mxu1 %v10522_v11 }
0x1169   :  { %v10525_v20 = vpack.c.bf16 %v6371_v28, %v6370_v42  ;;  %v9914_v18 = vpop.f32.mrb[252].mxu0  ;;  %10524 = vmatprep.subr.bf16.mxu1 %v14008_v16 }
0x116a   :  { %v6373_v43 = vmul.f32 %v9914_v18, %v14460_v35  ;;  %v6281_v24 = vpop.f32.mrb[253].mxu0 }
0x116b   :  { %v6372_v53 = vmul.f32 %v6281_v24, %v14461_v47 }
0x116c   :  { %10526 = vmatpush1.bf16.msra.mxu1 %v10525_v20 }
0x116d   :  { %v10528_v22 = vpack.c.bf16 %v6373_v43, %v6372_v53  ;;  %v9917_v55 = vpop.f32.mrb[254].mxu0  ;;  %10527 = vmatprep.subr.bf16.mxu1 %v14008_v16 }
0x116e   :  { %v6375_v14 = vmul.f32 %v9917_v55, %v14462_v57  ;;  %v6291_v63 = vpop.f32.mrb[255].mxu0 }
0x116f   :  { %v6374_v27 = vmul.f32 %v6291_v63, %v14463_v17 }
0x1170   :  { %10529 = vmatpush1.bf16.msra.mxu1 %v10528_v22 }
0x1171   :  { %v10531_v58 = vpack.c.bf16 %v6375_v14, %v6374_v27  ;;  %v9920_v32 = vpop.f32.mrb[0].mxu0  ;;  %10530 = vmatprep.subr.bf16.mxu1 %v14008_v16 }
0x1172   :  { %v6377_v51 = vmul.f32 %v9920_v32, %v14464_v56  ;;  %v6301_v9 = vpop.f32.mrb[1].mxu0  ;;  %v7876_v32 = vld [vmem:[%s13663_s6 + $0x1e0] sm:$0xff]  ;;  %v7877_v56 = vld [vmem:[%s13663_s6 + $0x1e8] sm:$0xff] }
0x1173   :  { %v6376_v33 = vmul.f32 %v6301_v9, %v14465_v30  ;;  %v10562_v9 = vpack.c.bf16 %v7877_v56, %v7876_v32  ;;  %v7879_v30 = vld [vmem:[%s13663_s6 + $0x1f8] sm:$0xff] }
0x1174   :  { %10532 = vmatpush1.bf16.msra.mxu1 %v10531_v58 }
0x1175   :  { %v10534_v2 = vpack.c.bf16 %v6377_v51, %v6376_v33  ;;  %v9923_v36 = vpop.f32.mrb[2].mxu0  ;;  %10533 = vmatprep.subr.bf16.mxu1 %v14008_v16  ;;  %v7878_v51 = vld [vmem:[%s13663_s6 + $0x1f0] sm:$0xff]  ;;  %10563 = vmatpush3.bf16.msra.mxu0 %v10562_v9 }
0x1176   :  { %v6379_v12 = vmul.f32 %v9923_v36, %v14466_v60  ;;  %v6311_v48 = vpop.f32.mrb[3].mxu0  ;;  %v10565_v33 = vpack.c.bf16 %v7879_v30, %v7878_v51  ;;  %10564 = vmatprep.subr.bf16.mxu0 %v14008_v16  ;;  %v10830_v30 = vld [vmem:[%s13664_s7 + $0x6] ss:$0 sm:$0xff] }
0x1177   :  { %v6378_v49 = vmul.f32 %v6311_v48, %v14467_v6 }
0x1178   :  { %10535 = vmatpush1.bf16.msra.mxu1 %v10534_v2  ;;  %v6754_v2 = vld [vmem:[%s13664_s7 + $0x4] ss:$0 sm:$0xff] }
0x1179   :  { %v10537_v25 = vpack.c.bf16 %v6379_v12, %v6378_v49  ;;  %10536 = vmatprep.subr.bf16.mxu1 %v14008_v16  ;;  %10566 = vmatpush3.bf16.msra.mxu0 %v10565_v33 }
0x117c   :  { %10538 = vmatpush1.bf16.msra.mxu1 %v10537_v25 }
0x117d   :  { %10540 = vmatprep.subr.bf16.mxu1 %v10539_v62 }
0x117f   :  { %6530 = vmatmul.mubr.f32.vlgmr.msra.gmra.mrb[212].mxu1 %v14468_v15 }
0x1180   :  { %7852 = vmatprep.mubr.msk.f32.mxu1 %vm2168_vm4, %v14469_v4  ;;  %10542 = vmatpush3.bf16.msra.mxu1 %v10539_v62 }
0x1181   :  { %10544 = vmatprep.subr.bf16.mxu1 %v10543_v21 }
0x1183   :  { %6535 = vmatmul.mubr.f32.gmra.mrb[214].mxu1 %v14470_v52 }
0x1184   :  { %7853 = vmatprep.mubr.msk.f32.mxu1 %vm2168_vm4, %v14471_v61  ;;  %10546 = vmatpush3.bf16.msra.mxu1 %v10543_v21 }
0x1185   :  { %10548 = vmatprep.subr.bf16.mxu1 %v10547_v1 }
0x1187   :  { %6540 = vmatmul.mubr.f32.gmra.mrb[216].mxu1 %v14472_v50 }
0x1188   :  { %7854 = vmatprep.mubr.msk.f32.mxu1 %vm2168_vm4, %v14473_v29 }
0x118b   :  { %6545 = vmatmul.mubr.f32.gmra.mrb[218].mxu1 %v14474_v19 }
0x118c   :  { %9932 = vmatprep.mubr.msk.f32.mxu1 %vm424_vm2, %v13177_v44 }
0x118f   :  { %9933 = vmatmul.mubr.msk.f32.vlgmr.msra.gmra.mrb[220].mxu1 %vm424_vm2, %v13179_v26 }
0x1190   :  { %9935 = vmatprep.mubr.msk.f32.mxu1 %vm424_vm2, %v13183_v37  ;;  %10550 = vmatpush3.bf16.msra.mxu1 %v10547_v1  ;;  %v7857_v37 = vld [vmem:[%s13663_s6 + $0x90] sm:$0xff] }
0x1193   :  { %9936 = vmatmul.mubr.msk.f32.gmra.mrb[222].mxu1 %vm424_vm2, %v13185_v40  ;;  %v7858_v40 = vld [vmem:[%s13663_s6 + $0x98] sm:$0xff] }
0x1194   :  { %v10551_v0 = vpack.c.bf16 %v7858_v40, %v7857_v37 }
0x1196   :  { %10552 = vmatprep.subr.bf16.mxu1 %v10551_v0 }
0x1197   :  { %10554 = vmatpush3.bf16.msra.mxu1 %v10551_v0 }
0x1198   :  { %10555 = vmatprep.subr.bf16.mxu1 %v14008_v16 }
0x11cd   :  { %v5950_v44 = vpop.f32.mrb[202].mxu1 }
0x11ce   :  { %v13453_v26 = vadd.f32 %v5950_v44, %v14475_v23  ;;  %v9825_v3 = vpop.f32.mrb[203].mxu1 }
0x121a   :  { %v8963_v34 = vpop.f32.mrb[204].mxu1 }
0x121b   :  { %v8964_v41 = vpop.f32.mrb[205].mxu1 }
0x121c   :  { %v8965_v11 = vadd.f32 %v8964_v41, %v8963_v34 }
0x121e   :  { %v8966_v45 = vpop.f32.mrb[206].mxu1 }
0x121f   :  { %v8967_v59 = vpop.f32.mrb[207].mxu1 }
0x1220   :  { %v8968_v28 = vadd.f32 %v8967_v59, %v8966_v45 }
0x1222   :  { %v8969_v38 = vpop.f32.mrb[208].mxu1 }
0x1223   :  { %v8970_v54 = vpop.f32.mrb[209].mxu1 }
0x1224   :  { %v8971_v42 = vadd.f32 %v8970_v54, %v8969_v38 }
0x1226   :  { %v8972_v20 = vpop.f32.mrb[210].mxu1 }
0x1227   :  { %v8973_v18 = vpop.f32.mrb[211].mxu1 }
0x1228   :  { %v8974_v35 = vadd.f32 %v8973_v18, %v8972_v20 }
0x1252   :  { %v6531_v43 = vpop.f32.mrb[212].mxu1 }
0x1253   :  { %v6532_v24 = vadd.f32 %v8965_v11, %v6531_v43  ;;  %v6533_v47 = vpop.f32.mrb[213].mxu1 }
0x1255   :  { %9946 = vmatprep.mubr.msk.f32.mxu1 %vm424_vm2, %v6532_v24 }
0x1256   :  { %v6536_v53 = vpop.f32.mrb[214].mxu1 }
0x1257   :  { %v6537_v22 = vadd.f32 %v8968_v28, %v6536_v53  ;;  %v6538_v55 = vpop.f32.mrb[215].mxu1 }
0x1259   :  { %9947 = vmatmul.mubr.msk.f32.vlgmr.msra.gmra.mrb[220].mxu1 %vm424_vm2, %v6537_v22 }
0x125a   :  { %v6541_v57 = vpop.f32.mrb[216].mxu1 }
0x125b   :  { %v6542_v14 = vadd.f32 %v8971_v42, %v6541_v57  ;;  %v6543_v63 = vpop.f32.mrb[217].mxu1 }
0x125d   :  { %9949 = vmatprep.mubr.msk.f32.mxu1 %vm424_vm2, %v6542_v14 }
0x125e   :  { %v6546_v17 = vpop.f32.mrb[218].mxu1 }
0x125f   :  { %v6547_v27 = vadd.f32 %v8974_v35, %v6546_v17  ;;  %v6548_v58 = vpop.f32.mrb[219].mxu1 }
0x1260   :  { %v10829_v58 = vld [vmem:[%s13664_s7 + $0x5] ss:$0 sm:$0xff] }
0x1261   :  { %9950 = vmatmul.mubr.msk.f32.gmra.mrb[222].mxu1 %vm424_vm2, %v6547_v27 }
0x1262   :  { %9960 = vmatprep.mubr.msk.f32.mxu1 %vm10881_vm3, %v14262_v31 }
0x132c   :  { %v9948_v36 = vpop.f32.mrb[220].mxu1 }
0x132d   :  { %v6756_v60 = vadd.f32 %v9948_v36, %v6754_v2  ;;  %v6735_v12 = vpop.f32.mrb[221].mxu1 }
0x132e   :  { %v6755_v48 = vadd.f32 %v6754_v2, %v6735_v12 }
0x132f   :  { %v6760_v46 = vsel %vm424_vm2, %v6756_v60, 0.0  ;;  %v6774_v10 = vmul.f32 %v6756_v60, %v6756_v60 }
0x1330   :  { %v6759_v6 = vsel %vm424_vm2, %v6755_v48, 0.0  ;;  %v6773_v49 = vmul.f32 %v6755_v48, %v6755_v48 }
0x1331   :  { %v6778_v25 = vsel %vm424_vm2, %v6774_v10, 0.0  ;;  %v6761_v62 = vadd.f32 %v6760_v46, %v6759_v6 }
0x1332   :  { %v6777_v39 = vsel %vm424_vm2, %v6773_v49, 0.0 }
0x1333   :  { %v6779_v13 = vadd.f32 %v6778_v25, %v6777_v39 }
0x1334   :  { %v9951_v21 = vpop.f32.mrb[222].mxu1 }
0x1335   :  { %v6758_v15 = vadd.f32 %v9951_v21, %v6754_v2  ;;  %v6745_v4 = vpop.f32.mrb[223].mxu1 }
0x1336   :  { %v6757_v52 = vadd.f32 %v6754_v2, %v6745_v4 }
0x1337   :  { %v6776_v61 = vmul.f32 %v6758_v15, %v6758_v15  ;;  %v6764_v8 = vsel %vm424_vm2, %v6758_v15, 0.0 }
0x1338   :  { %v6762_v50 = vsel %vm424_vm2, %v6757_v52, 0.0  ;;  %v6775_v29 = vmul.f32 %v6757_v52, %v6757_v52 }
0x1339   :  { %v6763_v19 = vadd.f32 %v6762_v50, %v6761_v62  ;;  %v6782_v23 = vsel %vm424_vm2, %v6776_v61, 0.0 }
0x133a   :  { %v6780_v5 = vsel %vm424_vm2, %v6775_v29, 0.0 }
0x133b   :  { %v6765_v1 = vadd.f32 %v6764_v8, %v6763_v19  ;;  %v6781_v44 = vadd.f32 %v6780_v5, %v6779_v13 }
0x133d   :  { %v6766_v3 = vrot.slane %v6765_v1, 4  ;;  %v6783_v37 = vadd.f32 %v6782_v23, %v6781_v44 }
0x133f   :  { %v6767_v40 = vadd.f32 %v6766_v3, %v6765_v1  ;;  %v6784_v0 = vrot.slane %v6783_v37, 4 }
0x1341   :  { %v6768_v34 = vrot.slane %v6767_v40, 2  ;;  %v6785_v41 = vadd.f32 %v6784_v0, %v6783_v37  ;;  %v7881_v37 = vld [vmem:[%s13663_s6 + $0x200] sm:$0xff] }
0x1343   :  { %v6769_v11 = vadd.f32 %v6768_v34, %v6767_v40  ;;  %v6786_v45 = vrot.slane %v6785_v41, 2  ;;  %v7882_v40 = vld [vmem:[%s13663_s6 + $0x208] sm:$0xff] }
0x1344   :  { %v10568_v0 = vpack.c.bf16 %v7882_v40, %v7881_v37 }
0x1345   :  { %v6770_v59 = vrot.slane %v6769_v11, 1  ;;  %v6787_v28 = vadd.f32 %v6786_v45, %v6785_v41  ;;  %v7072_v41 = vld [vmem:[%s13665_s8 + $0x8] sm:$0xff]  ;;  %v7071_v45 = vld [vmem:[%s13665_s8] sm:$0xff] }
0x1347   :  { %v6771_v38 = vadd.f32 %v6770_v59, %v6769_v11  ;;  %v6788_v54 = vrot.slane %v6787_v28, 1  ;;  %v7074_v11 = vld [vmem:[%s13665_s8 + $0x18] sm:$0xff] }
0x1348   :  { %v10573_v59 = vpack.c.bf16 %v7074_v11, %v7072_v41 }
0x1349   :  { %v6772_v42 = vmul.f32 0.03125, %v6771_v38  ;;  %v6789_v20 = vadd.f32 %v6788_v54, %v6787_v28  ;;  %v7073_v28 = vld [vmem:[%s13665_s8 + $0x10] sm:$0xff] }
0x134a   :  { %v10575_v38 = vpack.c.bf16 %v7073_v28, %v7071_v45  ;;  %10574 = vmatprep.subr.bf16.mxu0 %v10573_v59  ;;  %v7188_v45 = vld [vmem:[%s13664_s7 + $0x12] ss:$0 sm:$0xff] }
0x134b   :  { %v6790_v18 = vmul.f32 0.03125, %v6789_v20  ;;  %v6791_v35 = vmul.f32 %v6772_v42, %v6772_v42  ;;  %v6795_v43 = vsub.f32 %v6757_v52, %v6772_v42  ;;  %v6793_v24 = vsub.f32 %v6755_v48, %v6772_v42 }
0x134c   :  { %v6794_v47 = vsub.f32 %v6756_v60, %v6772_v42  ;;  %v6796_v53 = vsub.f32 %v6758_v15, %v6772_v42  ;;  %v6988_v42 = vld [vmem:[%s13664_s7 + $0x7] ss:$0 sm:$0xff] }
0x134d   :  { %v6792_v22 = vsub.f32 %v6790_v18, %v6791_v35 }
0x134f   :  { %v6797_v55 = vadd.f32 1e-05, %v6792_v22  ;;  %v7075_v22 = vld [vmem:[%s13665_s8 + $0x20] sm:$0xff] }
0x1351   :  { %10803 = vrsqrt.f32 %v6797_v55 }
0x135b   :  { %v10804_v57 = vpop.eup %10803 }
0x135c   :  { %v6801_v14 = vmul.f32 %v10804_v57, %v6795_v43  ;;  %v6799_v63 = vmul.f32 %v10804_v57, %v6793_v24  ;;  %v6800_v17 = vmul.f32 %v10804_v57, %v6794_v47  ;;  %v6802_v27 = vmul.f32 %v10804_v57, %v6796_v53  ;;  %v7076_v24 = vld [vmem:[%s13665_s8 + $0x28] sm:$0xff]  ;;  %v7078_v47 = vld [vmem:[%s13665_s8 + $0x38] sm:$0xff]  ;;  %v7168_v57 = vld [vmem:[%s13665_s8 + $0x40] sm:$0xff] }
0x135d   :  { %v10577_v53 = vpack.c.bf16 %v7078_v47, %v7076_v24 }
0x135e   :  { %v6805_v32 = vmul.f32 %v10829_v58, %v6801_v14  ;;  %v6803_v56 = vmul.f32 %v10829_v58, %v6799_v63  ;;  %v6804_v51 = vmul.f32 %v10829_v58, %v6800_v17  ;;  %v6806_v9 = vmul.f32 %v10829_v58, %v6802_v27  ;;  %v7169_v14 = vld [vmem:[%s13665_s8 + $0x50] sm:$0xff]  ;;  %v7170_v63 = vld [vmem:[%s13665_s8 + $0x60] sm:$0xff] }
0x135f   :  { %v10582_v17 = vpack.c.bf16 %v7169_v14, %v7168_v57  ;;  %v7171_v27 = vld [vmem:[%s13665_s8 + $0x70] sm:$0xff] }
0x1360   :  { %v6809_v33 = vadd.f32 %v10830_v30, %v6805_v32  ;;  %v6807_v2 = vadd.f32 %v10830_v30, %v6803_v56  ;;  %v6808_v36 = vadd.f32 %v10830_v30, %v6804_v51  ;;  %v6810_v60 = vadd.f32 %v10830_v30, %v6806_v9  ;;  %v7172_v32 = vld [vmem:[%s13665_s8 + $0x80] sm:$0xff]  ;;  %v7173_v56 = vld [vmem:[%s13665_s8 + $0x90] sm:$0xff] }
0x1361   :  { %v10585_v58 = vpack.c.bf16 %v7171_v27, %v7170_v63  ;;  %v10588_v51 = vpack.c.bf16 %v7173_v56, %v7172_v32  ;;  %v7174_v9 = vld [vmem:[%s13665_s8 + $0xa0] sm:$0xff]  ;;  %v7175_v30 = vld [vmem:[%s13665_s8 + $0xb0] sm:$0xff] }
0x1362   :  { %v7873_v12 = vmul.f32 -1.442695, %v6809_v33  ;;  %v7871_v48 = vmul.f32 -1.442695, %v6807_v2  ;;  %v7872_v46 = vmul.f32 -1.442695, %v6808_v36 }
0x1363   :  { %v7874_v10 = vmul.f32 -1.442695, %v6810_v60 }
0x1364   :  { %10805 = vpow2.f32 %v7873_v12  ;;  %v7178_v12 = vld [vmem:[%s13665_s8 + $0xe0] sm:$0xff] }
0x1365   :  { %10807 = vpow2.f32 %v7871_v48  ;;  %v7179_v48 = vld [vmem:[%s13665_s8 + $0xf0] sm:$0xff] }
0x1366   :  { %10809 = vpow2.f32 %v7872_v46  ;;  %v10597_v46 = vpack.c.bf16 %v7179_v48, %v7178_v12 }
0x1367   :  { %10811 = vpow2.f32 %v7874_v10  ;;  %v7180_v10 = vld [vmem:[%s13665_s8 + $0x100] sm:$0xff] }
0x136e   :  { %v10806_v6 = vpop.eup %10805 }
0x136f   :  { %v10808_v49 = vpop.eup %10807  ;;  %v6825_v25 = vadd.f32 1.0, %v10806_v6  ;;  %v7181_v6 = vld [vmem:[%s13665_s8 + $0x110] sm:$0xff] }
0x1370   :  { %v10810_v62 = vpop.eup %10809  ;;  %v6823_v39 = vadd.f32 1.0, %v10808_v49  ;;  %v10600_v49 = vpack.c.bf16 %v7181_v6, %v7180_v10 }
0x1371   :  { %v10812_v13 = vpop.eup %10811  ;;  %10813 = vrcp.f32 %v6825_v25  ;;  %v6824_v21 = vadd.f32 1.0, %v10810_v62  ;;  %v7182_v25 = vld [vmem:[%s13665_s8 + $0x120] sm:$0xff]  ;;  %v7183_v62 = vld [vmem:[%s13665_s8 + $0x130] sm:$0xff] }
0x1372   :  { %10815 = vrcp.f32 %v6823_v39  ;;  %v6826_v15 = vadd.f32 1.0, %v10812_v13  ;;  %v10603_v39 = vpack.c.bf16 %v7183_v62, %v7182_v25  ;;  %v6996_v13 = vld [vmem:[%s13664_s7 + $0x10] ss:$0 sm:$0xff] }
0x1373   :  { %10817 = vrcp.f32 %v6824_v21 }
0x1374   :  { %10819 = vrcp.f32 %v6826_v15 }
0x137b   :  { %v10814_v4 = vpop.eup %10813 }
0x137c   :  { %v10816_v52 = vpop.eup %10815  ;;  %v6837_v29 = vmul.f32 %v10814_v4, %v6809_v33  ;;  %v10591_v33 = vpack.c.bf16 %v7175_v30, %v7174_v9 }
0x137d   :  { %v10818_v61 = vpop.eup %10817  ;;  %v6835_v50 = vmul.f32 %v10816_v52, %v6807_v2  ;;  %v7176_v2 = vld [vmem:[%s13665_s8 + $0xc0] sm:$0xff] }
0x137e   :  { %v10820_v19 = vpop.eup %10819  ;;  %v6836_v8 = vmul.f32 %v10818_v61, %v6808_v36  ;;  %v7177_v36 = vld [vmem:[%s13665_s8 + $0xd0] sm:$0xff]  ;;  %v7184_v61 = vld [vmem:[%s13665_s8 + $0x140] sm:$0xff] }
0x137f   :  { %v6838_v5 = vmul.f32 %v10820_v19, %v6810_v60  ;;  %v10594_v60 = vpack.c.bf16 %v7177_v36, %v7176_v2  ;;  %v7186_v19 = vld [vmem:[%s13665_s8 + $0x160] sm:$0xff] }
0x1380   :  { %v10556_v1 = vpack.c.bf16 %v6836_v8, %v6835_v50  ;;  %v7185_v50 = vld [vmem:[%s13665_s8 + $0x150] sm:$0xff] }
0x1381   :  { %v10559_v44 = vpack.c.bf16 %v6838_v5, %v6837_v29  ;;  %v10606_v29 = vpack.c.bf16 %v7185_v50, %v7184_v61  ;;  %v7187_v8 = vld [vmem:[%s13665_s8 + $0x170] sm:$0xff] }
0x1382   :  { %10557 = vmatpush3.bf16.msra.mxu1 %v10556_v1  ;;  %v10609_v5 = vpack.c.bf16 %v7187_v8, %v7186_v19  ;;  %v7082_v1 = vlaneseq }
0x1383   :  { %10558 = vmatprep.subr.bf16.mxu1 %v14008_v16 }
0x1386   :  { %10560 = vmatpush3.bf16.msra.mxu1 %v10559_v44  ;;  %v7083_v44 = vshrl.u32 %v7082_v1, 7 }
0x1387   :  { %10567 = vmatprep.subr.bf16.mxu1 %v14008_v16 }
0x1388   :  { %v7088_v37 = vsub.s32 1, %v7083_v44 }
0x1389   :  { %9961 = vmatmul.mubr.msk.f32.vlgmr.msra.gmra.mrb[224].mxu1 %vm424_vm2, %v14372_v7  ;;  %v7883_v7 = vld [vmem:[%s13663_s6 + $0x210] sm:$0xff] }
0x138a   :  { %9982 = vmatprep.mubr.msk.f32.mxu1 %vm10881_vm3, %v14262_v31  ;;  %10569 = vmatpush3.bf16.msra.mxu1 %v10568_v0 }
0x138b   :  { %10570 = vmatprep.subr.bf16.mxu1 %v14008_v16 }
0x145c   :  { %v6905_v23 = vpop.f32.mrb[224].mxu1 }
0x145d   :  { %9972 = vmatmul.mubr.msk.f32.vlgmr.msra.gmra.mrb[4].mxu0 %vm424_vm2, %v6905_v23  ;;  %v9962_v3 = vpop.f32.mrb[225].mxu1  ;;  %v7084_v23 = vsub.s32 0, %v7083_v44 }
0x145e   :  { %7159 = vmatprep.mubr.f32.mxu0 %v14262_v31  ;;  %v7884_v31 = vld [vmem:[%s13663_s6 + $0x218] sm:$0xff]  ;;  %10576 = vmatpush1.bf16.msra.mxu0 %v10575_v38 }
0x145f   :  { %v10571_v34 = vpack.c.bf16 %v7884_v31, %v7883_v7  ;;  %10578 = vmatprep.subr.bf16.mxu0 %v10577_v53  ;;  %v7886_v3 = vld [vmem:[%s13664_s7 + $0x11] ss:$8 sm:$0x3]  ;;  %s10831_s7 = scalar_lea.vmem %s7284_s16, 32 }
0x1460   :  { %v7085_v40 = vrot.slane %v7886_v3, %v7084_v23  ;;  %p10832_p0 = scmp.ne.s32.totalorder %s7284_s16, %s10831_s7  ;;  %p10837_p2 = scmp.lt.s32.totalorder %s10831_s7, %s10831_s7 }
0x1461   :  { %10572 = vmatpush3.bf16.msra.mxu1 %v10571_v34 }
0x1462   :  { %10581 = vmatprep.subr.bf16.mxu1 %v14008_v16  ;;  %p10838_p3 = por %p10837_p2, %p10836_p1 }
0x1464   :  { %p10839_p4 = pnand %p10838_p3, %p10832_p0 }
0x1530   :  { %v6983_v54 = vpop.f32.mrb[4].mxu0 }
0x1531   :  { %v6987_v20 = vadd.f32 %v6983_v54, %v13453_v26  ;;  %v9973_v18 = vpop.f32.mrb[5].mxu0  ;;  %v7077_v26 = vld [vmem:[%s13665_s8 + $0x30] sm:$0xff] }
0x1532   :  { %v10579_v55 = vpack.c.bf16 %v7077_v26, %v7075_v22 }
0x1533   :  { %v6989_v35 = vadd.f32 %v6988_v42, %v6987_v20 }
0x1534   :  { %10580 = vmatpush1.bf16.msra.mxu0 %v10579_v55 }
0x1535   :  { %v6990_v43 = vmax.f32 %v6989_v35, 0.0 }
0x1537   :  { %9983 = vmatmul.mubr.msk.f32.vlgmr.msra.gmra.mrb[226].mxu1 %vm424_vm2, %v6990_v43 }
0x1538   :  { %10583 = vmatpush1.bf16.msra.mxu1 %v10582_v17 }
0x1539   :  { %10584 = vmatprep.subr.bf16.mxu1 %v14008_v16 }
0x153c   :  { %10586 = vmatpush1.bf16.msra.mxu1 %v10585_v58 }
0x153d   :  { %10587 = vmatprep.subr.bf16.mxu1 %v14008_v16 }
0x1540   :  { %10589 = vmatpush1.bf16.msra.mxu1 %v10588_v51 }
0x1541   :  { %10590 = vmatprep.subr.bf16.mxu1 %v14008_v16 }
0x1544   :  { %10592 = vmatpush1.bf16.msra.mxu1 %v10591_v33 }
0x1545   :  { %10593 = vmatprep.subr.bf16.mxu1 %v14008_v16 }
0x1548   :  { %10595 = vmatpush1.bf16.msra.mxu1 %v10594_v60 }
0x1549   :  { %10596 = vmatprep.subr.bf16.mxu1 %v14008_v16 }
0x154c   :  { %10598 = vmatpush1.bf16.msra.mxu1 %v10597_v46 }
0x154d   :  { %10599 = vmatprep.subr.bf16.mxu1 %v14008_v16 }
0x1550   :  { %10601 = vmatpush1.bf16.msra.mxu1 %v10600_v49 }
0x1551   :  { %10602 = vmatprep.subr.bf16.mxu1 %v14008_v16 }
0x1554   :  { %10604 = vmatpush1.bf16.msra.mxu1 %v10603_v39 }
0x1555   :  { %10605 = vmatprep.subr.bf16.mxu1 %v14008_v16 }
0x1558   :  { %10607 = vmatpush1.bf16.msra.mxu1 %v10606_v29 }
0x1559   :  { %10608 = vmatprep.subr.bf16.mxu1 %v14008_v16  ;;  %v7089_v16 = vrot.slane %v7886_v3, %v7088_v37 }
0x155c   :  { %10610 = vmatpush1.bf16.msra.mxu1 %v10609_v5 }
0x160a   :  { %v7066_v21 = vpop.f32.mrb[226].mxu1 }
0x160b   :  { %v7067_v15 = vadd.f32 %v7066_v21, %v6996_v13  ;;  %v9984_v4 = vpop.f32.mrb[227].mxu1 }
0x160d   :  { %v7070_v52 = vmax.f32 %v7067_v15, 0.0 }
0x160f   :  { %7887 = vmatmul.mubr.msk.f32.vlgmr.msra.gmra.mrb[6].mxu0 %vm424_vm2, %v7070_v52 }
0x16e2   :  { %v7161_v0 = vpop.f32.mrb[6].mxu0 }
0x16e3   :  { %v7162_v7 = vadd.f32 %v7161_v0, %v7085_v40  ;;  %v7163_v31 = vpop.f32.mrb[7].mxu0 }
0x16e4   :  { %v7164_v34 = vadd.f32 %v7163_v31, %v7089_v16 }
0x16e5   :  { %v7166_v11 = vmax.f32 %v7162_v7, 0.0 }
0x16e6   :  { %v7167_v41 = vmax.f32 %v7164_v34, 0.0 }
0x16e8   :  { %7888 = vmatprep.mubr.msk.f32.mxu1 %vm424_vm2, %v7167_v41 }
0x16e9   :  { %7257 = vmatmul.mubr.f32.vlgmr.msra.gmra.mrb[228].mxu1 %v7166_v11 }
0x17bc   :  { %v7258_v59 = vpop.f32.mrb[228].mxu1 }
0x17bd   :  { %v7259_v28 = vadd.f32 %v7258_v59, %v7188_v45  ;;  %v7260_v38 = vpop.f32.mrb[229].mxu1 }
0x17bf   :  { %v7264_v54 = vsel %vm7262_vm5, %v7259_v28, -inf  ;;  %7263 = vst.msk [vmem:[#allocation2] sm:$0x3] %vm7262_vm5, %v7259_v28 }
0x17c0   :  { %7265 = vmax.xlane.f32.xlu0 %v7264_v54 }
0x184d   :  { %v7266_v42 = vpop.xlane.xlu0 %7265 }
0x184e   :  { %v7267_v20 = vsub.f32 %v7259_v28, %v7266_v42 }
0x1850   :  { %v7268_v18 = vmul.f32 1.442695, %v7267_v20 }
0x1852   :  { %10821 = vpow2.f32 %v7268_v18 }
0x185c   :  { %v10822_v35 = vpop.eup %10821 }
0x185d   :  { %v7270_v43 = vsel %vm7262_vm5, %v10822_v35, 0.0 }
0x185e   :  { %7271 = vadd.xlane.f32.xlu1 %v7270_v43 }
0x185f   :  { %10842 = shalt.err (!%p10839_p4)
}
0x1860   :  { %s10843_s18 = scalar_lea.hbm %s13666_s9, 32 }
0x1861   :  { %p10844_p5 = scmp.ne.s32.totalorder %s13666_s9, %s10843_s18  ;;  %p10847_p6 = scmp.lt.u32.totalorder %s10843_s18, %s13666_s9 }
0x1863   :  { %p10849_p7 = pnand %p10847_p6, %p10844_p5 }
0x1865   :  { %10852 = shalt.err (!%p10849_p7)
}
0x1866   :  { %7286 = dma.vmem_to_hbm [thread:$0]  %s7284_s16, 32, %s13666_s9, [#allocation3]  }
0x1867   :  { %s10886_s24 = smov [#allocation4]  }
0x1868   :  { %s7293_s25 = sshll.u32 %s10886_s24, 4  ;;  %s7294_s25 = int_to_ptr.vmem [resolvable:$true] %s7293_s25 }
0x1869   :  { %s10853_s26 = scalar_lea.vmem %s7294_s25, 32  ;;  %p10858_p9 = scmp.lt.s32.totalorder %s7294_s25, %s7294_s25 }
0x186a   :  { %p10854_p8 = scmp.ne.s32.totalorder %s7294_s25, %s10853_s26  ;;  %p10859_p10 = scmp.lt.s32.totalorder %s10853_s26, %s10853_s26 }
0x186c   :  { %p10860_p11 = por %p10859_p10, %p10858_p9 }
0x186e   :  { %p10861_p12 = pnand %p10860_p11, %p10854_p8 }
0x18eb   :  { %v7272_v24 = vpop.xlane.xlu1 %7271 }
0x18ec   :  { %10823 = vlog2.f32 %v7272_v24 }
0x18f6   :  { %v10824_v47 = vpop.eup %10823 }
0x18f7   :  { %v7274_v53 = vmul.f32 0.6931472, %v10824_v47 }
0x18f9   :  { %v7275_v22 = vsub.f32 %v7267_v20, %v7274_v53 }
0x18fb   :  { %7276 = vst.msk [vmem:[#allocation4] sm:$0x3] %vm7262_vm5, %v7275_v22 }
0x18fc   :  { %10864 = shalt.err (!%p10861_p12)
}
0x18fd   :  { %s10865_s9 = scalar_lea.hbm %s13667_s10, 32 }
0x18fe   :  { %p10866_p13 = scmp.ne.s32.totalorder %s13667_s10, %s10865_s9  ;;  %p10869_p0 = scmp.lt.u32.totalorder %s10865_s9, %s13667_s10 }
0x1900   :  { %p10871_p1 = pnand %p10869_p0, %p10866_p13 }
0x1902   :  { %10874 = shalt.err (!%p10871_p1)
}
0x1903   :  { %7296 = dma.vmem_to_hbm [thread:$0]  %s7294_s25, 32, %s13667_s10, [#allocation5]  }
0x1904   :  { %10875 = dma.done.wait [#allocation3], 32  }
0x1905   :  { %10876 = vsyncadd [#allocation3], 4294967264 }
0x1906   :  { %10877 = dma.done.wait [#allocation5], 32  }
0x1907   :  { %10878 = vsyncadd [#allocation5], 4294967264 }
0x1908   :  { %7303 = vsyncpa [#allocation3], 1 }
0x1909   :  { %7304 = vsyncpa [#allocation5], 1 }

</bundles_post_ra>
